<compile_context>
chip_gen: v6e
topology: v6e:2x2x1
jax: 0.10.0
libtpu: 0.0.40
codegen_flags: <defaults>
</compile_context>

<pallas_src>
import functools

import jax
import jax.numpy as jnp
from jax.experimental import pallas as pl
from jax.experimental.pallas import tpu as pltpu

LEAKY_SLOPE = 0.01  # PyTorch nn.LeakyReLU() default


# ----------------------------------------------------------------------------
# Pallas kernel: fused (X @ W) + bias + activation  (bf16 MXU, f32 accumulate)
# ----------------------------------------------------------------------------
def _gemm_bias_act_kernel(x_ref, w_ref, b_ref, o_ref, *, act):
    acc = jnp.dot(x_ref[...], w_ref[...], preferred_element_type=jnp.float32)
    acc = acc + b_ref[...]  # (1, N) broadcasts over (tm, N); f32 epilogue
    if act == "leaky_relu":
        acc = jnp.where(acc >= 0, acc, LEAKY_SLOPE * acc)
    elif act == "tanh":
        acc = jnp.tanh(acc)
    o_ref[...] = acc.astype(o_ref.dtype)


def gemm_bias_act(x, w, b, act, n_out=None, out_dtype=jnp.float32):
    """act(x @ w + b).  x: (M, K), w: (K, Np) bf16 (Np % 128 == 0), b: (Np,).

    Returns (M, n_out) in `out_dtype`.  Rows are padded to a multiple of 8;
    M is tiled with a "parallel" grid when large so weight blocks stay resident
    and row-block DMAs overlap the MXU.
    """
    M, K = x.shape
    K2, Np = w.shape
    assert K == K2, (K, K2)
    n_out = Np if n_out is None else n_out

    Mp = (M + 7) // 8 * 8
    if Mp != M:
        x = jnp.pad(x, ((0, Mp - M), (0, 0)))
    # Tile M only when it divides cleanly; otherwise single full-array block.
    tm = 512 if (Mp > 512 and Mp % 512 == 0) else Mp

    kernel = functools.partial(_gemm_bias_act_kernel, act=act)
    out = pl.pallas_call(
        kernel,
        out_shape=jax.ShapeDtypeStruct((Mp, Np), out_dtype),
        grid=(Mp // tm,),
        in_specs=[
            pl.BlockSpec((tm, K), lambda i: (i, 0)),   # row tile of patches / z
            pl.BlockSpec((K, Np), lambda i: (0, 0)),   # weight: resident across M tiles
            pl.BlockSpec((1, Np), lambda i: (0, 0)),   # bias: resident
        ],
        out_specs=pl.BlockSpec((tm, Np), lambda i: (i, 0)),
        compiler_params=pltpu.CompilerParams(
            dimension_semantics=("parallel",),         # row tiles are independent
            vmem_limit_bytes=32 * 1024 * 1024,
        ),
    )(x.astype(jnp.bfloat16), w.astype(jnp.bfloat16),
      b.reshape(1, Np).astype(jnp.float32))
    if Mp != M or n_out != Np:
        out = out[:M, :n_out]
    return out


# ----------------------------------------------------------------------------
# Conv glue (im2col / dilation / padding are cheap data rearrangement on the
# small activations; all MACs run in the Pallas kernel above).
# ----------------------------------------------------------------------------
def _conv_from_padded(xp, w_mat, b, act, cout, out_dtype, ksize):
    """xp: (B, Hp, Wp, Cin) spatially padded NHWC activation.
    w_mat: (ksize*ksize*Cin, Np) bf16 GEMM weight, feature order (kh, kw, cin),
    columns zero-padded to a multiple of 128; `cout` is the true channel count."""
    B, Hp, Wp, Cin = xp.shape
    Ho, Wo = Hp - ksize + 1, Wp - ksize + 1
    cols = [xp[:, kh:kh + Ho, kw:kw + Wo, :]
            for kh in range(ksize) for kw in range(ksize)]
    patches = jnp.concatenate(cols, axis=-1).reshape(B * Ho * Wo, ksize * ksize * Cin)
    patches = patches.astype(jnp.bfloat16)  # halve HBM traffic of the im2col blow-up
    out = gemm_bias_act(patches, w_mat, b, act, n_out=cout, out_dtype=out_dtype)
    return out.reshape(B, Ho, Wo, cout)


def conv2d(x, w_mat, b, padding, act, cout, out_dtype, ksize=3):
    xp = jnp.pad(x, ((0, 0), (padding, padding), (padding, padding), (0, 0)))
    return _conv_from_padded(xp, w_mat, b, act, cout, out_dtype, ksize)


def conv_transpose2d(x, w_mat, b, stride, padding, output_padding, act, cout,
                     out_dtype, ksize=3):
    """Exact nn.ConvTranspose2d: zero-dilate input, pad, cross-correlate with the
    pre-flipped / channel-transposed kernel (already baked into w_mat)."""
    B, H, W, Cin = x.shape
    Hd, Wd = (H - 1) * stride + 1, (W - 1) * stride + 1
    xd = jnp.zeros((B, Hd, Wd, Cin), x.dtype)
    xd = xd.at[:, ::stride, ::stride, :].set(x)        # zero-insertion (XLA side)
    lo = ksize - 1 - padding
    hi = ksize - 1 - padding + output_padding
    xp = jnp.pad(xd, ((0, 0), (lo, hi), (lo, hi), (0, 0)))
    return _conv_from_padded(xp, w_mat, b, act, cout, out_dtype, ksize)


# ----------------------------------------------------------------------------
# Parameters: PyTorch-layout init + one-time packing into kernel-ready layout
# ----------------------------------------------------------------------------
def init_params(key):
    """Deterministic synthetic params in the exact PyTorch module layouts."""
    ks = jax.random.split(key, 10)
    s = 0.05
    return {
        # Linear(100 -> 4096); stored pre-transposed as (in, out) for the matmul
        "w_fc": s * jax.random.normal(ks[0], (100, 4 * 4 * 256), jnp.float32),
        "b_fc": s * jax.random.normal(ks[1], (4 * 4 * 256,), jnp.float32),
        # ConvTranspose2d weights in PyTorch layout (Cin, Cout, K, K)
        "wt1": s * jax.random.normal(ks[2], (256, 128, 3, 3), jnp.float32),
        "bt1": s * jax.random.normal(ks[3], (128,), jnp.float32),
        "wt2": s * jax.random.normal(ks[4], (128, 64, 3, 3), jnp.float32),
        "bt2": s * jax.random.normal(ks[5], (64,), jnp.float32),
        "wt3": s * jax.random.normal(ks[6], (64, 64, 3, 3), jnp.float32),
        "bt3": s * jax.random.normal(ks[7], (64,), jnp.float32),
        # Conv2d weight in PyTorch layout (Cout, Cin, K, K)
        "wc4": s * jax.random.normal(ks[8], (3, 64, 3, 3), jnp.float32),
        "bc4": s * jax.random.normal(ks[9], (3,), jnp.float32),
    }


def prepare_params(p):
    """Pack PyTorch-layout params into bf16 GEMM-ready matrices (done once).

    Output columns are zero-padded to a multiple of 128 so every Pallas GEMM
    writes lane-dense (unmasked) stores; true channel counts are passed
    statically to the forward pass and the padding is sliced off there.
    """
    def pad_cols(w_mat, b):
        n = w_mat.shape[1]
        np_ = -(-n // 128) * 128
        if np_ != n:
            w_mat = jnp.pad(w_mat, ((0, 0), (0, np_ - n)))
            b = jnp.pad(b, (0, np_ - n))
        return w_mat.astype(jnp.bfloat16), b.astype(jnp.float32)

    def conv_w_mat(w_conv):  # (Cout, Cin, K, K) -> (K*K*Cin, Cout), (kh,kw,cin) order
        Cout, Cin, K, _ = w_conv.shape
        return jnp.transpose(w_conv, (2, 3, 1, 0)).reshape(K * K * Cin, Cout)

    def convT_w_mat(w_t):    # (Cin, Cout, K, K) -> equivalent forward-conv GEMM matrix
        w_conv = jnp.transpose(jnp.flip(w_t, axis=(2, 3)), (1, 0, 2, 3))
        return conv_w_mat(w_conv)

    # FC: permute output columns (c,h,w) -> (h,w,c) so the NCHW view + NHWC
    # transpose after the FC becomes a free reshape; pad contraction 100 -> 128.
    perm = jnp.arange(256 * 4 * 4).reshape(256, 4, 4).transpose(1, 2, 0).reshape(-1)
    w_fc = p["w_fc"][:, perm]
    b_fc = p["b_fc"][perm]
    w_fc = jnp.pad(w_fc, ((0, 128 - w_fc.shape[0]), (0, 0)))
    w_fc, b_fc = pad_cols(w_fc, b_fc)                   # already 4096 (no-op pad)

    w1, b1 = pad_cols(convT_w_mat(p["wt1"]), p["bt1"])  # 128 -> 128
    w2, b2 = pad_cols(convT_w_mat(p["wt2"]), p["bt2"])  #  64 -> 128
    w3, b3 = pad_cols(convT_w_mat(p["wt3"]), p["bt3"])  #  64 -> 128
    w4, b4 = pad_cols(conv_w_mat(p["wc4"]), p["bc4"])   #   3 -> 128
    return {
        "w_fc": w_fc, "b_fc": b_fc,
        "w1": w1, "b1": b1,
        "w2": w2, "b2": b2,
        "w3": w3, "b3": b3,
        "w4": w4, "b4": b4,
    }


# ----------------------------------------------------------------------------
# Full Generator forward
# ----------------------------------------------------------------------------
@jax.jit
def generator_forward(z, kp):
    B, zdim = z.shape
    zp = jnp.pad(z, ((0, 0), (0, (-zdim) % 128)))                       # K: 100 -> 128
    # Linear + LeakyReLU (Pallas GEMM kernel); columns already in (h, w, c) order
    h = gemm_bias_act(zp, kp["w_fc"], kp["b_fc"], "leaky_relu",
                      out_dtype=jnp.bfloat16)                           # (B, 4096)
    x = h.reshape(B, 4, 4, 256)                                         # NHWC, free reshape
    x = conv_transpose2d(x, kp["w1"], kp["b1"], 2, 0, 0, "leaky_relu",
                         128, jnp.bfloat16)                             # (B, 9, 9,128)
    x = conv_transpose2d(x, kp["w2"], kp["b2"], 2, 1, 0, "leaky_relu",
                         64, jnp.bfloat16)                              # (B,17,17, 64)
    x = conv_transpose2d(x, kp["w3"], kp["b3"], 2, 2, 1, "leaky_relu",
                         64, jnp.bfloat16)                              # (B,32,32, 64)
    x = conv2d(x, kp["w4"], kp["b4"], 1, "tanh", 3, jnp.float32)        # (B,32,32,  3)
    return x.transpose(0, 3, 1, 2)  # back to NCHW: (B, 3, 32, 32)


if __name__ == "__main__":
    key = jax.random.PRNGKey(0)
    kz, kparam = jax.random.split(key)
    B = 2
    z = jax.random.normal(kz, (B, 100), jnp.float32)
    params = init_params(kparam)
    kernel_params = prepare_params(params)   # one-time packing to kernel layout

    out = generator_forward(z, kernel_params)
    out = jax.block_until_ready(out)

    assert out.shape == (B, 3, 32, 32), out.shape
    assert out.dtype == jnp.float32
    assert bool(jnp.all(jnp.isfinite(out)))
    assert bool(jnp.all(jnp.abs(out) <= 1.0))  # tanh output range
    print("KERNEL_OK")
</pallas_src>

<mosaic_0001>
module attributes {stable_mosaic.version = 11 : i64} {
  func.func @_gemm_bias_act_kernel(%arg0: i32, %arg1: memref<8x128xbf16, #tpu.memory_space<vmem>>, %arg2: memref<128x4096xbf16, #tpu.memory_space<vmem>>, %arg3: memref<1x4096xf32, #tpu.memory_space<vmem>>, %arg4: memref<8x4096xbf16, #tpu.memory_space<vmem>>) attributes {dimension_semantics = [#tpu.dimension_semantics<parallel>], iteration_bounds = array<i64: 1>, scalar_prefetch = 0 : i64, scratch_operands = 0 : i64, tpu.core_type = #tpu.core_type<tc>, window_params = [{transform_indices = @transform_0, window_bounds = array<i64: 8, 128>}, {pipeline_mode = #tpu.pipeline_mode<synchronous>, transform_indices = @transform_1, window_bounds = array<i64: 128, 4096>}, {pipeline_mode = #tpu.pipeline_mode<synchronous>, transform_indices = @transform_2, window_bounds = array<i64: 1, 4096>}, {transform_indices = @transform_3, window_bounds = array<i64: 8, 4096>}]} {
    %c0 = arith.constant 0 : index
    %c0_0 = arith.constant 0 : index
    %0 = vector.load %arg1[%c0, %c0_0] : memref<8x128xbf16, #tpu.memory_space<vmem>>, vector<8x128xbf16>
    %c0_1 = arith.constant 0 : index
    %c0_2 = arith.constant 0 : index
    %1 = vector.load %arg2[%c0_1, %c0_2] : memref<128x4096xbf16, #tpu.memory_space<vmem>>, vector<128x4096xbf16>
    %cst = arith.constant dense<0.000000e+00> : vector<8x4096xf32>
    %2 = tpu.matmul %0, %1, %cst {dimension_numbers = #tpu.dot_dimension_numbers<[1], [0], [0], [1], [0, 0, 1, 1], [], []>} : vector<8x128xbf16>, vector<128x4096xbf16>, vector<8x4096xf32> -> vector<8x4096xf32>
    %c0_3 = arith.constant 0 : index
    %c0_4 = arith.constant 0 : index
    %3 = vector.load %arg3[%c0_3, %c0_4] : memref<1x4096xf32, #tpu.memory_space<vmem>>, vector<1x4096xf32>
    %4 = vector.broadcast %3 : vector<1x4096xf32> to vector<8x4096xf32>
    %5 = arith.addf %2, %4 : vector<8x4096xf32>
    %cst_5 = arith.constant 0.000000e+00 : f32
    %6 = vector.broadcast %cst_5 : f32 to vector<8x4096xf32>
    %7 = arith.cmpf oge, %5, %6 : vector<8x4096xf32>
    %cst_6 = arith.constant 0.00999999977 : f32
    %8 = vector.broadcast %cst_6 : f32 to vector<8x4096xf32>
    %9 = arith.mulf %8, %5 : vector<8x4096xf32>
    %10 = arith.select %7, %5, %9 : vector<8x4096xi1>, vector<8x4096xf32>
    %11 = arith.truncf %10 : vector<8x4096xf32> to vector<8x4096xbf16>
    %c0_7 = arith.constant 0 : index
    %c0_8 = arith.constant 0 : index
    %12 = vector.load %arg4[%c0_7, %c0_8] : memref<8x4096xbf16, #tpu.memory_space<vmem>>, vector<8x4096xbf16>
    tpu.vector_store %arg4[%c0_7, %c0_8], %11 {strides = array<i32>} : memref<8x4096xbf16, #tpu.memory_space<vmem>>, vector<8x4096xbf16>,
    return
  }
  func.func @transform_0(%arg0: i32) -> (i32, i32) {
    %c0_i32 = arith.constant 0 : i32
    %c0_i32_0 = arith.constant 0 : i32
    return %arg0, %c0_i32 : i32, i32
  }
  func.func @transform_1(%arg0: i32) -> (i32, i32) {
    %c0_i32 = arith.constant 0 : i32
    %c0_i32_0 = arith.constant 0 : i32
    %c0_i32_1 = arith.constant 0 : i32
    return %c0_i32, %c0_i32_0 : i32, i32
  }
  func.func @transform_2(%arg0: i32) -> (i32, i32) {
    %c0_i32 = arith.constant 0 : i32
    %c0_i32_0 = arith.constant 0 : i32
    %c0_i32_1 = arith.constant 0 : i32
    return %c0_i32, %c0_i32_0 : i32, i32
  }
  func.func @transform_3(%arg0: i32) -> (i32, i32) {
    %c0_i32 = arith.constant 0 : i32
    %c0_i32_0 = arith.constant 0 : i32
    return %arg0, %c0_i32 : i32, i32
  }
}

module attributes {stable_mosaic.version = 11 : i64} {
  func.func @_gemm_bias_act_kernel(%arg0: i32, %arg1: memref<168x2304xbf16, #tpu.memory_space<vmem>>, %arg2: memref<2304x128xbf16, #tpu.memory_space<vmem>>, %arg3: memref<1x128xf32, #tpu.memory_space<vmem>>, %arg4: memref<168x128xbf16, #tpu.memory_space<vmem>>) attributes {dimension_semantics = [#tpu.dimension_semantics<parallel>], iteration_bounds = array<i64: 1>, scalar_prefetch = 0 : i64, scratch_operands = 0 : i64, tpu.core_type = #tpu.core_type<tc>, window_params = [{transform_indices = @transform_0, window_bounds = array<i64: 168, 2304>}, {pipeline_mode = #tpu.pipeline_mode<synchronous>, transform_indices = @transform_1, window_bounds = array<i64: 2304, 128>}, {pipeline_mode = #tpu.pipeline_mode<synchronous>, transform_indices = @transform_2, window_bounds = array<i64: 1, 128>}, {transform_indices = @transform_3, window_bounds = array<i64: 168, 128>}]} {
    %c0 = arith.constant 0 : index
    %c0_0 = arith.constant 0 : index
    %0 = vector.load %arg1[%c0, %c0_0] : memref<168x2304xbf16, #tpu.memory_space<vmem>>, vector<168x2304xbf16>
    %c0_1 = arith.constant 0 : index
    %c0_2 = arith.constant 0 : index
    %1 = vector.load %arg2[%c0_1, %c0_2] : memref<2304x128xbf16, #tpu.memory_space<vmem>>, vector<2304x128xbf16>
    %cst = arith.constant dense<0.000000e+00> : vector<168x128xf32>
    %2 = tpu.matmul %0, %1, %cst {dimension_numbers = #tpu.dot_dimension_numbers<[1], [0], [0], [1], [0, 0, 1, 1], [], []>} : vector<168x2304xbf16>, vector<2304x128xbf16>, vector<168x128xf32> -> vector<168x128xf32>
    %c0_3 = arith.constant 0 : index
    %c0_4 = arith.constant 0 : index
    %3 = vector.load %arg3[%c0_3, %c0_4] : memref<1x128xf32, #tpu.memory_space<vmem>>, vector<1x128xf32>
    %4 = vector.broadcast %3 : vector<1x128xf32> to vector<168x128xf32>
    %5 = arith.addf %2, %4 : vector<168x128xf32>
    %cst_5 = arith.constant 0.000000e+00 : f32
    %6 = vector.broadcast %cst_5 : f32 to vector<168x128xf32>
    %7 = arith.cmpf oge, %5, %6 : vector<168x128xf32>
    %cst_6 = arith.constant 0.00999999977 : f32
    %8 = vector.broadcast %cst_6 : f32 to vector<168x128xf32>
    %9 = arith.mulf %8, %5 : vector<168x128xf32>
    %10 = arith.select %7, %5, %9 : vector<168x128xi1>, vector<168x128xf32>
    %11 = arith.truncf %10 : vector<168x128xf32> to vector<168x128xbf16>
    %c0_7 = arith.constant 0 : index
    %c0_8 = arith.constant 0 : index
    %12 = vector.load %arg4[%c0_7, %c0_8] : memref<168x128xbf16, #tpu.memory_space<vmem>>, vector<168x128xbf16>
    tpu.vector_store %arg4[%c0_7, %c0_8], %11 {strides = array<i32>} : memref<168x128xbf16, #tpu.memory_space<vmem>>, vector<168x128xbf16>,
    return
  }
  func.func @transform_0(%arg0: i32) -> (i32, i32) {
    %c0_i32 = arith.constant 0 : i32
    %c0_i32_0 = arith.constant 0 : i32
    return %arg0, %c0_i32 : i32, i32
  }
  func.func @transform_1(%arg0: i32) -> (i32, i32) {
    %c0_i32 = arith.constant 0 : i32
    %c0_i32_0 = arith.constant 0 : i32
    %c0_i32_1 = arith.constant 0 : i32
    return %c0_i32, %c0_i32_0 : i32, i32
  }
  func.func @transform_2(%arg0: i32) -> (i32, i32) {
    %c0_i32 = arith.constant 0 : i32
    %c0_i32_0 = arith.constant 0 : i32
    %c0_i32_1 = arith.constant 0 : i32
    return %c0_i32, %c0_i32_0 : i32, i32
  }
  func.func @transform_3(%arg0: i32) -> (i32, i32) {
    %c0_i32 = arith.constant 0 : i32
    %c0_i32_0 = arith.constant 0 : i32
    return %arg0, %c0_i32 : i32, i32
  }
}

module attributes {stable_mosaic.version = 11 : i64} {
  func.func @_gemm_bias_act_kernel(%arg0: i32, %arg1: memref<584x1152xbf16, #tpu.memory_space<vmem>>, %arg2: memref<1152x128xbf16, #tpu.memory_space<vmem>>, %arg3: memref<1x128xf32, #tpu.memory_space<vmem>>, %arg4: memref<584x128xbf16, #tpu.memory_space<vmem>>) attributes {dimension_semantics = [#tpu.dimension_semantics<parallel>], iteration_bounds = array<i64: 1>, scalar_prefetch = 0 : i64, scratch_operands = 0 : i64, tpu.core_type = #tpu.core_type<tc>, window_params = [{transform_indices = @transform_0, window_bounds = array<i64: 584, 1152>}, {pipeline_mode = #tpu.pipeline_mode<synchronous>, transform_indices = @transform_1, window_bounds = array<i64: 1152, 128>}, {pipeline_mode = #tpu.pipeline_mode<synchronous>, transform_indices = @transform_2, window_bounds = array<i64: 1, 128>}, {transform_indices = @transform_3, window_bounds = array<i64: 584, 128>}]} {
    %c0 = arith.constant 0 : index
    %c0_0 = arith.constant 0 : index
    %0 = vector.load %arg1[%c0, %c0_0] : memref<584x1152xbf16, #tpu.memory_space<vmem>>, vector<584x1152xbf16>
    %c0_1 = arith.constant 0 : index
    %c0_2 = arith.constant 0 : index
    %1 = vector.load %arg2[%c0_1, %c0_2] : memref<1152x128xbf16, #tpu.memory_space<vmem>>, vector<1152x128xbf16>
    %cst = arith.constant dense<0.000000e+00> : vector<584x128xf32>
    %2 = tpu.matmul %0, %1, %cst {dimension_numbers = #tpu.dot_dimension_numbers<[1], [0], [0], [1], [0, 0, 1, 1], [], []>} : vector<584x1152xbf16>, vector<1152x128xbf16>, vector<584x128xf32> -> vector<584x128xf32>
    %c0_3 = arith.constant 0 : index
    %c0_4 = arith.constant 0 : index
    %3 = vector.load %arg3[%c0_3, %c0_4] : memref<1x128xf32, #tpu.memory_space<vmem>>, vector<1x128xf32>
    %4 = vector.broadcast %3 : vector<1x128xf32> to vector<584x128xf32>
    %5 = arith.addf %2, %4 : vector<584x128xf32>
    %cst_5 = arith.constant 0.000000e+00 : f32
    %6 = vector.broadcast %cst_5 : f32 to vector<584x128xf32>
    %7 = arith.cmpf oge, %5, %6 : vector<584x128xf32>
    %cst_6 = arith.constant 0.00999999977 : f32
    %8 = vector.broadcast %cst_6 : f32 to vector<584x128xf32>
    %9 = arith.mulf %8, %5 : vector<584x128xf32>
    %10 = arith.select %7, %5, %9 : vector<584x128xi1>, vector<584x128xf32>
    %11 = arith.truncf %10 : vector<584x128xf32> to vector<584x128xbf16>
    %c0_7 = arith.constant 0 : index
    %c0_8 = arith.constant 0 : index
    %12 = vector.load %arg4[%c0_7, %c0_8] : memref<584x128xbf16, #tpu.memory_space<vmem>>, vector<584x128xbf16>
    tpu.vector_store %arg4[%c0_7, %c0_8], %11 {strides = array<i32>} : memref<584x128xbf16, #tpu.memory_space<vmem>>, vector<584x128xbf16>,
    return
  }
  func.func @transform_0(%arg0: i32) -> (i32, i32) {
    %c0_i32 = arith.constant 0 : i32
    %c0_i32_0 = arith.constant 0 : i32
    return %arg0, %c0_i32 : i32, i32
  }
  func.func @transform_1(%arg0: i32) -> (i32, i32) {
    %c0_i32 = arith.constant 0 : i32
    %c0_i32_0 = arith.constant 0 : i32
    %c0_i32_1 = arith.constant 0 : i32
    return %c0_i32, %c0_i32_0 : i32, i32
  }
  func.func @transform_2(%arg0: i32) -> (i32, i32) {
    %c0_i32 = arith.constant 0 : i32
    %c0_i32_0 = arith.constant 0 : i32
    %c0_i32_1 = arith.constant 0 : i32
    return %c0_i32, %c0_i32_0 : i32, i32
  }
  func.func @transform_3(%arg0: i32) -> (i32, i32) {
    %c0_i32 = arith.constant 0 : i32
    %c0_i32_0 = arith.constant 0 : i32
    return %arg0, %c0_i32 : i32, i32
  }
}

module attributes {stable_mosaic.version = 11 : i64} {
  func.func @_gemm_bias_act_kernel(%arg0: i32, %arg1: memref<512x576xbf16, #tpu.memory_space<vmem>>, %arg2: memref<576x128xbf16, #tpu.memory_space<vmem>>, %arg3: memref<1x128xf32, #tpu.memory_space<vmem>>, %arg4: memref<512x128xbf16, #tpu.memory_space<vmem>>) attributes {dimension_semantics = [#tpu.dimension_semantics<parallel>], iteration_bounds = array<i64: 4>, scalar_prefetch = 0 : i64, scratch_operands = 0 : i64, tpu.core_type = #tpu.core_type<tc>, window_params = [{transform_indices = @transform_0, window_bounds = array<i64: 512, 576>}, {pipeline_mode = #tpu.pipeline_mode<synchronous>, transform_indices = @transform_1, window_bounds = array<i64: 576, 128>}, {pipeline_mode = #tpu.pipeline_mode<synchronous>, transform_indices = @transform_2, window_bounds = array<i64: 1, 128>}, {transform_indices = @transform_3, window_bounds = array<i64: 512, 128>}]} {
    %c0 = arith.constant 0 : index
    %c0_0 = arith.constant 0 : index
    %0 = vector.load %arg1[%c0, %c0_0] : memref<512x576xbf16, #tpu.memory_space<vmem>>, vector<512x576xbf16>
    %c0_1 = arith.constant 0 : index
    %c0_2 = arith.constant 0 : index
    %1 = vector.load %arg2[%c0_1, %c0_2] : memref<576x128xbf16, #tpu.memory_space<vmem>>, vector<576x128xbf16>
    %cst = arith.constant dense<0.000000e+00> : vector<512x128xf32>
    %2 = tpu.matmul %0, %1, %cst {dimension_numbers = #tpu.dot_dimension_numbers<[1], [0], [0], [1], [0, 0, 1, 1], [], []>} : vector<512x576xbf16>, vector<576x128xbf16>, vector<512x128xf32> -> vector<512x128xf32>
    %c0_3 = arith.constant 0 : index
    %c0_4 = arith.constant 0 : index
    %3 = vector.load %arg3[%c0_3, %c0_4] : memref<1x128xf32, #tpu.memory_space<vmem>>, vector<1x128xf32>
    %4 = vector.broadcast %3 : vector<1x128xf32> to vector<512x128xf32>
    %5 = arith.addf %2, %4 : vector<512x128xf32>
    %cst_5 = arith.constant 0.000000e+00 : f32
    %6 = vector.broadcast %cst_5 : f32 to vector<512x128xf32>
    %7 = arith.cmpf oge, %5, %6 : vector<512x128xf32>
    %cst_6 = arith.constant 0.00999999977 : f32
    %8 = vector.broadcast %cst_6 : f32 to vector<512x128xf32>
    %9 = arith.mulf %8, %5 : vector<512x128xf32>
    %10 = arith.select %7, %5, %9 : vector<512x128xi1>, vector<512x128xf32>
    %11 = arith.truncf %10 : vector<512x128xf32> to vector<512x128xbf16>
    %c0_7 = arith.constant 0 : index
    %c0_8 = arith.constant 0 : index
    %12 = vector.load %arg4[%c0_7, %c0_8] : memref<512x128xbf16, #tpu.memory_space<vmem>>, vector<512x128xbf16>
    tpu.vector_store %arg4[%c0_7, %c0_8], %11 {strides = array<i32>} : memref<512x128xbf16, #tpu.memory_space<vmem>>, vector<512x128xbf16>,
    return
  }
  func.func @transform_0(%arg0: i32) -> (i32, i32) {
    %c0_i32 = arith.constant 0 : i32
    %c0_i32_0 = arith.constant 0 : i32
    return %arg0, %c0_i32 : i32, i32
  }
  func.func @transform_1(%arg0: i32) -> (i32, i32) {
    %c0_i32 = arith.constant 0 : i32
    %c0_i32_0 = arith.constant 0 : i32
    %c0_i32_1 = arith.constant 0 : i32
    return %c0_i32, %c0_i32_0 : i32, i32
  }
  func.func @transform_2(%arg0: i32) -> (i32, i32) {
    %c0_i32 = arith.constant 0 : i32
    %c0_i32_0 = arith.constant 0 : i32
    %c0_i32_1 = arith.constant 0 : i32
    return %c0_i32, %c0_i32_0 : i32, i32
  }
  func.func @transform_3(%arg0: i32) -> (i32, i32) {
    %c0_i32 = arith.constant 0 : i32
    %c0_i32_0 = arith.constant 0 : i32
    return %arg0, %c0_i32 : i32, i32
  }
}

module attributes {stable_mosaic.version = 11 : i64} {
  func.func @_gemm_bias_act_kernel(%arg0: i32, %arg1: memref<512x576xbf16, #tpu.memory_space<vmem>>, %arg2: memref<576x128xbf16, #tpu.memory_space<vmem>>, %arg3: memref<1x128xf32, #tpu.memory_space<vmem>>, %arg4: memref<512x128xf32, #tpu.memory_space<vmem>>) attributes {dimension_semantics = [#tpu.dimension_semantics<parallel>], iteration_bounds = array<i64: 4>, scalar_prefetch = 0 : i64, scratch_operands = 0 : i64, tpu.core_type = #tpu.core_type<tc>, window_params = [{transform_indices = @transform_0, window_bounds = array<i64: 512, 576>}, {pipeline_mode = #tpu.pipeline_mode<synchronous>, transform_indices = @transform_1, window_bounds = array<i64: 576, 128>}, {pipeline_mode = #tpu.pipeline_mode<synchronous>, transform_indices = @transform_2, window_bounds = array<i64: 1, 128>}, {transform_indices = @transform_3, window_bounds = array<i64: 512, 128>}]} {
    %c0 = arith.constant 0 : index
    %c0_0 = arith.constant 0 : index
    %0 = vector.load %arg1[%c0, %c0_0] : memref<512x576xbf16, #tpu.memory_space<vmem>>, vector<512x576xbf16>
    %c0_1 = arith.constant 0 : index
    %c0_2 = arith.constant 0 : index
    %1 = vector.load %arg2[%c0_1, %c0_2] : memref<576x128xbf16, #tpu.memory_space<vmem>>, vector<576x128xbf16>
    %cst = arith.constant dense<0.000000e+00> : vector<512x128xf32>
    %2 = tpu.matmul %0, %1, %cst {dimension_numbers = #tpu.dot_dimension_numbers<[1], [0], [0], [1], [0, 0, 1, 1], [], []>} : vector<512x576xbf16>, vector<576x128xbf16>, vector<512x128xf32> -> vector<512x128xf32>
    %c0_3 = arith.constant 0 : index
    %c0_4 = arith.constant 0 : index
    %3 = vector.load %arg3[%c0_3, %c0_4] : memref<1x128xf32, #tpu.memory_space<vmem>>, vector<1x128xf32>
    %4 = vector.broadcast %3 : vector<1x128xf32> to vector<512x128xf32>
    %5 = arith.addf %2, %4 : vector<512x128xf32>
    %6 = math.tanh %5 : vector<512x128xf32>
    %c0_5 = arith.constant 0 : index
    %c0_6 = arith.constant 0 : index
    %7 = vector.load %arg4[%c0_5, %c0_6] : memref<512x128xf32, #tpu.memory_space<vmem>>, vector<512x128xf32>
    tpu.vector_store %arg4[%c0_5, %c0_6], %6 {strides = array<i32>} : memref<512x128xf32, #tpu.memory_space<vmem>>, vector<512x128xf32>,
    return
  }
  func.func @transform_0(%arg0: i32) -> (i32, i32) {
    %c0_i32 = arith.constant 0 : i32
    %c0_i32_0 = arith.constant 0 : i32
    return %arg0, %c0_i32 : i32, i32
  }
  func.func @transform_1(%arg0: i32) -> (i32, i32) {
    %c0_i32 = arith.constant 0 : i32
    %c0_i32_0 = arith.constant 0 : i32
    %c0_i32_1 = arith.constant 0 : i32
    return %c0_i32, %c0_i32_0 : i32, i32
  }
  func.func @transform_2(%arg0: i32) -> (i32, i32) {
    %c0_i32 = arith.constant 0 : i32
    %c0_i32_0 = arith.constant 0 : i32
    %c0_i32_1 = arith.constant 0 : i32
    return %c0_i32, %c0_i32_0 : i32, i32
  }
  func.func @transform_3(%arg0: i32) -> (i32, i32) {
    %c0_i32 = arith.constant 0 : i32
    %c0_i32_0 = arith.constant 0 : i32
    return %arg0, %c0_i32 : i32, i32
  }
}

</mosaic_0001>

<bundles_post_ra>
// kernel: generator_forward.5
= control target key start
LH: loop header
LB: loop body
LE: loop exit
PB: predicated region body
PF: predicated region fallthrough
CT: control target
= control target key end

     0   :  { %8 = vsyncpa [#allocation3], 0  ;;  %s3178_s0 = inlined_call_operand.vmem [shape: bf16[8,128], index: 0, kind: input, shape index: {}]   ;;  %s3179_s1 = inlined_call_operand.hbm [shape: bf16[128,4096], index: 1, kind: input, shape index: {}]   ;;  %s3180_s2 = inlined_call_operand.hbm [shape: f32[1,4096], index: 2, kind: input, shape index: {}]   ;;  %s3181_s3 = inlined_call_operand.vmem [shape: bf16[8,4096], index: 3, kind: output, shape index: {}]  }
   0x1   :  { %9 = vsyncpa [#allocation5], 0  ;;  %s2986_s12 = smov [#allocation2]  }
   0x2   :  { %s17_s13 = sshll.u32 %s2986_s12, 4  ;;  %s18_s13 = int_to_ptr.vmem [resolvable:$true] %s17_s13 }
   0x3   :  { %s2950_s14 = scalar_lea.vmem %s18_s13, 32768  ;;  %p2955_p1 = scmp.lt.s32.totalorder %s18_s13, %s18_s13 }
   0x4   :  { %p2951_p0 = scmp.ne.s32.totalorder %s18_s13, %s2950_s14  ;;  %p2956_p2 = scmp.lt.s32.totalorder %s2950_s14, %s2950_s14 }
   0x6   :  { %p2957_p3 = por %p2956_p2, %p2955_p1 }
   0x8   :  { %p2958_p4 = pnand %p2957_p3, %p2951_p0 }
   0xa   :  { %2961 = shalt.err (!%p2958_p4)
}
   0xb   :  { %s2987_s15 = smov 2048   ;;  %s2988_s16 = smov 128  }
   0xc   :  { %23 = dma.hbm_to_vmem [thread:$0]  %s3179_s1, 32768, %s18_s13, [#allocation3], %s2987_s15, %s2987_s15, %s2988_s16  }
   0xd   :  { %s2989_s19 = smov [#allocation4]  }
   0xe   :  { %s30_s20 = sshll.u32 %s2989_s19, 4  ;;  %s31_s20 = int_to_ptr.vmem [resolvable:$true] %s30_s20 }
   0xf   :  { %s2970_s21 = scalar_lea.vmem %s31_s20, 512  ;;  %p2975_p6 = scmp.lt.s32.totalorder %s31_s20, %s31_s20 }
  0x10   :  { %p2971_p5 = scmp.ne.s32.totalorder %s31_s20, %s2970_s21  ;;  %p2976_p7 = scmp.lt.s32.totalorder %s2970_s21, %s2970_s21 }
  0x12   :  { %p2977_p8 = por %p2976_p7, %p2975_p6 }
  0x14   :  { %p2978_p9 = pnand %p2977_p8, %p2971_p5 }
  0x16   :  { %2981 = shalt.err (!%p2978_p9)
}
  0x17   :  { %33 = dma.hbm_to_vmem [thread:$0]  %s3180_s2, 512, %s31_s20, [#allocation5]  }
  0x18   :  { %2982 = dma.done.wait [#allocation3], 32768  }
  0x19   :  { %2983 = vsyncadd [#allocation3], 4294934528 }
  0x1a   :  { %2984 = dma.done.wait [#allocation5], 512  }
  0x1b   :  { %2985 = vsyncadd [#allocation5], 4294966784  ;;  %v2990_v0 = vmov 0   ;;  %v266_v1 = vld [vmem:[#allocation2 + $0x700] sm:$0xff]  ;;  %v267_v3 = vld [vmem:[#allocation2 + $0x708] sm:$0xff] }
  0x1c   :  { %1778 = vmatprep.mubr.bf16.mxu0 %v2990_v0  ;;  %1819 = vmatprep.mubr.bf16.mxu1 %v2990_v0  ;;  %v282_v2 = vld [vmem:[#allocation2 + $0x780] sm:$0xff]  ;;  %v283_v5 = vld [vmem:[#allocation2 + $0x788] sm:$0xff]  ;;  %v268_v63 = vld [vmem:[#allocation2 + $0x710] sm:$0xff] }
  0x1d   :  { %v2873_v4 = vcombine.high %v266_v1, %v282_v2  ;;  %v2872_v6 = vcombine.low %v266_v1, %v282_v2  ;;  %v234_v7 = vld [vmem:[#allocation2 + $0x600] sm:$0xff]  ;;  %v2875_v9 = vcombine.high %v267_v3, %v283_v5  ;;  %v2874_v10 = vcombine.low %v267_v3, %v283_v5  ;;  %v235_v12 = vld [vmem:[#allocation2 + $0x608] sm:$0xff]  ;;  %v284_v1 = vld [vmem:[#allocation2 + $0x790] sm:$0xff] }
  0x1e   :  { %v250_v8 = vld [vmem:[#allocation2 + $0x680] sm:$0xff]  ;;  %v251_v13 = vld [vmem:[#allocation2 + $0x688] sm:$0xff]  ;;  %v269_v2 = vld [vmem:[#allocation2 + $0x718] sm:$0xff] }
  0x1f   :  { %v2841_v11 = vcombine.high %v234_v7, %v250_v8  ;;  %v202_v14 = vld [vmem:[#allocation2 + $0x500] sm:$0xff]  ;;  %1746 = vmatprep.subr.bf16.mxu0 %v2873_v4  ;;  %v2843_v15 = vcombine.high %v235_v12, %v251_v13  ;;  %v203_v17 = vld [vmem:[#allocation2 + $0x508] sm:$0xff]  ;;  %1787 = vmatprep.subr.bf16.mxu1 %v2875_v9  ;;  %v2840_v19 = vcombine.low %v234_v7, %v250_v8  ;;  %v285_v3 = vld [vmem:[#allocation2 + $0x798] sm:$0xff] }
  0x20   :  { %v218_v16 = vld [vmem:[#allocation2 + $0x580] sm:$0xff]  ;;  %v219_v18 = vld [vmem:[#allocation2 + $0x588] sm:$0xff]  ;;  %1747 = vmatpush1.bf16.msra.mxu0 %v2872_v6  ;;  %1788 = vmatpush1.bf16.msra.mxu1 %v2874_v10  ;;  %v2842_v20 = vcombine.low %v235_v12, %v251_v13  ;;  %v2877_v6 = vcombine.high %v268_v63, %v284_v1  ;;  %v2879_v7 = vcombine.high %v269_v2, %v285_v3  ;;  %v236_v8 = vld [vmem:[#allocation2 + $0x610] sm:$0xff] }
  0x21   :  { %1748 = vmatprep.subr.bf16.mxu0 %v2841_v11  ;;  %v2809_v21 = vcombine.high %v202_v14, %v218_v16  ;;  %1789 = vmatprep.subr.bf16.mxu1 %v2843_v15  ;;  %v2811_v22 = vcombine.high %v203_v17, %v219_v18  ;;  %v170_v23 = vld [vmem:[#allocation2 + $0x400] sm:$0xff]  ;;  %v171_v25 = vld [vmem:[#allocation2 + $0x408] sm:$0xff]  ;;  %v2808_v27 = vcombine.low %v202_v14, %v218_v16  ;;  %v252_v9 = vld [vmem:[#allocation2 + $0x690] sm:$0xff] }
  0x22   :  { %v186_v24 = vld [vmem:[#allocation2 + $0x480] sm:$0xff]  ;;  %v187_v26 = vld [vmem:[#allocation2 + $0x488] sm:$0xff]  ;;  %v2810_v28 = vcombine.low %v203_v17, %v219_v18  ;;  %v237_v10 = vld [vmem:[#allocation2 + $0x618] sm:$0xff]  ;;  %v2876_v13 = vcombine.low %v268_v63, %v284_v1  ;;  %v2878_v14 = vcombine.low %v269_v2, %v285_v3  ;;  %v2845_v15 = vcombine.high %v236_v8, %v252_v9 }
  0x23   :  { %v2777_v29 = vcombine.high %v170_v23, %v186_v24  ;;  %v2779_v30 = vcombine.high %v171_v25, %v187_v26  ;;  %v138_v31 = vld [vmem:[#allocation2 + $0x300] sm:$0xff]  ;;  %v139_v33 = vld [vmem:[#allocation2 + $0x308] sm:$0xff]  ;;  %v2776_v35 = vcombine.low %v170_v23, %v186_v24  ;;  %v2778_v36 = vcombine.low %v171_v25, %v187_v26  ;;  %v253_v11 = vld [vmem:[#allocation2 + $0x698] sm:$0xff] }
  0x24   :  { %1749 = vmatpush1.bf16.msra.mxu0 %v2840_v19  ;;  %1790 = vmatpush1.bf16.msra.mxu1 %v2842_v20  ;;  %v154_v32 = vld [vmem:[#allocation2 + $0x380] sm:$0xff]  ;;  %v155_v34 = vld [vmem:[#allocation2 + $0x388] sm:$0xff]  ;;  %v2847_v16 = vcombine.high %v237_v10, %v253_v11  ;;  %v204_v17 = vld [vmem:[#allocation2 + $0x510] sm:$0xff] }
  0x25   :  { %1750 = vmatprep.subr.bf16.mxu0 %v2809_v21  ;;  %1791 = vmatprep.subr.bf16.mxu1 %v2811_v22  ;;  %v2745_v37 = vcombine.high %v138_v31, %v154_v32  ;;  %v2747_v38 = vcombine.high %v139_v33, %v155_v34  ;;  %v106_v39 = vld [vmem:[#allocation2 + $0x200] sm:$0xff]  ;;  %v107_v41 = vld [vmem:[#allocation2 + $0x208] sm:$0xff]  ;;  %v2744_v43 = vcombine.low %v138_v31, %v154_v32  ;;  %v220_v18 = vld [vmem:[#allocation2 + $0x590] sm:$0xff] }
  0x26   :  { %v122_v40 = vld [vmem:[#allocation2 + $0x280] sm:$0xff]  ;;  %v123_v42 = vld [vmem:[#allocation2 + $0x288] sm:$0xff]  ;;  %v2746_v44 = vcombine.low %v139_v33, %v155_v34  ;;  %v205_v19 = vld [vmem:[#allocation2 + $0x518] sm:$0xff]  ;;  %v2844_v21 = vcombine.low %v236_v8, %v252_v9  ;;  %v2846_v22 = vcombine.low %v237_v10, %v253_v11  ;;  %v2813_v23 = vcombine.high %v204_v17, %v220_v18 }
  0x27   :  { %v2713_v45 = vcombine.high %v106_v39, %v122_v40  ;;  %v2715_v46 = vcombine.high %v107_v41, %v123_v42  ;;  %v74_v47 = vld [vmem:[#allocation2 + $0x100] sm:$0xff]  ;;  %v75_v49 = vld [vmem:[#allocation2 + $0x108] sm:$0xff]  ;;  %v2712_v51 = vcombine.low %v106_v39, %v122_v40  ;;  %v2714_v52 = vcombine.low %v107_v41, %v123_v42  ;;  %v221_v20 = vld [vmem:[#allocation2 + $0x598] sm:$0xff] }
  0x28   :  { %1751 = vmatpush1.bf16.msra.mxu0 %v2808_v27  ;;  %1792 = vmatpush1.bf16.msra.mxu1 %v2810_v28  ;;  %v90_v48 = vld [vmem:[#allocation2 + $0x180] sm:$0xff]  ;;  %v91_v50 = vld [vmem:[#allocation2 + $0x188] sm:$0xff]  ;;  %v2815_v24 = vcombine.high %v205_v19, %v221_v20  ;;  %v172_v25 = vld [vmem:[#allocation2 + $0x410] sm:$0xff] }
  0x29   :  { %1752 = vmatprep.subr.bf16.mxu0 %v2777_v29  ;;  %1793 = vmatprep.subr.bf16.mxu1 %v2779_v30  ;;  %v2681_v53 = vcombine.high %v74_v47, %v90_v48  ;;  %v2683_v54 = vcombine.high %v75_v49, %v91_v50  ;;  %v42_v55 = vld [vmem:[#allocation2] sm:$0xff]  ;;  %v43_v57 = vld [vmem:[#allocation2 + $0x8] sm:$0xff]  ;;  %v2680_v59 = vcombine.low %v74_v47, %v90_v48  ;;  %v188_v26 = vld [vmem:[#allocation2 + $0x490] sm:$0xff] }
  0x2a   :  { %v58_v56 = vld [vmem:[#allocation2 + $0x80] sm:$0xff]  ;;  %v59_v58 = vld [vmem:[#allocation2 + $0x88] sm:$0xff]  ;;  %v2682_v60 = vcombine.low %v75_v49, %v91_v50  ;;  %v173_v27 = vld [vmem:[#allocation2 + $0x418] sm:$0xff]  ;;  %v2812_v29 = vcombine.low %v204_v17, %v220_v18  ;;  %v2814_v30 = vcombine.low %v205_v19, %v221_v20  ;;  %v2781_v31 = vcombine.high %v172_v25, %v188_v26 }
  0x2b   :  { %v2649_v61 = vcombine.high %v42_v55, %v58_v56  ;;  %v2651_v62 = vcombine.high %v43_v57, %v59_v58  ;;  %v2648_v4 = vcombine.low %v42_v55, %v58_v56  ;;  %v2650_v5 = vcombine.low %v43_v57, %v59_v58  ;;  %v3022_v12 = vld [vmem:[%s3178_s0] sm:$0xf]  ;;  %v189_v28 = vld [vmem:[#allocation2 + $0x498] sm:$0xff]  ;;  %v140_v33 = vld [vmem:[#allocation2 + $0x310] sm:$0xff] }
  0x2c   :  { %1753 = vmatpush1.bf16.msra.mxu0 %v2776_v35  ;;  %1794 = vmatpush1.bf16.msra.mxu1 %v2778_v36  ;;  %v2783_v32 = vcombine.high %v173_v27, %v189_v28  ;;  %v156_v34 = vld [vmem:[#allocation2 + $0x390] sm:$0xff]  ;;  %v141_v35 = vld [vmem:[#allocation2 + $0x318] sm:$0xff]  ;;  %v270_v2 = vld [vmem:[#allocation2 + $0x720] sm:$0xff] }
  0x2d   :  { %1754 = vmatprep.subr.bf16.mxu0 %v2745_v37  ;;  %1795 = vmatprep.subr.bf16.mxu1 %v2747_v38  ;;  %v157_v36 = vld [vmem:[#allocation2 + $0x398] sm:$0xff]  ;;  %v2780_v37 = vcombine.low %v172_v25, %v188_v26  ;;  %v2782_v38 = vcombine.low %v173_v27, %v189_v28  ;;  %v2749_v39 = vcombine.high %v140_v33, %v156_v34  ;;  %v108_v41 = vld [vmem:[#allocation2 + $0x210] sm:$0xff]  ;;  %v286_v3 = vld [vmem:[#allocation2 + $0x7a0] sm:$0xff] }
  0x2e   :  { %v2751_v40 = vcombine.high %v141_v35, %v157_v36  ;;  %v124_v42 = vld [vmem:[#allocation2 + $0x290] sm:$0xff]  ;;  %v2881_v8 = vcombine.high %v270_v2, %v286_v3  ;;  %v238_v10 = vld [vmem:[#allocation2 + $0x620] sm:$0xff] }
  0x2f   :  { %v2717_v47 = vcombine.high %v108_v41, %v124_v42  ;;  %v76_v49 = vld [vmem:[#allocation2 + $0x110] sm:$0xff]  ;;  %v254_v11 = vld [vmem:[#allocation2 + $0x6a0] sm:$0xff] }
  0x30   :  { %1755 = vmatpush1.bf16.msra.mxu0 %v2744_v43  ;;  %1796 = vmatpush1.bf16.msra.mxu1 %v2746_v44  ;;  %v109_v43 = vld [vmem:[#allocation2 + $0x218] sm:$0xff]  ;;  %v92_v50 = vld [vmem:[#allocation2 + $0x190] sm:$0xff]  ;;  %v2849_v17 = vcombine.high %v238_v10, %v254_v11  ;;  %v206_v19 = vld [vmem:[#allocation2 + $0x520] sm:$0xff] }
  0x31   :  { %1756 = vmatprep.subr.bf16.mxu0 %v2713_v45  ;;  %1797 = vmatprep.subr.bf16.mxu1 %v2715_v46  ;;  %v125_v44 = vld [vmem:[#allocation2 + $0x298] sm:$0xff]  ;;  %v2748_v45 = vcombine.low %v140_v33, %v156_v34  ;;  %v2750_v46 = vcombine.low %v141_v35, %v157_v36  ;;  %v2685_v55 = vcombine.high %v76_v49, %v92_v50  ;;  %v44_v57 = vld [vmem:[#allocation2 + $0x10] sm:$0xff]  ;;  %v222_v20 = vld [vmem:[#allocation2 + $0x5a0] sm:$0xff] }
  0x32   :  { %v2719_v48 = vcombine.high %v109_v43, %v125_v44  ;;  %v60_v58 = vld [vmem:[#allocation2 + $0x90] sm:$0xff]  ;;  %v2817_v25 = vcombine.high %v206_v19, %v222_v20  ;;  %v174_v27 = vld [vmem:[#allocation2 + $0x420] sm:$0xff] }
  0x33   :  { %v2653_v63 = vcombine.high %v44_v57, %v60_v58  ;;  %v190_v28 = vld [vmem:[#allocation2 + $0x4a0] sm:$0xff] }
  0x34   :  { %1757 = vmatpush1.bf16.msra.mxu0 %v2712_v51  ;;  %1798 = vmatpush1.bf16.msra.mxu1 %v2714_v52  ;;  %v77_v51 = vld [vmem:[#allocation2 + $0x118] sm:$0xff]  ;;  %v2785_v33 = vcombine.high %v174_v27, %v190_v28  ;;  %v142_v35 = vld [vmem:[#allocation2 + $0x320] sm:$0xff] }
  0x35   :  { %1758 = vmatprep.subr.bf16.mxu0 %v2681_v53  ;;  %1799 = vmatprep.subr.bf16.mxu1 %v2683_v54  ;;  %v93_v52 = vld [vmem:[#allocation2 + $0x198] sm:$0xff]  ;;  %v2716_v53 = vcombine.low %v108_v41, %v124_v42  ;;  %v2718_v54 = vcombine.low %v109_v43, %v125_v44  ;;  %v158_v36 = vld [vmem:[#allocation2 + $0x3a0] sm:$0xff] }
  0x36   :  { %v2687_v56 = vcombine.high %v77_v51, %v93_v52  ;;  %v2753_v41 = vcombine.high %v142_v35, %v158_v36  ;;  %v110_v43 = vld [vmem:[#allocation2 + $0x220] sm:$0xff] }
  0x37   :  { %v126_v44 = vld [vmem:[#allocation2 + $0x2a0] sm:$0xff] }
  0x38   :  { %1759 = vmatpush1.bf16.msra.mxu0 %v2680_v59  ;;  %1800 = vmatpush1.bf16.msra.mxu1 %v2682_v60  ;;  %v45_v59 = vld [vmem:[#allocation2 + $0x18] sm:$0xff] }
  0x39   :  { %1760 = vmatprep.subr.bf16.mxu0 %v2649_v61  ;;  %1801 = vmatprep.subr.bf16.mxu1 %v2651_v62  ;;  %v61_v60 = vld [vmem:[#allocation2 + $0x98] sm:$0xff]  ;;  %v2684_v61 = vcombine.low %v76_v49, %v92_v50  ;;  %v2686_v62 = vcombine.low %v77_v51, %v93_v52  ;;  %v2721_v49 = vcombine.high %v110_v43, %v126_v44  ;;  %v78_v51 = vld [vmem:[#allocation2 + $0x120] sm:$0xff] }
  0x3a   :  { %v2655_v1 = vcombine.high %v45_v59, %v61_v60  ;;  %v94_v52 = vld [vmem:[#allocation2 + $0x1a0] sm:$0xff] }
  0x3c   :  { %1761 = vmatpush1.bf16.msra.mxu0 %v2648_v4  ;;  %1802 = vmatpush1.bf16.msra.mxu1 %v2650_v5  ;;  %v271_v4 = vld [vmem:[#allocation2 + $0x728] sm:$0xff] }
  0x3d   :  { %1828 = vmatprep.subr.bf16.mxu0 %v2877_v6  ;;  %1869 = vmatprep.subr.bf16.mxu1 %v2879_v7  ;;  %v287_v5 = vld [vmem:[#allocation2 + $0x7a8] sm:$0xff]  ;;  %v2652_v6 = vcombine.low %v44_v57, %v60_v58  ;;  %v2654_v7 = vcombine.low %v45_v59, %v61_v60  ;;  %v2689_v57 = vcombine.high %v78_v51, %v94_v52  ;;  %v46_v59 = vld [vmem:[#allocation2 + $0x20] sm:$0xff] }
  0x3e   :  { %v2883_v9 = vcombine.high %v271_v4, %v287_v5  ;;  %v62_v60 = vld [vmem:[#allocation2 + $0xa0] sm:$0xff] }
  0x3f   :  { %1779 = vmatmul.mubr.bf16.vlgmr.msra.gmra.mxu0 %v3022_v12  ;;  %1820 = vmatmul.mubr.bf16.vlgmr.msra.gmra.mxu1 %v3022_v12 }
  0x40   :  { %1829 = vmatpush1.bf16.msra.mxu0 %v2876_v13  ;;  %1870 = vmatpush1.bf16.msra.mxu1 %v2878_v14  ;;  %v239_v13 = vld [vmem:[#allocation2 + $0x628] sm:$0xff] }
  0x41   :  { %1830 = vmatprep.subr.bf16.mxu0 %v2845_v15  ;;  %1871 = vmatprep.subr.bf16.mxu1 %v2847_v16  ;;  %v255_v14 = vld [vmem:[#allocation2 + $0x6a8] sm:$0xff]  ;;  %v2880_v15 = vcombine.low %v270_v2, %v286_v3  ;;  %v2882_v16 = vcombine.low %v271_v4, %v287_v5  ;;  %v2657_v2 = vcombine.high %v46_v59, %v62_v60  ;;  %v272_v4 = vld [vmem:[#allocation2 + $0x730] sm:$0xff] }
  0x42   :  { %1860 = vmatprep.mubr.bf16.mxu0 %v2990_v0  ;;  %1901 = vmatprep.mubr.bf16.mxu1 %v2990_v0  ;;  %v2851_v18 = vcombine.high %v239_v13, %v255_v14  ;;  %v288_v5 = vld [vmem:[#allocation2 + $0x7b0] sm:$0xff] }
  0x44   :  { %1831 = vmatpush1.bf16.msra.mxu0 %v2844_v21  ;;  %1872 = vmatpush1.bf16.msra.mxu1 %v2846_v22  ;;  %v207_v21 = vld [vmem:[#allocation2 + $0x528] sm:$0xff] }
  0x45   :  { %1832 = vmatprep.subr.bf16.mxu0 %v2813_v23  ;;  %1873 = vmatprep.subr.bf16.mxu1 %v2815_v24  ;;  %v223_v22 = vld [vmem:[#allocation2 + $0x5a8] sm:$0xff]  ;;  %v2848_v23 = vcombine.low %v238_v10, %v254_v11  ;;  %v2850_v24 = vcombine.low %v239_v13, %v255_v14  ;;  %v2885_v10 = vcombine.high %v272_v4, %v288_v5  ;;  %v240_v13 = vld [vmem:[#allocation2 + $0x630] sm:$0xff] }
  0x46   :  { %v2819_v26 = vcombine.high %v207_v21, %v223_v22  ;;  %v256_v14 = vld [vmem:[#allocation2 + $0x6b0] sm:$0xff] }
  0x48   :  { %1833 = vmatpush1.bf16.msra.mxu0 %v2812_v29  ;;  %1874 = vmatpush1.bf16.msra.mxu1 %v2814_v30  ;;  %v175_v29 = vld [vmem:[#allocation2 + $0x428] sm:$0xff] }
  0x49   :  { %1834 = vmatprep.subr.bf16.mxu0 %v2781_v31  ;;  %1875 = vmatprep.subr.bf16.mxu1 %v2783_v32  ;;  %v191_v30 = vld [vmem:[#allocation2 + $0x4a8] sm:$0xff]  ;;  %v2816_v31 = vcombine.low %v206_v19, %v222_v20  ;;  %v2818_v32 = vcombine.low %v207_v21, %v223_v22  ;;  %v2853_v19 = vcombine.high %v240_v13, %v256_v14  ;;  %v208_v21 = vld [vmem:[#allocation2 + $0x530] sm:$0xff] }
  0x4a   :  { %v2787_v34 = vcombine.high %v175_v29, %v191_v30  ;;  %v224_v22 = vld [vmem:[#allocation2 + $0x5b0] sm:$0xff] }
  0x4c   :  { %1835 = vmatpush1.bf16.msra.mxu0 %v2780_v37  ;;  %1876 = vmatpush1.bf16.msra.mxu1 %v2782_v38  ;;  %v143_v37 = vld [vmem:[#allocation2 + $0x328] sm:$0xff] }
  0x4d   :  { %1836 = vmatprep.subr.bf16.mxu0 %v2749_v39  ;;  %1877 = vmatprep.subr.bf16.mxu1 %v2751_v40  ;;  %v159_v38 = vld [vmem:[#allocation2 + $0x3a8] sm:$0xff]  ;;  %v2784_v39 = vcombine.low %v174_v27, %v190_v28  ;;  %v2786_v40 = vcombine.low %v175_v29, %v191_v30  ;;  %v2821_v27 = vcombine.high %v208_v21, %v224_v22  ;;  %v176_v29 = vld [vmem:[#allocation2 + $0x430] sm:$0xff] }
  0x4e   :  { %v2755_v42 = vcombine.high %v143_v37, %v159_v38  ;;  %v192_v30 = vld [vmem:[#allocation2 + $0x4b0] sm:$0xff] }
  0x50   :  { %1837 = vmatpush1.bf16.msra.mxu0 %v2748_v45  ;;  %1878 = vmatpush1.bf16.msra.mxu1 %v2750_v46  ;;  %v111_v45 = vld [vmem:[#allocation2 + $0x228] sm:$0xff] }
  0x51   :  { %1838 = vmatprep.subr.bf16.mxu0 %v2717_v47  ;;  %1879 = vmatprep.subr.bf16.mxu1 %v2719_v48  ;;  %v127_v46 = vld [vmem:[#allocation2 + $0x2a8] sm:$0xff]  ;;  %v2752_v47 = vcombine.low %v142_v35, %v158_v36  ;;  %v2754_v48 = vcombine.low %v143_v37, %v159_v38  ;;  %v2789_v35 = vcombine.high %v176_v29, %v192_v30  ;;  %v144_v37 = vld [vmem:[#allocation2 + $0x330] sm:$0xff] }
  0x52   :  { %v2723_v50 = vcombine.high %v111_v45, %v127_v46  ;;  %v160_v38 = vld [vmem:[#allocation2 + $0x3b0] sm:$0xff] }
  0x54   :  { %1839 = vmatpush1.bf16.msra.mxu0 %v2716_v53  ;;  %1880 = vmatpush1.bf16.msra.mxu1 %v2718_v54  ;;  %v79_v53 = vld [vmem:[#allocation2 + $0x128] sm:$0xff] }
  0x55   :  { %1840 = vmatprep.subr.bf16.mxu0 %v2685_v55  ;;  %1881 = vmatprep.subr.bf16.mxu1 %v2687_v56  ;;  %v95_v54 = vld [vmem:[#allocation2 + $0x1a8] sm:$0xff]  ;;  %v2720_v55 = vcombine.low %v110_v43, %v126_v44  ;;  %v2722_v56 = vcombine.low %v111_v45, %v127_v46  ;;  %v2757_v43 = vcombine.high %v144_v37, %v160_v38  ;;  %v112_v45 = vld [vmem:[#allocation2 + $0x230] sm:$0xff] }
  0x56   :  { %v2691_v58 = vcombine.high %v79_v53, %v95_v54  ;;  %v128_v46 = vld [vmem:[#allocation2 + $0x2b0] sm:$0xff] }
  0x58   :  { %1841 = vmatpush1.bf16.msra.mxu0 %v2684_v61  ;;  %1882 = vmatpush1.bf16.msra.mxu1 %v2686_v62  ;;  %v47_v61 = vld [vmem:[#allocation2 + $0x28] sm:$0xff] }
  0x59   :  { %1842 = vmatprep.subr.bf16.mxu0 %v2653_v63  ;;  %1883 = vmatprep.subr.bf16.mxu1 %v2655_v1  ;;  %v63_v62 = vld [vmem:[#allocation2 + $0xa8] sm:$0xff]  ;;  %v2688_v63 = vcombine.low %v78_v51, %v94_v52  ;;  %v2690_v1 = vcombine.low %v79_v53, %v95_v54  ;;  %v2725_v51 = vcombine.high %v112_v45, %v128_v46  ;;  %v80_v53 = vld [vmem:[#allocation2 + $0x130] sm:$0xff] }
  0x5a   :  { %v2659_v3 = vcombine.high %v47_v61, %v63_v62  ;;  %v96_v54 = vld [vmem:[#allocation2 + $0x1b0] sm:$0xff] }
  0x5c   :  { %1843 = vmatpush1.bf16.msra.mxu0 %v2652_v6  ;;  %1884 = vmatpush1.bf16.msra.mxu1 %v2654_v7  ;;  %v273_v6 = vld [vmem:[#allocation2 + $0x738] sm:$0xff] }
  0x5d   :  { %1910 = vmatprep.subr.bf16.mxu0 %v2881_v8  ;;  %1951 = vmatprep.subr.bf16.mxu1 %v2883_v9  ;;  %v289_v7 = vld [vmem:[#allocation2 + $0x7b8] sm:$0xff]  ;;  %v2656_v8 = vcombine.low %v46_v59, %v62_v60  ;;  %v2658_v9 = vcombine.low %v47_v61, %v63_v62  ;;  %v2693_v59 = vcombine.high %v80_v53, %v96_v54  ;;  %v48_v61 = vld [vmem:[#allocation2 + $0x30] sm:$0xff] }
  0x5e   :  { %v2887_v11 = vcombine.high %v273_v6, %v289_v7  ;;  %v64_v62 = vld [vmem:[#allocation2 + $0xb0] sm:$0xff] }
  0x5f   :  { %1861 = vmatmul.mubr.bf16.vlgmr.msra.gmra.mxu0 %v3022_v12  ;;  %1902 = vmatmul.mubr.bf16.vlgmr.msra.gmra.mxu1 %v3022_v12 }
  0x60   :  { %1911 = vmatpush1.bf16.msra.mxu0 %v2880_v15  ;;  %1952 = vmatpush1.bf16.msra.mxu1 %v2882_v16  ;;  %v241_v15 = vld [vmem:[#allocation2 + $0x638] sm:$0xff] }
  0x61   :  { %1912 = vmatprep.subr.bf16.mxu0 %v2849_v17  ;;  %1953 = vmatprep.subr.bf16.mxu1 %v2851_v18  ;;  %v257_v16 = vld [vmem:[#allocation2 + $0x6b8] sm:$0xff]  ;;  %v2884_v17 = vcombine.low %v272_v4, %v288_v5  ;;  %v2886_v18 = vcombine.low %v273_v6, %v289_v7  ;;  %v2661_v4 = vcombine.high %v48_v61, %v64_v62  ;;  %v274_v6 = vld [vmem:[#allocation2 + $0x740] sm:$0xff] }
  0x62   :  { %1942 = vmatprep.mubr.bf16.mxu0 %v2990_v0  ;;  %1983 = vmatprep.mubr.bf16.mxu1 %v2990_v0  ;;  %v2855_v20 = vcombine.high %v241_v15, %v257_v16  ;;  %v290_v7 = vld [vmem:[#allocation2 + $0x7c0] sm:$0xff] }
  0x64   :  { %1913 = vmatpush1.bf16.msra.mxu0 %v2848_v23  ;;  %1954 = vmatpush1.bf16.msra.mxu1 %v2850_v24  ;;  %v209_v23 = vld [vmem:[#allocation2 + $0x538] sm:$0xff] }
  0x65   :  { %1914 = vmatprep.subr.bf16.mxu0 %v2817_v25  ;;  %1955 = vmatprep.subr.bf16.mxu1 %v2819_v26  ;;  %v225_v24 = vld [vmem:[#allocation2 + $0x5b8] sm:$0xff]  ;;  %v2852_v25 = vcombine.low %v240_v13, %v256_v14  ;;  %v2854_v26 = vcombine.low %v241_v15, %v257_v16  ;;  %v2889_v13 = vcombine.high %v274_v6, %v290_v7  ;;  %v242_v15 = vld [vmem:[#allocation2 + $0x640] sm:$0xff] }
  0x66   :  { %v2823_v28 = vcombine.high %v209_v23, %v225_v24  ;;  %v258_v16 = vld [vmem:[#allocation2 + $0x6c0] sm:$0xff] }
  0x68   :  { %1915 = vmatpush1.bf16.msra.mxu0 %v2816_v31  ;;  %1956 = vmatpush1.bf16.msra.mxu1 %v2818_v32  ;;  %v177_v31 = vld [vmem:[#allocation2 + $0x438] sm:$0xff] }
  0x69   :  { %1916 = vmatprep.subr.bf16.mxu0 %v2785_v33  ;;  %1957 = vmatprep.subr.bf16.mxu1 %v2787_v34  ;;  %v193_v32 = vld [vmem:[#allocation2 + $0x4b8] sm:$0xff]  ;;  %v2820_v33 = vcombine.low %v208_v21, %v224_v22  ;;  %v2822_v34 = vcombine.low %v209_v23, %v225_v24  ;;  %v2857_v21 = vcombine.high %v242_v15, %v258_v16  ;;  %v210_v23 = vld [vmem:[#allocation2 + $0x540] sm:$0xff] }
  0x6a   :  { %v2791_v36 = vcombine.high %v177_v31, %v193_v32  ;;  %v226_v24 = vld [vmem:[#allocation2 + $0x5c0] sm:$0xff] }
  0x6c   :  { %1917 = vmatpush1.bf16.msra.mxu0 %v2784_v39  ;;  %1958 = vmatpush1.bf16.msra.mxu1 %v2786_v40  ;;  %v145_v39 = vld [vmem:[#allocation2 + $0x338] sm:$0xff] }
  0x6d   :  { %1918 = vmatprep.subr.bf16.mxu0 %v2753_v41  ;;  %1959 = vmatprep.subr.bf16.mxu1 %v2755_v42  ;;  %v161_v40 = vld [vmem:[#allocation2 + $0x3b8] sm:$0xff]  ;;  %v2788_v41 = vcombine.low %v176_v29, %v192_v30  ;;  %v2790_v42 = vcombine.low %v177_v31, %v193_v32  ;;  %v2825_v29 = vcombine.high %v210_v23, %v226_v24  ;;  %v178_v31 = vld [vmem:[#allocation2 + $0x440] sm:$0xff] }
  0x6e   :  { %v2759_v44 = vcombine.high %v145_v39, %v161_v40  ;;  %v194_v32 = vld [vmem:[#allocation2 + $0x4c0] sm:$0xff] }
  0x70   :  { %1919 = vmatpush1.bf16.msra.mxu0 %v2752_v47  ;;  %1960 = vmatpush1.bf16.msra.mxu1 %v2754_v48  ;;  %v113_v47 = vld [vmem:[#allocation2 + $0x238] sm:$0xff] }
  0x71   :  { %1920 = vmatprep.subr.bf16.mxu0 %v2721_v49  ;;  %1961 = vmatprep.subr.bf16.mxu1 %v2723_v50  ;;  %v129_v48 = vld [vmem:[#allocation2 + $0x2b8] sm:$0xff]  ;;  %v2756_v49 = vcombine.low %v144_v37, %v160_v38  ;;  %v2758_v50 = vcombine.low %v145_v39, %v161_v40  ;;  %v2793_v37 = vcombine.high %v178_v31, %v194_v32  ;;  %v146_v39 = vld [vmem:[#allocation2 + $0x340] sm:$0xff] }
  0x72   :  { %v2727_v52 = vcombine.high %v113_v47, %v129_v48  ;;  %v162_v40 = vld [vmem:[#allocation2 + $0x3c0] sm:$0xff] }
  0x74   :  { %1921 = vmatpush1.bf16.msra.mxu0 %v2720_v55  ;;  %1962 = vmatpush1.bf16.msra.mxu1 %v2722_v56  ;;  %v81_v55 = vld [vmem:[#allocation2 + $0x138] sm:$0xff] }
  0x75   :  { %1922 = vmatprep.subr.bf16.mxu0 %v2689_v57  ;;  %1963 = vmatprep.subr.bf16.mxu1 %v2691_v58  ;;  %v97_v56 = vld [vmem:[#allocation2 + $0x1b8] sm:$0xff]  ;;  %v2724_v57 = vcombine.low %v112_v45, %v128_v46  ;;  %v2726_v58 = vcombine.low %v113_v47, %v129_v48  ;;  %v2761_v45 = vcombine.high %v146_v39, %v162_v40  ;;  %v114_v47 = vld [vmem:[#allocation2 + $0x240] sm:$0xff] }
  0x76   :  { %v2695_v60 = vcombine.high %v81_v55, %v97_v56  ;;  %v130_v48 = vld [vmem:[#allocation2 + $0x2c0] sm:$0xff] }
  0x78   :  { %1923 = vmatpush1.bf16.msra.mxu0 %v2688_v63  ;;  %1964 = vmatpush1.bf16.msra.mxu1 %v2690_v1  ;;  %v49_v63 = vld [vmem:[#allocation2 + $0x38] sm:$0xff] }
  0x79   :  { %1924 = vmatprep.subr.bf16.mxu0 %v2657_v2  ;;  %1965 = vmatprep.subr.bf16.mxu1 %v2659_v3  ;;  %v65_v1 = vld [vmem:[#allocation2 + $0xb8] sm:$0xff]  ;;  %v2692_v2 = vcombine.low %v80_v53, %v96_v54  ;;  %v2694_v3 = vcombine.low %v81_v55, %v97_v56  ;;  %v2729_v53 = vcombine.high %v114_v47, %v130_v48  ;;  %v82_v55 = vld [vmem:[#allocation2 + $0x140] sm:$0xff] }
  0x7a   :  { %v2663_v5 = vcombine.high %v49_v63, %v65_v1  ;;  %v98_v56 = vld [vmem:[#allocation2 + $0x1c0] sm:$0xff] }
  0x7c   :  { %1925 = vmatpush1.bf16.msra.mxu0 %v2656_v8  ;;  %1966 = vmatpush1.bf16.msra.mxu1 %v2658_v9  ;;  %v275_v8 = vld [vmem:[#allocation2 + $0x748] sm:$0xff] }
  0x7d   :  { %1992 = vmatprep.subr.bf16.mxu0 %v2885_v10  ;;  %2033 = vmatprep.subr.bf16.mxu1 %v2887_v11  ;;  %v291_v9 = vld [vmem:[#allocation2 + $0x7c8] sm:$0xff]  ;;  %v2660_v10 = vcombine.low %v48_v61, %v64_v62  ;;  %v2662_v11 = vcombine.low %v49_v63, %v65_v1  ;;  %v2697_v61 = vcombine.high %v82_v55, %v98_v56  ;;  %v50_v63 = vld [vmem:[#allocation2 + $0x40] sm:$0xff] }
  0x7e   :  { %v2891_v14 = vcombine.high %v275_v8, %v291_v9  ;;  %v66_v1 = vld [vmem:[#allocation2 + $0xc0] sm:$0xff] }
  0x7f   :  { %1943 = vmatmul.mubr.bf16.vlgmr.msra.gmra.mxu0 %v3022_v12  ;;  %1984 = vmatmul.mubr.bf16.vlgmr.msra.gmra.mxu1 %v3022_v12 }
  0x80   :  { %1993 = vmatpush1.bf16.msra.mxu0 %v2884_v17  ;;  %2034 = vmatpush1.bf16.msra.mxu1 %v2886_v18  ;;  %v243_v17 = vld [vmem:[#allocation2 + $0x648] sm:$0xff] }
  0x81   :  { %1994 = vmatprep.subr.bf16.mxu0 %v2853_v19  ;;  %2035 = vmatprep.subr.bf16.mxu1 %v2855_v20  ;;  %v259_v18 = vld [vmem:[#allocation2 + $0x6c8] sm:$0xff]  ;;  %v2888_v19 = vcombine.low %v274_v6, %v290_v7  ;;  %v2890_v20 = vcombine.low %v275_v8, %v291_v9  ;;  %v2665_v6 = vcombine.high %v50_v63, %v66_v1  ;;  %v276_v8 = vld [vmem:[#allocation2 + $0x750] sm:$0xff] }
  0x82   :  { %2024 = vmatprep.mubr.bf16.mxu0 %v2990_v0  ;;  %2065 = vmatprep.mubr.bf16.mxu1 %v2990_v0  ;;  %v2859_v22 = vcombine.high %v243_v17, %v259_v18  ;;  %v292_v9 = vld [vmem:[#allocation2 + $0x7d0] sm:$0xff] }
  0x84   :  { %1995 = vmatpush1.bf16.msra.mxu0 %v2852_v25  ;;  %2036 = vmatpush1.bf16.msra.mxu1 %v2854_v26  ;;  %v211_v25 = vld [vmem:[#allocation2 + $0x548] sm:$0xff] }
  0x85   :  { %1996 = vmatprep.subr.bf16.mxu0 %v2821_v27  ;;  %2037 = vmatprep.subr.bf16.mxu1 %v2823_v28  ;;  %v227_v26 = vld [vmem:[#allocation2 + $0x5c8] sm:$0xff]  ;;  %v2856_v27 = vcombine.low %v242_v15, %v258_v16  ;;  %v2858_v28 = vcombine.low %v243_v17, %v259_v18  ;;  %v2893_v15 = vcombine.high %v276_v8, %v292_v9  ;;  %v244_v17 = vld [vmem:[#allocation2 + $0x650] sm:$0xff] }
  0x86   :  { %v2827_v30 = vcombine.high %v211_v25, %v227_v26  ;;  %v260_v18 = vld [vmem:[#allocation2 + $0x6d0] sm:$0xff] }
  0x88   :  { %1997 = vmatpush1.bf16.msra.mxu0 %v2820_v33  ;;  %2038 = vmatpush1.bf16.msra.mxu1 %v2822_v34  ;;  %v179_v33 = vld [vmem:[#allocation2 + $0x448] sm:$0xff] }
  0x89   :  { %1998 = vmatprep.subr.bf16.mxu0 %v2789_v35  ;;  %2039 = vmatprep.subr.bf16.mxu1 %v2791_v36  ;;  %v195_v34 = vld [vmem:[#allocation2 + $0x4c8] sm:$0xff]  ;;  %v2824_v35 = vcombine.low %v210_v23, %v226_v24  ;;  %v2826_v36 = vcombine.low %v211_v25, %v227_v26  ;;  %v2861_v23 = vcombine.high %v244_v17, %v260_v18  ;;  %v212_v25 = vld [vmem:[#allocation2 + $0x550] sm:$0xff] }
  0x8a   :  { %v2795_v38 = vcombine.high %v179_v33, %v195_v34  ;;  %v228_v26 = vld [vmem:[#allocation2 + $0x5d0] sm:$0xff] }
  0x8c   :  { %1999 = vmatpush1.bf16.msra.mxu0 %v2788_v41  ;;  %2040 = vmatpush1.bf16.msra.mxu1 %v2790_v42  ;;  %v147_v41 = vld [vmem:[#allocation2 + $0x348] sm:$0xff] }
  0x8d   :  { %2000 = vmatprep.subr.bf16.mxu0 %v2757_v43  ;;  %2041 = vmatprep.subr.bf16.mxu1 %v2759_v44  ;;  %v163_v42 = vld [vmem:[#allocation2 + $0x3c8] sm:$0xff]  ;;  %v2792_v43 = vcombine.low %v178_v31, %v194_v32  ;;  %v2794_v44 = vcombine.low %v179_v33, %v195_v34  ;;  %v2829_v31 = vcombine.high %v212_v25, %v228_v26  ;;  %v180_v33 = vld [vmem:[#allocation2 + $0x450] sm:$0xff] }
  0x8e   :  { %v2763_v46 = vcombine.high %v147_v41, %v163_v42  ;;  %v196_v34 = vld [vmem:[#allocation2 + $0x4d0] sm:$0xff] }
  0x90   :  { %2001 = vmatpush1.bf16.msra.mxu0 %v2756_v49  ;;  %2042 = vmatpush1.bf16.msra.mxu1 %v2758_v50  ;;  %v115_v49 = vld [vmem:[#allocation2 + $0x248] sm:$0xff] }
  0x91   :  { %2002 = vmatprep.subr.bf16.mxu0 %v2725_v51  ;;  %2043 = vmatprep.subr.bf16.mxu1 %v2727_v52  ;;  %v131_v50 = vld [vmem:[#allocation2 + $0x2c8] sm:$0xff]  ;;  %v2760_v51 = vcombine.low %v146_v39, %v162_v40  ;;  %v2762_v52 = vcombine.low %v147_v41, %v163_v42  ;;  %v2797_v39 = vcombine.high %v180_v33, %v196_v34  ;;  %v148_v41 = vld [vmem:[#allocation2 + $0x350] sm:$0xff] }
  0x92   :  { %v2731_v54 = vcombine.high %v115_v49, %v131_v50  ;;  %v164_v42 = vld [vmem:[#allocation2 + $0x3d0] sm:$0xff] }
  0x94   :  { %2003 = vmatpush1.bf16.msra.mxu0 %v2724_v57  ;;  %2044 = vmatpush1.bf16.msra.mxu1 %v2726_v58  ;;  %v83_v57 = vld [vmem:[#allocation2 + $0x148] sm:$0xff] }
  0x95   :  { %2004 = vmatprep.subr.bf16.mxu0 %v2693_v59  ;;  %2045 = vmatprep.subr.bf16.mxu1 %v2695_v60  ;;  %v99_v58 = vld [vmem:[#allocation2 + $0x1c8] sm:$0xff]  ;;  %v2728_v59 = vcombine.low %v114_v47, %v130_v48  ;;  %v2730_v60 = vcombine.low %v115_v49, %v131_v50  ;;  %v2765_v47 = vcombine.high %v148_v41, %v164_v42  ;;  %v116_v49 = vld [vmem:[#allocation2 + $0x250] sm:$0xff] }
  0x96   :  { %v2699_v62 = vcombine.high %v83_v57, %v99_v58  ;;  %v132_v50 = vld [vmem:[#allocation2 + $0x2d0] sm:$0xff] }
  0x98   :  { %2005 = vmatpush1.bf16.msra.mxu0 %v2692_v2  ;;  %2046 = vmatpush1.bf16.msra.mxu1 %v2694_v3  ;;  %v51_v2 = vld [vmem:[#allocation2 + $0x48] sm:$0xff] }
  0x99   :  { %2006 = vmatprep.subr.bf16.mxu0 %v2661_v4  ;;  %2047 = vmatprep.subr.bf16.mxu1 %v2663_v5  ;;  %v67_v3 = vld [vmem:[#allocation2 + $0xc8] sm:$0xff]  ;;  %v2696_v4 = vcombine.low %v82_v55, %v98_v56  ;;  %v2698_v5 = vcombine.low %v83_v57, %v99_v58  ;;  %v2733_v55 = vcombine.high %v116_v49, %v132_v50  ;;  %v84_v57 = vld [vmem:[#allocation2 + $0x150] sm:$0xff] }
  0x9a   :  { %v2667_v7 = vcombine.high %v51_v2, %v67_v3  ;;  %v100_v58 = vld [vmem:[#allocation2 + $0x1d0] sm:$0xff] }
  0x9c   :  { %2007 = vmatpush1.bf16.msra.mxu0 %v2660_v10  ;;  %2048 = vmatpush1.bf16.msra.mxu1 %v2662_v11  ;;  %v277_v10 = vld [vmem:[#allocation2 + $0x758] sm:$0xff] }
  0x9d   :  { %2074 = vmatprep.subr.bf16.mxu0 %v2889_v13  ;;  %2115 = vmatprep.subr.bf16.mxu1 %v2891_v14  ;;  %v293_v11 = vld [vmem:[#allocation2 + $0x7d8] sm:$0xff]  ;;  %v2664_v13 = vcombine.low %v50_v63, %v66_v1  ;;  %v2666_v14 = vcombine.low %v51_v2, %v67_v3  ;;  %v2701_v63 = vcombine.high %v84_v57, %v100_v58  ;;  %v52_v2 = vld [vmem:[#allocation2 + $0x50] sm:$0xff] }
  0x9e   :  { %v2895_v16 = vcombine.high %v277_v10, %v293_v11  ;;  %v68_v3 = vld [vmem:[#allocation2 + $0xd0] sm:$0xff] }
  0x9f   :  { %2025 = vmatmul.mubr.bf16.vlgmr.msra.gmra.mxu0 %v3022_v12  ;;  %2066 = vmatmul.mubr.bf16.vlgmr.msra.gmra.mxu1 %v3022_v12 }
  0xa0   :  { %2075 = vmatpush1.bf16.msra.mxu0 %v2888_v19  ;;  %2116 = vmatpush1.bf16.msra.mxu1 %v2890_v20  ;;  %v245_v19 = vld [vmem:[#allocation2 + $0x658] sm:$0xff] }
  0xa1   :  { %2076 = vmatprep.subr.bf16.mxu0 %v2857_v21  ;;  %2117 = vmatprep.subr.bf16.mxu1 %v2859_v22  ;;  %v261_v20 = vld [vmem:[#allocation2 + $0x6d8] sm:$0xff]  ;;  %v2892_v21 = vcombine.low %v276_v8, %v292_v9  ;;  %v2894_v22 = vcombine.low %v277_v10, %v293_v11  ;;  %v2669_v8 = vcombine.high %v52_v2, %v68_v3  ;;  %v278_v10 = vld [vmem:[#allocation2 + $0x760] sm:$0xff] }
  0xa2   :  { %2106 = vmatprep.mubr.bf16.mxu0 %v2990_v0  ;;  %2147 = vmatprep.mubr.bf16.mxu1 %v2990_v0  ;;  %v2863_v24 = vcombine.high %v245_v19, %v261_v20  ;;  %v294_v11 = vld [vmem:[#allocation2 + $0x7e0] sm:$0xff] }
  0xa4   :  { %2077 = vmatpush1.bf16.msra.mxu0 %v2856_v27  ;;  %2118 = vmatpush1.bf16.msra.mxu1 %v2858_v28  ;;  %v213_v27 = vld [vmem:[#allocation2 + $0x558] sm:$0xff] }
  0xa5   :  { %2078 = vmatprep.subr.bf16.mxu0 %v2825_v29  ;;  %2119 = vmatprep.subr.bf16.mxu1 %v2827_v30  ;;  %v229_v28 = vld [vmem:[#allocation2 + $0x5d8] sm:$0xff]  ;;  %v2860_v29 = vcombine.low %v244_v17, %v260_v18  ;;  %v2862_v30 = vcombine.low %v245_v19, %v261_v20  ;;  %v2897_v17 = vcombine.high %v278_v10, %v294_v11  ;;  %v246_v19 = vld [vmem:[#allocation2 + $0x660] sm:$0xff] }
  0xa6   :  { %v2831_v32 = vcombine.high %v213_v27, %v229_v28  ;;  %v262_v20 = vld [vmem:[#allocation2 + $0x6e0] sm:$0xff] }
  0xa8   :  { %2079 = vmatpush1.bf16.msra.mxu0 %v2824_v35  ;;  %2120 = vmatpush1.bf16.msra.mxu1 %v2826_v36  ;;  %v181_v35 = vld [vmem:[#allocation2 + $0x458] sm:$0xff] }
  0xa9   :  { %2080 = vmatprep.subr.bf16.mxu0 %v2793_v37  ;;  %2121 = vmatprep.subr.bf16.mxu1 %v2795_v38  ;;  %v197_v36 = vld [vmem:[#allocation2 + $0x4d8] sm:$0xff]  ;;  %v2828_v37 = vcombine.low %v212_v25, %v228_v26  ;;  %v2830_v38 = vcombine.low %v213_v27, %v229_v28  ;;  %v2865_v25 = vcombine.high %v246_v19, %v262_v20  ;;  %v214_v27 = vld [vmem:[#allocation2 + $0x560] sm:$0xff] }
  0xaa   :  { %v2799_v40 = vcombine.high %v181_v35, %v197_v36  ;;  %v230_v28 = vld [vmem:[#allocation2 + $0x5e0] sm:$0xff] }
  0xac   :  { %2081 = vmatpush1.bf16.msra.mxu0 %v2792_v43  ;;  %2122 = vmatpush1.bf16.msra.mxu1 %v2794_v44  ;;  %v149_v43 = vld [vmem:[#allocation2 + $0x358] sm:$0xff] }
  0xad   :  { %2082 = vmatprep.subr.bf16.mxu0 %v2761_v45  ;;  %2123 = vmatprep.subr.bf16.mxu1 %v2763_v46  ;;  %v165_v44 = vld [vmem:[#allocation2 + $0x3d8] sm:$0xff]  ;;  %v2796_v45 = vcombine.low %v180_v33, %v196_v34  ;;  %v2798_v46 = vcombine.low %v181_v35, %v197_v36  ;;  %v2833_v34 = vcombine.high %v214_v27, %v230_v28  ;;  %v182_v36 = vld [vmem:[#allocation2 + $0x460] sm:$0xff] }
  0xae   :  { %v2767_v48 = vcombine.high %v149_v43, %v165_v44 }
  0xb0   :  { %2083 = vmatpush1.bf16.msra.mxu0 %v2760_v51  ;;  %2124 = vmatpush1.bf16.msra.mxu1 %v2762_v52  ;;  %v117_v51 = vld [vmem:[#allocation2 + $0x258] sm:$0xff] }
  0xb1   :  { %2084 = vmatprep.subr.bf16.mxu0 %v2729_v53  ;;  %2125 = vmatprep.subr.bf16.mxu1 %v2731_v54  ;;  %v133_v52 = vld [vmem:[#allocation2 + $0x2d8] sm:$0xff]  ;;  %v2764_v53 = vcombine.low %v148_v41, %v164_v42  ;;  %v2766_v54 = vcombine.low %v149_v43, %v165_v44  ;;  %v150_v43 = vld [vmem:[#allocation2 + $0x360] sm:$0xff] }
  0xb2   :  { %v2735_v56 = vcombine.high %v117_v51, %v133_v52  ;;  %v166_v44 = vld [vmem:[#allocation2 + $0x3e0] sm:$0xff] }
  0xb4   :  { %2085 = vmatpush1.bf16.msra.mxu0 %v2728_v59  ;;  %2126 = vmatpush1.bf16.msra.mxu1 %v2730_v60  ;;  %v85_v59 = vld [vmem:[#allocation2 + $0x158] sm:$0xff] }
  0xb5   :  { %2086 = vmatprep.subr.bf16.mxu0 %v2697_v61  ;;  %2127 = vmatprep.subr.bf16.mxu1 %v2699_v62  ;;  %v101_v60 = vld [vmem:[#allocation2 + $0x1d8] sm:$0xff]  ;;  %v2732_v61 = vcombine.low %v116_v49, %v132_v50  ;;  %v2734_v62 = vcombine.low %v117_v51, %v133_v52  ;;  %v2769_v49 = vcombine.high %v150_v43, %v166_v44  ;;  %v118_v51 = vld [vmem:[#allocation2 + $0x260] sm:$0xff] }
  0xb6   :  { %v2703_v1 = vcombine.high %v85_v59, %v101_v60  ;;  %v134_v52 = vld [vmem:[#allocation2 + $0x2e0] sm:$0xff] }
  0xb8   :  { %2087 = vmatpush1.bf16.msra.mxu0 %v2696_v4  ;;  %2128 = vmatpush1.bf16.msra.mxu1 %v2698_v5  ;;  %v53_v4 = vld [vmem:[#allocation2 + $0x58] sm:$0xff] }
  0xb9   :  { %2088 = vmatprep.subr.bf16.mxu0 %v2665_v6  ;;  %2129 = vmatprep.subr.bf16.mxu1 %v2667_v7  ;;  %v69_v5 = vld [vmem:[#allocation2 + $0xd8] sm:$0xff]  ;;  %v2700_v6 = vcombine.low %v84_v57, %v100_v58  ;;  %v2702_v7 = vcombine.low %v85_v59, %v101_v60  ;;  %v2737_v57 = vcombine.high %v118_v51, %v134_v52  ;;  %v86_v59 = vld [vmem:[#allocation2 + $0x160] sm:$0xff] }
  0xba   :  { %v2671_v9 = vcombine.high %v53_v4, %v69_v5  ;;  %v102_v60 = vld [vmem:[#allocation2 + $0x1e0] sm:$0xff] }
  0xbc   :  { %2089 = vmatpush1.bf16.msra.mxu0 %v2664_v13  ;;  %2130 = vmatpush1.bf16.msra.mxu1 %v2666_v14  ;;  %v279_v13 = vld [vmem:[#allocation2 + $0x768] sm:$0xff] }
  0xbd   :  { %2156 = vmatprep.subr.bf16.mxu0 %v2893_v15  ;;  %2197 = vmatprep.subr.bf16.mxu1 %v2895_v16  ;;  %v295_v14 = vld [vmem:[#allocation2 + $0x7e8] sm:$0xff]  ;;  %v2668_v15 = vcombine.low %v52_v2, %v68_v3  ;;  %v2670_v16 = vcombine.low %v53_v4, %v69_v5  ;;  %v2705_v3 = vcombine.high %v86_v59, %v102_v60  ;;  %v54_v5 = vld [vmem:[#allocation2 + $0x60] sm:$0xff] }
  0xbe   :  { %v2899_v18 = vcombine.high %v279_v13, %v295_v14 }
  0xbf   :  { %2107 = vmatmul.mubr.bf16.vlgmr.msra.gmra.mxu0 %v3022_v12  ;;  %2148 = vmatmul.mubr.bf16.vlgmr.msra.gmra.mxu1 %v3022_v12 }
  0xc0   :  { %2157 = vmatpush1.bf16.msra.mxu0 %v2892_v21  ;;  %2198 = vmatpush1.bf16.msra.mxu1 %v2894_v22  ;;  %v247_v21 = vld [vmem:[#allocation2 + $0x668] sm:$0xff] }
  0xc1   :  { %2158 = vmatprep.subr.bf16.mxu0 %v2861_v23  ;;  %2199 = vmatprep.subr.bf16.mxu1 %v2863_v24  ;;  %v263_v22 = vld [vmem:[#allocation2 + $0x6e8] sm:$0xff]  ;;  %v2896_v23 = vcombine.low %v278_v10, %v294_v11  ;;  %v2898_v24 = vcombine.low %v279_v13, %v295_v14 }
  0xc2   :  { %2188 = vmatprep.mubr.bf16.mxu0 %v2990_v0  ;;  %2229 = vmatprep.mubr.bf16.mxu1 %v2990_v0  ;;  %v2867_v26 = vcombine.high %v247_v21, %v263_v22  ;;  %v2866_v33 = vcombine.low %v247_v21, %v263_v22  ;;  %v3058_v22 = vld [vmem:[#allocation4] sm:$0xff] }
  0xc4   :  { %2159 = vmatpush1.bf16.msra.mxu0 %v2860_v29  ;;  %2200 = vmatpush1.bf16.msra.mxu1 %v2862_v30  ;;  %v215_v29 = vld [vmem:[#allocation2 + $0x568] sm:$0xff] }
  0xc5   :  { %2160 = vmatprep.subr.bf16.mxu0 %v2829_v31  ;;  %2201 = vmatprep.subr.bf16.mxu1 %v2831_v32  ;;  %v231_v30 = vld [vmem:[#allocation2 + $0x5e8] sm:$0xff]  ;;  %v3048_v31 = vld [vmem:[%s3178_s0] sm:$0xf]  ;;  %v2864_v32 = vcombine.low %v246_v19, %v262_v20 }
  0xc6   :  { %v2835_v35 = vcombine.high %v215_v29, %v231_v30 }
  0xc8   :  { %2161 = vmatpush1.bf16.msra.mxu0 %v2828_v37  ;;  %2202 = vmatpush1.bf16.msra.mxu1 %v2830_v38  ;;  %v198_v37 = vld [vmem:[#allocation2 + $0x4e0] sm:$0xff]  ;;  %v199_v38 = vld [vmem:[#allocation2 + $0x4e8] sm:$0xff] }
  0xc9   :  { %2162 = vmatprep.subr.bf16.mxu0 %v2797_v39  ;;  %2203 = vmatprep.subr.bf16.mxu1 %v2799_v40  ;;  %v2832_v39 = vcombine.low %v214_v27, %v230_v28  ;;  %v2834_v40 = vcombine.low %v215_v29, %v231_v30  ;;  %v2801_v41 = vcombine.high %v182_v36, %v198_v37  ;;  %v248_v27 = vld [vmem:[#allocation2 + $0x670] sm:$0xff]  ;;  %v249_v30 = vld [vmem:[#allocation2 + $0x678] sm:$0xff] }
  0xca   :  { %v264_v28 = vld [vmem:[#allocation2 + $0x6f0] sm:$0xff] }
  0xcc   :  { %2163 = vmatpush1.bf16.msra.mxu0 %v2796_v45  ;;  %2204 = vmatpush1.bf16.msra.mxu1 %v2798_v46  ;;  %v151_v45 = vld [vmem:[#allocation2 + $0x368] sm:$0xff] }
  0xcd   :  { %2164 = vmatprep.subr.bf16.mxu0 %v2765_v47  ;;  %2205 = vmatprep.subr.bf16.mxu1 %v2767_v48  ;;  %v167_v46 = vld [vmem:[#allocation2 + $0x3e8] sm:$0xff]  ;;  %v2800_v47 = vcombine.low %v182_v36, %v198_v37  ;;  %v2869_v37 = vcombine.high %v248_v27, %v264_v28 }
  0xce   :  { %v2771_v50 = vcombine.high %v151_v45, %v167_v46 }
  0xd0   :  { %2165 = vmatpush1.bf16.msra.mxu0 %v2764_v53  ;;  %2206 = vmatpush1.bf16.msra.mxu1 %v2766_v54  ;;  %v119_v53 = vld [vmem:[#allocation2 + $0x268] sm:$0xff] }
  0xd1   :  { %2166 = vmatprep.subr.bf16.mxu0 %v2733_v55  ;;  %2207 = vmatprep.subr.bf16.mxu1 %v2735_v56  ;;  %v135_v54 = vld [vmem:[#allocation2 + $0x2e8] sm:$0xff]  ;;  %v2768_v55 = vcombine.low %v150_v43, %v166_v44  ;;  %v2770_v56 = vcombine.low %v151_v45, %v167_v46  ;;  %v217_v43 = vld [vmem:[#allocation2 + $0x578] sm:$0xff] }
  0xd2   :  { %v2739_v58 = vcombine.high %v119_v53, %v135_v54  ;;  %v2738_v2 = vcombine.low %v119_v53, %v135_v54  ;;  %v233_v44 = vld [vmem:[#allocation2 + $0x5f8] sm:$0xff] }
  0xd4   :  { %2167 = vmatpush1.bf16.msra.mxu0 %v2732_v61  ;;  %2208 = vmatpush1.bf16.msra.mxu1 %v2734_v62  ;;  %v87_v61 = vld [vmem:[#allocation2 + $0x168] sm:$0xff] }
  0xd5   :  { %2168 = vmatprep.subr.bf16.mxu0 %v2701_v63  ;;  %2209 = vmatprep.subr.bf16.mxu1 %v2703_v1  ;;  %v103_v62 = vld [vmem:[#allocation2 + $0x1e8] sm:$0xff]  ;;  %v2736_v63 = vcombine.low %v118_v51, %v134_v52  ;;  %v306_v1 = vlaneseq }
  0xd6   :  { %v2707_v4 = vcombine.high %v87_v61, %v103_v62  ;;  %v2706_v11 = vcombine.low %v87_v61, %v103_v62  ;;  %v185_v61 = vld [vmem:[#allocation2 + $0x478] sm:$0xff] }
  0xd7   :  { %v3053_v10 = vshrl.u32 %v306_v1, 7  ;;  %v201_v62 = vld [vmem:[#allocation2 + $0x4f8] sm:$0xff] }
  0xd8   :  { %2169 = vmatpush1.bf16.msra.mxu0 %v2700_v6  ;;  %2210 = vmatpush1.bf16.msra.mxu1 %v2702_v7  ;;  %v70_v6 = vld [vmem:[#allocation2 + $0xe0] sm:$0xff]  ;;  %v55_v7 = vld [vmem:[#allocation2 + $0x68] sm:$0xff] }
  0xd9   :  { %2170 = vmatprep.subr.bf16.mxu0 %v2669_v8  ;;  %2211 = vmatprep.subr.bf16.mxu1 %v2671_v9  ;;  %v71_v8 = vld [vmem:[#allocation2 + $0xe8] sm:$0xff]  ;;  %v2704_v9 = vcombine.low %v86_v59, %v102_v60  ;;  %v2673_v13 = vcombine.high %v54_v5, %v70_v6  ;;  %v2672_v19 = vcombine.low %v54_v5, %v70_v6  ;;  %v3056_v20 = vsub.s32 0, %v3053_v10 }
  0xda   :  { %v2675_v14 = vcombine.high %v55_v7, %v71_v8  ;;  %v2674_v21 = vcombine.low %v55_v7, %v71_v8  ;;  %v3067_v29 = vsub.s32 3, %v3053_v10  ;;  %v2838_v5 = vcombine.low %v217_v43, %v233_v44 }
  0xdc   :  { %2171 = vmatpush1.bf16.msra.mxu0 %v2668_v15  ;;  %2212 = vmatpush1.bf16.msra.mxu1 %v2670_v16  ;;  %v280_v15 = vld [vmem:[#allocation2 + $0x770] sm:$0xff] }
  0xdd   :  { %2238 = vmatprep.subr.bf16.mxu0 %v2897_v17  ;;  %2279 = vmatprep.subr.bf16.mxu1 %v2899_v18  ;;  %v296_v16 = vld [vmem:[#allocation2 + $0x7f0] sm:$0xff]  ;;  %v281_v17 = vld [vmem:[#allocation2 + $0x778] sm:$0xff] }
  0xde   :  { %v297_v18 = vld [vmem:[#allocation2 + $0x7f8] sm:$0xff] }
  0xdf   :  { %2189 = vmatmul.mubr.bf16.vlgmr.msra.gmra.mxu0 %v3022_v12  ;;  %2230 = vmatmul.mubr.bf16.vlgmr.msra.gmra.mxu1 %v3048_v31  ;;  %v183_v12 = vld [vmem:[#allocation2 + $0x468] sm:$0xff]  ;;  %v2902_v36 = vcombine.low %v281_v17, %v297_v18 }
  0xe0   :  { %2239 = vmatpush1.bf16.msra.mxu0 %v2896_v23  ;;  %2280 = vmatpush1.bf16.msra.mxu1 %v2898_v24  ;;  %v2803_v42 = vcombine.high %v183_v12, %v199_v38  ;;  %v2802_v48 = vcombine.low %v183_v12, %v199_v38  ;;  %v3061_v23 = vsub.s32 2, %v3053_v10  ;;  %v2901_v24 = vcombine.high %v280_v15, %v296_v16 }
  0xe1   :  { %2240 = vmatprep.subr.bf16.mxu0 %v2865_v25  ;;  %2281 = vmatprep.subr.bf16.mxu1 %v2867_v26  ;;  %v2903_v25 = vcombine.high %v281_v17, %v297_v18  ;;  %v3064_v26 = vsub.s32 1, %v3053_v10  ;;  %v153_v17 = vld [vmem:[#allocation2 + $0x378] sm:$0xff] }
  0xe2   :  { %2270 = vmatprep.mubr.bf16.mxu0 %v2990_v0  ;;  %2311 = vmatprep.mubr.bf16.mxu1 %v2990_v0  ;;  %v169_v18 = vld [vmem:[#allocation2 + $0x3f8] sm:$0xff] }
  0xe3   :  { %v313_v12 = vrot.slane %v3058_v22, %v3064_v26 }
  0xe4   :  { %2241 = vmatpush1.bf16.msra.mxu0 %v2864_v32  ;;  %2282 = vmatpush1.bf16.msra.mxu1 %v2866_v33  ;;  %v265_v32 = vld [vmem:[#allocation2 + $0x6f8] sm:$0xff]  ;;  %v309_v33 = vrot.slane %v3058_v22, %v3056_v20 }
  0xe5   :  { %2242 = vmatprep.subr.bf16.mxu0 %v2833_v34  ;;  %2283 = vmatprep.subr.bf16.mxu1 %v2835_v35  ;;  %v2900_v34 = vcombine.low %v280_v15, %v296_v16  ;;  %v317_v35 = vrot.slane %v3058_v22, %v3061_v23  ;;  %v2871_v38 = vcombine.high %v249_v30, %v265_v32 }
  0xe8   :  { %2243 = vmatpush1.bf16.msra.mxu0 %v2832_v39  ;;  %2284 = vmatpush1.bf16.msra.mxu1 %v2834_v40  ;;  %v216_v39 = vld [vmem:[#allocation2 + $0x570] sm:$0xff] }
  0xe9   :  { %2244 = vmatprep.subr.bf16.mxu0 %v2801_v41  ;;  %2285 = vmatprep.subr.bf16.mxu1 %v2803_v42  ;;  %v232_v40 = vld [vmem:[#allocation2 + $0x5f0] sm:$0xff]  ;;  %v321_v42 = vrot.slane %v3058_v22, %v3067_v29 }
  0xea   :  { %v2837_v51 = vcombine.high %v216_v39, %v232_v40 }
  0xec   :  { %2245 = vmatpush1.bf16.msra.mxu0 %v2800_v47  ;;  %2286 = vmatpush1.bf16.msra.mxu1 %v2802_v48  ;;  %v2868_v47 = vcombine.low %v248_v27, %v264_v28  ;;  %v2775_v27 = vcombine.high %v153_v17, %v169_v18  ;;  %v120_v28 = vld [vmem:[#allocation2 + $0x270] sm:$0xff] }
  0xed   :  { %2246 = vmatprep.subr.bf16.mxu0 %v2769_v49  ;;  %2287 = vmatprep.subr.bf16.mxu1 %v2771_v50  ;;  %v2870_v50 = vcombine.low %v249_v30, %v265_v32  ;;  %v136_v30 = vld [vmem:[#allocation2 + $0x2f0] sm:$0xff]  ;;  %v121_v32 = vld [vmem:[#allocation2 + $0x278] sm:$0xff] }
  0xf0   :  { %2247 = vmatpush1.bf16.msra.mxu0 %v2768_v55  ;;  %2288 = vmatpush1.bf16.msra.mxu1 %v2770_v56  ;;  %v2839_v55 = vcombine.high %v217_v43, %v233_v44  ;;  %v184_v56 = vld [vmem:[#allocation2 + $0x470] sm:$0xff] }
  0xf1   :  { %2248 = vmatprep.subr.bf16.mxu0 %v2737_v57  ;;  %2289 = vmatprep.subr.bf16.mxu1 %v2739_v58  ;;  %v200_v57 = vld [vmem:[#allocation2 + $0x4f0] sm:$0xff] }
  0xf2   :  { %v2805_v6 = vcombine.high %v184_v56, %v200_v57 }
  0xf4   :  { %2249 = vmatpush1.bf16.msra.mxu0 %v2736_v63  ;;  %2290 = vmatpush1.bf16.msra.mxu1 %v2738_v2  ;;  %v2836_v2 = vcombine.low %v216_v39, %v232_v40  ;;  %v89_v39 = vld [vmem:[#allocation2 + $0x178] sm:$0xff] }
  0xf5   :  { %2250 = vmatprep.subr.bf16.mxu0 %v2705_v3  ;;  %2291 = vmatprep.subr.bf16.mxu1 %v2707_v4  ;;  %v105_v40 = vld [vmem:[#allocation2 + $0x1f8] sm:$0xff] }
  0xf6   :  { %v2711_v44 = vcombine.high %v89_v39, %v105_v40 }
  0xf8   :  { %2251 = vmatpush1.bf16.msra.mxu0 %v2704_v9  ;;  %2292 = vmatpush1.bf16.msra.mxu1 %v2706_v11  ;;  %v2807_v11 = vcombine.high %v185_v61, %v201_v62 }
  0xf9   :  { %2252 = vmatprep.subr.bf16.mxu0 %v2673_v13  ;;  %2293 = vmatprep.subr.bf16.mxu1 %v2675_v14  ;;  %v168_v13 = vld [vmem:[#allocation2 + $0x3f0] sm:$0xff] }
  0xfc   :  { %2253 = vmatpush1.bf16.msra.mxu0 %v2672_v19  ;;  %2294 = vmatpush1.bf16.msra.mxu1 %v2674_v21  ;;  %v2804_v21 = vcombine.low %v184_v56, %v200_v57  ;;  %v3094_v56 = vsub.s32 6, %v3053_v10  ;;  %v3097_v57 = vsub.s32 5, %v3053_v10 }
  0xfd   :  { %2320 = vmatprep.subr.bf16.mxu0 %v2901_v24  ;;  %2361 = vmatprep.subr.bf16.mxu1 %v2903_v25  ;;  %v2806_v24 = vcombine.low %v185_v61, %v201_v62 }
  0xfe   :  { %v329_v61 = vrot.slane %v3058_v22, %v3097_v57 }
  0xff   :  { %v1780_v41 = vpop.f32.mrf.mxu0  ;;  %2271 = vmatmul.mubr.bf16.vlgmr.msra.gmra.mxu0 %v3048_v31  ;;  %v1821_v46 = vpop.f32.mrf.mxu1  ;;  %2312 = vmatmul.mubr.bf16.vlgmr.msra.gmra.mxu1 %v3048_v31 }
 0x100   :  { %v1781_v45 = vadd.f32 %v1780_v41, %v309_v33  ;;  %2321 = vmatpush1.bf16.msra.mxu0 %v2900_v34  ;;  %v1822_v48 = vadd.f32 %v1821_v46, %v317_v35  ;;  %2362 = vmatpush1.bf16.msra.mxu1 %v2902_v36  ;;  %v137_v33 = vld [vmem:[#allocation2 + $0x2f8] sm:$0xff]  ;;  %v2774_v35 = vcombine.low %v153_v17, %v169_v18  ;;  %v72_v46 = vld [vmem:[#allocation2 + $0xf0] sm:$0xff] }
 0x101   :  { %v1782_v49 = vpop.f32.mrf.mxu0  ;;  %2322 = vmatprep.subr.bf16.mxu0 %v2869_v37  ;;  %v1823_v54 = vpop.f32.mrf.mxu1  ;;  %2363 = vmatprep.subr.bf16.mxu1 %v2871_v38  ;;  %v2741_v36 = vcombine.high %v120_v28, %v136_v30  ;;  %v2743_v37 = vcombine.high %v121_v32, %v137_v33  ;;  %v104_v38 = vld [vmem:[#allocation2 + $0x1f0] sm:$0xff]  ;;  %v2740_v41 = vcombine.low %v120_v28, %v136_v30 }
 0x102   :  { %v2434_v52 = vmul.f32 0.01, %v1781_v45  ;;  %v1783_v53 = vadd.f32 %v1782_v49, %v313_v12  ;;  %2352 = vmatprep.mubr.bf16.mxu0 %v2990_v0  ;;  %vm2402_vm0 = vcmp.ge.f32.partialorder %v1781_v45, 0.0  ;;  %v2436_v58 = vmul.f32 0.01, %v1822_v48  ;;  %2393 = vmatprep.mubr.bf16.mxu1 %v2990_v0  ;;  %v152_v0 = vld [vmem:[#allocation2 + $0x370] sm:$0xff] }
 0x103   :  { %v1824_v59 = vadd.f32 %v1823_v54, %v321_v42  ;;  %v1784_v60 = vpop.f32.mrf.mxu0  ;;  %vm2404_vm1 = vcmp.ge.f32.partialorder %v1822_v48, 0.0  ;;  %v1825_v1 = vpop.f32.mrf.mxu1  ;;  %v2773_v25 = vcombine.high %v152_v0, %v168_v13  ;;  %v2772_v34 = vcombine.low %v152_v0, %v168_v13  ;;  %v88_v12 = vld [vmem:[#allocation2 + $0x170] sm:$0xff] }
 0x104   :  { %vm2403_vm2 = vcmp.ge.f32.partialorder %v1783_v53, 0.0  ;;  %v2435_v63 = vmul.f32 0.01, %v1783_v53  ;;  %2323 = vmatpush1.bf16.msra.mxu0 %v2868_v47  ;;  %2364 = vmatpush1.bf16.msra.mxu1 %v2870_v50  ;;  %v2466_v7 = vsel %vm2402_vm0, %v1781_v45, %v2434_v52  ;;  %v2468_v14 = vsel %vm2404_vm1, %v1822_v48, %v2436_v58  ;;  %v56_v45 = vld [vmem:[#allocation2 + $0x70] sm:$0xff]  ;;  %v57_v47 = vld [vmem:[#allocation2 + $0x78] sm:$0xff] }
 0x105   :  { %vm2405_vm3 = vcmp.ge.f32.partialorder %v1824_v59, 0.0  ;;  %v2437_v3 = vmul.f32 0.01, %v1824_v59  ;;  %v1785_v4 = vpop.f32.mrf.mxu0  ;;  %2324 = vmatprep.subr.bf16.mxu0 %v2837_v51  ;;  %v1826_v9 = vpop.f32.mrf.mxu1  ;;  %2365 = vmatprep.subr.bf16.mxu1 %v2839_v55  ;;  %v2742_v42 = vcombine.low %v121_v32, %v137_v33  ;;  %v2709_v43 = vcombine.high %v88_v12, %v104_v38  ;;  %v73_v48 = vld [vmem:[#allocation2 + $0xf8] sm:$0xff] }
 0x106   :  { %v2467_v8 = vsel %vm2403_vm2, %v1783_v53, %v2435_v63  ;;  %v2708_v49 = vcombine.low %v88_v12, %v104_v38  ;;  %v2710_v50 = vcombine.low %v89_v39, %v105_v40  ;;  %v2677_v51 = vcombine.high %v56_v45, %v72_v46 }
 0x107   :  { %v2920_v15 = vpack.c.bf16 %v2467_v8, %v2466_v7  ;;  %v2469_v16 = vsel %vm2405_vm3, %v1824_v59, %v2437_v3  ;;  %v2679_v52 = vcombine.high %v57_v47, %v73_v48  ;;  %v2676_v53 = vcombine.low %v56_v45, %v72_v46 }
 0x108   :  { %v2921_v19 = vpack.c.bf16 %v2469_v16, %v2468_v14  ;;  %2325 = vmatpush1.bf16.msra.mxu0 %v2836_v2  ;;  %2366 = vmatpush1.bf16.msra.mxu1 %v2838_v5  ;;  %v3091_v54 = vsub.s32 4, %v3053_v10  ;;  %v2678_v55 = vcombine.low %v57_v47, %v73_v48  ;;  %v3100_v58 = vsub.s32 7, %v3053_v10 }
 0x109   :  { %2626 = vst [vmem:[%s3181_s3] sm:$0xff] %v2920_v15  ;;  %2326 = vmatprep.subr.bf16.mxu0 %v2805_v6  ;;  %2367 = vmatprep.subr.bf16.mxu1 %v2807_v11  ;;  %v333_v60 = vrot.slane %v3058_v22, %v3094_v56 }
 0x10a   :  { %2627 = vst [vmem:[%s3181_s3 + $0x8] sm:$0xff] %v2921_v19  ;;  %v325_v59 = vrot.slane %v3058_v22, %v3091_v54  ;;  %v337_v63 = vrot.slane %v3058_v22, %v3100_v58 }
 0x10c   :  { %2327 = vmatpush1.bf16.msra.mxu0 %v2804_v21  ;;  %2368 = vmatpush1.bf16.msra.mxu1 %v2806_v24  ;;  %v299_v21 = vld [vmem:[#allocation4 + $0x8] sm:$0xff] }
 0x10d   :  { %2328 = vmatprep.subr.bf16.mxu0 %v2773_v25  ;;  %2369 = vmatprep.subr.bf16.mxu1 %v2775_v27  ;;  %v341_v24 = vrot.slane %v299_v21, %v3056_v20  ;;  %v349_v25 = vrot.slane %v299_v21, %v3061_v23  ;;  %v345_v27 = vrot.slane %v299_v21, %v3064_v26 }
 0x10e   :  { %v353_v30 = vrot.slane %v299_v21, %v3067_v29 }
 0x110   :  { %2329 = vmatpush1.bf16.msra.mxu0 %v2772_v34  ;;  %2370 = vmatpush1.bf16.msra.mxu1 %v2774_v35 }
 0x111   :  { %2330 = vmatprep.subr.bf16.mxu0 %v2741_v36  ;;  %2371 = vmatprep.subr.bf16.mxu1 %v2743_v37 }
 0x114   :  { %2331 = vmatpush1.bf16.msra.mxu0 %v2740_v41  ;;  %2372 = vmatpush1.bf16.msra.mxu1 %v2742_v42 }
 0x115   :  { %2332 = vmatprep.subr.bf16.mxu0 %v2709_v43  ;;  %2373 = vmatprep.subr.bf16.mxu1 %v2711_v44 }
 0x118   :  { %2333 = vmatpush1.bf16.msra.mxu0 %v2708_v49  ;;  %2374 = vmatpush1.bf16.msra.mxu1 %v2710_v50 }
 0x119   :  { %2334 = vmatprep.subr.bf16.mxu0 %v2677_v51  ;;  %2375 = vmatprep.subr.bf16.mxu1 %v2679_v52  ;;  %v357_v52 = vrot.slane %v299_v21, %v3091_v54 }
 0x11c   :  { %2335 = vmatpush1.bf16.msra.mxu0 %v2676_v53  ;;  %2376 = vmatpush1.bf16.msra.mxu1 %v2678_v55  ;;  %v365_v53 = vrot.slane %v299_v21, %v3094_v56  ;;  %v361_v55 = vrot.slane %v299_v21, %v3097_v57 }
 0x11f   :  { %v1862_v62 = vpop.f32.mrf.mxu0  ;;  %2353 = vmatmul.mubr.bf16.vlgmr.msra.gmra.mxu0 %v3048_v31  ;;  %v1903_v10 = vpop.f32.mrf.mxu1  ;;  %2394 = vmatmul.mubr.bf16.vlgmr.msra.gmra.mxu1 %v3048_v31 }
 0x120   :  { %v1863_v1 = vadd.f32 %v1862_v62, %v325_v59  ;;  %v1904_v2 = vadd.f32 %v1903_v10, %v333_v60  ;;  %v369_v60 = vrot.slane %v299_v21, %v3100_v58 }
 0x121   :  { %v1864_v3 = vpop.f32.mrf.mxu0  ;;  %v1905_v6 = vpop.f32.mrf.mxu1 }
 0x122   :  { %v2438_v4 = vmul.f32 0.01, %v1863_v1  ;;  %v1865_v5 = vadd.f32 %v1864_v3, %v329_v61  ;;  %vm2406_vm4 = vcmp.ge.f32.partialorder %v1863_v1, 0.0  ;;  %v2440_v7 = vmul.f32 0.01, %v1904_v2 }
 0x123   :  { %v1906_v8 = vadd.f32 %v1905_v6, %v337_v63  ;;  %v1866_v9 = vpop.f32.mrf.mxu0  ;;  %vm2408_vm5 = vcmp.ge.f32.partialorder %v1904_v2, 0.0  ;;  %v1907_v0 = vpop.f32.mrf.mxu1 }
 0x124   :  { %vm2407_vm6 = vcmp.ge.f32.partialorder %v1865_v5, 0.0  ;;  %v2439_v11 = vmul.f32 0.01, %v1865_v5  ;;  %v2470_v14 = vsel %vm2406_vm4, %v1863_v1, %v2438_v4  ;;  %v2472_v31 = vsel %vm2408_vm5, %v1904_v2, %v2440_v7 }
 0x125   :  { %vm2409_vm7 = vcmp.ge.f32.partialorder %v1906_v8, 0.0  ;;  %v2441_v13 = vmul.f32 0.01, %v1906_v8  ;;  %v1867_v22 = vpop.f32.mrf.mxu0  ;;  %v1908_v16 = vpop.f32.mrf.mxu1 }
 0x126   :  { %v2471_v15 = vsel %vm2407_vm6, %v1865_v5, %v2439_v11 }
 0x127   :  { %v2922_v17 = vpack.c.bf16 %v2471_v15, %v2470_v14  ;;  %v2473_v18 = vsel %vm2409_vm7, %v1906_v8, %v2441_v13 }
 0x128   :  { %v2923_v19 = vpack.c.bf16 %v2473_v18, %v2472_v31 }
 0x129   :  { %2628 = vst [vmem:[%s3181_s3 + $0x10] sm:$0xff] %v2922_v17  ;;  %v300_v17 = vld [vmem:[#allocation4 + $0x10] sm:$0xff] }
 0x12a   :  { %2629 = vst [vmem:[%s3181_s3 + $0x18] sm:$0xff] %v2923_v19  ;;  %v373_v18 = vrot.slane %v300_v17, %v3056_v20  ;;  %v381_v19 = vrot.slane %v300_v17, %v3061_v23  ;;  %v377_v21 = vrot.slane %v300_v17, %v3064_v26 }
 0x13f   :  { %v1944_v28 = vpop.f32.mrf.mxu0  ;;  %v1985_v33 = vpop.f32.mrf.mxu1 }
 0x140   :  { %v1945_v32 = vadd.f32 %v1944_v28, %v341_v24  ;;  %v1986_v34 = vadd.f32 %v1985_v33, %v349_v25  ;;  %v385_v25 = vrot.slane %v300_v17, %v3067_v29 }
 0x141   :  { %v1946_v35 = vpop.f32.mrf.mxu0  ;;  %v1987_v12 = vpop.f32.mrf.mxu1 }
 0x142   :  { %v2442_v36 = vmul.f32 0.01, %v1945_v32  ;;  %v1947_v37 = vadd.f32 %v1946_v35, %v345_v27  ;;  %vm2410_vm8 = vcmp.ge.f32.partialorder %v1945_v32, 0.0  ;;  %v2444_v38 = vmul.f32 0.01, %v1986_v34 }
 0x143   :  { %v1988_v39 = vadd.f32 %v1987_v12, %v353_v30  ;;  %v1948_v40 = vpop.f32.mrf.mxu0  ;;  %vm2412_vm9 = vcmp.ge.f32.partialorder %v1986_v34, 0.0  ;;  %v1989_v42 = vpop.f32.mrf.mxu1 }
 0x144   :  { %vm2411_vm10 = vcmp.ge.f32.partialorder %v1947_v37, 0.0  ;;  %v2443_v41 = vmul.f32 0.01, %v1947_v37  ;;  %v2474_v45 = vsel %vm2410_vm8, %v1945_v32, %v2442_v36  ;;  %v2476_v48 = vsel %vm2412_vm9, %v1986_v34, %v2444_v38 }
 0x145   :  { %vm2413_vm11 = vcmp.ge.f32.partialorder %v1988_v39, 0.0  ;;  %v2445_v43 = vmul.f32 0.01, %v1988_v39  ;;  %v1949_v44 = vpop.f32.mrf.mxu0  ;;  %v1990_v47 = vpop.f32.mrf.mxu1 }
 0x146   :  { %v2475_v46 = vsel %vm2411_vm10, %v1947_v37, %v2443_v41 }
 0x147   :  { %v2924_v49 = vpack.c.bf16 %v2475_v46, %v2474_v45  ;;  %v2477_v50 = vsel %vm2413_vm11, %v1988_v39, %v2445_v43 }
 0x148   :  { %v2925_v51 = vpack.c.bf16 %v2477_v50, %v2476_v48  ;;  %v397_v50 = vrot.slane %v300_v17, %v3094_v56 }
 0x149   :  { %2630 = vst [vmem:[%s3181_s3 + $0x20] sm:$0xff] %v2924_v49  ;;  %v389_v49 = vrot.slane %v300_v17, %v3091_v54 }
 0x14a   :  { %2631 = vst [vmem:[%s3181_s3 + $0x28] sm:$0xff] %v2925_v51  ;;  %v393_v51 = vrot.slane %v300_v17, %v3097_v57 }
 0x15f   :  { %v2026_v59 = vpop.f32.mrf.mxu0  ;;  %v2067_v62 = vpop.f32.mrf.mxu1 }
 0x160   :  { %v2027_v61 = vadd.f32 %v2026_v59, %v357_v52  ;;  %v2068_v63 = vadd.f32 %v2067_v62, %v365_v53  ;;  %v401_v53 = vrot.slane %v300_v17, %v3100_v58 }
 0x161   :  { %v2028_v1 = vpop.f32.mrf.mxu0  ;;  %v2069_v3 = vpop.f32.mrf.mxu1 }
 0x162   :  { %v2446_v10 = vmul.f32 0.01, %v2027_v61  ;;  %v2029_v2 = vadd.f32 %v2028_v1, %v361_v55  ;;  %vm2414_vm12 = vcmp.ge.f32.partialorder %v2027_v61, 0.0  ;;  %v2448_v4 = vmul.f32 0.01, %v2068_v63 }
 0x163   :  { %v2070_v5 = vadd.f32 %v2069_v3, %v369_v60  ;;  %v2030_v6 = vpop.f32.mrf.mxu0  ;;  %vm2416_vm13 = vcmp.ge.f32.partialorder %v2068_v63, 0.0  ;;  %v2071_v8 = vpop.f32.mrf.mxu1 }
 0x164   :  { %vm2415_vm14 = vcmp.ge.f32.partialorder %v2029_v2, 0.0  ;;  %v2447_v7 = vmul.f32 0.01, %v2029_v2  ;;  %v2478_v0 = vsel %vm2414_vm12, %v2027_v61, %v2446_v10  ;;  %v2480_v14 = vsel %vm2416_vm13, %v2068_v63, %v2448_v4 }
 0x165   :  { %vm2417_vm15 = vcmp.ge.f32.partialorder %v2070_v5, 0.0  ;;  %v2449_v9 = vmul.f32 0.01, %v2070_v5  ;;  %v2031_v11 = vpop.f32.mrf.mxu0  ;;  %v2072_v22 = vpop.f32.mrf.mxu1 }
 0x166   :  { %v2479_v13 = vsel %vm2415_vm14, %v2029_v2, %v2447_v7 }
 0x167   :  { %v2926_v15 = vpack.c.bf16 %v2479_v13, %v2478_v0  ;;  %v2481_v16 = vsel %vm2417_vm15, %v2070_v5, %v2449_v9 }
 0x168   :  { %v2927_v31 = vpack.c.bf16 %v2481_v16, %v2480_v14 }
 0x169   :  { %2632 = vst [vmem:[%s3181_s3 + $0x30] sm:$0xff] %v2926_v15  ;;  %v301_v15 = vld [vmem:[#allocation4 + $0x18] sm:$0xff] }
 0x16a   :  { %2633 = vst [vmem:[%s3181_s3 + $0x38] sm:$0xff] %v2927_v31  ;;  %v405_v16 = vrot.slane %v301_v15, %v3056_v20  ;;  %v413_v31 = vrot.slane %v301_v15, %v3061_v23  ;;  %v409_v17 = vrot.slane %v301_v15, %v3064_v26 }
 0x17f   :  { %v2108_v24 = vpop.f32.mrf.mxu0  ;;  %v2149_v28 = vpop.f32.mrf.mxu1 }
 0x180   :  { %v2109_v27 = vadd.f32 %v2108_v24, %v373_v18  ;;  %v2150_v30 = vadd.f32 %v2149_v28, %v381_v19  ;;  %v417_v19 = vrot.slane %v301_v15, %v3067_v29 }
 0x181   :  { %v2110_v32 = vpop.f32.mrf.mxu0  ;;  %v2151_v35 = vpop.f32.mrf.mxu1 }
 0x182   :  { %v2450_v33 = vmul.f32 0.01, %v2109_v27  ;;  %v2111_v34 = vadd.f32 %v2110_v32, %v377_v21  ;;  %vm2418_vm0 = vcmp.ge.f32.partialorder %v2109_v27, 0.0  ;;  %v2452_v36 = vmul.f32 0.01, %v2150_v30 }
 0x183   :  { %v2152_v37 = vadd.f32 %v2151_v35, %v385_v25  ;;  %v2112_v12 = vpop.f32.mrf.mxu0  ;;  %vm2420_vm1 = vcmp.ge.f32.partialorder %v2150_v30, 0.0  ;;  %v2153_v39 = vpop.f32.mrf.mxu1 }
 0x184   :  { %vm2419_vm2 = vcmp.ge.f32.partialorder %v2111_v34, 0.0  ;;  %v2451_v38 = vmul.f32 0.01, %v2111_v34  ;;  %v2482_v42 = vsel %vm2418_vm0, %v2109_v27, %v2450_v33  ;;  %v2484_v45 = vsel %vm2420_vm1, %v2150_v30, %v2452_v36 }
 0x185   :  { %vm2421_vm3 = vcmp.ge.f32.partialorder %v2152_v37, 0.0  ;;  %v2453_v40 = vmul.f32 0.01, %v2152_v37  ;;  %v2113_v41 = vpop.f32.mrf.mxu0  ;;  %v2154_v44 = vpop.f32.mrf.mxu1 }
 0x186   :  { %v2483_v43 = vsel %vm2419_vm2, %v2111_v34, %v2451_v38  ;;  %v425_v44 = vrot.slane %v301_v15, %v3097_v57 }
 0x187   :  { %v2928_v46 = vpack.c.bf16 %v2483_v43, %v2482_v42  ;;  %v2485_v47 = vsel %vm2421_vm3, %v2152_v37, %v2453_v40  ;;  %v421_v42 = vrot.slane %v301_v15, %v3091_v54  ;;  %v429_v43 = vrot.slane %v301_v15, %v3094_v56 }
 0x188   :  { %v2929_v48 = vpack.c.bf16 %v2485_v47, %v2484_v45 }
 0x189   :  { %2634 = vst [vmem:[%s3181_s3 + $0x40] sm:$0xff] %v2928_v46  ;;  %v433_v46 = vrot.slane %v301_v15, %v3100_v58 }
 0x18a   :  { %2635 = vst [vmem:[%s3181_s3 + $0x48] sm:$0xff] %v2929_v48 }
 0x19f   :  { %v2190_v52 = vpop.f32.mrf.mxu0  ;;  %v2231_v59 = vpop.f32.mrf.mxu1 }
 0x1a0   :  { %v2191_v55 = vadd.f32 %v2190_v52, %v389_v49  ;;  %v2232_v60 = vadd.f32 %v2231_v59, %v397_v50 }
 0x1a1   :  { %v2192_v61 = vpop.f32.mrf.mxu0  ;;  %v2233_v1 = vpop.f32.mrf.mxu1 }
 0x1a2   :  { %v2454_v62 = vmul.f32 0.01, %v2191_v55  ;;  %v2193_v63 = vadd.f32 %v2192_v61, %v393_v51  ;;  %vm2422_vm4 = vcmp.ge.f32.partialorder %v2191_v55, 0.0  ;;  %v2456_v10 = vmul.f32 0.01, %v2232_v60 }
 0x1a3   :  { %v2234_v2 = vadd.f32 %v2233_v1, %v401_v53  ;;  %v2194_v3 = vpop.f32.mrf.mxu0  ;;  %vm2424_vm5 = vcmp.ge.f32.partialorder %v2232_v60, 0.0  ;;  %v2235_v5 = vpop.f32.mrf.mxu1 }
 0x1a4   :  { %vm2423_vm6 = vcmp.ge.f32.partialorder %v2193_v63, 0.0  ;;  %v2455_v4 = vmul.f32 0.01, %v2193_v63  ;;  %v2486_v8 = vsel %vm2422_vm4, %v2191_v55, %v2454_v62  ;;  %v2488_v0 = vsel %vm2424_vm5, %v2232_v60, %v2456_v10 }
 0x1a5   :  { %vm2425_vm7 = vcmp.ge.f32.partialorder %v2234_v2, 0.0  ;;  %v2457_v6 = vmul.f32 0.01, %v2234_v2  ;;  %v2195_v7 = vpop.f32.mrf.mxu0  ;;  %v2236_v11 = vpop.f32.mrf.mxu1 }
 0x1a6   :  { %v2487_v9 = vsel %vm2423_vm6, %v2193_v63, %v2455_v4 }
 0x1a7   :  { %v2930_v13 = vpack.c.bf16 %v2487_v9, %v2486_v8  ;;  %v2489_v22 = vsel %vm2425_vm7, %v2234_v2, %v2457_v6 }
 0x1a8   :  { %v2931_v14 = vpack.c.bf16 %v2489_v22, %v2488_v0 }
 0x1a9   :  { %2636 = vst [vmem:[%s3181_s3 + $0x50] sm:$0xff] %v2930_v13 }
 0x1aa   :  { %2637 = vst [vmem:[%s3181_s3 + $0x58] sm:$0xff] %v2931_v14 }
 0x1bf   :  { %v2272_v18 = vpop.f32.mrf.mxu0  ;;  %v2313_v24 = vpop.f32.mrf.mxu1 }
 0x1c0   :  { %v2273_v21 = vadd.f32 %v2272_v18, %v405_v16  ;;  %v2314_v25 = vadd.f32 %v2313_v24, %v413_v31 }
 0x1c1   :  { %v2274_v27 = vpop.f32.mrf.mxu0  ;;  %v2315_v32 = vpop.f32.mrf.mxu1 }
 0x1c2   :  { %v2458_v28 = vmul.f32 0.01, %v2273_v21  ;;  %v2275_v30 = vadd.f32 %v2274_v27, %v409_v17  ;;  %vm2426_vm8 = vcmp.ge.f32.partialorder %v2273_v21, 0.0  ;;  %v2460_v33 = vmul.f32 0.01, %v2314_v25 }
 0x1c3   :  { %v2316_v34 = vadd.f32 %v2315_v32, %v417_v19  ;;  %v2276_v35 = vpop.f32.mrf.mxu0  ;;  %vm2428_vm9 = vcmp.ge.f32.partialorder %v2314_v25, 0.0  ;;  %v2317_v23 = vpop.f32.mrf.mxu1 }
 0x1c4   :  { %vm2427_vm10 = vcmp.ge.f32.partialorder %v2275_v30, 0.0  ;;  %v2459_v20 = vmul.f32 0.01, %v2275_v30  ;;  %v2490_v37 = vsel %vm2426_vm8, %v2273_v21, %v2458_v28  ;;  %v2492_v38 = vsel %vm2428_vm9, %v2314_v25, %v2460_v33 }
 0x1c5   :  { %vm2429_vm11 = vcmp.ge.f32.partialorder %v2316_v34, 0.0  ;;  %v2461_v26 = vmul.f32 0.01, %v2316_v34  ;;  %v2277_v36 = vpop.f32.mrf.mxu0  ;;  %v2318_v12 = vpop.f32.mrf.mxu1 }
 0x1c6   :  { %v2491_v29 = vsel %vm2427_vm10, %v2275_v30, %v2459_v20 }
 0x1c7   :  { %v2932_v39 = vpack.c.bf16 %v2491_v29, %v2490_v37  ;;  %v2493_v40 = vsel %vm2429_vm11, %v2316_v34, %v2461_v26 }
 0x1c8   :  { %v2933_v41 = vpack.c.bf16 %v2493_v40, %v2492_v38 }
 0x1c9   :  { %2638 = vst [vmem:[%s3181_s3 + $0x60] sm:$0xff] %v2932_v39 }
 0x1ca   :  { %2639 = vst [vmem:[%s3181_s3 + $0x68] sm:$0xff] %v2933_v41 }
 0x1df   :  { %v2354_v45 = vpop.f32.mrf.mxu0  ;;  %v2395_v48 = vpop.f32.mrf.mxu1 }
 0x1e0   :  { %v2355_v47 = vadd.f32 %v2354_v45, %v421_v42  ;;  %v2396_v49 = vadd.f32 %v2395_v48, %v429_v43 }
 0x1e1   :  { %v2356_v50 = vpop.f32.mrf.mxu0  ;;  %v2397_v53 = vpop.f32.mrf.mxu1 }
 0x1e2   :  { %v2462_v51 = vmul.f32 0.01, %v2355_v47  ;;  %v2357_v52 = vadd.f32 %v2356_v50, %v425_v44  ;;  %vm2430_vm12 = vcmp.ge.f32.partialorder %v2355_v47, 0.0  ;;  %v2464_v55 = vmul.f32 0.01, %v2396_v49 }
 0x1e3   :  { %v2398_v59 = vadd.f32 %v2397_v53, %v433_v46  ;;  %v2358_v60 = vpop.f32.mrf.mxu0  ;;  %vm2432_vm13 = vcmp.ge.f32.partialorder %v2396_v49, 0.0  ;;  %v2399_v56 = vpop.f32.mrf.mxu1 }
 0x1e4   :  { %vm2431_vm14 = vcmp.ge.f32.partialorder %v2357_v52, 0.0  ;;  %v2463_v54 = vmul.f32 0.01, %v2357_v52  ;;  %v2494_v62 = vsel %vm2430_vm12, %v2355_v47, %v2462_v51  ;;  %v2496_v1 = vsel %vm2432_vm13, %v2396_v49, %v2464_v55 }
 0x1e5   :  { %vm2433_vm15 = vcmp.ge.f32.partialorder %v2398_v59, 0.0  ;;  %v2465_v57 = vmul.f32 0.01, %v2398_v59  ;;  %v2359_v61 = vpop.f32.mrf.mxu0  ;;  %v2400_v63 = vpop.f32.mrf.mxu1 }
 0x1e6   :  { %v2495_v58 = vsel %vm2431_vm14, %v2357_v52, %v2463_v54 }
 0x1e7   :  { %v2934_v10 = vpack.c.bf16 %v2495_v58, %v2494_v62  ;;  %v2497_v2 = vsel %vm2433_vm15, %v2398_v59, %v2465_v57 }
 0x1e8   :  { %v2935_v3 = vpack.c.bf16 %v2497_v2, %v2496_v1 }
 0x1e9   :  { %2640 = vst [vmem:[%s3181_s3 + $0x70] sm:$0xff] %v2934_v10 }
 0x1ea   :  { %2641 = vst [vmem:[%s3181_s3 + $0x78] sm:$0xff] %v2935_v3 }
 0x1eb   :  { %2646 = vsyncpa [#allocation3], 1 }
 0x1ec   :  { %2647 = vsyncpa [#allocation5], 1 }

// kernel: generator_forward.6
= control target key start
LH: loop header
LB: loop body
LE: loop exit
PB: predicated region body
PF: predicated region fallthrough
CT: control target
= control target key end

     0   :  { %s6539_s1 = inlined_call_operand.vmem [shape: bf16[2304,128], index: 1, kind: input, shape index: {}]   ;;  %s6540_s0 = inlined_call_operand.vmem [shape: bf16[168,2304], index: 0, kind: input, shape index: {}]   ;;  %s6541_s2 = inlined_call_operand.vmem [shape: f32[1,128], index: 2, kind: input, shape index: {}]   ;;  %s6542_s3 = inlined_call_operand.vmem [shape: bf16[168,128], index: 3, kind: output, shape index: {}]  }
   0x1   :  { %v4777_v0 = vld [vmem:[%s6539_s1 + $0x78] sm:$0xff]   ;;  %v4779_v2 = vld [vmem:[%s6539_s1 + $0x70] sm:$0xff]   ;;  %v4781_v4 = vld [vmem:[%s6539_s1 + $0x68] sm:$0xff]  }
   0x2   :  { %v4778_v1 = vld [vmem:[%s6539_s1 + $0x38] sm:$0xff]   ;;  %4023 = vmatprep.subr.bf16.mxu0 %v4777_v0  ;;  %4761 = vmatprep.subr.bf16.mxu1 %v4777_v0  ;;  %v4780_v3 = vld [vmem:[%s6539_s1 + $0x30] sm:$0xff]   ;;  %v4782_v5 = vld [vmem:[%s6539_s1 + $0x28] sm:$0xff]  }
   0x3   :  { %4024 = vmatpush3.bf16.msra.mxu0 %v4778_v1  ;;  %4769 = vmatpush3.bf16.msra.mxu1 %v4778_v1  ;;  %v4783_v6 = vld [vmem:[%s6539_s1 + $0x60] sm:$0xff]   ;;  %v4785_v8 = vld [vmem:[%s6539_s1 + $0x58] sm:$0xff]   ;;  %v4787_v10 = vld [vmem:[%s6539_s1 + $0x50] sm:$0xff]  }
   0x4   :  { %4025 = vmatprep.subr.bf16.mxu0 %v4779_v2  ;;  %4762 = vmatprep.subr.bf16.mxu1 %v4779_v2  ;;  %v4784_v7 = vld [vmem:[%s6539_s1 + $0x20] sm:$0xff]   ;;  %v4786_v9 = vld [vmem:[%s6539_s1 + $0x18] sm:$0xff]   ;;  %v4788_v13 = vld [vmem:[%s6539_s1 + $0x10] sm:$0xff]  }
   0x5   :  { %v4795_v11 = vld [vmem:[%s6540_s0 + $0x4] ss:$72 sps:$4 sm:$0xff]   ;;  %v4799_v18 = vld [vmem:[%s6539_s1 + $0x178] sm:$0xff]   ;;  %v4793_v19 = vld [vmem:[%s6540_s0] ss:$72 sps:$4 sm:$0xff]  }
   0x6   :  { %v4798_v12 = vld [vmem:[%s6540_s0 + $0x364] ss:$72 sps:$4 sm:$0xff]   ;;  %2358 = vmatprep.mubr.bf16.mxu0 %v4795_v11  ;;  %v4796_v20 = vld [vmem:[%s6540_s0 + $0x360] ss:$72 sps:$4 sm:$0xff]   ;;  %v4801_v21 = vld [vmem:[%s6539_s1 + $0xf8] sm:$0xff]  }
   0x7   :  { %4026 = vmatpush3.bf16.msra.mxu0 %v4780_v3  ;;  %4770 = vmatpush3.bf16.msra.mxu1 %v4780_v3  ;;  %v4789_v14 = vld [vmem:[%s6539_s1 + $0x48] sm:$0xff]   ;;  %v4791_v16 = vld [vmem:[%s6539_s1 + $0x40] sm:$0xff]   ;;  %v4800_v22 = vld [vmem:[%s6539_s1 + $0x138] sm:$0xff]  }
   0x8   :  { %4027 = vmatprep.subr.bf16.mxu0 %v4781_v4  ;;  %4763 = vmatprep.subr.bf16.mxu1 %v4781_v4  ;;  %v4790_v15 = vld [vmem:[%s6539_s1 + $0x8] sm:$0xff]   ;;  %v4792_v17 = vld [vmem:[%s6539_s1] sm:$0xff]   ;;  %v4802_v23 = vld [vmem:[%s6539_s1 + $0x170] sm:$0xff]  }
   0x9   :  { %2406 = vmatprep.mubr.bf16.mxu1 %v4798_v12  ;;  %v4803_v24 = vld [vmem:[%s6540_s0 + $0x94] ss:$72 sps:$4 sm:$0xff]   ;;  %v4809_v30 = vld [vmem:[%s6540_s0 + $0x90] ss:$72 sps:$4 sm:$0xff]   ;;  %v4813_v32 = vld [vmem:[%s6539_s1 + $0x168] sm:$0xff]  }
   0xa   :  { %v4805_v25 = vld [vmem:[%s6540_s0 + $0x3f4] ss:$72 sps:$4 sm:$0xff]   ;;  %v4810_v31 = vld [vmem:[%s6540_s0 + $0x3f0] ss:$72 sps:$4 sm:$0xff]   ;;  %v4814_v33 = vld [vmem:[%s6539_s1 + $0x128] sm:$0xff]  }
   0xb   :  { %4028 = vmatpush3.bf16.msra.mxu0 %v4782_v5  ;;  %4771 = vmatpush3.bf16.msra.mxu1 %v4782_v5  ;;  %v4807_v26 = vld [vmem:[%s6539_s1 + $0xb8] sm:$0xff]   ;;  %v4808_v27 = vld [vmem:[%s6539_s1 + $0x130] sm:$0xff]   ;;  %v4815_v34 = vld [vmem:[%s6540_s0 + $0x124] ss:$72 sps:$4 sm:$0xff]  }
   0xc   :  { %4029 = vmatprep.subr.bf16.mxu0 %v4783_v6  ;;  %4764 = vmatprep.subr.bf16.mxu1 %v4783_v6  ;;  %v4811_v28 = vld [vmem:[%s6539_s1 + $0xf0] sm:$0xff]   ;;  %v4817_v35 = vld [vmem:[%s6540_s0 + $0x484] ss:$72 sps:$4 sm:$0xff]   ;;  %v4819_v42 = vld [vmem:[%s6540_s0 + $0x120] ss:$72 sps:$4 sm:$0xff]  }
   0xd   :  { %v4812_v29 = vld [vmem:[%s6539_s1 + $0xb0] sm:$0xff]   ;;  %v4821_v36 = vld [vmem:[%s6539_s1 + $0xe8] sm:$0xff]   ;;  %v4823_v38 = vld [vmem:[%s6539_s1 + $0x160] sm:$0xff]  }
   0xe   :  { %v4822_v37 = vld [vmem:[%s6539_s1 + $0xa8] sm:$0xff]   ;;  %v4824_v39 = vld [vmem:[%s6539_s1 + $0x120] sm:$0xff]   ;;  %v4834_v44 = vld [vmem:[%s6539_s1 + $0x158] sm:$0xff]  }
   0xf   :  { %4030 = vmatpush3.bf16.msra.mxu0 %v4784_v7  ;;  %4772 = vmatpush3.bf16.msra.mxu1 %v4784_v7  ;;  %v4825_v40 = vld [vmem:[%s6539_s1 + $0xe0] sm:$0xff]   ;;  %v4827_v45 = vld [vmem:[%s6540_s0 + $0x1b4] ss:$72 sps:$4 sm:$0xff]   ;;  %v4831_v54 = vld [vmem:[%s6540_s0 + $0x1b0] ss:$72 sps:$4 sm:$0xff]  }
  0x10   :  { %4031 = vmatprep.subr.bf16.mxu0 %v4785_v8  ;;  %4765 = vmatprep.subr.bf16.mxu1 %v4785_v8  ;;  %v4826_v41 = vld [vmem:[%s6539_s1 + $0xa0] sm:$0xff]   ;;  %v4829_v46 = vld [vmem:[%s6540_s0 + $0x514] ss:$72 sps:$4 sm:$0xff]   ;;  %v4832_v55 = vld [vmem:[%s6540_s0 + $0x510] ss:$72 sps:$4 sm:$0xff]  }
  0x11   :  { %v4820_v43 = vld [vmem:[%s6540_s0 + $0x480] ss:$72 sps:$4 sm:$0xff]   ;;  %v4833_v47 = vld [vmem:[%s6539_s1 + $0xd8] sm:$0xff]   ;;  %v4839_v50 = vld [vmem:[%s6539_s1 + $0x150] sm:$0xff]  }
  0x12   :  { %v4835_v48 = vld [vmem:[%s6539_s1 + $0x98] sm:$0xff]   ;;  %v4837_v51 = vld [vmem:[%s6539_s1 + $0xd0] sm:$0xff]   ;;  %v195_v53 = vld [vmem:[%s6540_s0 + $0x5a0] sm:$0xff] }
  0x13   :  { %4032 = vmatpush3.bf16.msra.mxu0 %v4786_v9  ;;  %4773 = vmatpush3.bf16.msra.mxu1 %v4786_v9  ;;  %v4836_v49 = vld [vmem:[%s6539_s1 + $0x118] sm:$0xff]   ;;  %v4838_v52 = vld [vmem:[%s6539_s1 + $0x90] sm:$0xff]   ;;  %v4840_v57 = vld [vmem:[%s6540_s0 + $0x244] ss:$72 sps:$4 sm:$0xff]   ;;  %v3761_v59 = vcombine.high %v195_v53, %v195_v53  ;;  %v3760_v4 = vcombine.low %v195_v53, %v195_v53 }
  0x14   :  { %4033 = vmatprep.subr.bf16.mxu0 %v4787_v10  ;;  %4766 = vmatprep.subr.bf16.mxu1 %v4787_v10  ;;  %v4843_v56 = vld [vmem:[%s6539_s1 + $0x110] sm:$0xff]   ;;  %v4846_v58 = vld [vmem:[%s6539_s1 + $0xc8] sm:$0xff]   ;;  %v4848_v62 = vld [vmem:[%s6539_s1 + $0xc0] sm:$0xff]  }
  0x15   :  { %v4847_v60 = vld [vmem:[%s6539_s1 + $0x88] sm:$0xff]   ;;  %v4850_v1 = vld [vmem:[%s6539_s1 + $0x80] sm:$0xff]   ;;  %v4852_v2 = vld [vmem:[%s6540_s0 + $0x2d4] ss:$72 sps:$4 sm:$0xff]  }
  0x16   :  { %v4849_v61 = vld [vmem:[%s6539_s1 + $0x148] sm:$0xff]   ;;  %v4858_v3 = vld [vmem:[%s6539_s1 + $0x140] sm:$0xff]   ;;  %v4860_v7 = vld [vmem:[%s6539_s1 + $0x1f8] sm:$0xff]  }
  0x17   :  { %4034 = vmatpush3.bf16.msra.mxu0 %v4788_v13  ;;  %4774 = vmatpush3.bf16.msra.mxu1 %v4788_v13  ;;  %v4851_v63 = vld [vmem:[%s6539_s1 + $0x108] sm:$0xff]   ;;  %v4859_v5 = vld [vmem:[%s6539_s1 + $0x100] sm:$0xff]   ;;  %v4868_v8 = vld [vmem:[%s6539_s1 + $0x278] sm:$0xff]  }
  0x18   :  { %4035 = vmatprep.subr.bf16.mxu0 %v4789_v14  ;;  %4767 = vmatprep.subr.bf16.mxu1 %v4789_v14  ;;  %v4844_v0 = vld [vmem:[%s6540_s0 + $0x240] ss:$72 sps:$4 sm:$0xff]   ;;  %v4856_v6 = vld [vmem:[%s6540_s0 + $0xc] ss:$72 sps:$4 sm:$0xff]   ;;  %v4857_v10 = vld [vmem:[%s6540_s0 + $0x2d0] ss:$72 sps:$4 sm:$0xff]  }
  0x19   :  { %v4854_v9 = vld [vmem:[%s6540_s0 + $0x8] ss:$72 sps:$4 sm:$0xff]   ;;  %v4861_v11 = vld [vmem:[%s6540_s0 + $0x9c] ss:$72 sps:$4 sm:$0xff]   ;;  %v4906_v53 = vld [vmem:[%s6540_s0 + $0x36c] ss:$72 sps:$4 sm:$0xff]  }
  0x1a   :  { %v4865_v12 = vld [vmem:[%s6540_s0 + $0x14] ss:$72 sps:$4 sm:$0xff]  }
  0x1b   :  { %4036 = vmatpush3.bf16.msra.mxu0 %v4790_v15  ;;  %4775 = vmatpush3.bf16.msra.mxu1 %v4790_v15  ;;  %v4866_v13 = vld [vmem:[%s6539_s1 + $0x1b8] sm:$0xff]   ;;  %v4876_v14 = vld [vmem:[%s6539_s1 + $0x1f0] sm:$0xff]  }
  0x1c   :  { %4037 = vmatprep.subr.bf16.mxu0 %v4791_v16  ;;  %4768 = vmatprep.subr.bf16.mxu1 %v4791_v16  ;;  %v4863_v15 = vld [vmem:[%s6540_s0 + $0x10] ss:$72 sps:$4 sm:$0xff]  }
  0x1d   :  { %v4877_v16 = vld [vmem:[%s6539_s1 + $0x1b0] sm:$0xff]  }
  0x1f   :  { %4038 = vmatpush3.bf16.msra.mxu0 %v4792_v17  ;;  %4776 = vmatpush3.bf16.msra.mxu1 %v4792_v17  ;;  %v4867_v17 = vld [vmem:[%s6540_s0 + $0x98] ss:$72 sps:$4 sm:$0xff]  }
  0x20   :  { %4187 = vmatprep.subr.bf16.mxu0 %v4799_v18  ;;  %4105 = vmatprep.subr.bf16.mxu1 %v4801_v21  ;;  %v4869_v18 = vld [vmem:[%s6539_s1 + $0x238] sm:$0xff]   ;;  %v4886_v21 = vld [vmem:[%s6539_s1 + $0x1e8] sm:$0xff]  }
  0x22   :  { %2359 = vmatmul.mubr.bf16.vlgmr.msra.gmra.mxu0 %v4793_v19  ;;  %2407 = vmatmul.mubr.bf16.vlgmr.msra.gmra.mxu1 %v4796_v20  ;;  %v4870_v19 = vld [vmem:[%s6540_s0 + $0x12c] ss:$72 sps:$4 sm:$0xff]  }
  0x23   :  { %4188 = vmatpush3.bf16.msra.mxu0 %v4800_v22  ;;  %2366 = vmatprep.mubr.bf16.mxu0 %v4803_v24  ;;  %v4872_v20 = vld [vmem:[%s6540_s0 + $0xa4] ss:$72 sps:$4 sm:$0xff]   ;;  %v4878_v22 = vld [vmem:[%s6539_s1 + $0x270] sm:$0xff]  }
  0x24   :  { %4189 = vmatprep.subr.bf16.mxu0 %v4802_v23  ;;  %2414 = vmatprep.mubr.bf16.mxu1 %v4805_v25  ;;  %v4887_v23 = vld [vmem:[%s6539_s1 + $0x1a8] sm:$0xff]   ;;  %v4879_v24 = vld [vmem:[%s6539_s1 + $0x230] sm:$0xff]  }
  0x25   :  { %4106 = vmatpush3.bf16.msra.mxu1 %v4807_v26  ;;  %v4888_v25 = vld [vmem:[%s6539_s1 + $0x268] sm:$0xff]  }
  0x26   :  { %4107 = vmatprep.subr.bf16.mxu1 %v4811_v28  ;;  %v4874_v26 = vld [vmem:[%s6540_s0 + $0x128] ss:$72 sps:$4 sm:$0xff]   ;;  %v4880_v28 = vld [vmem:[%s6540_s0 + $0x1bc] ss:$72 sps:$4 sm:$0xff]  }
  0x27   :  { %4190 = vmatpush3.bf16.msra.mxu0 %v4808_v27  ;;  %v4875_v27 = vld [vmem:[%s6540_s0 + $0xa0] ss:$72 sps:$4 sm:$0xff]  }
  0x28   :  { %4191 = vmatprep.subr.bf16.mxu0 %v4813_v32  ;;  %v4903_v32 = vld [vmem:[%s6539_s1 + $0x1a0] sm:$0xff]  }
  0x29   :  { %4108 = vmatpush3.bf16.msra.mxu1 %v4812_v29  ;;  %v4882_v29 = vld [vmem:[%s6540_s0 + $0x134] ss:$72 sps:$4 sm:$0xff]  }
  0x2a   :  { %2367 = vmatmul.mubr.bf16.gmra.mxu0 %v4809_v30  ;;  %2415 = vmatmul.mubr.bf16.gmra.mxu1 %v4810_v31  ;;  %v4893_v30 = vld [vmem:[%s6539_s1 + $0x228] sm:$0xff]   ;;  %v4900_v31 = vld [vmem:[%s6539_s1 + $0x1e0] sm:$0xff]  }
  0x2b   :  { %4192 = vmatpush3.bf16.msra.mxu0 %v4814_v33  ;;  %2374 = vmatprep.mubr.bf16.mxu0 %v4815_v34  ;;  %v4904_v33 = vld [vmem:[%s6539_s1 + $0x260] sm:$0xff]  }
  0x2c   :  { %2422 = vmatprep.mubr.bf16.mxu1 %v4817_v35  ;;  %4109 = vmatprep.subr.bf16.mxu1 %v4821_v36  ;;  %v4905_v34 = vld [vmem:[%s6539_s1 + $0x220] sm:$0xff]   ;;  %v4885_v36 = vld [vmem:[%s6540_s0 + $0x130] ss:$72 sps:$4 sm:$0xff]  }
  0x2d   :  { %4110 = vmatpush3.bf16.msra.mxu1 %v4822_v37  ;;  %4193 = vmatprep.subr.bf16.mxu0 %v4823_v38  ;;  %v4884_v35 = vld [vmem:[%s6540_s0 + $0x1b8] ss:$72 sps:$4 sm:$0xff]   ;;  %v4889_v37 = vld [vmem:[%s6540_s0 + $0x24c] ss:$72 sps:$4 sm:$0xff]  }
  0x2e   :  { %4111 = vmatprep.subr.bf16.mxu1 %v4825_v40  ;;  %v4891_v38 = vld [vmem:[%s6540_s0 + $0x1c4] ss:$72 sps:$4 sm:$0xff]   ;;  %v4913_v40 = vld [vmem:[%s6539_s1 + $0x198] sm:$0xff]  }
  0x2f   :  { %4194 = vmatpush3.bf16.msra.mxu0 %v4824_v39  ;;  %v4912_v39 = vld [vmem:[%s6539_s1 + $0x1d8] sm:$0xff]  }
  0x30   :  { %4195 = vmatprep.subr.bf16.mxu0 %v4834_v44  ;;  %v4895_v44 = vld [vmem:[%s6540_s0 + $0x1c0] ss:$72 sps:$4 sm:$0xff]  }
  0x31   :  { %4112 = vmatpush3.bf16.msra.mxu1 %v4826_v41  ;;  %v4914_v41 = vld [vmem:[%s6539_s1 + $0x258] sm:$0xff]  }
  0x32   :  { %2375 = vmatmul.mubr.bf16.gmra.mxu0 %v4819_v42  ;;  %2423 = vmatmul.mubr.bf16.gmra.mxu1 %v4820_v43  ;;  %v4915_v42 = vld [vmem:[%s6539_s1 + $0x218] sm:$0xff]   ;;  %v4894_v43 = vld [vmem:[%s6540_s0 + $0x248] ss:$72 sps:$4 sm:$0xff]  }
  0x33   :  { %2382 = vmatprep.mubr.bf16.mxu0 %v4827_v45  ;;  %2430 = vmatprep.mubr.bf16.mxu1 %v4829_v46  ;;  %v4896_v45 = vld [vmem:[%s6540_s0 + $0x2dc] ss:$72 sps:$4 sm:$0xff]  }
  0x34   :  { %4113 = vmatprep.subr.bf16.mxu1 %v4833_v47  ;;  %4196 = vmatpush3.bf16.msra.mxu0 %v4836_v49  ;;  %v4898_v46 = vld [vmem:[%s6540_s0 + $0x254] ss:$72 sps:$4 sm:$0xff]  }
  0x35   :  { %4114 = vmatpush3.bf16.msra.mxu1 %v4835_v48  ;;  %4197 = vmatprep.subr.bf16.mxu0 %v4839_v50  ;;  %v4922_v47 = vld [vmem:[%s6539_s1 + $0x1d0] sm:$0xff]  }
  0x36   :  { %4115 = vmatprep.subr.bf16.mxu1 %v4837_v51  ;;  %v4923_v48 = vld [vmem:[%s6539_s1 + $0x190] sm:$0xff]   ;;  %v4901_v51 = vld [vmem:[%s6540_s0 + $0x2d8] ss:$72 sps:$4 sm:$0xff]  }
  0x37   :  { %v4928_v49 = vld [vmem:[%s6539_s1 + $0x250] sm:$0xff]  }
  0x38   :  { %4198 = vmatpush3.bf16.msra.mxu0 %v4843_v56  ;;  %v4931_v50 = vld [vmem:[%s6539_s1 + $0x210] sm:$0xff]   ;;  %v4939_v56 = vld [vmem:[%s6539_s1 + $0x188] sm:$0xff]  }
  0x39   :  { %4116 = vmatpush3.bf16.msra.mxu1 %v4838_v52  ;;  %4199 = vmatprep.subr.bf16.mxu0 %v4849_v61  ;;  %v4902_v52 = vld [vmem:[%s6540_s0 + $0x250] ss:$72 sps:$4 sm:$0xff]   ;;  %v4916_v61 = vld [vmem:[%s6540_s0 + $0x3fc] ss:$72 sps:$4 sm:$0xff]  }
  0x3a   :  { %2383 = vmatmul.mubr.bf16.gmra.mxu0 %v4831_v54  ;;  %2431 = vmatmul.mubr.bf16.gmra.mxu1 %v4832_v55  ;;  %v4908_v54 = vld [vmem:[%s6540_s0 + $0x2e4] ss:$72 sps:$4 sm:$0xff]  }
  0x3b   :  { %2390 = vmatprep.mubr.bf16.mxu0 %v4840_v57  ;;  %2438 = vmatprep.mubr.bf16.mxu1 %v3761_v59  ;;  %v4938_v55 = vld [vmem:[%s6539_s1 + $0x1c8] sm:$0xff]  }
  0x3c   :  { %4117 = vmatprep.subr.bf16.mxu1 %v4846_v58  ;;  %4200 = vmatpush3.bf16.msra.mxu0 %v4851_v63  ;;  %v4940_v57 = vld [vmem:[%s6539_s1 + $0x248] sm:$0xff]   ;;  %v4947_v63 = vld [vmem:[%s6539_s1 + $0x1c0] sm:$0xff]  }
  0x3d   :  { %4118 = vmatpush3.bf16.msra.mxu1 %v4847_v60  ;;  %4201 = vmatprep.subr.bf16.mxu0 %v4858_v3  ;;  %v4941_v58 = vld [vmem:[%s6539_s1 + $0x208] sm:$0xff]   ;;  %v4956_v3 = vld [vmem:[%s6539_s1 + $0x2f8] sm:$0xff]  }
  0x3e   :  { %4119 = vmatprep.subr.bf16.mxu1 %v4848_v62  ;;  %v4910_v59 = vld [vmem:[%s6540_s0 + $0x368] ss:$72 sps:$4 sm:$0xff]   ;;  %v4918_v62 = vld [vmem:[%s6540_s0 + $0x374] ss:$72 sps:$4 sm:$0xff]  }
  0x3f   :  { %v4911_v60 = vld [vmem:[%s6540_s0 + $0x2e0] ss:$72 sps:$4 sm:$0xff]  }
  0x40   :  { %4202 = vmatpush3.bf16.msra.mxu0 %v4859_v5  ;;  %v4921_v5 = vld [vmem:[%s6540_s0 + $0x370] ss:$72 sps:$4 sm:$0xff]  }
  0x41   :  { %4120 = vmatpush3.bf16.msra.mxu1 %v4850_v1  ;;  %4351 = vmatprep.subr.bf16.mxu0 %v4868_v8  ;;  %v4949_v1 = vld [vmem:[%s6539_s1 + $0x240] sm:$0xff]   ;;  %v4964_v8 = vld [vmem:[%s6539_s1 + $0x378] sm:$0xff]  }
  0x42   :  { %2391 = vmatmul.mubr.bf16.gmra.mxu0 %v4844_v0  ;;  %2439 = vmatmul.mubr.bf16.gmra.mxu1 %v3760_v4  ;;  %v4948_v0 = vld [vmem:[%s6539_s1 + $0x180] sm:$0xff]  }
  0x43   :  { %2398 = vmatprep.mubr.bf16.mxu0 %v4852_v2  ;;  %2478 = vmatprep.mubr.bf16.mxu1 %v4856_v6  ;;  %v4950_v2 = vld [vmem:[%s6539_s1 + $0x200] sm:$0xff]   ;;  %v4924_v6 = vld [vmem:[%s6540_s0 + $0x48c] ss:$72 sps:$4 sm:$0xff]  }
  0x44   :  { %4269 = vmatprep.subr.bf16.mxu1 %v4860_v7  ;;  %v4920_v4 = vld [vmem:[%s6540_s0 + $0x3f8] ss:$72 sps:$4 sm:$0xff]   ;;  %v4926_v7 = vld [vmem:[%s6540_s0 + $0x404] ss:$72 sps:$4 sm:$0xff]  }
  0x4a   :  { %2399 = vmatmul.mubr.bf16.gmra.mxu0 %v4857_v10  ;;  %2479 = vmatmul.mubr.bf16.vlgmr.msra.gmra.mxu1 %v4854_v9  ;;  %v4929_v9 = vld [vmem:[%s6540_s0 + $0x488] ss:$72 sps:$4 sm:$0xff]  }
  0x4b   :  { %2486 = vmatprep.mubr.bf16.mxu1 %v4861_v11  ;;  %2598 = vmatprep.mubr.bf16.mxu0 %v4865_v12  ;;  %v4930_v10 = vld [vmem:[%s6540_s0 + $0x400] ss:$72 sps:$4 sm:$0xff]   ;;  %v4932_v11 = vld [vmem:[%s6540_s0 + $0x51c] ss:$72 sps:$4 sm:$0xff]  }
  0x4c   :  { %4270 = vmatpush3.bf16.msra.mxu1 %v4866_v13  ;;  %v4934_v12 = vld [vmem:[%s6540_s0 + $0x494] ss:$72 sps:$4 sm:$0xff]   ;;  %v196_v13 = vld [vmem:[%s6540_s0 + $0x5a8] sm:$0xff] }
  0x4d   :  { %4271 = vmatprep.subr.bf16.mxu1 %v4876_v14  ;;  %v4936_v14 = vld [vmem:[%s6540_s0 + $0x518] ss:$72 sps:$4 sm:$0xff]  }
  0x50   :  { %4272 = vmatpush3.bf16.msra.mxu1 %v4877_v16  ;;  %v3763_v16 = vcombine.high %v196_v13, %v196_v13 }
  0x51   :  { %4273 = vmatprep.subr.bf16.mxu1 %v4886_v21 }
  0x52   :  { %2487 = vmatmul.mubr.bf16.gmra.mxu1 %v4867_v17  ;;  %2599 = vmatmul.mubr.bf16.vlgmr.msra.gmra.mxu0 %v4863_v15  ;;  %v4937_v15 = vld [vmem:[%s6540_s0 + $0x490] ss:$72 sps:$4 sm:$0xff]   ;;  %v4943_v17 = vld [vmem:[%s6540_s0 + $0x524] ss:$72 sps:$4 sm:$0xff]  }
  0x53   :  { %4352 = vmatpush3.bf16.msra.mxu0 %v4869_v18  ;;  %2494 = vmatprep.mubr.bf16.mxu1 %v4870_v19  ;;  %v197_v18 = vld [vmem:[%s6540_s0 + $0x5b0] sm:$0xff]  ;;  %v3762_v19 = vcombine.low %v196_v13, %v196_v13  ;;  %v5002_v13 = vld [vmem:[%s6540_s0 + $0x37c] ss:$72 sps:$4 sm:$0xff]  }
  0x54   :  { %2606 = vmatprep.mubr.bf16.mxu0 %v4872_v20  ;;  %4353 = vmatprep.subr.bf16.mxu0 %v4878_v22  ;;  %v4946_v20 = vld [vmem:[%s6540_s0 + $0x520] ss:$72 sps:$4 sm:$0xff]   ;;  %v3765_v21 = vcombine.high %v197_v18, %v197_v18  ;;  %v4954_v22 = vld [vmem:[%s6540_s0 + $0x1c] ss:$72 sps:$4 sm:$0xff]  }
  0x55   :  { %4274 = vmatpush3.bf16.msra.mxu1 %v4887_v23  ;;  %v4952_v23 = vld [vmem:[%s6540_s0 + $0x18] ss:$72 sps:$4 sm:$0xff]  }
  0x56   :  { %4275 = vmatprep.subr.bf16.mxu1 %v4900_v31  ;;  %v4982_v31 = vld [vmem:[%s6539_s1 + $0x2e8] sm:$0xff]  }
  0x57   :  { %4354 = vmatpush3.bf16.msra.mxu0 %v4879_v24  ;;  %v3764_v24 = vcombine.low %v197_v18, %v197_v18  ;;  %v5014_v18 = vld [vmem:[%s6540_s0 + $0x384] ss:$72 sps:$4 sm:$0xff]  }
  0x58   :  { %4355 = vmatprep.subr.bf16.mxu0 %v4888_v25  ;;  %v4957_v25 = vld [vmem:[%s6540_s0 + $0xac] ss:$72 sps:$4 sm:$0xff]  }
  0x59   :  { %4276 = vmatpush3.bf16.msra.mxu1 %v4903_v32  ;;  %v4963_v32 = vld [vmem:[%s6540_s0 + $0xa8] ss:$72 sps:$4 sm:$0xff]  }
  0x5a   :  { %2495 = vmatmul.mubr.bf16.gmra.mxu1 %v4874_v26  ;;  %2607 = vmatmul.mubr.bf16.gmra.mxu0 %v4875_v27  ;;  %v4961_v26 = vld [vmem:[%s6540_s0 + $0x24] ss:$72 sps:$4 sm:$0xff]   ;;  %v4962_v27 = vld [vmem:[%s6539_s1 + $0x2b8] sm:$0xff]  }
  0x5b   :  { %2502 = vmatprep.mubr.bf16.mxu1 %v4880_v28  ;;  %2614 = vmatprep.mubr.bf16.mxu0 %v4882_v29  ;;  %v4972_v28 = vld [vmem:[%s6539_s1 + $0x2f0] sm:$0xff]   ;;  %v4959_v29 = vld [vmem:[%s6540_s0 + $0x20] ss:$72 sps:$4 sm:$0xff]  }
  0x5c   :  { %4356 = vmatpush3.bf16.msra.mxu0 %v4893_v30  ;;  %4277 = vmatprep.subr.bf16.mxu1 %v4912_v39  ;;  %v4973_v30 = vld [vmem:[%s6539_s1 + $0x2b0] sm:$0xff]  }
  0x5d   :  { %4357 = vmatprep.subr.bf16.mxu0 %v4904_v33  ;;  %4278 = vmatpush3.bf16.msra.mxu1 %v4913_v40  ;;  %v4965_v33 = vld [vmem:[%s6539_s1 + $0x338] sm:$0xff]   ;;  %v4975_v39 = vld [vmem:[%s6539_s1 + $0x330] sm:$0xff]  }
  0x5e   :  { %4279 = vmatprep.subr.bf16.mxu1 %v4922_v47  ;;  %v4970_v40 = vld [vmem:[%s6540_s0 + $0x138] ss:$72 sps:$4 sm:$0xff]  }
  0x5f   :  { %v5000_v47 = vld [vmem:[%s6539_s1 + $0x360] sm:$0xff]  }
  0x60   :  { %4358 = vmatpush3.bf16.msra.mxu0 %v4905_v34  ;;  %v4966_v34 = vld [vmem:[%s6540_s0 + $0x13c] ss:$72 sps:$4 sm:$0xff]  }
  0x61   :  { %4359 = vmatprep.subr.bf16.mxu0 %v4914_v41  ;;  %4280 = vmatpush3.bf16.msra.mxu1 %v4923_v48  ;;  %v4971_v41 = vld [vmem:[%s6540_s0 + $0xb0] ss:$72 sps:$4 sm:$0xff]  }
  0x62   :  { %2503 = vmatmul.mubr.bf16.gmra.mxu1 %v4884_v35  ;;  %2615 = vmatmul.mubr.bf16.gmra.mxu0 %v4885_v36  ;;  %v4968_v35 = vld [vmem:[%s6540_s0 + $0xb4] ss:$72 sps:$4 sm:$0xff]  }
  0x63   :  { %2510 = vmatprep.mubr.bf16.mxu1 %v4889_v37  ;;  %2622 = vmatprep.mubr.bf16.mxu0 %v4891_v38  ;;  %v4974_v36 = vld [vmem:[%s6539_s1 + $0x370] sm:$0xff]   ;;  %v4983_v37 = vld [vmem:[%s6539_s1 + $0x2a8] sm:$0xff]   ;;  %v4996_v38 = vld [vmem:[%s6539_s1 + $0x2e0] sm:$0xff]  }
  0x64   :  { %4360 = vmatpush3.bf16.msra.mxu0 %v4915_v42  ;;  %4281 = vmatprep.subr.bf16.mxu1 %v4938_v55  ;;  %v4984_v42 = vld [vmem:[%s6539_s1 + $0x368] sm:$0xff]   ;;  %v5008_v48 = vld [vmem:[%s6539_s1 + $0x2d8] sm:$0xff]  }
  0x65   :  { %4361 = vmatprep.subr.bf16.mxu0 %v4928_v49  ;;  %4282 = vmatpush3.bf16.msra.mxu1 %v4939_v56  ;;  %v5009_v49 = vld [vmem:[%s6539_s1 + $0x298] sm:$0xff]   ;;  %v5019_v56 = vld [vmem:[%s6539_s1 + $0x290] sm:$0xff]  }
  0x66   :  { %4283 = vmatprep.subr.bf16.mxu1 %v4947_v63  ;;  %v5010_v55 = vld [vmem:[%s6539_s1 + $0x358] sm:$0xff]  }
  0x67   :  { %v4990_v63 = vld [vmem:[%s6540_s0 + $0x258] ss:$72 sps:$4 sm:$0xff]  }
  0x68   :  { %4362 = vmatpush3.bf16.msra.mxu0 %v4931_v50  ;;  %v5018_v50 = vld [vmem:[%s6539_s1 + $0x2d0] sm:$0xff]  }
  0x69   :  { %4363 = vmatprep.subr.bf16.mxu0 %v4940_v57  ;;  %4284 = vmatpush3.bf16.msra.mxu1 %v4948_v0  ;;  %v4987_v57 = vld [vmem:[%s6540_s0 + $0x1d4] ss:$72 sps:$4 sm:$0xff]   ;;  %v4991_v0 = vld [vmem:[%s6540_s0 + $0x1d0] ss:$72 sps:$4 sm:$0xff]  }
  0x6a   :  { %2511 = vmatmul.mubr.bf16.gmra.mxu1 %v4894_v43  ;;  %2623 = vmatmul.mubr.bf16.gmra.mxu0 %v4895_v44  ;;  %v4976_v43 = vld [vmem:[%s6540_s0 + $0x1cc] ss:$72 sps:$4 sm:$0xff]   ;;  %v4999_v44 = vld [vmem:[%s6539_s1 + $0x2a0] sm:$0xff]  }
  0x6b   :  { %2518 = vmatprep.mubr.bf16.mxu1 %v4896_v45  ;;  %2630 = vmatprep.mubr.bf16.mxu0 %v4898_v46  ;;  %v4978_v45 = vld [vmem:[%s6540_s0 + $0x144] ss:$72 sps:$4 sm:$0xff]  }
  0x6c   :  { %4364 = vmatpush3.bf16.msra.mxu0 %v4941_v58  ;;  %4433 = vmatprep.subr.bf16.mxu1 %v4956_v3  ;;  %v4989_v46 = vld [vmem:[%s6539_s1 + $0x328] sm:$0xff]   ;;  %v5011_v58 = vld [vmem:[%s6539_s1 + $0x318] sm:$0xff]  }
  0x6d   :  { %4365 = vmatprep.subr.bf16.mxu0 %v4949_v1  ;;  %v5027_v1 = vld [vmem:[%s6539_s1 + $0x310] sm:$0xff]   ;;  %v5036_v3 = vld [vmem:[%s6539_s1 + $0x348] sm:$0xff]  }
  0x70   :  { %4366 = vmatpush3.bf16.msra.mxu0 %v4950_v2  ;;  %v4992_v2 = vld [vmem:[%s6540_s0 + $0x2ec] ss:$72 sps:$4 sm:$0xff]  }
  0x71   :  { %4515 = vmatprep.subr.bf16.mxu0 %v4964_v8  ;;  %v5045_v8 = vld [vmem:[%s6539_s1 + $0x340] sm:$0xff]  }
  0x72   :  { %2519 = vmatmul.mubr.bf16.gmra.mxu1 %v4901_v51  ;;  %2631 = vmatmul.mubr.bf16.gmra.mxu0 %v4902_v52  ;;  %v4980_v51 = vld [vmem:[%s6540_s0 + $0x1c8] ss:$72 sps:$4 sm:$0xff]  }
  0x73   :  { %2526 = vmatprep.mubr.bf16.mxu1 %v4906_v53  ;;  %2638 = vmatprep.mubr.bf16.mxu0 %v4908_v54  ;;  %v4981_v52 = vld [vmem:[%s6540_s0 + $0x140] ss:$72 sps:$4 sm:$0xff]   ;;  %v4985_v54 = vld [vmem:[%s6540_s0 + $0x25c] ss:$72 sps:$4 sm:$0xff]  }
  0x74   :  { %v5001_v53 = vld [vmem:[%s6539_s1 + $0x320] sm:$0xff]  }
  0x7a   :  { %2527 = vmatmul.mubr.bf16.gmra.mxu1 %v4910_v59  ;;  %2639 = vmatmul.mubr.bf16.gmra.mxu0 %v4911_v60  ;;  %v5034_v59 = vld [vmem:[%s6539_s1 + $0x2c8] sm:$0xff]   ;;  %v5024_v60 = vld [vmem:[%s6539_s1 + $0x350] sm:$0xff]  }
  0x7b   :  { %2534 = vmatprep.mubr.bf16.mxu1 %v4916_v61  ;;  %2646 = vmatprep.mubr.bf16.mxu0 %v4918_v62  ;;  %v5035_v61 = vld [vmem:[%s6539_s1 + $0x288] sm:$0xff]   ;;  %v5043_v62 = vld [vmem:[%s6539_s1 + $0x2c0] sm:$0xff]  }
  0x82   :  { %2535 = vmatmul.mubr.bf16.gmra.mxu1 %v4920_v4  ;;  %2647 = vmatmul.mubr.bf16.gmra.mxu0 %v4921_v5  ;;  %v5044_v4 = vld [vmem:[%s6539_s1 + $0x280] sm:$0xff]  }
  0x83   :  { %2542 = vmatprep.mubr.bf16.mxu1 %v4924_v6  ;;  %2654 = vmatprep.mubr.bf16.mxu0 %v4926_v7  ;;  %v4994_v5 = vld [vmem:[%s6540_s0 + $0x264] ss:$72 sps:$4 sm:$0xff]   ;;  %v5052_v7 = vld [vmem:[%s6539_s1 + $0x3f8] sm:$0xff]  }
  0x84   :  { %v5037_v6 = vld [vmem:[%s6539_s1 + $0x308] sm:$0xff]  }
  0x8a   :  { %2543 = vmatmul.mubr.bf16.gmra.mxu1 %v4929_v9  ;;  %2655 = vmatmul.mubr.bf16.gmra.mxu0 %v4930_v10  ;;  %v4997_v9 = vld [vmem:[%s6540_s0 + $0x2e8] ss:$72 sps:$4 sm:$0xff]   ;;  %v5046_v10 = vld [vmem:[%s6539_s1 + $0x300] sm:$0xff]  }
  0x8b   :  { %2550 = vmatprep.mubr.bf16.mxu1 %v4932_v11  ;;  %2662 = vmatprep.mubr.bf16.mxu0 %v4934_v12  ;;  %v4998_v11 = vld [vmem:[%s6540_s0 + $0x260] ss:$72 sps:$4 sm:$0xff]   ;;  %v5060_v12 = vld [vmem:[%s6539_s1 + $0x478] sm:$0xff]  }
  0x92   :  { %2551 = vmatmul.mubr.bf16.gmra.mxu1 %v4936_v14  ;;  %2663 = vmatmul.mubr.bf16.gmra.mxu0 %v4937_v15  ;;  %v5004_v14 = vld [vmem:[%s6540_s0 + $0x2f4] ss:$72 sps:$4 sm:$0xff]   ;;  %v5006_v15 = vld [vmem:[%s6540_s0 + $0x378] ss:$72 sps:$4 sm:$0xff]  }
  0x93   :  { %2558 = vmatprep.mubr.bf16.mxu1 %v3763_v16  ;;  %2670 = vmatprep.mubr.bf16.mxu0 %v4943_v17  ;;  %v5007_v16 = vld [vmem:[%s6540_s0 + $0x2f0] ss:$72 sps:$4 sm:$0xff]   ;;  %v5012_v17 = vld [vmem:[%s6540_s0 + $0x40c] ss:$72 sps:$4 sm:$0xff]  }
  0x9a   :  { %2559 = vmatmul.mubr.bf16.gmra.mxu1 %v3762_v19  ;;  %2671 = vmatmul.mubr.bf16.gmra.mxu0 %v4946_v20  ;;  %v5016_v19 = vld [vmem:[%s6540_s0 + $0x408] ss:$72 sps:$4 sm:$0xff]  }
  0x9b   :  { %2678 = vmatprep.mubr.bf16.mxu0 %v3765_v21  ;;  %2718 = vmatprep.mubr.bf16.mxu1 %v4954_v22  ;;  %v5017_v20 = vld [vmem:[%s6540_s0 + $0x380] ss:$72 sps:$4 sm:$0xff]   ;;  %v5020_v21 = vld [vmem:[%s6540_s0 + $0x49c] ss:$72 sps:$4 sm:$0xff]  }
  0x9c   :  { %v5022_v22 = vld [vmem:[%s6540_s0 + $0x414] ss:$72 sps:$4 sm:$0xff]  }
  0xa2   :  { %2679 = vmatmul.mubr.bf16.gmra.mxu0 %v3764_v24  ;;  %2719 = vmatmul.mubr.bf16.vlgmr.msra.gmra.mxu1 %v4952_v23  ;;  %v5025_v23 = vld [vmem:[%s6540_s0 + $0x498] ss:$72 sps:$4 sm:$0xff]  }
  0xa3   :  { %2726 = vmatprep.mubr.bf16.mxu1 %v4957_v25  ;;  %2838 = vmatprep.mubr.bf16.mxu0 %v4961_v26  ;;  %v5026_v24 = vld [vmem:[%s6540_s0 + $0x410] ss:$72 sps:$4 sm:$0xff]   ;;  %v5028_v25 = vld [vmem:[%s6540_s0 + $0x52c] ss:$72 sps:$4 sm:$0xff]  }
  0xa4   :  { %4434 = vmatpush3.bf16.msra.mxu1 %v4962_v27  ;;  %v5030_v26 = vld [vmem:[%s6540_s0 + $0x4a4] ss:$72 sps:$4 sm:$0xff]  }
  0xa5   :  { %4435 = vmatprep.subr.bf16.mxu1 %v4972_v28 }
  0xa8   :  { %4436 = vmatpush3.bf16.msra.mxu1 %v4973_v30 }
  0xa9   :  { %4437 = vmatprep.subr.bf16.mxu1 %v4982_v31  ;;  %v198_v31 = vld [vmem:[%s6540_s0 + $0x5b8] sm:$0xff] }
  0xaa   :  { %2727 = vmatmul.mubr.bf16.gmra.mxu1 %v4963_v32  ;;  %2839 = vmatmul.mubr.bf16.vlgmr.msra.gmra.mxu0 %v4959_v29 }
  0xab   :  { %4516 = vmatpush3.bf16.msra.mxu0 %v4965_v33  ;;  %2734 = vmatprep.mubr.bf16.mxu1 %v4966_v34  ;;  %v5032_v34 = vld [vmem:[%s6540_s0 + $0x528] ss:$72 sps:$4 sm:$0xff]  }
  0xac   :  { %2846 = vmatprep.mubr.bf16.mxu0 %v4968_v35  ;;  %4517 = vmatprep.subr.bf16.mxu0 %v4974_v36 }
  0xad   :  { %4438 = vmatpush3.bf16.msra.mxu1 %v4983_v37  ;;  %v5033_v37 = vld [vmem:[%s6540_s0 + $0x4a0] ss:$72 sps:$4 sm:$0xff]  }
  0xae   :  { %4439 = vmatprep.subr.bf16.mxu1 %v4996_v38  ;;  %v3767_v38 = vcombine.high %v198_v31, %v198_v31 }
  0xaf   :  { %4518 = vmatpush3.bf16.msra.mxu0 %v4975_v39  ;;  %v5039_v39 = vld [vmem:[%s6540_s0 + $0x534] ss:$72 sps:$4 sm:$0xff]  }
  0xb0   :  { %4519 = vmatprep.subr.bf16.mxu0 %v4984_v42 }
  0xb1   :  { %4440 = vmatpush3.bf16.msra.mxu1 %v4999_v44 }
  0xb2   :  { %2735 = vmatmul.mubr.bf16.gmra.mxu1 %v4970_v40  ;;  %2847 = vmatmul.mubr.bf16.gmra.mxu0 %v4971_v41 }
  0xb3   :  { %2742 = vmatprep.mubr.bf16.mxu1 %v4976_v43  ;;  %2854 = vmatprep.mubr.bf16.mxu0 %v4978_v45 }
  0xb4   :  { %4520 = vmatpush3.bf16.msra.mxu0 %v4989_v46  ;;  %4441 = vmatprep.subr.bf16.mxu1 %v5008_v48  ;;  %v199_v48 = vld [vmem:[%s6540_s0 + $0x5c0] sm:$0xff] }
  0xb5   :  { %4521 = vmatprep.subr.bf16.mxu0 %v5000_v47  ;;  %4442 = vmatpush3.bf16.msra.mxu1 %v5009_v49 }
  0xb6   :  { %4443 = vmatprep.subr.bf16.mxu1 %v5018_v50 }
  0xb8   :  { %4522 = vmatpush3.bf16.msra.mxu0 %v5001_v53  ;;  %v3766_v53 = vcombine.low %v198_v31, %v198_v31  ;;  %v5064_v31 = vld [vmem:[%s6540_s0 + $0x14c] ss:$72 sps:$4 sm:$0xff]  }
  0xb9   :  { %4523 = vmatprep.subr.bf16.mxu0 %v5010_v55  ;;  %4444 = vmatpush3.bf16.msra.mxu1 %v5019_v56  ;;  %v3769_v55 = vcombine.high %v199_v48, %v199_v48  ;;  %v5050_v56 = vld [vmem:[%s6540_s0 + $0x2c] ss:$72 sps:$4 sm:$0xff]  }
  0xba   :  { %2743 = vmatmul.mubr.bf16.gmra.mxu1 %v4980_v51  ;;  %2855 = vmatmul.mubr.bf16.gmra.mxu0 %v4981_v52 }
  0xbb   :  { %2750 = vmatprep.mubr.bf16.mxu1 %v4985_v54  ;;  %2862 = vmatprep.mubr.bf16.mxu0 %v4987_v57  ;;  %v5042_v54 = vld [vmem:[%s6540_s0 + $0x530] ss:$72 sps:$4 sm:$0xff]  }
  0xbc   :  { %4524 = vmatpush3.bf16.msra.mxu0 %v5011_v58  ;;  %4445 = vmatprep.subr.bf16.mxu1 %v5034_v59 }
  0xbd   :  { %4525 = vmatprep.subr.bf16.mxu0 %v5024_v60  ;;  %4446 = vmatpush3.bf16.msra.mxu1 %v5035_v61 }
  0xbe   :  { %4447 = vmatprep.subr.bf16.mxu1 %v5043_v62 }
  0xc0   :  { %4526 = vmatpush3.bf16.msra.mxu0 %v5027_v1 }
  0xc1   :  { %4527 = vmatprep.subr.bf16.mxu0 %v5036_v3  ;;  %4448 = vmatpush3.bf16.msra.mxu1 %v5044_v4  ;;  %v5910_v3 = vld [vmem:[%s6541_s2] ss:$0 sm:$0xff] }
  0xc2   :  { %2751 = vmatmul.mubr.bf16.gmra.mxu1 %v4990_v63  ;;  %2863 = vmatmul.mubr.bf16.gmra.mxu0 %v4991_v0 }
  0xc3   :  { %2758 = vmatprep.mubr.bf16.mxu1 %v4992_v2  ;;  %2870 = vmatprep.mubr.bf16.mxu0 %v4994_v5 }
  0xc4   :  { %4528 = vmatpush3.bf16.msra.mxu0 %v5037_v6  ;;  %4597 = vmatprep.subr.bf16.mxu1 %v5052_v7  ;;  %v5048_v6 = vld [vmem:[%s6540_s0 + $0x28] ss:$72 sps:$4 sm:$0xff]   ;;  %v3768_v7 = vcombine.low %v199_v48, %v199_v48 }
  0xc5   :  { %4529 = vmatprep.subr.bf16.mxu0 %v5045_v8  ;;  %v5080_v48 = vld [vmem:[%s6539_s1 + $0x468] sm:$0xff]  }
  0xc8   :  { %4530 = vmatpush3.bf16.msra.mxu0 %v5046_v10  ;;  %v5058_v10 = vld [vmem:[%s6540_s0 + $0x34] ss:$72 sps:$4 sm:$0xff]  }
  0xc9   :  { %4679 = vmatprep.subr.bf16.mxu0 %v5060_v12 }
  0xca   :  { %2759 = vmatmul.mubr.bf16.gmra.mxu1 %v4997_v9  ;;  %2871 = vmatmul.mubr.bf16.gmra.mxu0 %v4998_v11  ;;  %v5055_v9 = vld [vmem:[%s6540_s0 + $0xbc] ss:$72 sps:$4 sm:$0xff]  }
  0xcb   :  { %2766 = vmatprep.mubr.bf16.mxu1 %v5002_v13  ;;  %2878 = vmatprep.mubr.bf16.mxu0 %v5004_v14  ;;  %v5059_v13 = vld [vmem:[%s6539_s1 + $0x3b8] sm:$0xff]  }
  0xd2   :  { %2767 = vmatmul.mubr.bf16.gmra.mxu1 %v5006_v15  ;;  %2879 = vmatmul.mubr.bf16.gmra.mxu0 %v5007_v16  ;;  %v5068_v16 = vld [vmem:[%s6539_s1 + $0x3f0] sm:$0xff]  }
  0xd3   :  { %2774 = vmatprep.mubr.bf16.mxu1 %v5012_v17  ;;  %2886 = vmatprep.mubr.bf16.mxu0 %v5014_v18 }
  0xda   :  { %2775 = vmatmul.mubr.bf16.gmra.mxu1 %v5016_v19  ;;  %2887 = vmatmul.mubr.bf16.gmra.mxu0 %v5017_v20 }
  0xdb   :  { %2782 = vmatprep.mubr.bf16.mxu1 %v5020_v21  ;;  %2894 = vmatprep.mubr.bf16.mxu0 %v5022_v22  ;;  %v5053_v22 = vld [vmem:[%s6540_s0 + $0xb8] ss:$72 sps:$4 sm:$0xff]  }
  0xe2   :  { %v4039_v27 = vpop.f32.mrf.mxu0  ;;  %v4075_v28 = vpop.f32.mrf.mxu1  ;;  %2783 = vmatmul.mubr.bf16.gmra.mxu1 %v5025_v23  ;;  %2895 = vmatmul.mubr.bf16.gmra.mxu0 %v5026_v24  ;;  %v5056_v23 = vld [vmem:[%s6540_s0 + $0x30] ss:$72 sps:$4 sm:$0xff]  }
  0xe3   :  { %2790 = vmatprep.mubr.bf16.mxu1 %v5028_v25  ;;  %2902 = vmatprep.mubr.bf16.mxu0 %v5030_v26  ;;  %v5069_v24 = vld [vmem:[%s6539_s1 + $0x3b0] sm:$0xff]  }
  0xe4   :  { %v4040_v29 = vpop.f32.mrf.mxu0  ;;  %v4076_v30 = vpop.f32.mrf.mxu1 }
  0xe5   :  { %v5871_v32 = vadd.f32 %v4040_v29, %v4039_v27  ;;  %v5873_v33 = vadd.f32 %v4076_v30, %v4075_v28  ;;  %v5078_v27 = vld [vmem:[%s6539_s1 + $0x3e8] sm:$0xff]   ;;  %v5061_v30 = vld [vmem:[%s6539_s1 + $0x438] sm:$0xff]  }
  0xe6   :  { %v4042_v35 = vpop.f32.mrf.mxu0  ;;  %v4078_v36 = vpop.f32.mrf.mxu1 }
  0xe8   :  { %v4043_v40 = vpop.f32.mrf.mxu0  ;;  %v4079_v41 = vpop.f32.mrf.mxu1 }
  0xe9   :  { %v5884_v42 = vadd.f32 %v4043_v40, %v4042_v35  ;;  %v5886_v43 = vadd.f32 %v4079_v41, %v4078_v36  ;;  %v5067_v35 = vld [vmem:[%s6540_s0 + $0xc4] ss:$72 sps:$4 sm:$0xff]  }
  0xea   :  { %v4045_v44 = vpop.f32.mrf.mxu0  ;;  %v4081_v45 = vpop.f32.mrf.mxu1  ;;  %2791 = vmatmul.mubr.bf16.gmra.mxu1 %v5032_v34  ;;  %2903 = vmatmul.mubr.bf16.gmra.mxu0 %v5033_v37 }
  0xeb   :  { %2798 = vmatprep.mubr.bf16.mxu1 %v3767_v38  ;;  %2910 = vmatprep.mubr.bf16.mxu0 %v5039_v39  ;;  %v5070_v38 = vld [vmem:[%s6539_s1 + $0x470] sm:$0xff]   ;;  %v5079_v39 = vld [vmem:[%s6539_s1 + $0x3a8] sm:$0xff]  }
  0xec   :  { %v4046_v46 = vpop.f32.mrf.mxu0  ;;  %v4082_v47 = vpop.f32.mrf.mxu1 }
  0xed   :  { %v5891_v49 = vadd.f32 %v4046_v46, %v4045_v44  ;;  %v5893_v50 = vadd.f32 %v4082_v47, %v4081_v45  ;;  %v5071_v44 = vld [vmem:[%s6539_s1 + $0x430] sm:$0xff]   ;;  %v5094_v45 = vld [vmem:[%s6539_s1 + $0x3e0] sm:$0xff]  }
  0xee   :  { %v4048_v51 = vpop.f32.mrf.mxu0  ;;  %v4084_v52 = vpop.f32.mrf.mxu1 }
  0xf0   :  { %v4049_v57 = vpop.f32.mrf.mxu0  ;;  %v4085_v58 = vpop.f32.mrf.mxu1 }
  0xf1   :  { %v5901_v59 = vadd.f32 %v4049_v57, %v4048_v51  ;;  %v5903_v60 = vadd.f32 %v4085_v58, %v4084_v52  ;;  %v5095_v52 = vld [vmem:[%s6539_s1 + $0x3a0] sm:$0xff]  }
  0xf2   :  { %v4051_v61 = vpop.f32.mrf.mxu0  ;;  %v4087_v62 = vpop.f32.mrf.mxu1  ;;  %2799 = vmatmul.mubr.bf16.gmra.mxu1 %v3766_v53  ;;  %2911 = vmatmul.mubr.bf16.gmra.mxu0 %v5042_v54 }
  0xf3   :  { %2918 = vmatprep.mubr.bf16.mxu0 %v3769_v55  ;;  %2958 = vmatprep.mubr.bf16.mxu1 %v5050_v56 }
  0xf4   :  { %v4052_v63 = vpop.f32.mrf.mxu0  ;;  %v4088_v0 = vpop.f32.mrf.mxu1 }
  0xf5   :  { %v5905_v1 = vadd.f32 %v4052_v63, %v4051_v61  ;;  %v4089_v2 = vadd.f32 %v4088_v0, %v4087_v62  ;;  %v5062_v61 = vld [vmem:[%s6540_s0 + $0x148] ss:$72 sps:$4 sm:$0xff]   ;;  %v5074_v0 = vld [vmem:[%s6540_s0 + $0x1dc] ss:$72 sps:$4 sm:$0xff]  }
  0xf6   :  { %v4054_v4 = vpop.f32.mrf.mxu0  ;;  %v4090_v5 = vpop.f32.mrf.mxu1  ;;  %v5065_v62 = vld [vmem:[%s6540_s0 + $0xc0] ss:$72 sps:$4 sm:$0xff]  }
  0xf7   :  { %v5916_v8 = vadd.f32 %v4089_v2, %v5910_v3  ;;  %v5077_v2 = vld [vmem:[%s6540_s0 + $0x154] ss:$72 sps:$4 sm:$0xff]  }
  0xf8   :  { %v4055_v11 = vpop.f32.mrf.mxu0  ;;  %v4091_v12 = vpop.f32.mrf.mxu1 }
  0xf9   :  { %v5927_v14 = vadd.f32 %v4055_v11, %v4054_v4  ;;  %v4092_v15 = vadd.f32 %v4091_v12, %v4090_v5  ;;  %v5105_v11 = vld [vmem:[%s6539_s1 + $0x398] sm:$0xff]  }
  0xfa   :  { %v4057_v17 = vpop.f32.mrf.mxu0  ;;  %v4093_v18 = vpop.f32.mrf.mxu1  ;;  %2919 = vmatmul.mubr.bf16.gmra.mxu0 %v3768_v7  ;;  %2959 = vmatmul.mubr.bf16.vlgmr.msra.gmra.mxu1 %v5048_v6  ;;  %v5087_v6 = vld [vmem:[%s6539_s1 + $0x428] sm:$0xff]   ;;  %v5104_v7 = vld [vmem:[%s6539_s1 + $0x3d8] sm:$0xff]  }
  0xfb   :  { %v5933_v19 = vadd.f32 %v4092_v15, %v5910_v3  ;;  %2966 = vmatprep.mubr.bf16.mxu1 %v5055_v9  ;;  %3078 = vmatprep.mubr.bf16.mxu0 %v5058_v10  ;;  %v5096_v10 = vld [vmem:[%s6539_s1 + $0x460] sm:$0xff]   ;;  %v5114_v15 = vld [vmem:[%s6539_s1 + $0x3d0] sm:$0xff]  }
  0xfc   :  { %v4058_v20 = vpop.f32.mrf.mxu0  ;;  %v4094_v21 = vpop.f32.mrf.mxu1  ;;  %4598 = vmatpush3.bf16.msra.mxu1 %v5059_v13 }
  0xfd   :  { %v5944_v25 = vadd.f32 %v4058_v20, %v4057_v17  ;;  %v4095_v26 = vadd.f32 %v4094_v21, %v4093_v18  ;;  %4599 = vmatprep.subr.bf16.mxu1 %v5068_v16  ;;  %v5097_v18 = vld [vmem:[%s6539_s1 + $0x420] sm:$0xff]   ;;  %v2361_v20 = vadd.f32 %v5871_v32, %v5910_v3  ;;  %v5075_v32 = vld [vmem:[%s6540_s0 + $0x150] ss:$72 sps:$4 sm:$0xff]  }
  0xfe   :  { %v4060_v28 = vpop.f32.mrf.mxu0  ;;  %v4096_v29 = vpop.f32.mrf.mxu1 }
  0xff   :  { %v5956_v34 = vadd.f32 %v4095_v26, %v5910_v3 }
 0x100   :  { %v4061_v36 = vpop.f32.mrf.mxu0  ;;  %v4097_v37 = vpop.f32.mrf.mxu1  ;;  %4600 = vmatpush3.bf16.msra.mxu1 %v5069_v24  ;;  %v5115_v24 = vld [vmem:[%s6539_s1 + $0x390] sm:$0xff]  }
 0x101   :  { %v5967_v40 = vadd.f32 %v4061_v36, %v4060_v28  ;;  %v4098_v41 = vadd.f32 %v4097_v37, %v4096_v29  ;;  %4601 = vmatprep.subr.bf16.mxu1 %v5078_v27  ;;  %v5072_v28 = vld [vmem:[%s6540_s0 + $0x1d8] ss:$72 sps:$4 sm:$0xff]  }
 0x102   :  { %v4063_v46 = vpop.f32.mrf.mxu0  ;;  %v4099_v47 = vpop.f32.mrf.mxu1  ;;  %2967 = vmatmul.mubr.bf16.gmra.mxu1 %v5053_v22  ;;  %3079 = vmatmul.mubr.bf16.vlgmr.msra.gmra.mxu0 %v5056_v23  ;;  %v5106_v23 = vld [vmem:[%s6539_s1 + $0x458] sm:$0xff]  }
 0x103   :  { %v5979_v51 = vadd.f32 %v4098_v41, %v5910_v3  ;;  %4680 = vmatpush3.bf16.msra.mxu0 %v5061_v30  ;;  %2974 = vmatprep.mubr.bf16.mxu1 %v5064_v31  ;;  %v5083_v30 = vld [vmem:[%s6540_s0 + $0x26c] ss:$72 sps:$4 sm:$0xff]   ;;  %v5107_v37 = vld [vmem:[%s6539_s1 + $0x418] sm:$0xff]  }
 0x104   :  { %v4064_v53 = vpop.f32.mrf.mxu0  ;;  %v4100_v54 = vpop.f32.mrf.mxu1  ;;  %3086 = vmatprep.mubr.bf16.mxu0 %v5067_v35  ;;  %4681 = vmatprep.subr.bf16.mxu0 %v5070_v38  ;;  %v5086_v31 = vld [vmem:[%s6540_s0 + $0x1e4] ss:$72 sps:$4 sm:$0xff]  }
 0x105   :  { %v5984_v55 = vadd.f32 %v4064_v53, %v4063_v46  ;;  %v4101_v56 = vadd.f32 %v4100_v54, %v4099_v47  ;;  %4602 = vmatpush3.bf16.msra.mxu1 %v5079_v39  ;;  %v5130_v38 = vld [vmem:[%s6539_s1 + $0x3c8] sm:$0xff]   ;;  %v2364_v39 = vadd.f32 %v5884_v42, %v5910_v3  ;;  %v5139_v42 = vld [vmem:[%s6539_s1 + $0x3c0] sm:$0xff]  }
 0x106   :  { %v4066_v57 = vpop.f32.mrf.mxu0  ;;  %v4102_v58 = vpop.f32.mrf.mxu1  ;;  %4603 = vmatprep.subr.bf16.mxu1 %v5094_v45  ;;  %v5122_v45 = vld [vmem:[%s6539_s1 + $0x450] sm:$0xff]   ;;  %v5131_v46 = vld [vmem:[%s6539_s1 + $0x388] sm:$0xff]  }
 0x107   :  { %v5993_v63 = vadd.f32 %v4101_v56, %v5910_v3  ;;  %4682 = vmatpush3.bf16.msra.mxu0 %v5071_v44  ;;  %v5123_v56 = vld [vmem:[%s6539_s1 + $0x410] sm:$0xff]  }
 0x108   :  { %v4067_v4 = vpop.f32.mrf.mxu0  ;;  %v4103_v5 = vpop.f32.mrf.mxu1  ;;  %4683 = vmatprep.subr.bf16.mxu0 %v5080_v48 }
 0x109   :  { %v6007_v9 = vadd.f32 %v4067_v4, %v4066_v57  ;;  %4604 = vmatpush3.bf16.msra.mxu1 %v5095_v52  ;;  %v2369_v57 = vadd.f32 %v5891_v49, %v5910_v3  ;;  %v5081_v5 = vld [vmem:[%s6540_s0 + $0x268] ss:$72 sps:$4 sm:$0xff]  }
 0x10a   :  { %v4069_v12 = vpop.f32.mrf.mxu0  ;;  %v4121_v13 = vpop.f32.mrf.mxu1  ;;  %2975 = vmatmul.mubr.bf16.gmra.mxu1 %v5062_v61  ;;  %3087 = vmatmul.mubr.bf16.gmra.mxu0 %v5065_v62  ;;  %v5132_v62 = vld [vmem:[%s6539_s1 + $0x448] sm:$0xff]  }
 0x10b   :  { %2982 = vmatprep.mubr.bf16.mxu1 %v5074_v0  ;;  %3094 = vmatprep.mubr.bf16.mxu0 %v5077_v2  ;;  %v5140_v0 = vld [vmem:[%s6539_s1 + $0x380] sm:$0xff]  }
 0x10c   :  { %v4070_v16 = vpop.f32.mrf.mxu0  ;;  %v4122_v17 = vpop.f32.mrf.mxu1  ;;  %4684 = vmatpush3.bf16.msra.mxu0 %v5087_v6  ;;  %4605 = vmatprep.subr.bf16.mxu1 %v5104_v7  ;;  %v5084_v49 = vld [vmem:[%s6540_s0 + $0x1e0] ss:$72 sps:$4 sm:$0xff]  }
 0x10d   :  { %v6023_v21 = vadd.f32 %v4070_v16, %v4069_v12  ;;  %v4123_v22 = vadd.f32 %v4122_v17, %v4121_v13  ;;  %4685 = vmatprep.subr.bf16.mxu0 %v5096_v10  ;;  %4606 = vmatpush3.bf16.msra.mxu1 %v5105_v11  ;;  %v5090_v10 = vld [vmem:[%s6540_s0 + $0x2fc] ss:$72 sps:$4 sm:$0xff]   ;;  %v2372_v16 = vadd.f32 %v5901_v59, %v5910_v3 }
 0x10e   :  { %v4072_v26 = vpop.f32.mrf.mxu0  ;;  %v4124_v27 = vpop.f32.mrf.mxu1  ;;  %4607 = vmatprep.subr.bf16.mxu1 %v5114_v15  ;;  %v5093_v11 = vld [vmem:[%s6540_s0 + $0x274] ss:$72 sps:$4 sm:$0xff]   ;;  %v5133_v15 = vld [vmem:[%s6539_s1 + $0x408] sm:$0xff]   ;;  %v5142_v59 = vld [vmem:[%s6539_s1 + $0x400] sm:$0xff]  }
 0x10f   :  { %v2481_v29 = vadd.f32 %v4123_v22, %v2361_v20  ;;  %v5141_v20 = vld [vmem:[%s6539_s1 + $0x440] sm:$0xff]  }
 0x110   :  { %v4073_v35 = vpop.f32.mrf.mxu0  ;;  %v4125_v36 = vpop.f32.mrf.mxu1  ;;  %4686 = vmatpush3.bf16.msra.mxu0 %v5097_v18 }
 0x111   :  { %v6051_v41 = vadd.f32 %v4073_v35, %v4072_v26  ;;  %v4126_v44 = vadd.f32 %v4125_v36, %v4124_v27  ;;  %4687 = vmatprep.subr.bf16.mxu0 %v5106_v23  ;;  %4608 = vmatpush3.bf16.msra.mxu1 %v5115_v24  ;;  %v5088_v36 = vld [vmem:[%s6540_s0 + $0x2f8] ss:$72 sps:$4 sm:$0xff]  }
 0x112   :  { %v4127_v47 = vpop.f32.mrf.mxu1  ;;  %v4203_v48 = vpop.f32.mrf.mxu0  ;;  %2983 = vmatmul.mubr.bf16.gmra.mxu1 %v5072_v28  ;;  %3095 = vmatmul.mubr.bf16.gmra.mxu0 %v5075_v32  ;;  %v2377_v32 = vadd.f32 %v5905_v1, %v5910_v3  ;;  %v5100_v1 = vld [vmem:[%s6540_s0 + $0x38c] ss:$72 sps:$4 sm:$0xff]  }
 0x113   :  { %v2484_v52 = vadd.f32 %v4126_v44, %v2364_v39  ;;  %2990 = vmatprep.mubr.bf16.mxu1 %v5083_v30  ;;  %3102 = vmatprep.mubr.bf16.mxu0 %v5086_v31  ;;  %v5103_v44 = vld [vmem:[%s6540_s0 + $0x304] ss:$72 sps:$4 sm:$0xff]  }
 0x114   :  { %v4128_v53 = vpop.f32.mrf.mxu1  ;;  %v4204_v54 = vpop.f32.mrf.mxu0  ;;  %4688 = vmatpush3.bf16.msra.mxu0 %v5107_v37  ;;  %4609 = vmatprep.subr.bf16.mxu1 %v5130_v38  ;;  %v5091_v37 = vld [vmem:[%s6540_s0 + $0x270] ss:$72 sps:$4 sm:$0xff]  }
 0x115   :  { %v4129_v58 = vadd.f32 %v4128_v53, %v4127_v47  ;;  %v4205_v61 = vadd.f32 %v4204_v54, %v4203_v48  ;;  %4689 = vmatprep.subr.bf16.mxu0 %v5122_v45  ;;  %4610 = vmatpush3.bf16.msra.mxu1 %v5131_v46  ;;  %v2380_v47 = vadd.f32 %v5927_v14, %v5910_v3 }
 0x116   :  { %v4130_v2 = vpop.f32.mrf.mxu1  ;;  %v4206_v4 = vpop.f32.mrf.mxu0  ;;  %4611 = vmatprep.subr.bf16.mxu1 %v5139_v42 }
 0x117   :  { %v2489_v6 = vadd.f32 %v4129_v58, %v2369_v57  ;;  %v6079_v7 = vadd.f32 %v4205_v61, %v2481_v29  ;;  %v2385_v61 = vadd.f32 %v5944_v25, %v5910_v3  ;;  %v5113_v25 = vld [vmem:[%s6540_s0 + $0x394] ss:$72 sps:$4 sm:$0xff]  }
 0x118   :  { %v4131_v12 = vpop.f32.mrf.mxu1  ;;  %v4207_v13 = vpop.f32.mrf.mxu0  ;;  %4690 = vmatpush3.bf16.msra.mxu0 %v5123_v56 }
 0x119   :  { %v4132_v17 = vadd.f32 %v4131_v12, %v4130_v2  ;;  %v4208_v18 = vadd.f32 %v4207_v13, %v4206_v4  ;;  %4691 = vmatprep.subr.bf16.mxu0 %v5132_v62  ;;  %4612 = vmatpush3.bf16.msra.mxu1 %v5140_v0  ;;  %v5098_v4 = vld [vmem:[%s6540_s0 + $0x388] ss:$72 sps:$4 sm:$0xff]   ;;  %v2388_v13 = vadd.f32 %v5967_v40, %v5910_v3 }
 0x11a   :  { %v4133_v22 = vpop.f32.mrf.mxu1  ;;  %v4209_v23 = vpop.f32.mrf.mxu0  ;;  %2991 = vmatmul.mubr.bf16.gmra.mxu1 %v5081_v5  ;;  %3103 = vmatmul.mubr.bf16.gmra.mxu0 %v5084_v49  ;;  %v5101_v5 = vld [vmem:[%s6540_s0 + $0x300] ss:$72 sps:$4 sm:$0xff]  }
 0x11b   :  { %v2492_v24 = vadd.f32 %v4132_v17, %v2372_v16  ;;  %v6095_v26 = vadd.f32 %v4208_v18, %v2484_v52  ;;  %2998 = vmatprep.mubr.bf16.mxu1 %v5090_v10  ;;  %3110 = vmatprep.mubr.bf16.mxu0 %v5093_v11  ;;  %v5110_v10 = vld [vmem:[%s6540_s0 + $0x41c] ss:$72 sps:$4 sm:$0xff]  }
 0x11c   :  { %v4134_v27 = vpop.f32.mrf.mxu1  ;;  %v4210_v28 = vpop.f32.mrf.mxu0  ;;  %4692 = vmatpush3.bf16.msra.mxu0 %v5133_v15 }
 0x11d   :  { %v4135_v29 = vadd.f32 %v4134_v27, %v4133_v22  ;;  %v4211_v30 = vadd.f32 %v4210_v28, %v4209_v23  ;;  %4693 = vmatprep.subr.bf16.mxu0 %v5141_v20  ;;  %v2393_v27 = vadd.f32 %v5984_v55, %v5910_v3  ;;  %v5121_v55 = vld [vmem:[%s6540_s0 + $0x424] ss:$72 sps:$4 sm:$0xff]  }
 0x11e   :  { %v4136_v31 = vpop.f32.mrf.mxu1  ;;  %v4212_v35 = vpop.f32.mrf.mxu0 }
 0x11f   :  { %v2497_v38 = vadd.f32 %v4135_v29, %v2377_v32  ;;  %v6108_v39 = vadd.f32 %v4211_v30, %v2489_v6  ;;  %v5108_v29 = vld [vmem:[%s6540_s0 + $0x418] ss:$72 sps:$4 sm:$0xff]  }
 0x120   :  { %v4137_v45 = vpop.f32.mrf.mxu1  ;;  %v4213_v46 = vpop.f32.mrf.mxu0  ;;  %4694 = vmatpush3.bf16.msra.mxu0 %v5142_v59  ;;  %v5111_v30 = vld [vmem:[%s6540_s0 + $0x390] ss:$72 sps:$4 sm:$0xff]  }
 0x121   :  { %v4138_v48 = vadd.f32 %v4137_v45, %v4136_v31  ;;  %v4214_v42 = vadd.f32 %v4213_v46, %v4212_v35 }
 0x122   :  { %v4139_v52 = vpop.f32.mrf.mxu1  ;;  %v4215_v53 = vpop.f32.mrf.mxu0  ;;  %2999 = vmatmul.mubr.bf16.gmra.mxu1 %v5088_v36  ;;  %3111 = vmatmul.mubr.bf16.gmra.mxu0 %v5091_v37  ;;  %v5118_v36 = vld [vmem:[%s6540_s0 + $0x4ac] ss:$72 sps:$4 sm:$0xff]  }
 0x123   :  { %v2500_v54 = vadd.f32 %v4138_v48, %v2380_v47  ;;  %v6118_v56 = vadd.f32 %v4214_v42, %v2492_v24  ;;  %3006 = vmatprep.mubr.bf16.mxu1 %v5100_v1  ;;  %3118 = vmatprep.mubr.bf16.mxu0 %v5103_v44  ;;  %v2396_v1 = vadd.f32 %v6007_v9, %v5910_v3 }
 0x124   :  { %v4140_v57 = vpop.f32.mrf.mxu1  ;;  %v4216_v58 = vpop.f32.mrf.mxu0 }
 0x125   :  { %v4141_v62 = vadd.f32 %v4140_v57, %v4139_v52  ;;  %v4217_v0 = vadd.f32 %v4216_v58, %v4215_v53 }
 0x126   :  { %v4142_v2 = vpop.f32.mrf.mxu1  ;;  %v4218_v14 = vpop.f32.mrf.mxu0 }
 0x127   :  { %v2505_v49 = vadd.f32 %v4141_v62, %v2385_v61  ;;  %v6128_v6 = vadd.f32 %v4217_v0, %v2497_v38  ;;  %v5116_v62 = vld [vmem:[%s6540_s0 + $0x4a8] ss:$72 sps:$4 sm:$0xff]  }
 0x128   :  { %v4143_v11 = vpop.f32.mrf.mxu1  ;;  %v4219_v12 = vpop.f32.mrf.mxu0  ;;  %v5119_v0 = vld [vmem:[%s6540_s0 + $0x420] ss:$72 sps:$4 sm:$0xff]  }
 0x129   :  { %v4144_v15 = vadd.f32 %v4143_v11, %v4142_v2  ;;  %v4220_v16 = vadd.f32 %v4219_v12, %v4218_v14 }
 0x12a   :  { %v4145_v17 = vpop.f32.mrf.mxu1  ;;  %v4221_v18 = vpop.f32.mrf.mxu0  ;;  %3007 = vmatmul.mubr.bf16.gmra.mxu1 %v5098_v4  ;;  %3119 = vmatmul.mubr.bf16.gmra.mxu0 %v5101_v5  ;;  %v5126_v4 = vld [vmem:[%s6540_s0 + $0x53c] ss:$72 sps:$4 sm:$0xff]  }
 0x12b   :  { %v2508_v20 = vadd.f32 %v4144_v15, %v2388_v13  ;;  %v6138_v22 = vadd.f32 %v4220_v16, %v2500_v54  ;;  %3014 = vmatprep.mubr.bf16.mxu1 %v5110_v10  ;;  %3126 = vmatprep.mubr.bf16.mxu0 %v5113_v25  ;;  %v2401_v54 = vadd.f32 %v6023_v21, %v5910_v3  ;;  %v5129_v21 = vld [vmem:[%s6540_s0 + $0x4b4] ss:$72 sps:$4 sm:$0xff]  }
 0x12c   :  { %v4146_v23 = vpop.f32.mrf.mxu1  ;;  %v4222_v24 = vpop.f32.mrf.mxu0  ;;  %v2404_v10 = vadd.f32 %v6051_v41, %v5910_v3  ;;  %v2409_v41 = vadd.f32 %v5873_v33, %v5910_v3  ;;  %v5138_v33 = vld [vmem:[%s6540_s0 + $0x544] ss:$72 sps:$4 sm:$0xff]  }
 0x12d   :  { %v4147_v28 = vadd.f32 %v4146_v23, %v4145_v17  ;;  %v4223_v59 = vadd.f32 %v4222_v24, %v4221_v18 }
 0x12e   :  { %v4148_v32 = vpop.f32.mrf.mxu1  ;;  %v4224_v40 = vpop.f32.mrf.mxu0 }
 0x12f   :  { %v2513_v31 = vadd.f32 %v4147_v28, %v2393_v27  ;;  %v6148_v35 = vadd.f32 %v4223_v59, %v2505_v49  ;;  %v5124_v59 = vld [vmem:[%s6540_s0 + $0x538] ss:$72 sps:$4 sm:$0xff]  }
 0x130   :  { %v4149_v37 = vpop.f32.mrf.mxu1  ;;  %v4225_v38 = vpop.f32.mrf.mxu0 }
 0x131   :  { %v4150_v44 = vadd.f32 %v4149_v37, %v4148_v32  ;;  %v4226_v45 = vadd.f32 %v4225_v38, %v4224_v40  ;;  %v5127_v32 = vld [vmem:[%s6540_s0 + $0x4b0] ss:$72 sps:$4 sm:$0xff]  }
 0x132   :  { %v4151_v46 = vpop.f32.mrf.mxu1  ;;  %v4227_v47 = vpop.f32.mrf.mxu0  ;;  %3015 = vmatmul.mubr.bf16.gmra.mxu1 %v5108_v29  ;;  %3127 = vmatmul.mubr.bf16.gmra.mxu0 %v5111_v30 }
 0x133   :  { %v2516_v48 = vadd.f32 %v4150_v44, %v2396_v1  ;;  %v6158_v42 = vadd.f32 %v4226_v45, %v2508_v20  ;;  %3022 = vmatprep.mubr.bf16.mxu1 %v5118_v36  ;;  %3134 = vmatprep.mubr.bf16.mxu0 %v5121_v55  ;;  %v200_v20 = vld [vmem:[%s6540_s0 + $0x5c8] sm:$0xff]  ;;  %v2412_v55 = vadd.f32 %v5886_v43, %v5910_v3 }
 0x134   :  { %v4152_v52 = vpop.f32.mrf.mxu1  ;;  %v4228_v53 = vpop.f32.mrf.mxu0  ;;  %v3771_v30 = vcombine.high %v200_v20, %v200_v20  ;;  %v2417_v43 = vadd.f32 %v5893_v50, %v5910_v3  ;;  %v2420_v50 = vadd.f32 %v5903_v60, %v5910_v3  ;;  %v5145_v60 = vld [vmem:[%s6540_s0 + $0x38] ss:$72 sps:$4 sm:$0xff]  }
 0x135   :  { %v4153_v57 = vadd.f32 %v4152_v52, %v4151_v46  ;;  %v4229_v58 = vadd.f32 %v4228_v53, %v4227_v47  ;;  %v201_v52 = vld [vmem:[%s6540_s0 + $0x5d0] sm:$0xff] }
 0x136   :  { %v4154_v61 = vpop.f32.mrf.mxu1  ;;  %v4230_v9 = vpop.f32.mrf.mxu0 }
 0x137   :  { %v2521_v2 = vadd.f32 %v4153_v57, %v2401_v54  ;;  %v6168_v14 = vadd.f32 %v4229_v58, %v2513_v31 }
 0x138   :  { %v4155_v5 = vpop.f32.mrf.mxu1  ;;  %v4231_v49 = vpop.f32.mrf.mxu0 }
 0x139   :  { %v4156_v25 = vadd.f32 %v4155_v5, %v4154_v61  ;;  %v4232_v11 = vadd.f32 %v4231_v49, %v4230_v9  ;;  %v3770_v61 = vcombine.low %v200_v20, %v200_v20  ;;  %v5136_v9 = vld [vmem:[%s6540_s0 + $0x540] ss:$72 sps:$4 sm:$0xff]  }
 0x13a   :  { %v4157_v12 = vpop.f32.mrf.mxu1  ;;  %v4233_v13 = vpop.f32.mrf.mxu0  ;;  %3023 = vmatmul.mubr.bf16.gmra.mxu1 %v5116_v62  ;;  %3135 = vmatmul.mubr.bf16.gmra.mxu0 %v5119_v0 }
 0x13b   :  { %v2524_v15 = vadd.f32 %v4156_v25, %v2404_v10  ;;  %v6178_v16 = vadd.f32 %v4232_v11, %v2516_v48  ;;  %3030 = vmatprep.mubr.bf16.mxu1 %v5126_v4  ;;  %3142 = vmatprep.mubr.bf16.mxu0 %v5129_v21  ;;  %v5147_v4 = vld [vmem:[%s6540_s0 + $0x3c] ss:$72 sps:$4 sm:$0xff]  }
 0x13c   :  { %v4158_v17 = vpop.f32.mrf.mxu1  ;;  %v4234_v18 = vpop.f32.mrf.mxu0 }
 0x13d   :  { %v4159_v23 = vadd.f32 %v4158_v17, %v4157_v12  ;;  %v4235_v24 = vadd.f32 %v4234_v18, %v4233_v13 }
 0x13e   :  { %v4160_v27 = vpop.f32.mrf.mxu1  ;;  %v4236_v28 = vpop.f32.mrf.mxu0 }
 0x13f   :  { %v2529_v40 = vadd.f32 %v4159_v23, %v2409_v41  ;;  %v6191_v29 = vadd.f32 %v4235_v24, %v2521_v2  ;;  %v3773_v2 = vcombine.high %v201_v52, %v201_v52  ;;  %v3772_v24 = vcombine.low %v201_v52, %v201_v52  ;;  %v5151_v52 = vld [vmem:[%s6540_s0 + $0x40] ss:$72 sps:$4 sm:$0xff]  }
 0x140   :  { %v4161_v31 = vpop.f32.mrf.mxu1  ;;  %v4237_v36 = vpop.f32.mrf.mxu0 }
 0x141   :  { %v4162_v37 = vadd.f32 %v4161_v31, %v4160_v27  ;;  %v4238_v38 = vadd.f32 %v4237_v36, %v4236_v28  ;;  %v5150_v28 = vld [vmem:[%s6540_s0 + $0xcc] ss:$72 sps:$4 sm:$0xff]  }
 0x142   :  { %v4163_v1 = vpop.f32.mrf.mxu1  ;;  %v4239_v44 = vpop.f32.mrf.mxu0  ;;  %3031 = vmatmul.mubr.bf16.gmra.mxu1 %v5124_v59  ;;  %3143 = vmatmul.mubr.bf16.gmra.mxu0 %v5127_v32  ;;  %v5153_v59 = vld [vmem:[%s6540_s0 + $0x44] ss:$72 sps:$4 sm:$0xff]  }
 0x143   :  { %v2532_v45 = vadd.f32 %v4162_v37, %v2412_v55  ;;  %v6198_v46 = vadd.f32 %v4238_v38, %v2524_v15  ;;  %3038 = vmatprep.mubr.bf16.mxu1 %v3771_v30  ;;  %3150 = vmatprep.mubr.bf16.mxu0 %v5138_v33 }
 0x144   :  { %v4164_v47 = vpop.f32.mrf.mxu1  ;;  %v4240_v48 = vpop.f32.mrf.mxu0 }
 0x145   :  { %v4165_v53 = vadd.f32 %v4164_v47, %v4163_v1  ;;  %v4241_v54 = vadd.f32 %v4240_v48, %v4239_v44  ;;  %v5148_v48 = vld [vmem:[%s6540_s0 + $0xc8] ss:$72 sps:$4 sm:$0xff]  }
 0x146   :  { %v4166_v57 = vpop.f32.mrf.mxu1  ;;  %v4242_v58 = vpop.f32.mrf.mxu0 }
 0x147   :  { %v2537_v62 = vadd.f32 %v4165_v53, %v2417_v43  ;;  %v6208_v0 = vadd.f32 %v4241_v54, %v2529_v40  ;;  %v5156_v53 = vld [vmem:[%s6540_s0 + $0x15c] ss:$72 sps:$4 sm:$0xff]  }
 0x148   :  { %v4167_v21 = vpop.f32.mrf.mxu1  ;;  %v4243_v5 = vpop.f32.mrf.mxu0  ;;  %v5159_v54 = vld [vmem:[%s6540_s0 + $0xd4] ss:$72 sps:$4 sm:$0xff]  }
 0x149   :  { %v4168_v49 = vadd.f32 %v4167_v21, %v4166_v57  ;;  %v4244_v10 = vadd.f32 %v4243_v5, %v4242_v58 }
 0x14a   :  { %v4169_v25 = vpop.f32.mrf.mxu1  ;;  %v4245_v11 = vpop.f32.mrf.mxu0  ;;  %3039 = vmatmul.mubr.bf16.gmra.mxu1 %v3770_v61  ;;  %3151 = vmatmul.mubr.bf16.gmra.mxu0 %v5136_v9 }
 0x14b   :  { %v2540_v12 = vadd.f32 %v4168_v49, %v2420_v50  ;;  %v6215_v13 = vadd.f32 %v4244_v10, %v2532_v45  ;;  %3158 = vmatprep.mubr.bf16.mxu0 %v3773_v2  ;;  %3198 = vmatprep.mubr.bf16.mxu1 %v5147_v4 }
 0x14c   :  { %v4170_v15 = vpop.f32.mrf.mxu1  ;;  %v4246_v17 = vpop.f32.mrf.mxu0 }
 0x14d   :  { %v4171_v18 = vadd.f32 %v4170_v15, %v4169_v25  ;;  %v4247_v20 = vadd.f32 %v4246_v17, %v4245_v11  ;;  %v5154_v11 = vld [vmem:[%s6540_s0 + $0x158] ss:$72 sps:$4 sm:$0xff]   ;;  %v5162_v17 = vld [vmem:[%s6540_s0 + $0x1ec] ss:$72 sps:$4 sm:$0xff]  }
 0x14e   :  { %v4172_v41 = vpop.f32.mrf.mxu1  ;;  %v4248_v23 = vpop.f32.mrf.mxu0 }
 0x14f   :  { %v2545_v3 = vadd.f32 %v4171_v18, %v5916_v8  ;;  %v6221_v27 = vadd.f32 %v4247_v20, %v2537_v62  ;;  %v5165_v18 = vld [vmem:[%s6540_s0 + $0x164] ss:$72 sps:$4 sm:$0xff]  }
 0x150   :  { %v4173_v32 = vpop.f32.mrf.mxu1  ;;  %v4249_v40 = vpop.f32.mrf.mxu0 }
 0x151   :  { %v4174_v30 = vadd.f32 %v4173_v32, %v4172_v41  ;;  %v4250_v33 = vadd.f32 %v4249_v40, %v4248_v23 }
 0x152   :  { %v4175_v31 = vpop.f32.mrf.mxu1  ;;  %v4251_v36 = vpop.f32.mrf.mxu0  ;;  %3159 = vmatmul.mubr.bf16.gmra.mxu0 %v3772_v24  ;;  %3199 = vmatmul.mubr.bf16.vlgmr.msra.gmra.mxu1 %v5145_v60 }
 0x153   :  { %v2548_v8 = vadd.f32 %v4174_v30, %v5933_v19  ;;  %v6230_v55 = vadd.f32 %v4250_v33, %v2540_v12  ;;  %3206 = vmatprep.mubr.bf16.mxu1 %v5150_v28  ;;  %3318 = vmatprep.mubr.bf16.mxu0 %v5153_v59  ;;  %v5157_v12 = vld [vmem:[%s6540_s0 + $0xd0] ss:$72 sps:$4 sm:$0xff]  }
 0x154   :  { %v4176_v37 = vpop.f32.mrf.mxu1  ;;  %v4252_v38 = vpop.f32.mrf.mxu0  ;;  %v5160_v33 = vld [vmem:[%s6540_s0 + $0x1e8] ss:$72 sps:$4 sm:$0xff]  }
 0x155   :  { %v4177_v1 = vadd.f32 %v4176_v37, %v4175_v31  ;;  %v4253_v44 = vadd.f32 %v4252_v38, %v4251_v36  ;;  %v5163_v31 = vld [vmem:[%s6540_s0 + $0x160] ss:$72 sps:$4 sm:$0xff]   ;;  %v5168_v37 = vld [vmem:[%s6540_s0 + $0x27c] ss:$72 sps:$4 sm:$0xff]  }
 0x156   :  { %v4178_v45 = vpop.f32.mrf.mxu1  ;;  %v4254_v47 = vpop.f32.mrf.mxu0  ;;  %v5171_v38 = vld [vmem:[%s6540_s0 + $0x1f4] ss:$72 sps:$4 sm:$0xff]  }
 0x157   :  { %v2553_v19 = vadd.f32 %v4177_v1, %v5956_v34  ;;  %v6239_v43 = vadd.f32 %v4253_v44, %v2545_v3 }
 0x158   :  { %v4179_v57 = vpop.f32.mrf.mxu1  ;;  %v4255_v58 = vpop.f32.mrf.mxu0 }
 0x159   :  { %v4180_v61 = vadd.f32 %v4179_v57, %v4178_v45  ;;  %v4256_v9 = vadd.f32 %v4255_v58, %v4254_v47 }
 0x15a   :  { %v4181_v62 = vpop.f32.mrf.mxu1  ;;  %v4257_v2 = vpop.f32.mrf.mxu0  ;;  %3207 = vmatmul.mubr.bf16.gmra.mxu1 %v5148_v48  ;;  %3319 = vmatmul.mubr.bf16.vlgmr.msra.gmra.mxu0 %v5151_v52 }
 0x15b   :  { %v2556_v34 = vadd.f32 %v4180_v61, %v5979_v51  ;;  %v6248_v4 = vadd.f32 %v4256_v9, %v2548_v8  ;;  %3214 = vmatprep.mubr.bf16.mxu1 %v5156_v53  ;;  %3326 = vmatprep.mubr.bf16.mxu0 %v5159_v54  ;;  %v5166_v61 = vld [vmem:[%s6540_s0 + $0x278] ss:$72 sps:$4 sm:$0xff]  }
 0x15c   :  { %v4182_v21 = vpop.f32.mrf.mxu1  ;;  %v4258_v5 = vpop.f32.mrf.mxu0  ;;  %v5169_v9 = vld [vmem:[%s6540_s0 + $0x1f0] ss:$72 sps:$4 sm:$0xff]  }
 0x15d   :  { %v4183_v50 = vadd.f32 %v4182_v21, %v4181_v62  ;;  %v4259_v49 = vadd.f32 %v4258_v5, %v4257_v2 }
 0x15e   :  { %v4184_v10 = vpop.f32.mrf.mxu1  ;;  %v4260_v25 = vpop.f32.mrf.mxu0 }
 0x15f   :  { %v2561_v51 = vadd.f32 %v4183_v50, %v5993_v63  ;;  %v6257_v15 = vadd.f32 %v4259_v49, %v2553_v19 }
 0x160   :  { %v4185_v20 = vpop.f32.mrf.mxu1  ;;  %v4261_v41 = vpop.f32.mrf.mxu0 }
 0x161   :  { %v4262_v23 = vadd.f32 %v4261_v41, %v4260_v25 }
 0x162   :  { %v4263_v24 = vpop.f32.mrf.mxu0  ;;  %v4285_v60 = vpop.f32.mrf.mxu1  ;;  %3215 = vmatmul.mubr.bf16.gmra.mxu1 %v5154_v11  ;;  %3327 = vmatmul.mubr.bf16.gmra.mxu0 %v5157_v12 }
 0x163   :  { %v6265_v3 = vadd.f32 %v4262_v23, %v2556_v34  ;;  %3222 = vmatprep.mubr.bf16.mxu1 %v5162_v17  ;;  %3334 = vmatprep.mubr.bf16.mxu0 %v5165_v18  ;;  %v5177_v34 = vld [vmem:[%s6540_s0 + $0x284] ss:$72 sps:$4 sm:$0xff]   ;;  %v5172_v23 = vld [vmem:[%s6540_s0 + $0x308] ss:$72 sps:$4 sm:$0xff]  }
 0x164   :  { %v4264_v63 = vpop.f32.mrf.mxu0  ;;  %v4286_v28 = vpop.f32.mrf.mxu1 }
 0x165   :  { %v4265_v59 = vadd.f32 %v4264_v63, %v4263_v24  ;;  %v4287_v32 = vadd.f32 %v4286_v28, %v4285_v60  ;;  %v5175_v24 = vld [vmem:[%s6540_s0 + $0x280] ss:$72 sps:$4 sm:$0xff]   ;;  %v5180_v63 = vld [vmem:[%s6540_s0 + $0x39c] ss:$72 sps:$4 sm:$0xff]  }
 0x166   :  { %v4266_v40 = vpop.f32.mrf.mxu0  ;;  %v4288_v30 = vpop.f32.mrf.mxu1  ;;  %v5183_v28 = vld [vmem:[%s6540_s0 + $0x314] ss:$72 sps:$4 sm:$0xff]  }
 0x167   :  { %v6273_v36 = vadd.f32 %v4265_v59, %v2561_v51  ;;  %v2721_v8 = vadd.f32 %v4287_v32, %v6079_v7 }
 0x168   :  { %v4267_v1 = vpop.f32.mrf.mxu0  ;;  %v4289_v44 = vpop.f32.mrf.mxu1 }
 0x169   :  { %v4290_v45 = vadd.f32 %v4289_v44, %v4288_v30 }
 0x16a   :  { %v4291_v47 = vpop.f32.mrf.mxu1  ;;  %v4367_v48 = vpop.f32.mrf.mxu0  ;;  %3223 = vmatmul.mubr.bf16.gmra.mxu1 %v5160_v33  ;;  %3335 = vmatmul.mubr.bf16.gmra.mxu0 %v5163_v31 }
 0x16b   :  { %v2724_v52 = vadd.f32 %v4290_v45, %v6095_v26  ;;  %3230 = vmatprep.mubr.bf16.mxu1 %v5168_v37  ;;  %3342 = vmatprep.mubr.bf16.mxu0 %v5171_v38  ;;  %v5174_v26 = vld [vmem:[%s6540_s0 + $0x30c] ss:$72 sps:$4 sm:$0xff]  }
 0x16c   :  { %v4292_v7 = vpop.f32.mrf.mxu1  ;;  %v4368_v19 = vpop.f32.mrf.mxu0 }
 0x16d   :  { %v4293_v53 = vadd.f32 %v4292_v7, %v4291_v47  ;;  %v4369_v54 = vadd.f32 %v4368_v19, %v4367_v48  ;;  %v5178_v48 = vld [vmem:[%s6540_s0 + $0x398] ss:$72 sps:$4 sm:$0xff]   ;;  %v5186_v19 = vld [vmem:[%s6540_s0 + $0x42c] ss:$72 sps:$4 sm:$0xff]  }
 0x16e   :  { %v4294_v57 = vpop.f32.mrf.mxu1  ;;  %v4370_v58 = vpop.f32.mrf.mxu0 }
 0x16f   :  { %v2729_v62 = vadd.f32 %v4293_v53, %v6108_v39  ;;  %v6290_v2 = vadd.f32 %v4369_v54, %v2721_v8  ;;  %v5189_v53 = vld [vmem:[%s6540_s0 + $0x3a4] ss:$72 sps:$4 sm:$0xff]  }
 0x170   :  { %v4295_v21 = vpop.f32.mrf.mxu1  ;;  %v4371_v5 = vpop.f32.mrf.mxu0 }
 0x171   :  { %v4296_v50 = vadd.f32 %v4295_v21, %v4294_v57  ;;  %v4372_v49 = vadd.f32 %v4371_v5, %v4370_v58 }
 0x172   :  { %v4297_v10 = vpop.f32.mrf.mxu1  ;;  %v4373_v25 = vpop.f32.mrf.mxu0  ;;  %3231 = vmatmul.mubr.bf16.gmra.mxu1 %v5166_v61  ;;  %3343 = vmatmul.mubr.bf16.gmra.mxu0 %v5169_v9 }
 0x173   :  { %v2732_v39 = vadd.f32 %v4296_v50, %v6118_v56  ;;  %v6299_v11 = vadd.f32 %v4372_v49, %v2724_v52  ;;  %3238 = vmatprep.mubr.bf16.mxu1 %v5174_v26  ;;  %3350 = vmatprep.mubr.bf16.mxu0 %v5177_v34  ;;  %v5181_v52 = vld [vmem:[%s6540_s0 + $0x310] ss:$72 sps:$4 sm:$0xff]  }
 0x174   :  { %v4298_v12 = vpop.f32.mrf.mxu1  ;;  %v4374_v51 = vpop.f32.mrf.mxu0 }
 0x175   :  { %v4299_v17 = vadd.f32 %v4298_v12, %v4297_v10  ;;  %v4375_v18 = vadd.f32 %v4374_v51, %v4373_v25  ;;  %v5184_v25 = vld [vmem:[%s6540_s0 + $0x428] ss:$72 sps:$4 sm:$0xff]   ;;  %v5192_v51 = vld [vmem:[%s6540_s0 + $0x4bc] ss:$72 sps:$4 sm:$0xff]  }
 0x176   :  { %v4300_v20 = vpop.f32.mrf.mxu1  ;;  %v4376_v41 = vpop.f32.mrf.mxu0 }
 0x177   :  { %v2737_v56 = vadd.f32 %v4299_v17, %v6128_v6  ;;  %v6308_v60 = vadd.f32 %v4375_v18, %v2729_v62  ;;  %v5195_v17 = vld [vmem:[%s6540_s0 + $0x434] ss:$72 sps:$4 sm:$0xff]  }
 0x178   :  { %v4301_v59 = vpop.f32.mrf.mxu1  ;;  %v4377_v32 = vpop.f32.mrf.mxu0 }
 0x179   :  { %v4302_v40 = vadd.f32 %v4301_v59, %v4300_v20  ;;  %v4378_v30 = vadd.f32 %v4377_v32, %v4376_v41 }
 0x17a   :  { %v4303_v33 = vpop.f32.mrf.mxu1  ;;  %v4379_v31 = vpop.f32.mrf.mxu0  ;;  %3239 = vmatmul.mubr.bf16.gmra.mxu1 %v5172_v23  ;;  %3351 = vmatmul.mubr.bf16.gmra.mxu0 %v5175_v24 }
 0x17b   :  { %v2740_v6 = vadd.f32 %v4302_v40, %v6138_v22  ;;  %v6317_v8 = vadd.f32 %v4378_v30, %v2732_v39  ;;  %3246 = vmatprep.mubr.bf16.mxu1 %v5180_v63  ;;  %3358 = vmatprep.mubr.bf16.mxu0 %v5183_v28  ;;  %v5187_v39 = vld [vmem:[%s6540_s0 + $0x3a0] ss:$72 sps:$4 sm:$0xff]  }
 0x17c   :  { %v4304_v37 = vpop.f32.mrf.mxu1  ;;  %v4380_v38 = vpop.f32.mrf.mxu0 }
 0x17d   :  { %v4305_v1 = vadd.f32 %v4304_v37, %v4303_v33  ;;  %v4381_v44 = vadd.f32 %v4380_v38, %v4379_v31  ;;  %v5190_v31 = vld [vmem:[%s6540_s0 + $0x4b8] ss:$72 sps:$4 sm:$0xff]   ;;  %v5198_v38 = vld [vmem:[%s6540_s0 + $0x54c] ss:$72 sps:$4 sm:$0xff]  }
 0x17e   :  { %v4306_v45 = vpop.f32.mrf.mxu1  ;;  %v4382_v47 = vpop.f32.mrf.mxu0 }
 0x17f   :  { %v2745_v22 = vadd.f32 %v4305_v1, %v6148_v35  ;;  %v6326_v7 = vadd.f32 %v4381_v44, %v2737_v56  ;;  %v5201_v1 = vld [vmem:[%s6540_s0 + $0x4c4] ss:$72 sps:$4 sm:$0xff]  }
 0x180   :  { %v4307_v54 = vpop.f32.mrf.mxu1  ;;  %v4383_v57 = vpop.f32.mrf.mxu0 }
 0x181   :  { %v4308_v58 = vadd.f32 %v4307_v54, %v4306_v45  ;;  %v4384_v61 = vadd.f32 %v4383_v57, %v4382_v47  ;;  %v202_v57 = vld [vmem:[%s6540_s0 + $0x5d8] sm:$0xff] }
 0x182   :  { %v4309_v9 = vpop.f32.mrf.mxu1  ;;  %v4385_v62 = vpop.f32.mrf.mxu0  ;;  %3247 = vmatmul.mubr.bf16.gmra.mxu1 %v5178_v48  ;;  %3359 = vmatmul.mubr.bf16.gmra.mxu0 %v5181_v52 }
 0x183   :  { %v2748_v35 = vadd.f32 %v4308_v58, %v6158_v42  ;;  %v6335_v26 = vadd.f32 %v4384_v61, %v2740_v6  ;;  %3254 = vmatprep.mubr.bf16.mxu1 %v5186_v19  ;;  %3366 = vmatprep.mubr.bf16.mxu0 %v5189_v53  ;;  %v5193_v6 = vld [vmem:[%s6540_s0 + $0x430] ss:$72 sps:$4 sm:$0xff]  }
 0x184   :  { %v4310_v34 = vpop.f32.mrf.mxu1  ;;  %v4386_v21 = vpop.f32.mrf.mxu0 }
 0x185   :  { %v4311_v5 = vadd.f32 %v4310_v34, %v4309_v9  ;;  %v4387_v50 = vadd.f32 %v4386_v21, %v4385_v62 }
 0x186   :  { %v4312_v49 = vpop.f32.mrf.mxu1  ;;  %v4388_v10 = vpop.f32.mrf.mxu0 }
 0x187   :  { %v2753_v42 = vadd.f32 %v4311_v5, %v6168_v14  ;;  %v6344_v12 = vadd.f32 %v4387_v50, %v2745_v22  ;;  %v3775_v5 = vcombine.high %v202_v57, %v202_v57  ;;  %v5206_v50 = vld [vmem:[%s6540_s0 + $0x554] ss:$72 sps:$4 sm:$0xff]  }
 0x188   :  { %v4313_v18 = vpop.f32.mrf.mxu1  ;;  %v4389_v20 = vpop.f32.mrf.mxu0 }
 0x189   :  { %v4314_v41 = vadd.f32 %v4313_v18, %v4312_v49  ;;  %v4390_v23 = vadd.f32 %v4389_v20, %v4388_v10 }
 0x18a   :  { %v4315_v24 = vpop.f32.mrf.mxu1  ;;  %v4391_v56 = vpop.f32.mrf.mxu0  ;;  %3255 = vmatmul.mubr.bf16.gmra.mxu1 %v5184_v25  ;;  %3367 = vmatmul.mubr.bf16.gmra.mxu0 %v5187_v39 }
 0x18b   :  { %v2756_v14 = vadd.f32 %v4314_v41, %v6178_v16  ;;  %v6353_v63 = vadd.f32 %v4390_v23, %v2748_v35  ;;  %3262 = vmatprep.mubr.bf16.mxu1 %v5192_v51  ;;  %3374 = vmatprep.mubr.bf16.mxu0 %v5195_v17  ;;  %v5196_v35 = vld [vmem:[%s6540_s0 + $0x548] ss:$72 sps:$4 sm:$0xff]   ;;  %v203_v41 = vld [vmem:[%s6540_s0 + $0x5e0] sm:$0xff] }
 0x18c   :  { %v4316_v28 = vpop.f32.mrf.mxu1  ;;  %v4392_v59 = vpop.f32.mrf.mxu0 }
 0x18d   :  { %v4317_v32 = vadd.f32 %v4316_v28, %v4315_v24  ;;  %v4393_v40 = vadd.f32 %v4392_v59, %v4391_v56  ;;  %v3774_v28 = vcombine.low %v202_v57, %v202_v57  ;;  %v5204_v59 = vld [vmem:[%s6540_s0 + $0x550] ss:$72 sps:$4 sm:$0xff]  }
 0x18e   :  { %v4318_v30 = vpop.f32.mrf.mxu1  ;;  %v4394_v33 = vpop.f32.mrf.mxu0 }
 0x18f   :  { %v2761_v16 = vadd.f32 %v4317_v32, %v6191_v29  ;;  %v6362_v37 = vadd.f32 %v4393_v40, %v2753_v42  ;;  %v3777_v40 = vcombine.high %v203_v41, %v203_v41 }
 0x190   :  { %v4319_v44 = vpop.f32.mrf.mxu1  ;;  %v4395_v45 = vpop.f32.mrf.mxu0 }
 0x191   :  { %v4320_v47 = vadd.f32 %v4319_v44, %v4318_v30  ;;  %v4396_v48 = vadd.f32 %v4395_v45, %v4394_v33 }
 0x192   :  { %v4321_v52 = vpop.f32.mrf.mxu1  ;;  %v4397_v22 = vpop.f32.mrf.mxu0  ;;  %3263 = vmatmul.mubr.bf16.gmra.mxu1 %v5190_v31  ;;  %3375 = vmatmul.mubr.bf16.gmra.mxu0 %v5193_v6 }
 0x193   :  { %v2764_v29 = vadd.f32 %v4320_v47, %v6198_v46  ;;  %v6371_v19 = vadd.f32 %v4396_v48, %v2756_v14  ;;  %3270 = vmatprep.mubr.bf16.mxu1 %v5198_v38  ;;  %3382 = vmatprep.mubr.bf16.mxu0 %v5201_v1  ;;  %v5199_v46 = vld [vmem:[%s6540_s0 + $0x4c0] ss:$72 sps:$4 sm:$0xff]  }
 0x194   :  { %v4322_v53 = vpop.f32.mrf.mxu1  ;;  %v4398_v54 = vpop.f32.mrf.mxu0 }
 0x195   :  { %v4323_v58 = vadd.f32 %v4322_v53, %v4321_v52  ;;  %v4399_v61 = vadd.f32 %v4398_v54, %v4397_v22 }
 0x196   :  { %v4324_v9 = vpop.f32.mrf.mxu1  ;;  %v4400_v62 = vpop.f32.mrf.mxu0 }
 0x197   :  { %v2769_v34 = vadd.f32 %v4323_v58, %v6208_v0  ;;  %v6383_v21 = vadd.f32 %v4399_v61, %v2761_v16 }
 0x198   :  { %v4325_v49 = vpop.f32.mrf.mxu1  ;;  %v4401_v10 = vpop.f32.mrf.mxu0 }
 0x199   :  { %v4326_v25 = vadd.f32 %v4325_v49, %v4324_v9  ;;  %v4402_v39 = vadd.f32 %v4401_v10, %v4400_v62 }
 0x19a   :  { %v4327_v42 = vpop.f32.mrf.mxu1  ;;  %v4403_v51 = vpop.f32.mrf.mxu0  ;;  %3271 = vmatmul.mubr.bf16.gmra.mxu1 %v5196_v35  ;;  %3383 = vmatmul.mubr.bf16.gmra.mxu0 %v5199_v46 }
 0x19b   :  { %v2772_v17 = vadd.f32 %v4326_v25, %v6215_v13  ;;  %v6389_v18 = vadd.f32 %v4402_v39, %v2764_v29  ;;  %3278 = vmatprep.mubr.bf16.mxu1 %v3775_v5  ;;  %3390 = vmatprep.mubr.bf16.mxu0 %v5206_v50  ;;  %v3776_v29 = vcombine.low %v203_v41, %v203_v41 }
 0x19c   :  { %v4328_v0 = vpop.f32.mrf.mxu1  ;;  %v4404_v20 = vpop.f32.mrf.mxu0 }
 0x19d   :  { %v4329_v23 = vadd.f32 %v4328_v0, %v4327_v42  ;;  %v4405_v24 = vadd.f32 %v4404_v20, %v4403_v51 }
 0x19e   :  { %v4330_v56 = vpop.f32.mrf.mxu1  ;;  %v4406_v14 = vpop.f32.mrf.mxu0 }
 0x19f   :  { %v2777_v13 = vadd.f32 %v4329_v23, %v6221_v27  ;;  %v6398_v32 = vadd.f32 %v4405_v24, %v2769_v34 }
 0x1a0   :  { %v4331_v30 = vpop.f32.mrf.mxu1  ;;  %v4407_v33 = vpop.f32.mrf.mxu0 }
 0x1a1   :  { %v4332_v31 = vadd.f32 %v4331_v30, %v4330_v56  ;;  %v4408_v6 = vadd.f32 %v4407_v33, %v4406_v14 }
 0x1a2   :  { %v4333_v16 = vpop.f32.mrf.mxu1  ;;  %v4409_v38 = vpop.f32.mrf.mxu0  ;;  %3279 = vmatmul.mubr.bf16.gmra.mxu1 %v3774_v28  ;;  %3391 = vmatmul.mubr.bf16.gmra.mxu0 %v5204_v59 }
 0x1a3   :  { %v2780_v1 = vadd.f32 %v4332_v31, %v6230_v55  ;;  %v6401_v44 = vadd.f32 %v4408_v6, %v2772_v17  ;;  %3398 = vmatprep.mubr.bf16.mxu0 %v3777_v40 }
 0x1a4   :  { %v4334_v45 = vpop.f32.mrf.mxu1  ;;  %v4410_v47 = vpop.f32.mrf.mxu0 }
 0x1a5   :  { %v4335_v48 = vadd.f32 %v4334_v45, %v4333_v16  ;;  %v4411_v27 = vadd.f32 %v4410_v47, %v4409_v38 }
 0x1a6   :  { %v4336_v52 = vpop.f32.mrf.mxu1  ;;  %v4412_v22 = vpop.f32.mrf.mxu0 }
 0x1a7   :  { %v2785_v53 = vadd.f32 %v4335_v48, %v6239_v43  ;;  %v6404_v54 = vadd.f32 %v4411_v27, %v2777_v13 }
 0x1a8   :  { %v4337_v57 = vpop.f32.mrf.mxu1  ;;  %v4413_v58 = vpop.f32.mrf.mxu0 }
 0x1a9   :  { %v4338_v61 = vadd.f32 %v4337_v57, %v4336_v52  ;;  %v4414_v9 = vadd.f32 %v4413_v58, %v4412_v22 }
 0x1aa   :  { %v4339_v62 = vpop.f32.mrf.mxu1  ;;  %v4415_v55 = vpop.f32.mrf.mxu0  ;;  %3399 = vmatmul.mubr.bf16.gmra.mxu0 %v3776_v29 }
 0x1ab   :  { %v2788_v35 = vadd.f32 %v4338_v61, %v6248_v4  ;;  %v6407_v46 = vadd.f32 %v4414_v9, %v2780_v1 }
 0x1ac   :  { %v4340_v34 = vpop.f32.mrf.mxu1  ;;  %v4416_v5 = vpop.f32.mrf.mxu0 }
 0x1ad   :  { %v4341_v50 = vadd.f32 %v4340_v34, %v4339_v62  ;;  %v4417_v49 = vadd.f32 %v4416_v5, %v4415_v55 }
 0x1ae   :  { %v4342_v10 = vpop.f32.mrf.mxu1  ;;  %v4418_v25 = vpop.f32.mrf.mxu0 }
 0x1af   :  { %v2793_v43 = vadd.f32 %v4341_v50, %v6257_v15  ;;  %v6410_v39 = vadd.f32 %v4417_v49, %v2785_v53 }
 0x1b0   :  { %v4343_v42 = vpop.f32.mrf.mxu1  ;;  %v4419_v51 = vpop.f32.mrf.mxu0 }
 0x1b1   :  { %v4344_v17 = vadd.f32 %v4343_v42, %v4342_v10  ;;  %v4420_v0 = vadd.f32 %v4419_v51, %v4418_v25 }
 0x1b2   :  { %v4345_v20 = vpop.f32.mrf.mxu1  ;;  %v4421_v41 = vpop.f32.mrf.mxu0 }
 0x1b3   :  { %v2796_v4 = vadd.f32 %v4344_v17, %v6265_v3  ;;  %v6413_v23 = vadd.f32 %v4420_v0, %v2788_v35 }
 0x1b4   :  { %v4346_v24 = vpop.f32.mrf.mxu1  ;;  %v4422_v56 = vpop.f32.mrf.mxu0 }
 0x1b5   :  { %v4347_v14 = vadd.f32 %v4346_v24, %v4345_v20  ;;  %v4423_v28 = vadd.f32 %v4422_v56, %v4421_v41 }
 0x1b6   :  { %v4348_v59 = vpop.f32.mrf.mxu1  ;;  %v4424_v13 = vpop.f32.mrf.mxu0 }
 0x1b7   :  { %v2801_v15 = vadd.f32 %v4347_v14, %v6273_v36  ;;  %v6416_v40 = vadd.f32 %v4423_v28, %v2793_v43 }
 0x1b8   :  { %v4349_v30 = vpop.f32.mrf.mxu1  ;;  %v4425_v33 = vpop.f32.mrf.mxu0 }
 0x1b9   :  { %v4426_v31 = vadd.f32 %v4425_v33, %v4424_v13 }
 0x1ba   :  { %v4427_v6 = vpop.f32.mrf.mxu0  ;;  %v4449_v16 = vpop.f32.mrf.mxu1 }
 0x1bb   :  { %v6418_v38 = vadd.f32 %v4426_v31, %v2796_v4 }
 0x1bc   :  { %v4428_v3 = vpop.f32.mrf.mxu0  ;;  %v4450_v1 = vpop.f32.mrf.mxu1 }
 0x1bd   :  { %v4429_v45 = vadd.f32 %v4428_v3, %v4427_v6  ;;  %v4451_v47 = vadd.f32 %v4450_v1, %v4449_v16 }
 0x1be   :  { %v4430_v48 = vpop.f32.mrf.mxu0  ;;  %v4452_v27 = vpop.f32.mrf.mxu1 }
 0x1bf   :  { %v6420_v52 = vadd.f32 %v4429_v45, %v2801_v15  ;;  %v2961_v22 = vadd.f32 %v4451_v47, %v6290_v2 }
 0x1c0   :  { %v4431_v36 = vpop.f32.mrf.mxu0  ;;  %v4453_v29 = vpop.f32.mrf.mxu1 }
 0x1c1   :  { %v4454_v53 = vadd.f32 %v4453_v29, %v4452_v27 }
 0x1c2   :  { %v4455_v57 = vpop.f32.mrf.mxu1  ;;  %v4531_v58 = vpop.f32.mrf.mxu0 }
 0x1c3   :  { %v2964_v61 = vadd.f32 %v4454_v53, %v6299_v11 }
 0x1c4   :  { %v4456_v9 = vpop.f32.mrf.mxu1  ;;  %v4532_v62 = vpop.f32.mrf.mxu0 }
 0x1c5   :  { %v4457_v55 = vadd.f32 %v4456_v9, %v4455_v57  ;;  %v4533_v35 = vadd.f32 %v4532_v62, %v4531_v58 }
 0x1c6   :  { %v4458_v34 = vpop.f32.mrf.mxu1  ;;  %v4534_v5 = vpop.f32.mrf.mxu0 }
 0x1c7   :  { %v2969_v50 = vadd.f32 %v4457_v55, %v6308_v60  ;;  %v6425_v49 = vadd.f32 %v4533_v35, %v2961_v22 }
 0x1c8   :  { %v4459_v10 = vpop.f32.mrf.mxu1  ;;  %v4535_v25 = vpop.f32.mrf.mxu0 }
 0x1c9   :  { %v4460_v2 = vadd.f32 %v4459_v10, %v4458_v34  ;;  %v4536_v43 = vadd.f32 %v4535_v25, %v4534_v5 }
 0x1ca   :  { %v4461_v42 = vpop.f32.mrf.mxu1  ;;  %v4537_v51 = vpop.f32.mrf.mxu0 }
 0x1cb   :  { %v2972_v17 = vadd.f32 %v4460_v2, %v6317_v8  ;;  %v6428_v0 = vadd.f32 %v4536_v43, %v2964_v61 }
 0x1cc   :  { %v4462_v11 = vpop.f32.mrf.mxu1  ;;  %v4538_v20 = vpop.f32.mrf.mxu0 }
 0x1cd   :  { %v4463_v41 = vadd.f32 %v4462_v11, %v4461_v42  ;;  %v4539_v4 = vadd.f32 %v4538_v20, %v4537_v51 }
 0x1ce   :  { %v4464_v24 = vpop.f32.mrf.mxu1  ;;  %v4540_v56 = vpop.f32.mrf.mxu0 }
 0x1cf   :  { %v2977_v60 = vadd.f32 %v4463_v41, %v6326_v7  ;;  %v6431_v14 = vadd.f32 %v4539_v4, %v2969_v50 }
 0x1d0   :  { %v4465_v28 = vpop.f32.mrf.mxu1  ;;  %v4541_v59 = vpop.f32.mrf.mxu0 }
 0x1d1   :  { %v4466_v13 = vadd.f32 %v4465_v28, %v4464_v24  ;;  %v4542_v15 = vadd.f32 %v4541_v59, %v4540_v56 }
 0x1d2   :  { %v4467_v30 = vpop.f32.mrf.mxu1  ;;  %v4543_v33 = vpop.f32.mrf.mxu0 }
 0x1d3   :  { %v2980_v8 = vadd.f32 %v4466_v13, %v6335_v26  ;;  %v6434_v31 = vadd.f32 %v4542_v15, %v2972_v17 }
 0x1d4   :  { %v4468_v6 = vpop.f32.mrf.mxu1  ;;  %v4544_v16 = vpop.f32.mrf.mxu0 }
 0x1d5   :  { %v4469_v3 = vadd.f32 %v4468_v6, %v4467_v30  ;;  %v4545_v1 = vadd.f32 %v4544_v16, %v4543_v33 }
 0x1d6   :  { %v4470_v45 = vpop.f32.mrf.mxu1  ;;  %v4546_v47 = vpop.f32.mrf.mxu0 }
 0x1d7   :  { %v2985_v7 = vadd.f32 %v4469_v3, %v6344_v12  ;;  %v6437_v48 = vadd.f32 %v4545_v1, %v2977_v60 }
 0x1d8   :  { %v4471_v27 = vpop.f32.mrf.mxu1  ;;  %v4547_v22 = vpop.f32.mrf.mxu0 }
 0x1d9   :  { %v4472_v36 = vadd.f32 %v4471_v27, %v4470_v45  ;;  %v4548_v29 = vadd.f32 %v4547_v22, %v4546_v47 }
 0x1da   :  { %v4473_v53 = vpop.f32.mrf.mxu1  ;;  %v4549_v57 = vpop.f32.mrf.mxu0 }
 0x1db   :  { %v2988_v26 = vadd.f32 %v4472_v36, %v6353_v63  ;;  %v6440_v58 = vadd.f32 %v4548_v29, %v2980_v8 }
 0x1dc   :  { %v4474_v61 = vpop.f32.mrf.mxu1  ;;  %v4550_v9 = vpop.f32.mrf.mxu0 }
 0x1dd   :  { %v4475_v62 = vadd.f32 %v4474_v61, %v4473_v53  ;;  %v4551_v55 = vadd.f32 %v4550_v9, %v4549_v57 }
 0x1de   :  { %v4476_v35 = vpop.f32.mrf.mxu1  ;;  %v4552_v34 = vpop.f32.mrf.mxu0 }
 0x1df   :  { %v2993_v12 = vadd.f32 %v4475_v62, %v6362_v37  ;;  %v6443_v5 = vadd.f32 %v4551_v55, %v2985_v7 }
 0x1e0   :  { %v4477_v50 = vpop.f32.mrf.mxu1  ;;  %v4553_v10 = vpop.f32.mrf.mxu0 }
 0x1e1   :  { %v4478_v25 = vadd.f32 %v4477_v50, %v4476_v35  ;;  %v4554_v2 = vadd.f32 %v4553_v10, %v4552_v34 }
 0x1e2   :  { %v4479_v43 = vpop.f32.mrf.mxu1  ;;  %v4555_v42 = vpop.f32.mrf.mxu0 }
 0x1e3   :  { %v2996_v63 = vadd.f32 %v4478_v25, %v6371_v19  ;;  %v6446_v51 = vadd.f32 %v4554_v2, %v2988_v26 }
 0x1e4   :  { %v4480_v17 = vpop.f32.mrf.mxu1  ;;  %v4556_v11 = vpop.f32.mrf.mxu0 }
 0x1e5   :  { %v4481_v20 = vadd.f32 %v4480_v17, %v4479_v43  ;;  %v4557_v41 = vadd.f32 %v4556_v11, %v4555_v42 }
 0x1e6   :  { %v4482_v4 = vpop.f32.mrf.mxu1  ;;  %v4558_v24 = vpop.f32.mrf.mxu0 }
 0x1e7   :  { %v3001_v37 = vadd.f32 %v4481_v20, %v6383_v21  ;;  %v6449_v56 = vadd.f32 %v4557_v41, %v2993_v12 }
 0x1e8   :  { %v4483_v60 = vpop.f32.mrf.mxu1  ;;  %v4559_v28 = vpop.f32.mrf.mxu0 }
 0x1e9   :  { %v4484_v59 = vadd.f32 %v4483_v60, %v4482_v4  ;;  %v4560_v13 = vadd.f32 %v4559_v28, %v4558_v24 }
 0x1ea   :  { %v4485_v15 = vpop.f32.mrf.mxu1  ;;  %v4561_v30 = vpop.f32.mrf.mxu0 }
 0x1eb   :  { %v3004_v19 = vadd.f32 %v4484_v59, %v6389_v18  ;;  %v6452_v33 = vadd.f32 %v4560_v13, %v2996_v63 }
 0x1ec   :  { %v4486_v8 = vpop.f32.mrf.mxu1  ;;  %v4562_v6 = vpop.f32.mrf.mxu0 }
 0x1ed   :  { %v4487_v16 = vadd.f32 %v4486_v8, %v4485_v15  ;;  %v4563_v3 = vadd.f32 %v4562_v6, %v4561_v30 }
 0x1ee   :  { %v4488_v1 = vpop.f32.mrf.mxu1  ;;  %v4564_v45 = vpop.f32.mrf.mxu0 }
 0x1ef   :  { %v3009_v21 = vadd.f32 %v4487_v16, %v6398_v32  ;;  %v6455_v47 = vadd.f32 %v4563_v3, %v3001_v37 }
 0x1f0   :  { %v4489_v7 = vpop.f32.mrf.mxu1  ;;  %v4565_v27 = vpop.f32.mrf.mxu0 }
 0x1f1   :  { %v4490_v22 = vadd.f32 %v4489_v7, %v4488_v1  ;;  %v4566_v36 = vadd.f32 %v4565_v27, %v4564_v45 }
 0x1f2   :  { %v4491_v29 = vpop.f32.mrf.mxu1  ;;  %v4567_v53 = vpop.f32.mrf.mxu0 }
 0x1f3   :  { %v3012_v18 = vadd.f32 %v4490_v22, %v6401_v44  ;;  %v6458_v57 = vadd.f32 %v4566_v36, %v3004_v19 }
 0x1f4   :  { %v4492_v26 = vpop.f32.mrf.mxu1  ;;  %v4568_v61 = vpop.f32.mrf.mxu0 }
 0x1f5   :  { %v4493_v9 = vadd.f32 %v4492_v26, %v4491_v29  ;;  %v4569_v62 = vadd.f32 %v4568_v61, %v4567_v53 }
 0x1f6   :  { %v4494_v55 = vpop.f32.mrf.mxu1  ;;  %v4570_v35 = vpop.f32.mrf.mxu0 }
 0x1f7   :  { %v3017_v32 = vadd.f32 %v4493_v9, %v6404_v54  ;;  %v6461_v34 = vadd.f32 %v4569_v62, %v3009_v21 }
 0x1f8   :  { %v4495_v12 = vpop.f32.mrf.mxu1  ;;  %v4571_v50 = vpop.f32.mrf.mxu0 }
 0x1f9   :  { %v4496_v10 = vadd.f32 %v4495_v12, %v4494_v55  ;;  %v4572_v25 = vadd.f32 %v4571_v50, %v4570_v35 }
 0x1fa   :  { %v4497_v2 = vpop.f32.mrf.mxu1  ;;  %v4573_v43 = vpop.f32.mrf.mxu0 }
 0x1fb   :  { %v3020_v44 = vadd.f32 %v4496_v10, %v6407_v46  ;;  %v6464_v42 = vadd.f32 %v4572_v25, %v3012_v18 }
 0x1fc   :  { %v4498_v63 = vpop.f32.mrf.mxu1  ;;  %v4574_v17 = vpop.f32.mrf.mxu0 }
 0x1fd   :  { %v4499_v11 = vadd.f32 %v4498_v63, %v4497_v2  ;;  %v4575_v20 = vadd.f32 %v4574_v17, %v4573_v43 }
 0x1fe   :  { %v4500_v41 = vpop.f32.mrf.mxu1  ;;  %v4576_v4 = vpop.f32.mrf.mxu0 }
 0x1ff   :  { %v3025_v54 = vadd.f32 %v4499_v11, %v6410_v39  ;;  %v6467_v24 = vadd.f32 %v4575_v20, %v3017_v32 }
 0x200   :  { %v4501_v37 = vpop.f32.mrf.mxu1  ;;  %v4577_v60 = vpop.f32.mrf.mxu0 }
 0x201   :  { %v4502_v28 = vadd.f32 %v4501_v37, %v4500_v41  ;;  %v4578_v59 = vadd.f32 %v4577_v60, %v4576_v4 }
 0x202   :  { %v4503_v13 = vpop.f32.mrf.mxu1  ;;  %v4579_v15 = vpop.f32.mrf.mxu0 }
 0x203   :  { %v3028_v46 = vadd.f32 %v4502_v28, %v6413_v23  ;;  %v6470_v30 = vadd.f32 %v4578_v59, %v3020_v44 }
 0x204   :  { %v4504_v19 = vpop.f32.mrf.mxu1  ;;  %v4580_v8 = vpop.f32.mrf.mxu0 }
 0x205   :  { %v4505_v6 = vadd.f32 %v4504_v19, %v4503_v13  ;;  %v4581_v16 = vadd.f32 %v4580_v8, %v4579_v15 }
 0x206   :  { %v4506_v3 = vpop.f32.mrf.mxu1  ;;  %v4582_v1 = vpop.f32.mrf.mxu0 }
 0x207   :  { %v3033_v39 = vadd.f32 %v4505_v6, %v6416_v40  ;;  %v6473_v45 = vadd.f32 %v4581_v16, %v3025_v54 }
 0x208   :  { %v4507_v21 = vpop.f32.mrf.mxu1  ;;  %v4583_v7 = vpop.f32.mrf.mxu0 }
 0x209   :  { %v4508_v27 = vadd.f32 %v4507_v21, %v4506_v3  ;;  %v4584_v22 = vadd.f32 %v4583_v7, %v4582_v1 }
 0x20a   :  { %v4509_v36 = vpop.f32.mrf.mxu1  ;;  %v4585_v29 = vpop.f32.mrf.mxu0 }
 0x20b   :  { %v3036_v23 = vadd.f32 %v4508_v27, %v6418_v38  ;;  %v6476_v53 = vadd.f32 %v4584_v22, %v3028_v46 }
 0x20c   :  { %v4510_v18 = vpop.f32.mrf.mxu1  ;;  %v4586_v26 = vpop.f32.mrf.mxu0 }
 0x20d   :  { %v4511_v61 = vadd.f32 %v4510_v18, %v4509_v36  ;;  %v4587_v9 = vadd.f32 %v4586_v26, %v4585_v29 }
 0x20e   :  { %v4512_v62 = vpop.f32.mrf.mxu1  ;;  %v4588_v55 = vpop.f32.mrf.mxu0 }
 0x20f   :  { %v3041_v40 = vadd.f32 %v4511_v61, %v6420_v52  ;;  %v6479_v35 = vadd.f32 %v4587_v9, %v3033_v39 }
 0x210   :  { %v4513_v32 = vpop.f32.mrf.mxu1  ;;  %v4589_v12 = vpop.f32.mrf.mxu0 }
 0x211   :  { %v4590_v50 = vadd.f32 %v4589_v12, %v4588_v55 }
 0x212   :  { %v4591_v10 = vpop.f32.mrf.mxu0  ;;  %v4613_v25 = vpop.f32.mrf.mxu1 }
 0x213   :  { %v6481_v2 = vadd.f32 %v4590_v50, %v3036_v23 }
 0x214   :  { %v4592_v38 = vpop.f32.mrf.mxu0  ;;  %v4614_v43 = vpop.f32.mrf.mxu1 }
 0x215   :  { %v4593_v44 = vadd.f32 %v4592_v38, %v4591_v10  ;;  %v4615_v4 = vadd.f32 %v4614_v43, %v4613_v25 }
 0x216   :  { %v4594_v63 = vpop.f32.mrf.mxu0  ;;  %v4616_v17 = vpop.f32.mrf.mxu1 }
 0x217   :  { %v6483_v11 = vadd.f32 %v4593_v44, %v3041_v40  ;;  %v3201_v28 = vadd.f32 %v4615_v4, %v6425_v49 }
 0x218   :  { %v4595_v20 = vpop.f32.mrf.mxu0  ;;  %v4617_v41 = vpop.f32.mrf.mxu1 }
 0x219   :  { %v4618_v59 = vadd.f32 %v4617_v41, %v4616_v17 }
 0x21a   :  { %v4619_v52 = vpop.f32.mrf.mxu1  ;;  %v4695_v54 = vpop.f32.mrf.mxu0 }
 0x21b   :  { %v3204_v3 = vadd.f32 %v4618_v59, %v6428_v0 }
 0x21c   :  { %v4620_v37 = vpop.f32.mrf.mxu1  ;;  %v4696_v60 = vpop.f32.mrf.mxu0 }
 0x21d   :  { %v4697_v13 = vadd.f32 %v4696_v60, %v4695_v54  ;;  %v4621_v8 = vadd.f32 %v4620_v37, %v4619_v52 }
 0x21e   :  { %v4622_v15 = vpop.f32.mrf.mxu1  ;;  %v4698_v46 = vpop.f32.mrf.mxu0 }
 0x21f   :  { %v3321_v19 = vadd.f32 %v4697_v13, %v3201_v28  ;;  %v3209_v22 = vadd.f32 %v4621_v8, %v6431_v14 }
 0x220   :  { %v4623_v6 = vpop.f32.mrf.mxu1  ;;  %v4699_v16 = vpop.f32.mrf.mxu0 }
 0x221   :  { %v4700_v1 = vadd.f32 %v4699_v16, %v4698_v46  ;;  %v3427_v7 = vmul.f32 0.01, %v3321_v19  ;;  %vm3406_vm0 = vcmp.ge.f32.partialorder %v3321_v19, 0.0  ;;  %v4624_v29 = vadd.f32 %v4623_v6, %v4622_v15 }
 0x222   :  { %v4625_v39 = vpop.f32.mrf.mxu1  ;;  %v4701_v21 = vpop.f32.mrf.mxu0 }
 0x223   :  { %v3324_v27 = vadd.f32 %v4700_v1, %v3204_v3  ;;  %v3448_v9 = vsel %vm3406_vm0, %v3321_v19, %v3427_v7  ;;  %v3212_v50 = vadd.f32 %v4624_v29, %v6434_v31 }
 0x224   :  { %v4626_v36 = vpop.f32.mrf.mxu1  ;;  %v4702_v49 = vpop.f32.mrf.mxu0 }
 0x225   :  { %vm3407_vm1 = vcmp.ge.f32.partialorder %v3324_v27, 0.0  ;;  %v3428_v23 = vmul.f32 0.01, %v3324_v27  ;;  %v4703_v18 = vadd.f32 %v4702_v49, %v4701_v21  ;;  %v4627_v40 = vadd.f32 %v4626_v36, %v4625_v39 }
 0x226   :  { %v4628_v26 = vpop.f32.mrf.mxu1  ;;  %v4704_v61 = vpop.f32.mrf.mxu0 }
 0x227   :  { %v3449_v62 = vsel %vm3407_vm1, %v3324_v27, %v3428_v23  ;;  %v3329_v55 = vadd.f32 %v4703_v18, %v3209_v22  ;;  %v3217_v44 = vadd.f32 %v4627_v40, %v6437_v48 }
 0x228   :  { %v3967_v0 = vpack.c.bf16 %v3449_v62, %v3448_v9  ;;  %v4629_v32 = vpop.f32.mrf.mxu1  ;;  %v4705_v12 = vpop.f32.mrf.mxu0 }
 0x229   :  { %v4706_v10 = vadd.f32 %v4705_v12, %v4704_v61  ;;  %v3429_v38 = vmul.f32 0.01, %v3329_v55  ;;  %vm3408_vm2 = vcmp.ge.f32.partialorder %v3329_v55, 0.0  ;;  %v4630_v20 = vadd.f32 %v4629_v32, %v4628_v26 }
 0x22a   :  { %3968 = vst [vmem:[%s6542_s3] sm:$0xff] %v3967_v0   ;;  %v4631_v14 = vpop.f32.mrf.mxu1  ;;  %v4707_v25 = vpop.f32.mrf.mxu0 }
 0x22b   :  { %v3332_v43 = vadd.f32 %v4706_v10, %v3212_v50  ;;  %v3450_v54 = vsel %vm3408_vm2, %v3329_v55, %v3429_v38  ;;  %v3220_v46 = vadd.f32 %v4630_v20, %v6440_v58 }
 0x22c   :  { %v4632_v63 = vpop.f32.mrf.mxu1  ;;  %v4708_v17 = vpop.f32.mrf.mxu0 }
 0x22d   :  { %vm3409_vm3 = vcmp.ge.f32.partialorder %v3332_v43, 0.0  ;;  %v3430_v41 = vmul.f32 0.01, %v3332_v43  ;;  %v4709_v4 = vadd.f32 %v4708_v17, %v4707_v25  ;;  %v4633_v59 = vadd.f32 %v4632_v63, %v4631_v14 }
 0x22e   :  { %v4634_v52 = vpop.f32.mrf.mxu1  ;;  %v4710_v31 = vpop.f32.mrf.mxu0 }
 0x22f   :  { %v3451_v37 = vsel %vm3409_vm3, %v3332_v43, %v3430_v41  ;;  %v3337_v60 = vadd.f32 %v4709_v4, %v3217_v44  ;;  %v3225_v3 = vadd.f32 %v4633_v59, %v6443_v5 }
 0x230   :  { %v3972_v28 = vpack.c.bf16 %v3451_v37, %v3450_v54  ;;  %v4635_v13 = vpop.f32.mrf.mxu1  ;;  %v4711_v15 = vpop.f32.mrf.mxu0 }
 0x231   :  { %v4712_v19 = vadd.f32 %v4711_v15, %v4710_v31  ;;  %v3431_v6 = vmul.f32 0.01, %v3337_v60  ;;  %vm3410_vm4 = vcmp.ge.f32.partialorder %v3337_v60, 0.0  ;;  %v4636_v21 = vadd.f32 %v4635_v13, %v4634_v52 }
 0x232   :  { %4014 = vst [vmem:[%s6542_s3 + $0x8] sm:$0xff] %v3972_v28   ;;  %v4637_v48 = vpop.f32.mrf.mxu1  ;;  %v4713_v8 = vpop.f32.mrf.mxu0 }
 0x233   :  { %v3340_v16 = vadd.f32 %v4712_v19, %v3220_v46  ;;  %v3452_v36 = vsel %vm3410_vm4, %v3337_v60, %v3431_v6  ;;  %v3228_v9 = vadd.f32 %v4636_v21, %v6446_v51 }
 0x234   :  { %v4638_v1 = vpop.f32.mrf.mxu1  ;;  %v4714_v39 = vpop.f32.mrf.mxu0 }
 0x235   :  { %vm3411_vm5 = vcmp.ge.f32.partialorder %v3340_v16, 0.0  ;;  %v3432_v7 = vmul.f32 0.01, %v3340_v16  ;;  %v4715_v27 = vadd.f32 %v4714_v39, %v4713_v8  ;;  %v4639_v18 = vadd.f32 %v4638_v1, %v4637_v48 }
 0x236   :  { %v4640_v22 = vpop.f32.mrf.mxu1  ;;  %v4716_v58 = vpop.f32.mrf.mxu0 }
 0x237   :  { %v3453_v49 = vsel %vm3411_vm5, %v3340_v16, %v3432_v7  ;;  %v3345_v29 = vadd.f32 %v4715_v27, %v3225_v3  ;;  %v3233_v32 = vadd.f32 %v4639_v18, %v6449_v56 }
 0x238   :  { %v3977_v23 = vpack.c.bf16 %v3453_v49, %v3452_v36  ;;  %v4641_v26 = vpop.f32.mrf.mxu1  ;;  %v4717_v61 = vpop.f32.mrf.mxu0 }
 0x239   :  { %v4718_v62 = vadd.f32 %v4717_v61, %v4716_v58  ;;  %v3433_v0 = vmul.f32 0.01, %v3345_v29  ;;  %vm3412_vm6 = vcmp.ge.f32.partialorder %v3345_v29, 0.0  ;;  %v4642_v10 = vadd.f32 %v4641_v26, %v4640_v22 }
 0x23a   :  { %4015 = vst [vmem:[%s6542_s3 + $0x10] sm:$0xff] %v3977_v23   ;;  %v4643_v5 = vpop.f32.mrf.mxu1  ;;  %v4719_v55 = vpop.f32.mrf.mxu0 }
 0x23b   :  { %v3348_v40 = vadd.f32 %v4718_v62, %v3228_v9  ;;  %v3454_v43 = vsel %vm3412_vm6, %v3345_v29, %v3433_v0  ;;  %v3236_v52 = vadd.f32 %v4642_v10, %v6452_v33 }
 0x23c   :  { %v4644_v12 = vpop.f32.mrf.mxu1  ;;  %v4720_v50 = vpop.f32.mrf.mxu0 }
 0x23d   :  { %vm3413_vm7 = vcmp.ge.f32.partialorder %v3348_v40, 0.0  ;;  %v3434_v14 = vmul.f32 0.01, %v3348_v40  ;;  %v4721_v25 = vadd.f32 %v4720_v50, %v4719_v55  ;;  %v4645_v20 = vadd.f32 %v4644_v12, %v4643_v5 }
 0x23e   :  { %v4646_v38 = vpop.f32.mrf.mxu1  ;;  %v4722_v51 = vpop.f32.mrf.mxu0 }
 0x23f   :  { %v3455_v44 = vsel %vm3413_vm7, %v3348_v40, %v3434_v14  ;;  %v3353_v63 = vadd.f32 %v4721_v25, %v3233_v32  ;;  %v3241_v28 = vadd.f32 %v4645_v20, %v6455_v47 }
 0x240   :  { %v3982_v17 = vpack.c.bf16 %v3455_v44, %v3454_v43  ;;  %v4647_v41 = vpop.f32.mrf.mxu1  ;;  %v4723_v4 = vpop.f32.mrf.mxu0 }
 0x241   :  { %v4724_v31 = vadd.f32 %v4723_v4, %v4722_v51  ;;  %v3435_v37 = vmul.f32 0.01, %v3353_v63  ;;  %vm3414_vm8 = vcmp.ge.f32.partialorder %v3353_v63, 0.0  ;;  %v4648_v15 = vadd.f32 %v4647_v41, %v4646_v38 }
 0x242   :  { %4016 = vst [vmem:[%s6542_s3 + $0x18] sm:$0xff] %v3982_v17   ;;  %v4649_v56 = vpop.f32.mrf.mxu1  ;;  %v4725_v54 = vpop.f32.mrf.mxu0 }
 0x243   :  { %v3356_v60 = vadd.f32 %v4724_v31, %v3236_v52  ;;  %v3456_v8 = vsel %vm3414_vm8, %v3353_v63, %v3435_v37  ;;  %v3244_v7 = vadd.f32 %v4648_v15, %v6458_v57 }
 0x244   :  { %v4650_v59 = vpop.f32.mrf.mxu1  ;;  %v4726_v13 = vpop.f32.mrf.mxu0 }
 0x245   :  { %vm3415_vm9 = vcmp.ge.f32.partialorder %v3356_v60, 0.0  ;;  %v3436_v46 = vmul.f32 0.01, %v3356_v60  ;;  %v4727_v19 = vadd.f32 %v4726_v13, %v4725_v54  ;;  %v4651_v1 = vadd.f32 %v4650_v59, %v4649_v56 }
 0x246   :  { %v4652_v48 = vpop.f32.mrf.mxu1  ;;  %v4728_v33 = vpop.f32.mrf.mxu0 }
 0x247   :  { %v3457_v6 = vsel %vm3415_vm9, %v3356_v60, %v3436_v46  ;;  %v3361_v16 = vadd.f32 %v4727_v19, %v3241_v28  ;;  %v3249_v49 = vadd.f32 %v4651_v1, %v6461_v34 }
 0x248   :  { %v3987_v3 = vpack.c.bf16 %v3457_v6, %v3456_v8  ;;  %v4653_v39 = vpop.f32.mrf.mxu1  ;;  %v4729_v21 = vpop.f32.mrf.mxu0 }
 0x249   :  { %v4730_v27 = vadd.f32 %v4729_v21, %v4728_v33  ;;  %v3437_v58 = vmul.f32 0.01, %v3361_v16  ;;  %vm3416_vm10 = vcmp.ge.f32.partialorder %v3361_v16, 0.0  ;;  %v4654_v18 = vadd.f32 %v4653_v39, %v4652_v48 }
 0x24a   :  { %4017 = vst [vmem:[%s6542_s3 + $0x20] sm:$0xff] %v3987_v3   ;;  %v4655_v47 = vpop.f32.mrf.mxu1  ;;  %v4731_v22 = vpop.f32.mrf.mxu0 }
 0x24b   :  { %v3364_v36 = vadd.f32 %v4730_v27, %v3244_v7  ;;  %v3458_v62 = vsel %vm3416_vm10, %v3361_v16, %v3437_v58  ;;  %v3252_v50 = vadd.f32 %v4654_v18, %v6464_v42 }
 0x24c   :  { %v4656_v29 = vpop.f32.mrf.mxu1  ;;  %v4732_v23 = vpop.f32.mrf.mxu0 }
 0x24d   :  { %vm3417_vm11 = vcmp.ge.f32.partialorder %v3364_v36, 0.0  ;;  %v3438_v26 = vmul.f32 0.01, %v3364_v36  ;;  %v4733_v61 = vadd.f32 %v4732_v23, %v4731_v22  ;;  %v4657_v40 = vadd.f32 %v4656_v29, %v4655_v47 }
 0x24e   :  { %v4658_v9 = vpop.f32.mrf.mxu1  ;;  %v4734_v57 = vpop.f32.mrf.mxu0 }
 0x24f   :  { %v3459_v5 = vsel %vm3417_vm11, %v3364_v36, %v3438_v26  ;;  %v3369_v55 = vadd.f32 %v4733_v61, %v3249_v49  ;;  %v3257_v51 = vadd.f32 %v4657_v40, %v6467_v24 }
 0x250   :  { %v3992_v0 = vpack.c.bf16 %v3459_v5, %v3458_v62  ;;  %v4659_v32 = vpop.f32.mrf.mxu1  ;;  %v4735_v12 = vpop.f32.mrf.mxu0 }
 0x251   :  { %v4736_v10 = vadd.f32 %v4735_v12, %v4734_v57  ;;  %v3439_v25 = vmul.f32 0.01, %v3369_v55  ;;  %vm3418_vm12 = vcmp.ge.f32.partialorder %v3369_v55, 0.0  ;;  %v4660_v63 = vadd.f32 %v4659_v32, %v4658_v9 }
 0x252   :  { %4018 = vst [vmem:[%s6542_s3 + $0x28] sm:$0xff] %v3992_v0   ;;  %v4661_v34 = vpop.f32.mrf.mxu1  ;;  %v4737_v14 = vpop.f32.mrf.mxu0 }
 0x253   :  { %v3372_v38 = vadd.f32 %v4736_v10, %v3252_v50  ;;  %v3460_v4 = vsel %vm3418_vm12, %v3369_v55, %v3439_v25  ;;  %v3260_v28 = vadd.f32 %v4660_v63, %v6470_v30 }
 0x254   :  { %v4662_v43 = vpop.f32.mrf.mxu1  ;;  %v4738_v44 = vpop.f32.mrf.mxu0 }
 0x255   :  { %vm3419_vm13 = vcmp.ge.f32.partialorder %v3372_v38, 0.0  ;;  %v3440_v17 = vmul.f32 0.01, %v3372_v38  ;;  %v4739_v20 = vadd.f32 %v4738_v44, %v4737_v14  ;;  %v4663_v54 = vadd.f32 %v4662_v43, %v4661_v34 }
 0x256   :  { %v4664_v41 = vpop.f32.mrf.mxu1  ;;  %v4740_v42 = vpop.f32.mrf.mxu0 }
 0x257   :  { %v3461_v52 = vsel %vm3419_vm13, %v3372_v38, %v3440_v17  ;;  %v3377_v31 = vadd.f32 %v4739_v20, %v3257_v51  ;;  %v3265_v19 = vadd.f32 %v4663_v54, %v6473_v45 }
 0x258   :  { %v3997_v56 = vpack.c.bf16 %v3461_v52, %v3460_v4  ;;  %v4665_v37 = vpop.f32.mrf.mxu1  ;;  %v4741_v60 = vpop.f32.mrf.mxu0 }
 0x259   :  { %v4742_v59 = vadd.f32 %v4741_v60, %v4740_v42  ;;  %v3441_v15 = vmul.f32 0.01, %v3377_v31  ;;  %vm3420_vm14 = vcmp.ge.f32.partialorder %v3377_v31, 0.0  ;;  %v4666_v8 = vadd.f32 %v4665_v37, %v4664_v41 }
 0x25a   :  { %4019 = vst [vmem:[%s6542_s3 + $0x30] sm:$0xff] %v3997_v56   ;;  %v4667_v24 = vpop.f32.mrf.mxu1  ;;  %v4743_v13 = vpop.f32.mrf.mxu0 }
 0x25b   :  { %v3380_v46 = vadd.f32 %v4742_v59, %v3260_v28  ;;  %v3462_v1 = vsel %vm3420_vm14, %v3377_v31, %v3441_v15  ;;  %v3268_v58 = vadd.f32 %v4666_v8, %v6476_v53 }
 0x25c   :  { %v4668_v48 = vpop.f32.mrf.mxu1  ;;  %v4744_v33 = vpop.f32.mrf.mxu0 }
 0x25d   :  { %vm3421_vm15 = vcmp.ge.f32.partialorder %v3380_v46, 0.0  ;;  %v3442_v6 = vmul.f32 0.01, %v3380_v46  ;;  %v4745_v16 = vadd.f32 %v4744_v33, %v4743_v13  ;;  %v4669_v27 = vadd.f32 %v4668_v48, %v4667_v24 }
 0x25e   :  { %v4670_v3 = vpop.f32.mrf.mxu1  ;;  %v4746_v30 = vpop.f32.mrf.mxu0 }
 0x25f   :  { %v3463_v39 = vsel %vm3421_vm15, %v3380_v46, %v3442_v6  ;;  %v3385_v21 = vadd.f32 %v4745_v16, %v3265_v19  ;;  %v3273_v18 = vadd.f32 %v4669_v27, %v6479_v35 }
 0x260   :  { %v4002_v7 = vpack.c.bf16 %v3463_v39, %v3462_v1  ;;  %v4671_v47 = vpop.f32.mrf.mxu1  ;;  %v4747_v22 = vpop.f32.mrf.mxu0 }
 0x261   :  { %v4748_v36 = vadd.f32 %v4747_v22, %v4746_v30  ;;  %v3443_v29 = vmul.f32 0.01, %v3385_v21  ;;  %vm3422_vm0 = vcmp.ge.f32.partialorder %v3385_v21, 0.0  ;;  %v4672_v9 = vadd.f32 %v4671_v47, %v4670_v3 }
 0x262   :  { %4020 = vst [vmem:[%s6542_s3 + $0x38] sm:$0xff] %v4002_v7   ;;  %v4673_v45 = vpop.f32.mrf.mxu1  ;;  %v4749_v49 = vpop.f32.mrf.mxu0 }
 0x263   :  { %v3388_v23 = vadd.f32 %v4748_v36, %v3268_v58  ;;  %v3464_v55 = vsel %vm3422_vm0, %v3385_v21, %v3443_v29  ;;  %v3276_v10 = vadd.f32 %v4672_v9, %v6481_v2 }
 0x264   :  { %v4674_v26 = vpop.f32.mrf.mxu1  ;;  %v4750_v61 = vpop.f32.mrf.mxu0 }
 0x265   :  { %vm3423_vm1 = vcmp.ge.f32.partialorder %v3388_v23, 0.0  ;;  %v3444_v57 = vmul.f32 0.01, %v3388_v23  ;;  %v4751_v62 = vadd.f32 %v4750_v61, %v4749_v49  ;;  %v4675_v34 = vadd.f32 %v4674_v26, %v4673_v45 }
 0x266   :  { %v4752_v5 = vpop.f32.mrf.mxu0  ;;  %v4676_v53 = vpop.f32.mrf.mxu1 }
 0x267   :  { %v3465_v0 = vsel %vm3423_vm1, %v3388_v23, %v3444_v57  ;;  %v3393_v40 = vadd.f32 %v4751_v62, %v3273_v18  ;;  %v3281_v43 = vadd.f32 %v4675_v34, %v6483_v11 }
 0x268   :  { %v4007_v32 = vpack.c.bf16 %v3465_v0, %v3464_v55  ;;  %v4753_v12 = vpop.f32.mrf.mxu0  ;;  %v4677_v50 = vpop.f32.mrf.mxu1 }
 0x269   :  { %v4754_v14 = vadd.f32 %v4753_v12, %v4752_v5  ;;  %v3445_v25 = vmul.f32 0.01, %v3393_v40  ;;  %vm3424_vm2 = vcmp.ge.f32.partialorder %v3393_v40, 0.0 }
 0x26a   :  { %4021 = vst [vmem:[%s6542_s3 + $0x40] sm:$0xff] %v4007_v32   ;;  %v4755_v35 = vpop.f32.mrf.mxu0 }
 0x26b   :  { %v3396_v38 = vadd.f32 %v4754_v14, %v3276_v10  ;;  %v3466_v20 = vsel %vm3424_vm2, %v3393_v40, %v3445_v25 }
 0x26c   :  { %v4756_v51 = vpop.f32.mrf.mxu0 }
 0x26d   :  { %vm3425_vm3 = vcmp.ge.f32.partialorder %v3396_v38, 0.0  ;;  %v3446_v44 = vmul.f32 0.01, %v3396_v38  ;;  %v4757_v63 = vadd.f32 %v4756_v51, %v4755_v35 }
 0x26e   :  { %v4758_v17 = vpop.f32.mrf.mxu0 }
 0x26f   :  { %v3467_v41 = vsel %vm3425_vm3, %v3396_v38, %v3446_v44  ;;  %v3401_v2 = vadd.f32 %v4757_v63, %v3281_v43 }
 0x270   :  { %v4012_v42 = vpack.c.bf16 %v3467_v41, %v3466_v20  ;;  %v4759_v4 = vpop.f32.mrf.mxu0 }
 0x271   :  { %vm3426_vm4 = vcmp.ge.f32.partialorder %v3401_v2, 0.0  ;;  %v3447_v52 = vmul.f32 0.01, %v3401_v2 }
 0x272   :  { %4022 = vst [vmem:[%s6542_s3 + $0x48] sm:$0xff] %v4012_v42  }
 0x273   :  { %v3468_v31 = vsel %vm3426_vm4, %v3401_v2, %v3447_v52 }
 0x274   :  { %v3963_v56 = vpack.c.bf16 %v3468_v31, %v3468_v31 }
 0x276   :  { %3574 = vst [vmem:[%s6542_s3 + $0x50] sm:$0xf] %v3963_v56 }

// kernel: generator_forward.7
= control target key start
LH: loop header
LB: loop body
LE: loop exit
PB: predicated region body
PF: predicated region fallthrough
CT: control target
= control target key end

     0   :  { %v6441_v0 = vmov 0   ;;  %vm6443_vm0 = vmmov 0   ;;  %s8461_s1 = inlined_call_operand.vmem [shape: bf16[1152,128], index: 1, kind: input, shape index: {}]   ;;  %s8462_s0 = inlined_call_operand.vmem [shape: bf16[584,1152], index: 0, kind: input, shape index: {}]   ;;  %s8463_s2 = inlined_call_operand.vmem [shape: f32[1,128], index: 2, kind: input, shape index: {}]   ;;  %s8464_s3 = inlined_call_operand.vmem [shape: bf16[584,128], index: 3, kind: output, shape index: {}]  }
   0x1   :  { %2651 = vmatprep.subr.bf16.mxu0 %v6441_v0  ;;  %5856 = vmatprep.subr.bf16.mxu1 %v6441_v0  ;;  %v5891_v1 = vld [vmem:[%s8461_s1 + $0x38] sm:$0xff]   ;;  %v5892_v2 = vld [vmem:[%s8461_s1 + $0x30] sm:$0xff]   ;;  %v5893_v3 = vld [vmem:[%s8461_s1 + $0x28] sm:$0xff]  }
   0x2   :  { %2652 = vmatpush1.bf16.msra.mxu0 %v5891_v1  ;;  %5872 = vmatpush1.bf16.msra.mxu1 %v5891_v1  ;;  %v5894_v4 = vld [vmem:[%s8461_s1 + $0x20] sm:$0xff]   ;;  %v5895_v5 = vld [vmem:[%s8461_s1 + $0x18] sm:$0xff]   ;;  %v5896_v7 = vld [vmem:[%s8461_s1 + $0x10] sm:$0xff]  }
   0x3   :  { %2653 = vmatprep.subr.bf16.mxu0 %v6441_v0  ;;  %5857 = vmatprep.subr.bf16.mxu1 %v6441_v0  ;;  %v5909_v6 = vld [vmem:[%s8462_s0 + $0x4] ss:$36 sps:$4 sm:$0xff]   ;;  %v5912_v8 = vld [vmem:[%s8462_s0 + $0x55c] ss:$36 sps:$4 sm:$0xff]   ;;  %v5900_v12 = vld [vmem:[%s8461_s1 + $0x70] sm:$0xff]  }
   0x4   :  { %2683 = vmatprep.mubr.bf16.mxu0 %v5909_v6  ;;  %2835 = vmatprep.mubr.bf16.mxu1 %v5912_v8  ;;  %v5897_v9 = vld [vmem:[%s8461_s1 + $0x8] sm:$0xff]   ;;  %v5898_v10 = vld [vmem:[%s8461_s1] sm:$0xff]   ;;  %v5899_v11 = vld [vmem:[%s8461_s1 + $0x78] sm:$0xff]  }
   0x5   :  { %v5901_v13 = vld [vmem:[%s8461_s1 + $0x68] sm:$0xff]   ;;  %v5902_v14 = vld [vmem:[%s8461_s1 + $0x60] sm:$0xff]   ;;  %v5903_v15 = vld [vmem:[%s8461_s1 + $0x58] sm:$0xff]  }
   0x6   :  { %2654 = vmatpush1.bf16.msra.mxu0 %v5892_v2  ;;  %5873 = vmatpush1.bf16.msra.mxu1 %v5892_v2  ;;  %v5904_v16 = vld [vmem:[%s8461_s1 + $0x50] sm:$0xff]   ;;  %v5905_v17 = vld [vmem:[%s8461_s1 + $0x48] sm:$0xff]   ;;  %v5906_v18 = vld [vmem:[%s8461_s1 + $0x40] sm:$0xff]  }
   0x7   :  { %2655 = vmatprep.subr.bf16.mxu0 %v6441_v0  ;;  %5858 = vmatprep.subr.bf16.mxu1 %v6441_v0  ;;  %v5907_v19 = vld [vmem:[%s8462_s0] ss:$36 sps:$4 sm:$0xff]   ;;  %v5910_v20 = vld [vmem:[%s8462_s0 + $0x558] ss:$36 sps:$4 sm:$0xff]   ;;  %v5914_v22 = vld [vmem:[%s8462_s0 + $0x4c] ss:$36 sps:$4 sm:$0xff]  }
   0x8   :  { %v5913_v21 = vld [vmem:[%s8461_s1 + $0x138] sm:$0xff]   ;;  %v5916_v23 = vld [vmem:[%s8462_s0 + $0x5a4] ss:$36 sps:$4 sm:$0xff]   ;;  %v5921_v25 = vld [vmem:[%s8461_s1 + $0x130] sm:$0xff]  }
   0x9   :  { %v5918_v24 = vld [vmem:[%s8461_s1 + $0xb8] sm:$0xff]   ;;  %v5919_v26 = vld [vmem:[%s8462_s0 + $0x48] ss:$36 sps:$4 sm:$0xff]   ;;  %v5928_v27 = vld [vmem:[%s8461_s1 + $0xb0] sm:$0xff]  }
   0xa   :  { %2656 = vmatpush1.bf16.msra.mxu0 %v5893_v3  ;;  %5874 = vmatpush1.bf16.msra.mxu1 %v5893_v3  ;;  %v5920_v28 = vld [vmem:[%s8462_s0 + $0x5a0] ss:$36 sps:$4 sm:$0xff]   ;;  %v5922_v29 = vld [vmem:[%s8462_s0 + $0x94] ss:$36 sps:$4 sm:$0xff]   ;;  %v5924_v30 = vld [vmem:[%s8462_s0 + $0x5ec] ss:$36 sps:$4 sm:$0xff]  }
   0xb   :  { %2657 = vmatprep.subr.bf16.mxu0 %v6441_v0  ;;  %5859 = vmatprep.subr.bf16.mxu1 %v6441_v0  ;;  %v5929_v31 = vld [vmem:[%s8461_s1 + $0x128] sm:$0xff]   ;;  %v5937_v33 = vld [vmem:[%s8461_s1 + $0x120] sm:$0xff]   ;;  %v5926_v34 = vld [vmem:[%s8462_s0 + $0x90] ss:$36 sps:$4 sm:$0xff]  }
   0xc   :  { %v5936_v32 = vld [vmem:[%s8461_s1 + $0xa8] sm:$0xff]   ;;  %v5944_v35 = vld [vmem:[%s8461_s1 + $0xa0] sm:$0xff]   ;;  %v5932_v38 = vld [vmem:[%s8462_s0 + $0x634] ss:$36 sps:$4 sm:$0xff]  }
   0xd   :  { %v5927_v36 = vld [vmem:[%s8462_s0 + $0x5e8] ss:$36 sps:$4 sm:$0xff]   ;;  %v5930_v37 = vld [vmem:[%s8462_s0 + $0xdc] ss:$36 sps:$4 sm:$0xff]   ;;  %v5959_v41 = vld [vmem:[%s8461_s1 + $0x110] sm:$0xff]  }
   0xe   :  { %2658 = vmatpush1.bf16.msra.mxu0 %v5894_v4  ;;  %5875 = vmatpush1.bf16.msra.mxu1 %v5894_v4  ;;  %v5949_v39 = vld [vmem:[%s8461_s1 + $0x118] sm:$0xff]   ;;  %v5960_v43 = vld [vmem:[%s8461_s1 + $0x90] sm:$0xff]   ;;  %v5938_v45 = vld [vmem:[%s8462_s0 + $0x124] ss:$36 sps:$4 sm:$0xff]  }
   0xf   :  { %2659 = vmatprep.subr.bf16.mxu0 %v6441_v0  ;;  %5860 = vmatprep.subr.bf16.mxu1 %v6441_v0  ;;  %v5952_v40 = vld [vmem:[%s8461_s1 + $0x98] sm:$0xff]   ;;  %v5935_v44 = vld [vmem:[%s8462_s0 + $0x630] ss:$36 sps:$4 sm:$0xff]   ;;  %v5967_v47 = vld [vmem:[%s8461_s1 + $0x108] sm:$0xff]  }
  0x10   :  { %v5934_v42 = vld [vmem:[%s8462_s0 + $0xd8] ss:$36 sps:$4 sm:$0xff]   ;;  %v5968_v48 = vld [vmem:[%s8461_s1 + $0x88] sm:$0xff]   ;;  %v5975_v49 = vld [vmem:[%s8461_s1 + $0x100] sm:$0xff]  }
  0x11   :  { %v5940_v46 = vld [vmem:[%s8462_s0 + $0x67c] ss:$36 sps:$4 sm:$0xff]   ;;  %v5945_v53 = vld [vmem:[%s8462_s0 + $0x16c] ss:$36 sps:$4 sm:$0xff]   ;;  %v5947_v54 = vld [vmem:[%s8462_s0 + $0x6c4] ss:$36 sps:$4 sm:$0xff]  }
  0x12   :  { %2660 = vmatpush1.bf16.msra.mxu0 %v5895_v5  ;;  %5876 = vmatpush1.bf16.msra.mxu1 %v5895_v5  ;;  %v5976_v50 = vld [vmem:[%s8461_s1 + $0x80] sm:$0xff]   ;;  %v5943_v52 = vld [vmem:[%s8462_s0 + $0x678] ss:$36 sps:$4 sm:$0xff]   ;;  %v5950_v57 = vld [vmem:[%s8462_s0 + $0x168] ss:$36 sps:$4 sm:$0xff]  }
  0x13   :  { %2661 = vmatprep.subr.bf16.mxu0 %v6441_v0  ;;  %5861 = vmatprep.subr.bf16.mxu1 %v6441_v0  ;;  %v5942_v51 = vld [vmem:[%s8462_s0 + $0x120] ss:$36 sps:$4 sm:$0xff]   ;;  %v5983_v55 = vld [vmem:[%s8461_s1 + $0x178] sm:$0xff]   ;;  %v5995_v59 = vld [vmem:[%s8461_s1 + $0x170] sm:$0xff]  }
  0x14   :  { %v5988_v56 = vld [vmem:[%s8461_s1 + $0xf8] sm:$0xff]   ;;  %v5951_v58 = vld [vmem:[%s8462_s0 + $0x6c0] ss:$36 sps:$4 sm:$0xff]   ;;  %v5998_v60 = vld [vmem:[%s8461_s1 + $0xf0] sm:$0xff]  }
  0x15   :  { %v5953_v61 = vld [vmem:[%s8462_s0 + $0x1b4] ss:$36 sps:$4 sm:$0xff]   ;;  %v5955_v62 = vld [vmem:[%s8462_s0 + $0x70c] ss:$36 sps:$4 sm:$0xff]   ;;  %v6013_v3 = vld [vmem:[%s8461_s1 + $0xe0] sm:$0xff]  }
  0x16   :  { %2662 = vmatpush1.bf16.msra.mxu0 %v5896_v7  ;;  %5877 = vmatpush1.bf16.msra.mxu1 %v5896_v7  ;;  %v6005_v63 = vld [vmem:[%s8461_s1 + $0x168] sm:$0xff]   ;;  %v5957_v2 = vld [vmem:[%s8462_s0 + $0x1b0] ss:$36 sps:$4 sm:$0xff]   ;;  %v6014_v4 = vld [vmem:[%s8461_s1 + $0x160] sm:$0xff]  }
  0x17   :  { %2663 = vmatprep.subr.bf16.mxu0 %v6441_v0  ;;  %5862 = vmatprep.subr.bf16.mxu1 %v6441_v0  ;;  %v6006_v1 = vld [vmem:[%s8461_s1 + $0xe8] sm:$0xff]   ;;  %v5961_v6 = vld [vmem:[%s8462_s0 + $0x1fc] ss:$36 sps:$4 sm:$0xff]   ;;  %v5963_v7 = vld [vmem:[%s8462_s0 + $0x754] ss:$36 sps:$4 sm:$0xff]  }
  0x18   :  { %v5958_v5 = vld [vmem:[%s8462_s0 + $0x708] ss:$36 sps:$4 sm:$0xff]   ;;  %v6021_v8 = vld [vmem:[%s8461_s1 + $0xd8] sm:$0xff]  }
  0x1a   :  { %2664 = vmatpush1.bf16.msra.mxu0 %v5897_v9  ;;  %5878 = vmatpush1.bf16.msra.mxu1 %v5897_v9  ;;  %v6022_v9 = vld [vmem:[%s8461_s1 + $0x158] sm:$0xff]  }
  0x1b   :  { %2665 = vmatprep.subr.bf16.mxu0 %v6441_v0  ;;  %5863 = vmatprep.subr.bf16.mxu1 %v6441_v0 }
  0x1e   :  { %2666 = vmatpush1.bf16.msra.mxu0 %v5898_v10  ;;  %5879 = vmatpush1.bf16.msra.mxu1 %v5898_v10  ;;  %v6029_v10 = vld [vmem:[%s8461_s1 + $0xd0] sm:$0xff]  }
  0x1f   :  { %2667 = vmatprep.subr.bf16.mxu0 %v6441_v0  ;;  %5864 = vmatprep.subr.bf16.mxu1 %v6441_v0 }
  0x22   :  { %2668 = vmatpush2.bf16.msra.mxu0 %v5899_v11  ;;  %5880 = vmatpush2.bf16.msra.mxu1 %v5899_v11  ;;  %v6030_v11 = vld [vmem:[%s8461_s1 + $0x150] sm:$0xff]  }
  0x23   :  { %2669 = vmatprep.subr.bf16.mxu0 %v6441_v0  ;;  %5865 = vmatprep.subr.bf16.mxu1 %v6441_v0 }
  0x26   :  { %2670 = vmatpush2.bf16.msra.mxu0 %v5900_v12  ;;  %5881 = vmatpush2.bf16.msra.mxu1 %v5900_v12  ;;  %v5965_v12 = vld [vmem:[%s8462_s0 + $0x1f8] ss:$36 sps:$4 sm:$0xff]  }
  0x27   :  { %2671 = vmatprep.subr.bf16.mxu0 %v6441_v0  ;;  %5866 = vmatprep.subr.bf16.mxu1 %v6441_v0 }
  0x2a   :  { %2672 = vmatpush2.bf16.msra.mxu0 %v5901_v13  ;;  %5882 = vmatpush2.bf16.msra.mxu1 %v5901_v13  ;;  %v5966_v13 = vld [vmem:[%s8462_s0 + $0x750] ss:$36 sps:$4 sm:$0xff]  }
  0x2b   :  { %2673 = vmatprep.subr.bf16.mxu0 %v6441_v0  ;;  %5867 = vmatprep.subr.bf16.mxu1 %v6441_v0 }
  0x2e   :  { %2674 = vmatpush2.bf16.msra.mxu0 %v5902_v14  ;;  %5883 = vmatpush2.bf16.msra.mxu1 %v5902_v14  ;;  %v5969_v14 = vld [vmem:[%s8462_s0 + $0x244] ss:$36 sps:$4 sm:$0xff]  }
  0x2f   :  { %2675 = vmatprep.subr.bf16.mxu0 %v6441_v0  ;;  %5868 = vmatprep.subr.bf16.mxu1 %v6441_v0 }
  0x32   :  { %2676 = vmatpush2.bf16.msra.mxu0 %v5903_v15  ;;  %5884 = vmatpush2.bf16.msra.mxu1 %v5903_v15  ;;  %v5971_v15 = vld [vmem:[%s8462_s0 + $0x79c] ss:$36 sps:$4 sm:$0xff]  }
  0x33   :  { %2677 = vmatprep.subr.bf16.mxu0 %v6441_v0  ;;  %5869 = vmatprep.subr.bf16.mxu1 %v6441_v0 }
  0x36   :  { %2678 = vmatpush2.bf16.msra.mxu0 %v5904_v16  ;;  %5885 = vmatpush2.bf16.msra.mxu1 %v5904_v16  ;;  %v6037_v16 = vld [vmem:[%s8461_s1 + $0xc8] sm:$0xff]  }
  0x37   :  { %2679 = vmatprep.subr.bf16.mxu0 %v6441_v0  ;;  %5870 = vmatprep.subr.bf16.mxu1 %v6441_v0 }
  0x3a   :  { %2680 = vmatpush2.bf16.msra.mxu0 %v5905_v17  ;;  %5886 = vmatpush2.bf16.msra.mxu1 %v5905_v17  ;;  %v6038_v17 = vld [vmem:[%s8461_s1 + $0x148] sm:$0xff]  }
  0x3b   :  { %2681 = vmatprep.subr.bf16.mxu0 %v6441_v0  ;;  %5871 = vmatprep.subr.bf16.mxu1 %v6441_v0 }
  0x3e   :  { %2682 = vmatpush2.bf16.msra.mxu0 %v5906_v18  ;;  %5887 = vmatpush2.bf16.msra.mxu1 %v5906_v18  ;;  %v6044_v18 = vld [vmem:[%s8461_s1 + $0xc0] sm:$0xff]  }
  0x3f   :  { %3307 = vmatprep.subr.bf16.mxu0 %v6441_v0  ;;  %2979 = vmatprep.subr.bf16.mxu1 %v6441_v0 }
  0x41   :  { %2684 = vmatmul.mubr.bf16.vlgmr.msra.gmra.mxu0 %v5907_v19  ;;  %2836 = vmatmul.mubr.bf16.vlgmr.msra.gmra.mxu1 %v5910_v20  ;;  %v5973_v19 = vld [vmem:[%s8462_s0 + $0x240] ss:$36 sps:$4 sm:$0xff]   ;;  %v5974_v20 = vld [vmem:[%s8462_s0 + $0x798] ss:$36 sps:$4 sm:$0xff]  }
  0x42   :  { %3308 = vmatpush1.bf16.msra.mxu0 %v5913_v21  ;;  %2691 = vmatprep.mubr.bf16.mxu0 %v5914_v22  ;;  %v6051_v21 = vld [vmem:[%s8461_s1 + $0x140] sm:$0xff]   ;;  %v5977_v22 = vld [vmem:[%s8462_s0 + $0x28c] ss:$36 sps:$4 sm:$0xff]  }
  0x43   :  { %2843 = vmatprep.mubr.bf16.mxu1 %v5916_v23  ;;  %2980 = vmatpush1.bf16.msra.mxu1 %v5918_v24  ;;  %v5979_v23 = vld [vmem:[%s8462_s0 + $0x7e4] ss:$36 sps:$4 sm:$0xff]   ;;  %v8465_v24 = vmov 0.0  }
  0x44   :  { %3309 = vmatprep.subr.bf16.mxu0 %v6441_v0  ;;  %2981 = vmatprep.subr.bf16.mxu1 %v6441_v0 }
  0x46   :  { %3310 = vmatpush1.bf16.msra.mxu0 %v5921_v25  ;;  %v5981_v25 = vld [vmem:[%s8462_s0 + $0x288] ss:$36 sps:$4 sm:$0xff]  }
  0x47   :  { %2982 = vmatpush1.bf16.msra.mxu1 %v5928_v27  ;;  %3311 = vmatprep.subr.bf16.mxu0 %v6441_v0  ;;  %v5984_v27 = vld [vmem:[%s8462_s0 + $0x2d4] ss:$36 sps:$4 sm:$0xff]  }
  0x48   :  { %2983 = vmatprep.subr.bf16.mxu1 %v6441_v0 }
  0x49   :  { %2692 = vmatmul.mubr.bf16.gmra.mxu0 %v5919_v26  ;;  %2844 = vmatmul.mubr.bf16.gmra.mxu1 %v5920_v28  ;;  %v5982_v26 = vld [vmem:[%s8462_s0 + $0x7e0] ss:$36 sps:$4 sm:$0xff]   ;;  %v5986_v28 = vld [vmem:[%s8462_s0 + $0x82c] ss:$36 sps:$4 sm:$0xff]  }
  0x4a   :  { %2699 = vmatprep.mubr.bf16.mxu0 %v5922_v29  ;;  %2851 = vmatprep.mubr.bf16.mxu1 %v5924_v30  ;;  %v5989_v29 = vld [vmem:[%s8462_s0 + $0x2d0] ss:$36 sps:$4 sm:$0xff]   ;;  %v5990_v30 = vld [vmem:[%s8462_s0 + $0x828] ss:$36 sps:$4 sm:$0xff]  }
  0x4b   :  { %3312 = vmatpush1.bf16.msra.mxu0 %v5929_v31  ;;  %2984 = vmatpush1.bf16.msra.mxu1 %v5936_v32  ;;  %v5991_v31 = vld [vmem:[%s8462_s0 + $0x31c] ss:$36 sps:$4 sm:$0xff]   ;;  %v5993_v32 = vld [vmem:[%s8462_s0 + $0x874] ss:$36 sps:$4 sm:$0xff]  }
  0x4c   :  { %3313 = vmatprep.subr.bf16.mxu0 %v6441_v0  ;;  %2985 = vmatprep.subr.bf16.mxu1 %v6441_v0 }
  0x4f   :  { %3314 = vmatpush1.bf16.msra.mxu0 %v5937_v33  ;;  %2986 = vmatpush1.bf16.msra.mxu1 %v5944_v35  ;;  %v5996_v33 = vld [vmem:[%s8462_s0 + $0x318] ss:$36 sps:$4 sm:$0xff]   ;;  %v5999_v35 = vld [vmem:[%s8462_s0 + $0x364] ss:$36 sps:$4 sm:$0xff]  }
  0x50   :  { %3315 = vmatprep.subr.bf16.mxu0 %v6441_v0  ;;  %2987 = vmatprep.subr.bf16.mxu1 %v6441_v0 }
  0x51   :  { %2700 = vmatmul.mubr.bf16.gmra.mxu0 %v5926_v34  ;;  %2852 = vmatmul.mubr.bf16.gmra.mxu1 %v5927_v36  ;;  %v5997_v34 = vld [vmem:[%s8462_s0 + $0x870] ss:$36 sps:$4 sm:$0xff]   ;;  %v6001_v36 = vld [vmem:[%s8462_s0 + $0x8bc] ss:$36 sps:$4 sm:$0xff]  }
  0x52   :  { %2707 = vmatprep.mubr.bf16.mxu0 %v5930_v37  ;;  %2859 = vmatprep.mubr.bf16.mxu1 %v5932_v38  ;;  %v6003_v37 = vld [vmem:[%s8462_s0 + $0x360] ss:$36 sps:$4 sm:$0xff]   ;;  %v6004_v38 = vld [vmem:[%s8462_s0 + $0x8b8] ss:$36 sps:$4 sm:$0xff]  }
  0x53   :  { %3316 = vmatpush1.bf16.msra.mxu0 %v5949_v39  ;;  %2988 = vmatpush1.bf16.msra.mxu1 %v5952_v40  ;;  %v6007_v39 = vld [vmem:[%s8462_s0 + $0x3ac] ss:$36 sps:$4 sm:$0xff]   ;;  %v6009_v40 = vld [vmem:[%s8462_s0 + $0x904] ss:$36 sps:$4 sm:$0xff]  }
  0x54   :  { %3317 = vmatprep.subr.bf16.mxu0 %v6441_v0  ;;  %2989 = vmatprep.subr.bf16.mxu1 %v6441_v0 }
  0x57   :  { %3318 = vmatpush1.bf16.msra.mxu0 %v5959_v41  ;;  %2990 = vmatpush1.bf16.msra.mxu1 %v5960_v43  ;;  %v6011_v41 = vld [vmem:[%s8462_s0 + $0x3a8] ss:$36 sps:$4 sm:$0xff]   ;;  %v6015_v43 = vld [vmem:[%s8462_s0 + $0x3f4] ss:$36 sps:$4 sm:$0xff]  }
  0x58   :  { %3319 = vmatprep.subr.bf16.mxu0 %v6441_v0  ;;  %2991 = vmatprep.subr.bf16.mxu1 %v6441_v0 }
  0x59   :  { %2708 = vmatmul.mubr.bf16.gmra.mxu0 %v5934_v42  ;;  %2860 = vmatmul.mubr.bf16.gmra.mxu1 %v5935_v44  ;;  %v6012_v42 = vld [vmem:[%s8462_s0 + $0x900] ss:$36 sps:$4 sm:$0xff]   ;;  %v6017_v44 = vld [vmem:[%s8462_s0 + $0x94c] ss:$36 sps:$4 sm:$0xff]  }
  0x5a   :  { %2715 = vmatprep.mubr.bf16.mxu0 %v5938_v45  ;;  %2867 = vmatprep.mubr.bf16.mxu1 %v5940_v46  ;;  %v6019_v45 = vld [vmem:[%s8462_s0 + $0x3f0] ss:$36 sps:$4 sm:$0xff]   ;;  %v6020_v46 = vld [vmem:[%s8462_s0 + $0x948] ss:$36 sps:$4 sm:$0xff]  }
  0x5b   :  { %3320 = vmatpush1.bf16.msra.mxu0 %v5967_v47  ;;  %2992 = vmatpush1.bf16.msra.mxu1 %v5968_v48  ;;  %v6023_v47 = vld [vmem:[%s8462_s0 + $0x43c] ss:$36 sps:$4 sm:$0xff]   ;;  %v6025_v48 = vld [vmem:[%s8462_s0 + $0x994] ss:$36 sps:$4 sm:$0xff]  }
  0x5c   :  { %3321 = vmatprep.subr.bf16.mxu0 %v6441_v0  ;;  %2993 = vmatprep.subr.bf16.mxu1 %v6441_v0 }
  0x5f   :  { %3322 = vmatpush1.bf16.msra.mxu0 %v5975_v49  ;;  %2994 = vmatpush1.bf16.msra.mxu1 %v5976_v50  ;;  %v6027_v49 = vld [vmem:[%s8462_s0 + $0x438] ss:$36 sps:$4 sm:$0xff]   ;;  %v6028_v50 = vld [vmem:[%s8462_s0 + $0x990] ss:$36 sps:$4 sm:$0xff]  }
  0x60   :  { %3323 = vmatprep.subr.bf16.mxu0 %v6441_v0  ;;  %2995 = vmatprep.subr.bf16.mxu1 %v6441_v0 }
  0x61   :  { %2716 = vmatmul.mubr.bf16.gmra.mxu0 %v5942_v51  ;;  %2868 = vmatmul.mubr.bf16.gmra.mxu1 %v5943_v52  ;;  %v6031_v51 = vld [vmem:[%s8462_s0 + $0x484] ss:$36 sps:$4 sm:$0xff]   ;;  %v6033_v52 = vld [vmem:[%s8462_s0 + $0x9dc] ss:$36 sps:$4 sm:$0xff]  }
  0x62   :  { %2723 = vmatprep.mubr.bf16.mxu0 %v5945_v53  ;;  %2875 = vmatprep.mubr.bf16.mxu1 %v5947_v54  ;;  %v375_v53 = vld [vmem:[%s8462_s0 + $0xa20] sm:$0xff] }
  0x63   :  { %3324 = vmatpush2.bf16.msra.mxu0 %v5983_v55  ;;  %2996 = vmatpush2.bf16.msra.mxu1 %v5988_v56  ;;  %v6035_v54 = vld [vmem:[%s8462_s0 + $0x480] ss:$36 sps:$4 sm:$0xff]   ;;  %v6036_v55 = vld [vmem:[%s8462_s0 + $0x9d8] ss:$36 sps:$4 sm:$0xff]   ;;  %v6039_v56 = vld [vmem:[%s8462_s0 + $0x4cc] ss:$36 sps:$4 sm:$0xff]  }
  0x64   :  { %3325 = vmatprep.subr.bf16.mxu0 %v6441_v0  ;;  %2997 = vmatprep.subr.bf16.mxu1 %v6441_v0 }
  0x67   :  { %3326 = vmatpush2.bf16.msra.mxu0 %v5995_v59  ;;  %2998 = vmatpush2.bf16.msra.mxu1 %v5998_v60  ;;  %v5205_v59 = vcombine.low %v375_v53, %v375_v53  ;;  %v6045_v60 = vld [vmem:[%s8462_s0 + $0x514] ss:$36 sps:$4 sm:$0xff]  }
  0x68   :  { %3327 = vmatprep.subr.bf16.mxu0 %v6441_v0  ;;  %2999 = vmatprep.subr.bf16.mxu1 %v6441_v0 }
  0x69   :  { %2724 = vmatmul.mubr.bf16.gmra.mxu0 %v5950_v57  ;;  %2876 = vmatmul.mubr.bf16.gmra.mxu1 %v5951_v58  ;;  %v5206_v57 = vcombine.high %v375_v53, %v375_v53  ;;  %v6042_v58 = vld [vmem:[%s8462_s0 + $0x4c8] ss:$36 sps:$4 sm:$0xff]  }
  0x6a   :  { %2731 = vmatprep.mubr.bf16.mxu0 %v5953_v61  ;;  %2883 = vmatprep.mubr.bf16.mxu1 %v5955_v62  ;;  %v6049_v61 = vld [vmem:[%s8462_s0 + $0xc] ss:$36 sps:$4 sm:$0xff]  }
  0x6b   :  { %3328 = vmatpush2.bf16.msra.mxu0 %v6005_v63  ;;  %3000 = vmatpush2.bf16.msra.mxu1 %v6006_v1  ;;  %v6047_v62 = vld [vmem:[%s8462_s0 + $0x8] ss:$36 sps:$4 sm:$0xff]   ;;  %v6050_v63 = vld [vmem:[%s8462_s0 + $0x510] ss:$36 sps:$4 sm:$0xff]  }
  0x6c   :  { %3001 = vmatprep.subr.bf16.mxu1 %v6441_v0  ;;  %3329 = vmatprep.subr.bf16.mxu0 %v6441_v0  ;;  %v6052_v1 = vld [vmem:[%s8462_s0 + $0x54] ss:$36 sps:$4 sm:$0xff]  }
  0x6f   :  { %3002 = vmatpush2.bf16.msra.mxu1 %v6013_v3  ;;  %3330 = vmatpush2.bf16.msra.mxu0 %v6014_v4  ;;  %v6057_v3 = vld [vmem:[%s8461_s1 + $0x1b8] sm:$0xff]   ;;  %v6072_v4 = vld [vmem:[%s8461_s1 + $0x1b0] sm:$0xff]  }
  0x70   :  { %3003 = vmatprep.subr.bf16.mxu1 %v6441_v0  ;;  %3331 = vmatprep.subr.bf16.mxu0 %v6441_v0 }
  0x71   :  { %2732 = vmatmul.mubr.bf16.gmra.mxu0 %v5957_v2  ;;  %2884 = vmatmul.mubr.bf16.gmra.mxu1 %v5958_v5  ;;  %v6056_v2 = vld [vmem:[%s8462_s0 + $0x14] ss:$36 sps:$4 sm:$0xff]  }
  0x72   :  { %2739 = vmatprep.mubr.bf16.mxu0 %v5961_v6  ;;  %2891 = vmatprep.mubr.bf16.mxu1 %v5963_v7  ;;  %v6054_v5 = vld [vmem:[%s8462_s0 + $0x10] ss:$36 sps:$4 sm:$0xff]   ;;  %v6059_v7 = vld [vmem:[%s8461_s1 + $0x238] sm:$0xff]  }
  0x73   :  { %3004 = vmatpush2.bf16.msra.mxu1 %v6021_v8  ;;  %3332 = vmatpush2.bf16.msra.mxu0 %v6022_v9  ;;  %v6058_v6 = vld [vmem:[%s8462_s0 + $0x50] ss:$36 sps:$4 sm:$0xff]   ;;  %v6060_v8 = vld [vmem:[%s8462_s0 + $0x9c] ss:$36 sps:$4 sm:$0xff]  }
  0x74   :  { %3005 = vmatprep.subr.bf16.mxu1 %v6441_v0  ;;  %3333 = vmatprep.subr.bf16.mxu0 %v6441_v0  ;;  %v6062_v9 = vld [vmem:[%s8462_s0 + $0x5c] ss:$36 sps:$4 sm:$0xff]  }
  0x77   :  { %3006 = vmatpush2.bf16.msra.mxu1 %v6029_v10  ;;  %3334 = vmatpush2.bf16.msra.mxu0 %v6030_v11  ;;  %v6085_v10 = vld [vmem:[%s8461_s1 + $0x1a8] sm:$0xff]   ;;  %v6086_v11 = vld [vmem:[%s8461_s1 + $0x230] sm:$0xff]  }
  0x78   :  { %3007 = vmatprep.subr.bf16.mxu1 %v6441_v0  ;;  %3335 = vmatprep.subr.bf16.mxu0 %v6441_v0 }
  0x79   :  { %2740 = vmatmul.mubr.bf16.gmra.mxu0 %v5965_v12  ;;  %2892 = vmatmul.mubr.bf16.gmra.mxu1 %v5966_v13  ;;  %v6103_v12 = vld [vmem:[%s8461_s1 + $0x1a0] sm:$0xff]   ;;  %v6064_v13 = vld [vmem:[%s8462_s0 + $0x98] ss:$36 sps:$4 sm:$0xff]  }
  0x7a   :  { %2747 = vmatprep.mubr.bf16.mxu0 %v5969_v14  ;;  %2899 = vmatprep.mubr.bf16.mxu1 %v5971_v15  ;;  %v6065_v14 = vld [vmem:[%s8462_s0 + $0x58] ss:$36 sps:$4 sm:$0xff]   ;;  %v6066_v15 = vld [vmem:[%s8462_s0 + $0xe4] ss:$36 sps:$4 sm:$0xff]  }
  0x7b   :  { %3008 = vmatpush2.bf16.msra.mxu1 %v6037_v16  ;;  %3336 = vmatpush2.bf16.msra.mxu0 %v6038_v17  ;;  %v6068_v16 = vld [vmem:[%s8462_s0 + $0xa4] ss:$36 sps:$4 sm:$0xff]   ;;  %v6118_v17 = vld [vmem:[%s8461_s1 + $0x198] sm:$0xff]  }
  0x7c   :  { %3009 = vmatprep.subr.bf16.mxu1 %v6441_v0  ;;  %3337 = vmatprep.subr.bf16.mxu0 %v6441_v0 }
  0x7f   :  { %3010 = vmatpush2.bf16.msra.mxu1 %v6044_v18  ;;  %3338 = vmatpush2.bf16.msra.mxu0 %v6051_v21  ;;  %v6119_v18 = vld [vmem:[%s8461_s1 + $0x228] sm:$0xff]   ;;  %v6070_v21 = vld [vmem:[%s8462_s0 + $0xe0] ss:$36 sps:$4 sm:$0xff]  }
  0x80   :  { %3635 = vmatprep.subr.bf16.mxu1 %v6441_v0  ;;  %5692 = vmatprep.subr.bf16.mxu0 %v8465_v24 }
  0x81   :  { %2748 = vmatmul.mubr.bf16.gmra.mxu0 %v5973_v19  ;;  %2900 = vmatmul.mubr.bf16.gmra.mxu1 %v5974_v20  ;;  %v6132_v19 = vld [vmem:[%s8461_s1 + $0x190] sm:$0xff]   ;;  %v6152_v20 = vld [vmem:[%s8461_s1 + $0x220] sm:$0xff]  }
  0x82   :  { %2755 = vmatprep.mubr.bf16.mxu0 %v5977_v22  ;;  %2907 = vmatprep.mubr.bf16.mxu1 %v5979_v23  ;;  %v6071_v22 = vld [vmem:[%s8462_s0 + $0xa0] ss:$36 sps:$4 sm:$0xff]   ;;  %v6073_v23 = vld [vmem:[%s8462_s0 + $0x12c] ss:$36 sps:$4 sm:$0xff]  }
  0x89   :  { %2756 = vmatmul.mubr.bf16.gmra.mxu0 %v5981_v25  ;;  %2908 = vmatmul.mubr.bf16.gmra.mxu1 %v5982_v26  ;;  %v6075_v25 = vld [vmem:[%s8462_s0 + $0xec] ss:$36 sps:$4 sm:$0xff]  }
  0x8a   :  { %2763 = vmatprep.mubr.bf16.mxu0 %v5984_v27  ;;  %2915 = vmatprep.mubr.bf16.mxu1 %v5986_v28  ;;  %v6145_v26 = vld [vmem:[%s8461_s1 + $0x188] sm:$0xff]  }
  0x8b   :  { %v6077_v27 = vld [vmem:[%s8462_s0 + $0x128] ss:$36 sps:$4 sm:$0xff]  }
  0x8c   :  { %v6078_v28 = vld [vmem:[%s8462_s0 + $0xe8] ss:$36 sps:$4 sm:$0xff]  }
  0x91   :  { %2764 = vmatmul.mubr.bf16.gmra.mxu0 %v5989_v29  ;;  %2916 = vmatmul.mubr.bf16.gmra.mxu1 %v5990_v30  ;;  %v6165_v29 = vld [vmem:[%s8461_s1 + $0x180] sm:$0xff]   ;;  %v6079_v30 = vld [vmem:[%s8462_s0 + $0x174] ss:$36 sps:$4 sm:$0xff]  }
  0x92   :  { %2771 = vmatprep.mubr.bf16.mxu0 %v5991_v31  ;;  %2923 = vmatprep.mubr.bf16.mxu1 %v5993_v32  ;;  %v6081_v31 = vld [vmem:[%s8462_s0 + $0x134] ss:$36 sps:$4 sm:$0xff]  }
  0x93   :  { %v6179_v32 = vld [vmem:[%s8461_s1 + $0x218] sm:$0xff]  }
  0x99   :  { %2772 = vmatmul.mubr.bf16.gmra.mxu0 %v5996_v33  ;;  %2924 = vmatmul.mubr.bf16.gmra.mxu1 %v5997_v34  ;;  %v6178_v33 = vld [vmem:[%s8461_s1 + $0x1f8] sm:$0xff]   ;;  %v6083_v34 = vld [vmem:[%s8462_s0 + $0x170] ss:$36 sps:$4 sm:$0xff]  }
  0x9a   :  { %2779 = vmatprep.mubr.bf16.mxu0 %v5999_v35  ;;  %2931 = vmatprep.mubr.bf16.mxu1 %v6001_v36  ;;  %v6084_v35 = vld [vmem:[%s8462_s0 + $0x130] ss:$36 sps:$4 sm:$0xff]   ;;  %v6087_v36 = vld [vmem:[%s8462_s0 + $0x1bc] ss:$36 sps:$4 sm:$0xff]  }
  0xa1   :  { %2780 = vmatmul.mubr.bf16.gmra.mxu0 %v6003_v37  ;;  %2932 = vmatmul.mubr.bf16.gmra.mxu1 %v6004_v38  ;;  %v6089_v37 = vld [vmem:[%s8462_s0 + $0x17c] ss:$36 sps:$4 sm:$0xff]  }
  0xa2   :  { %2787 = vmatprep.mubr.bf16.mxu0 %v6007_v39  ;;  %2939 = vmatprep.mubr.bf16.mxu1 %v6009_v40  ;;  %v6091_v38 = vld [vmem:[%s8462_s0 + $0x1b8] ss:$36 sps:$4 sm:$0xff]   ;;  %v6093_v40 = vld [vmem:[%s8462_s0 + $0x204] ss:$36 sps:$4 sm:$0xff]  }
  0xa3   :  { %v6092_v39 = vld [vmem:[%s8462_s0 + $0x178] ss:$36 sps:$4 sm:$0xff]  }
  0xa9   :  { %2788 = vmatmul.mubr.bf16.gmra.mxu0 %v6011_v41  ;;  %2940 = vmatmul.mubr.bf16.gmra.mxu1 %v6012_v42  ;;  %v6095_v41 = vld [vmem:[%s8462_s0 + $0x1c4] ss:$36 sps:$4 sm:$0xff]   ;;  %v6192_v42 = vld [vmem:[%s8461_s1 + $0x1f0] sm:$0xff]  }
  0xaa   :  { %2795 = vmatprep.mubr.bf16.mxu0 %v6015_v43  ;;  %2947 = vmatprep.mubr.bf16.mxu1 %v6017_v44 }
  0xb1   :  { %2796 = vmatmul.mubr.bf16.gmra.mxu0 %v6019_v45  ;;  %2948 = vmatmul.mubr.bf16.gmra.mxu1 %v6020_v46 }
  0xb2   :  { %2803 = vmatprep.mubr.bf16.mxu0 %v6023_v47  ;;  %2955 = vmatprep.mubr.bf16.mxu1 %v6025_v48 }
  0xb9   :  { %2804 = vmatmul.mubr.bf16.gmra.mxu0 %v6027_v49  ;;  %2956 = vmatmul.mubr.bf16.gmra.mxu1 %v6028_v50  ;;  %v6097_v49 = vld [vmem:[%s8462_s0 + $0x200] ss:$36 sps:$4 sm:$0xff]  }
  0xba   :  { %2811 = vmatprep.mubr.bf16.mxu0 %v6031_v51  ;;  %2963 = vmatprep.mubr.bf16.mxu1 %v6033_v52  ;;  %v6098_v50 = vld [vmem:[%s8462_s0 + $0x1c0] ss:$36 sps:$4 sm:$0xff]   ;;  %v6099_v51 = vld [vmem:[%s8462_s0 + $0x24c] ss:$36 sps:$4 sm:$0xff]  }
  0xbb   :  { %v6101_v52 = vld [vmem:[%s8462_s0 + $0x20c] ss:$36 sps:$4 sm:$0xff]  }
  0xc1   :  { %2812 = vmatmul.mubr.bf16.gmra.mxu0 %v6035_v54  ;;  %2964 = vmatmul.mubr.bf16.gmra.mxu1 %v6036_v55 }
  0xc2   :  { %2819 = vmatprep.mubr.bf16.mxu0 %v6039_v56  ;;  %2971 = vmatprep.mubr.bf16.mxu1 %v5206_v57 }
  0xc9   :  { %2820 = vmatmul.mubr.bf16.gmra.mxu0 %v6042_v58  ;;  %2972 = vmatmul.mubr.bf16.gmra.mxu1 %v5205_v59 }
  0xca   :  { %2827 = vmatprep.mubr.bf16.mxu0 %v6045_v60  ;;  %3011 = vmatprep.mubr.bf16.mxu1 %v6049_v61  ;;  %v6104_v61 = vld [vmem:[%s8462_s0 + $0x248] ss:$36 sps:$4 sm:$0xff]  }
  0xd1   :  { %2828 = vmatmul.mubr.bf16.gmra.mxu0 %v6050_v63  ;;  %3012 = vmatmul.mubr.bf16.vlgmr.msra.gmra.mxu1 %v6047_v62  ;;  %v6105_v62 = vld [vmem:[%s8462_s0 + $0x208] ss:$36 sps:$4 sm:$0xff]   ;;  %v6106_v63 = vld [vmem:[%s8462_s0 + $0x294] ss:$36 sps:$4 sm:$0xff]  }
  0xd2   :  { %3019 = vmatprep.mubr.bf16.mxu1 %v6052_v1  ;;  %3339 = vmatprep.mubr.bf16.mxu0 %v6056_v2  ;;  %v6108_v1 = vld [vmem:[%s8462_s0 + $0x254] ss:$36 sps:$4 sm:$0xff]  }
  0xd3   :  { %3636 = vmatpush1.bf16.msra.mxu1 %v6057_v3 }
  0xd4   :  { %3637 = vmatprep.subr.bf16.mxu1 %v6441_v0 }
  0xd7   :  { %3638 = vmatpush1.bf16.msra.mxu1 %v6072_v4 }
  0xd8   :  { %3639 = vmatprep.subr.bf16.mxu1 %v6441_v0 }
  0xd9   :  { %3020 = vmatmul.mubr.bf16.gmra.mxu1 %v6058_v6  ;;  %3340 = vmatmul.mubr.bf16.vlgmr.msra.gmra.mxu0 %v6054_v5  ;;  %v6211_v6 = vld [vmem:[%s8461_s1 + $0x1e8] sm:$0xff]  }
  0xda   :  { %5693 = vmatpush3.bf16.msra.mxu0 %v6059_v7  ;;  %3027 = vmatprep.mubr.bf16.mxu1 %v6060_v8 }
  0xdb   :  { %3347 = vmatprep.mubr.bf16.mxu0 %v6062_v9  ;;  %3640 = vmatpush1.bf16.msra.mxu1 %v6085_v10  ;;  %v6212_v9 = vld [vmem:[%s8461_s1 + $0x210] sm:$0xff]  }
  0xdc   :  { %5694 = vmatprep.subr.bf16.mxu0 %v8465_v24  ;;  %3641 = vmatprep.subr.bf16.mxu1 %v6441_v0 }
  0xde   :  { %5695 = vmatpush3.bf16.msra.mxu0 %v6086_v11 }
  0xdf   :  { %3642 = vmatpush1.bf16.msra.mxu1 %v6103_v12  ;;  %5696 = vmatprep.subr.bf16.mxu0 %v8465_v24  ;;  %v6110_v12 = vld [vmem:[%s8462_s0 + $0x290] ss:$36 sps:$4 sm:$0xff]  }
  0xe0   :  { %3643 = vmatprep.subr.bf16.mxu1 %v6441_v0 }
  0xe1   :  { %3028 = vmatmul.mubr.bf16.gmra.mxu1 %v6064_v13  ;;  %3348 = vmatmul.mubr.bf16.gmra.mxu0 %v6065_v14  ;;  %v6111_v13 = vld [vmem:[%s8462_s0 + $0x250] ss:$36 sps:$4 sm:$0xff]   ;;  %v6114_v14 = vld [vmem:[%s8462_s0 + $0x2dc] ss:$36 sps:$4 sm:$0xff]  }
  0xe2   :  { %3035 = vmatprep.mubr.bf16.mxu1 %v6066_v15  ;;  %3355 = vmatprep.mubr.bf16.mxu0 %v6068_v16  ;;  %v6117_v15 = vld [vmem:[%s8462_s0 + $0x29c] ss:$36 sps:$4 sm:$0xff]  }
  0xe3   :  { %3644 = vmatpush1.bf16.msra.mxu1 %v6118_v17  ;;  %5697 = vmatpush3.bf16.msra.mxu0 %v6119_v18 }
  0xe4   :  { %3645 = vmatprep.subr.bf16.mxu1 %v6441_v0  ;;  %5698 = vmatprep.subr.bf16.mxu0 %v8465_v24 }
  0xe7   :  { %3646 = vmatpush1.bf16.msra.mxu1 %v6132_v19  ;;  %5699 = vmatpush3.bf16.msra.mxu0 %v6152_v20 }
  0xe8   :  { %3647 = vmatprep.subr.bf16.mxu1 %v6441_v0  ;;  %5700 = vmatprep.subr.bf16.mxu0 %v8465_v24 }
  0xe9   :  { %3036 = vmatmul.mubr.bf16.gmra.mxu1 %v6070_v21  ;;  %3356 = vmatmul.mubr.bf16.gmra.mxu0 %v6071_v22 }
  0xea   :  { %3043 = vmatprep.mubr.bf16.mxu1 %v6073_v23  ;;  %3363 = vmatprep.mubr.bf16.mxu0 %v6075_v25  ;;  %v6112_v25 = vld [vmem:[%s8462_s0 + $0x2d8] ss:$36 sps:$4 sm:$0xff]  }
  0xeb   :  { %3648 = vmatpush1.bf16.msra.mxu1 %v6145_v26  ;;  %5701 = vmatpush3.bf16.msra.mxu0 %v6179_v32  ;;  %v6115_v26 = vld [vmem:[%s8462_s0 + $0x298] ss:$36 sps:$4 sm:$0xff]  }
  0xec   :  { %3649 = vmatprep.subr.bf16.mxu1 %v6441_v0  ;;  %5702 = vmatprep.subr.bf16.mxu0 %v8465_v24 }
  0xef   :  { %3650 = vmatpush1.bf16.msra.mxu1 %v6165_v29  ;;  %5703 = vmatpush3.bf16.msra.mxu0 %v6212_v9  ;;  %v6133_v9 = vld [vmem:[%s8462_s0 + $0x3b0] ss:$36 sps:$4 sm:$0xff]  }
  0xf0   :  { %3651 = vmatprep.subr.bf16.mxu1 %v6441_v0  ;;  %5704 = vmatprep.subr.bf16.mxu0 %v8465_v24 }
  0xf1   :  { %3044 = vmatmul.mubr.bf16.gmra.mxu1 %v6077_v27  ;;  %3364 = vmatmul.mubr.bf16.gmra.mxu0 %v6078_v28  ;;  %v6122_v27 = vld [vmem:[%s8462_s0 + $0x324] ss:$36 sps:$4 sm:$0xff]  }
  0xf2   :  { %3051 = vmatprep.mubr.bf16.mxu1 %v6079_v30  ;;  %3371 = vmatprep.mubr.bf16.mxu0 %v6081_v31  ;;  %v6125_v28 = vld [vmem:[%s8462_s0 + $0x2e4] ss:$36 sps:$4 sm:$0xff]  }
  0xf3   :  { %3652 = vmatpush2.bf16.msra.mxu1 %v6178_v33 }
  0xf4   :  { %3653 = vmatprep.subr.bf16.mxu1 %v6441_v0 }
  0xf7   :  { %3654 = vmatpush2.bf16.msra.mxu1 %v6192_v42 }
  0xf8   :  { %3655 = vmatprep.subr.bf16.mxu1 %v6441_v0 }
  0xf9   :  { %3052 = vmatmul.mubr.bf16.gmra.mxu1 %v6083_v34  ;;  %3372 = vmatmul.mubr.bf16.gmra.mxu0 %v6084_v35  ;;  %v6225_v35 = vld [vmem:[%s8461_s1 + $0x1e0] sm:$0xff]  }
  0xfa   :  { %3059 = vmatprep.mubr.bf16.mxu1 %v6087_v36  ;;  %3379 = vmatprep.mubr.bf16.mxu0 %v6089_v37 }
  0xfb   :  { %3656 = vmatpush2.bf16.msra.mxu1 %v6211_v6 }
  0xfc   :  { %3657 = vmatprep.subr.bf16.mxu1 %v6441_v0 }
  0xff   :  { %3658 = vmatpush2.bf16.msra.mxu1 %v6225_v35  ;;  %v6151_v35 = vld [vmem:[%s8462_s0 + $0x404] ss:$36 sps:$4 sm:$0xff]  }
 0x100   :  { %3659 = vmatprep.subr.bf16.mxu1 %v6441_v0 }
 0x101   :  { %v7036_v43 = vpop.f32.mrf.mxu0  ;;  %v7038_v44 = vpop.f32.mrf.mxu1  ;;  %3060 = vmatmul.mubr.bf16.gmra.mxu1 %v6091_v38  ;;  %3380 = vmatmul.mubr.bf16.gmra.mxu0 %v6092_v39  ;;  %v6120_v38 = vld [vmem:[%s8462_s0 + $0x320] ss:$36 sps:$4 sm:$0xff]  }
 0x102   :  { %3067 = vmatprep.mubr.bf16.mxu1 %v6093_v40  ;;  %3387 = vmatprep.mubr.bf16.mxu0 %v6095_v41  ;;  %v6123_v39 = vld [vmem:[%s8462_s0 + $0x2e0] ss:$36 sps:$4 sm:$0xff]   ;;  %v6128_v40 = vld [vmem:[%s8462_s0 + $0x36c] ss:$36 sps:$4 sm:$0xff]  }
 0x103   :  { %v2687_v45 = vpop.f32.mrf.mxu0  ;;  %v2839_v46 = vpop.f32.mrf.mxu1  ;;  %v6131_v41 = vld [vmem:[%s8462_s0 + $0x32c] ss:$36 sps:$4 sm:$0xff]  }
 0x105   :  { %v7041_v47 = vpop.f32.mrf.mxu0  ;;  %v7043_v48 = vpop.f32.mrf.mxu1 }
 0x107   :  { %v2690_v53 = vpop.f32.mrf.mxu0  ;;  %v2842_v54 = vpop.f32.mrf.mxu1 }
 0x108   :  { %v6126_v54 = vld [vmem:[%s8462_s0 + $0x368] ss:$36 sps:$4 sm:$0xff]  }
 0x109   :  { %v7057_v55 = vpop.f32.mrf.mxu0  ;;  %v7059_v56 = vpop.f32.mrf.mxu1  ;;  %3068 = vmatmul.mubr.bf16.gmra.mxu1 %v6097_v49  ;;  %3388 = vmatmul.mubr.bf16.gmra.mxu0 %v6098_v50 }
 0x10a   :  { %3075 = vmatprep.mubr.bf16.mxu1 %v6099_v51  ;;  %3395 = vmatprep.mubr.bf16.mxu0 %v6101_v52 }
 0x10b   :  { %v2695_v57 = vpop.f32.mrf.mxu0  ;;  %v2847_v58 = vpop.f32.mrf.mxu1 }
 0x10c   :  { %v6129_v57 = vld [vmem:[%s8462_s0 + $0x328] ss:$36 sps:$4 sm:$0xff]   ;;  %v6135_v58 = vld [vmem:[%s8462_s0 + $0x3b4] ss:$36 sps:$4 sm:$0xff]  }
 0x10d   :  { %v7061_v59 = vpop.f32.mrf.mxu0  ;;  %v7063_v60 = vpop.f32.mrf.mxu1 }
 0x10f   :  { %v2698_v2 = vpop.f32.mrf.mxu0  ;;  %v2850_v3 = vpop.f32.mrf.mxu1 }
 0x111   :  { %v7077_v4 = vpop.f32.mrf.mxu0  ;;  %v7079_v5 = vpop.f32.mrf.mxu1  ;;  %3076 = vmatmul.mubr.bf16.gmra.mxu1 %v6104_v61  ;;  %3396 = vmatmul.mubr.bf16.gmra.mxu0 %v6105_v62  ;;  %v6138_v61 = vld [vmem:[%s8462_s0 + $0x374] ss:$36 sps:$4 sm:$0xff]  }
 0x112   :  { %3083 = vmatprep.mubr.bf16.mxu1 %v6106_v63  ;;  %3403 = vmatprep.mubr.bf16.mxu0 %v6108_v1 }
 0x113   :  { %v2703_v7 = vpop.f32.mrf.mxu0  ;;  %v2855_v8 = vpop.f32.mrf.mxu1 }
 0x115   :  { %v7087_v10 = vpop.f32.mrf.mxu0  ;;  %v7089_v11 = vpop.f32.mrf.mxu1 }
 0x117   :  { %v2706_v16 = vpop.f32.mrf.mxu0  ;;  %v2858_v17 = vpop.f32.mrf.mxu1 }
 0x119   :  { %v7105_v18 = vpop.f32.mrf.mxu0  ;;  %v7107_v19 = vpop.f32.mrf.mxu1  ;;  %3084 = vmatmul.mubr.bf16.gmra.mxu1 %v6110_v12  ;;  %3404 = vmatmul.mubr.bf16.gmra.mxu0 %v6111_v13  ;;  %v6136_v12 = vld [vmem:[%s8462_s0 + $0x370] ss:$36 sps:$4 sm:$0xff]   ;;  %v6141_v13 = vld [vmem:[%s8462_s0 + $0x3fc] ss:$36 sps:$4 sm:$0xff]  }
 0x11a   :  { %3091 = vmatprep.mubr.bf16.mxu1 %v6114_v14  ;;  %3411 = vmatprep.mubr.bf16.mxu0 %v6117_v15  ;;  %v6144_v14 = vld [vmem:[%s8462_s0 + $0x3bc] ss:$36 sps:$4 sm:$0xff]  }
 0x11b   :  { %v2711_v20 = vpop.f32.mrf.mxu0  ;;  %v2863_v21 = vpop.f32.mrf.mxu1  ;;  %v6238_v15 = vld [vmem:[%s8461_s1 + $0x1d8] sm:$0xff]  }
 0x11c   :  { %v6245_v20 = vld [vmem:[%s8461_s1 + $0x208] sm:$0xff]   ;;  %3660 = vmatpush2.bf16.msra.mxu1 %v6238_v15 }
 0x11d   :  { %v7109_v22 = vpop.f32.mrf.mxu0  ;;  %v7111_v23 = vpop.f32.mrf.mxu1  ;;  %5705 = vmatpush3.bf16.msra.mxu0 %v6245_v20  ;;  %3661 = vmatprep.subr.bf16.mxu1 %v6441_v0  ;;  %v6161_v20 = vld [vmem:[%s8462_s0 + $0x4d4] ss:$36 sps:$4 sm:$0xff]  }
 0x11e   :  { %5706 = vmatprep.subr.bf16.mxu0 %v8465_v24 }
 0x11f   :  { %v2714_v29 = vpop.f32.mrf.mxu0  ;;  %v2866_v30 = vpop.f32.mrf.mxu1 }
 0x120   :  { %v6139_v30 = vld [vmem:[%s8462_s0 + $0x3f8] ss:$36 sps:$4 sm:$0xff]  }
 0x121   :  { %v7125_v31 = vpop.f32.mrf.mxu0  ;;  %v7127_v32 = vpop.f32.mrf.mxu1  ;;  %3092 = vmatmul.mubr.bf16.gmra.mxu1 %v6112_v25  ;;  %3412 = vmatmul.mubr.bf16.gmra.mxu0 %v6115_v26 }
 0x122   :  { %3099 = vmatprep.mubr.bf16.mxu1 %v6122_v27  ;;  %3419 = vmatprep.mubr.bf16.mxu0 %v6125_v28 }
 0x123   :  { %v2719_v33 = vpop.f32.mrf.mxu0  ;;  %v2871_v34 = vpop.f32.mrf.mxu1 }
 0x124   :  { %v6142_v33 = vld [vmem:[%s8462_s0 + $0x3b8] ss:$36 sps:$4 sm:$0xff]   ;;  %v6148_v34 = vld [vmem:[%s8462_s0 + $0x444] ss:$36 sps:$4 sm:$0xff]  }
 0x125   :  { %v7132_v36 = vpop.f32.mrf.mxu0  ;;  %v7134_v37 = vpop.f32.mrf.mxu1 }
 0x127   :  { %v2722_v42 = vpop.f32.mrf.mxu0  ;;  %v2874_v45 = vpop.f32.mrf.mxu1 }
 0x129   :  { %v7149_v46 = vpop.f32.mrf.mxu0  ;;  %v7151_v49 = vpop.f32.mrf.mxu1  ;;  %3100 = vmatmul.mubr.bf16.gmra.mxu1 %v6120_v38  ;;  %3420 = vmatmul.mubr.bf16.gmra.mxu0 %v6123_v39 }
 0x12a   :  { %8467 = vst [vmem:[#allocation2_spill] sm:$0xff] %v7151_v49  ;;  %3107 = vmatprep.mubr.bf16.mxu1 %v6128_v40  ;;  %3427 = vmatprep.mubr.bf16.mxu0 %v6131_v41 }
 0x12b   :  { %v2727_v50 = vpop.f32.mrf.mxu0  ;;  %v2879_v51 = vpop.f32.mrf.mxu1 }
 0x12d   :  { %v7153_v52 = vpop.f32.mrf.mxu0  ;;  %v7155_v53 = vpop.f32.mrf.mxu1 }
 0x12e   :  { %8468 = vst [vmem:[#allocation3_spill] sm:$0xff] %v7155_v53 }
 0x12f   :  { %v2730_v62 = vpop.f32.mrf.mxu0  ;;  %v2882_v63 = vpop.f32.mrf.mxu1 }
 0x131   :  { %v7169_v1 = vpop.f32.mrf.mxu0  ;;  %v7171_v2 = vpop.f32.mrf.mxu1  ;;  %3108 = vmatmul.mubr.bf16.gmra.mxu1 %v6126_v54  ;;  %3428 = vmatmul.mubr.bf16.gmra.mxu0 %v6129_v57  ;;  %v6146_v54 = vld [vmem:[%s8462_s0 + $0x440] ss:$36 sps:$4 sm:$0xff]  }
 0x132   :  { %8469 = vst [vmem:[#allocation4_spill] sm:$0xff] %v7171_v2  ;;  %3115 = vmatprep.mubr.bf16.mxu1 %v6135_v58  ;;  %3435 = vmatprep.mubr.bf16.mxu0 %v6138_v61  ;;  %v6149_v57 = vld [vmem:[%s8462_s0 + $0x400] ss:$36 sps:$4 sm:$0xff]   ;;  %v6155_v58 = vld [vmem:[%s8462_s0 + $0x48c] ss:$36 sps:$4 sm:$0xff]  }
 0x133   :  { %v2735_v3 = vpop.f32.mrf.mxu0  ;;  %v2887_v6 = vpop.f32.mrf.mxu1  ;;  %v6158_v61 = vld [vmem:[%s8462_s0 + $0x44c] ss:$36 sps:$4 sm:$0xff]  }
 0x135   :  { %v7173_v7 = vpop.f32.mrf.mxu0  ;;  %v7175_v8 = vpop.f32.mrf.mxu1 }
 0x136   :  { %8470 = vst [vmem:[#allocation5_spill] sm:$0xff] %v7175_v8 }
 0x137   :  { %v2738_v16 = vpop.f32.mrf.mxu0  ;;  %v2890_v17 = vpop.f32.mrf.mxu1 }
 0x138   :  { %v6153_v16 = vld [vmem:[%s8462_s0 + $0x488] ss:$36 sps:$4 sm:$0xff]  }
 0x139   :  { %v7195_v21 = vpop.f32.mrf.mxu0  ;;  %v7197_v25 = vpop.f32.mrf.mxu1  ;;  %3116 = vmatmul.mubr.bf16.gmra.mxu1 %v6133_v9  ;;  %3436 = vmatmul.mubr.bf16.gmra.mxu0 %v6136_v12  ;;  %v6258_v9 = vld [vmem:[%s8461_s1 + $0x1d0] sm:$0xff]   ;;  %v6156_v17 = vld [vmem:[%s8462_s0 + $0x448] ss:$36 sps:$4 sm:$0xff]  }
 0x13a   :  { %8471 = vst [vmem:[#allocation6_spill] sm:$0xff] %v7197_v25  ;;  %3123 = vmatprep.mubr.bf16.mxu1 %v6141_v13  ;;  %3443 = vmatprep.mubr.bf16.mxu0 %v6144_v14 }
 0x13b   :  { %v2743_v26 = vpop.f32.mrf.mxu0  ;;  %v2895_v27 = vpop.f32.mrf.mxu1  ;;  %3662 = vmatpush2.bf16.msra.mxu1 %v6258_v9 }
 0x13c   :  { %3663 = vmatprep.subr.bf16.mxu1 %v6441_v0  ;;  %v6164_v26 = vld [vmem:[%s8462_s0 + $0x494] ss:$36 sps:$4 sm:$0xff]  }
 0x13d   :  { %v7201_v28 = vpop.f32.mrf.mxu0  ;;  %v7203_v29 = vpop.f32.mrf.mxu1 }
 0x13e   :  { %8472 = vst [vmem:[#allocation7_spill] sm:$0xff] %v7203_v29 }
 0x13f   :  { %v2746_v38 = vpop.f32.mrf.mxu0  ;;  %v2898_v39 = vpop.f32.mrf.mxu1 }
 0x141   :  { %v7217_v40 = vpop.f32.mrf.mxu0  ;;  %v7219_v41 = vpop.f32.mrf.mxu1  ;;  %3124 = vmatmul.mubr.bf16.gmra.mxu1 %v6139_v30  ;;  %3444 = vmatmul.mubr.bf16.gmra.mxu0 %v6142_v33 }
 0x142   :  { %8473 = vst [vmem:[#allocation8_spill] sm:$0xff] %v7219_v41  ;;  %3131 = vmatprep.mubr.bf16.mxu1 %v6148_v34  ;;  %3451 = vmatprep.mubr.bf16.mxu0 %v6151_v35 }
 0x143   :  { %v2751_v42 = vpop.f32.mrf.mxu0  ;;  %v2903_v45 = vpop.f32.mrf.mxu1 }
 0x144   :  { %v6159_v45 = vld [vmem:[%s8462_s0 + $0x4d0] ss:$36 sps:$4 sm:$0xff]  }
 0x145   :  { %v7221_v50 = vpop.f32.mrf.mxu0  ;;  %v7223_v51 = vpop.f32.mrf.mxu1 }
 0x146   :  { %8474 = vst [vmem:[#allocation9_spill] sm:$0xff] %v7223_v51 }
 0x147   :  { %v2754_v62 = vpop.f32.mrf.mxu0  ;;  %v2906_v63 = vpop.f32.mrf.mxu1 }
 0x149   :  { %v7237_v3 = vpop.f32.mrf.mxu0  ;;  %v7239_v6 = vpop.f32.mrf.mxu1  ;;  %3132 = vmatmul.mubr.bf16.gmra.mxu1 %v6146_v54  ;;  %3452 = vmatmul.mubr.bf16.gmra.mxu0 %v6149_v57  ;;  %v6162_v54 = vld [vmem:[%s8462_s0 + $0x490] ss:$36 sps:$4 sm:$0xff]   ;;  %v6168_v57 = vld [vmem:[%s8462_s0 + $0x51c] ss:$36 sps:$4 sm:$0xff]  }
 0x14a   :  { %8475 = vst [vmem:[#allocation10_spill] sm:$0xff] %v7239_v6  ;;  %3139 = vmatprep.mubr.bf16.mxu1 %v6155_v58  ;;  %3459 = vmatprep.mubr.bf16.mxu0 %v6158_v61  ;;  %v6171_v58 = vld [vmem:[%s8462_s0 + $0x4dc] ss:$36 sps:$4 sm:$0xff]  }
 0x14b   :  { %v2759_v12 = vpop.f32.mrf.mxu0  ;;  %v2911_v13 = vpop.f32.mrf.mxu1 }
 0x14d   :  { %v7244_v14 = vpop.f32.mrf.mxu0  ;;  %v7246_v15 = vpop.f32.mrf.mxu1 }
 0x14e   :  { %8476 = vst [vmem:[#allocation11_spill] sm:$0xff] %v7246_v15  ;;  %v6199_v15 = vld [vmem:[%s8462_s0 + $0x680] ss:$36 sps:$4 sm:$0xff]  }
 0x14f   :  { %v2762_v27 = vpop.f32.mrf.mxu0  ;;  %v2914_v30 = vpop.f32.mrf.mxu1 }
 0x150   :  { %v6169_v27 = vld [vmem:[%s8462_s0 + $0x4d8] ss:$36 sps:$4 sm:$0xff]   ;;  %v6174_v30 = vld [vmem:[%s8462_s0 + $0x564] ss:$36 sps:$4 sm:$0xff]  }
 0x151   :  { %v7261_v33 = vpop.f32.mrf.mxu0  ;;  %v7263_v34 = vpop.f32.mrf.mxu1  ;;  %3140 = vmatmul.mubr.bf16.gmra.mxu1 %v6153_v16  ;;  %3460 = vmatmul.mubr.bf16.gmra.mxu0 %v6156_v17  ;;  %v6271_v16 = vld [vmem:[%s8461_s1 + $0x1c8] sm:$0xff]  }
 0x152   :  { %8477 = vst [vmem:[#allocation12_spill] sm:$0xff] %v7263_v34  ;;  %3147 = vmatprep.mubr.bf16.mxu1 %v6161_v20  ;;  %3467 = vmatprep.mubr.bf16.mxu0 %v6164_v26  ;;  %v6166_v26 = vld [vmem:[%s8462_s0 + $0x518] ss:$36 sps:$4 sm:$0xff]  }
 0x153   :  { %v2767_v35 = vpop.f32.mrf.mxu0  ;;  %v2919_v38 = vpop.f32.mrf.mxu1  ;;  %3664 = vmatpush2.bf16.msra.mxu1 %v6271_v16  ;;  %v6175_v16 = vld [vmem:[%s8462_s0 + $0x520] ss:$36 sps:$4 sm:$0xff]  }
 0x154   :  { %v6177_v35 = vld [vmem:[%s8462_s0 + $0x524] ss:$36 sps:$4 sm:$0xff]   ;;  %3665 = vmatprep.subr.bf16.mxu1 %v6441_v0 }
 0x155   :  { %v7265_v39 = vpop.f32.mrf.mxu0  ;;  %v7267_v42 = vpop.f32.mrf.mxu1  ;;  %v6272_v38 = vld [vmem:[%s8461_s1 + $0x200] sm:$0xff]  }
 0x156   :  { %8478 = vst [vmem:[#allocation13_spill] sm:$0xff] %v7267_v42  ;;  %5707 = vmatpush3.bf16.msra.mxu0 %v6272_v38  ;;  %v6172_v0 = vld [vmem:[%s8462_s0 + $0x560] ss:$36 sps:$4 sm:$0xff]   ;;  %v6193_v42 = vld [vmem:[%s8462_s0 + $0x638] ss:$36 sps:$4 sm:$0xff]  }
 0x157   :  { %v2770_v61 = vpop.f32.mrf.mxu0  ;;  %v2922_v62 = vpop.f32.mrf.mxu1 }
 0x159   :  { %v7281_v63 = vpop.f32.mrf.mxu0  ;;  %v7283_v9 = vpop.f32.mrf.mxu1  ;;  %3148 = vmatmul.mubr.bf16.gmra.mxu1 %v6159_v45  ;;  %3468 = vmatmul.mubr.bf16.gmra.mxu0 %v6162_v54 }
 0x15a   :  { %8479 = vst [vmem:[#allocation14_spill] sm:$0xff] %v7283_v9  ;;  %3155 = vmatprep.mubr.bf16.mxu1 %v6168_v57  ;;  %3475 = vmatprep.mubr.bf16.mxu0 %v6171_v58 }
 0x15b   :  { %v2775_v12 = vpop.f32.mrf.mxu0  ;;  %v2927_v13 = vpop.f32.mrf.mxu1 }
 0x15d   :  { %v7288_v17 = vpop.f32.mrf.mxu0  ;;  %v7290_v20 = vpop.f32.mrf.mxu1 }
 0x15e   :  { %8480 = vst [vmem:[#allocation15_spill] sm:$0xff] %v7290_v20 }
 0x15f   :  { %v2778_v45 = vpop.f32.mrf.mxu0  ;;  %v2930_v54 = vpop.f32.mrf.mxu1 }
 0x161   :  { %v7308_v57 = vpop.f32.mrf.mxu0  ;;  %v7310_v58 = vpop.f32.mrf.mxu1  ;;  %3156 = vmatmul.mubr.bf16.gmra.mxu1 %v6166_v26  ;;  %3476 = vmatmul.mubr.bf16.gmra.mxu0 %v6169_v27  ;;  %v6182_v26 = vld [vmem:[%s8462_s0 + $0x5ac] ss:$36 sps:$4 sm:$0xff]  }
 0x162   :  { %8481 = vst [vmem:[#allocation16_spill] sm:$0xff] %v7310_v58  ;;  %3163 = vmatprep.mubr.bf16.mxu1 %v6174_v30  ;;  %3483 = vmatprep.mubr.bf16.mxu0 %v6177_v35  ;;  %v6185_v27 = vld [vmem:[%s8462_s0 + $0x56c] ss:$36 sps:$4 sm:$0xff]  }
 0x163   :  { %v2783_v61 = vpop.f32.mrf.mxu0  ;;  %v2935_v62 = vpop.f32.mrf.mxu1 }
 0x165   :  { %v7312_v12 = vpop.f32.mrf.mxu0  ;;  %v7314_v13 = vpop.f32.mrf.mxu1 }
 0x166   :  { %8482 = vst [vmem:[#allocation17_spill] sm:$0xff] %v7314_v13  ;;  %v6180_v13 = vld [vmem:[%s8462_s0 + $0x5a8] ss:$36 sps:$4 sm:$0xff]  }
 0x167   :  { %v2786_v30 = vpop.f32.mrf.mxu0  ;;  %v2938_v35 = vpop.f32.mrf.mxu1 }
 0x168   :  { %v6183_v30 = vld [vmem:[%s8462_s0 + $0x568] ss:$36 sps:$4 sm:$0xff]  }
 0x169   :  { %v7328_v38 = vpop.f32.mrf.mxu0  ;;  %v7330_v45 = vpop.f32.mrf.mxu1  ;;  %3164 = vmatmul.mubr.bf16.gmra.mxu1 %v6172_v0  ;;  %3484 = vmatmul.mubr.bf16.gmra.mxu0 %v6175_v16  ;;  %v6188_v0 = vld [vmem:[%s8462_s0 + $0x5f4] ss:$36 sps:$4 sm:$0xff]  }
 0x16a   :  { %8483 = vst [vmem:[#allocation18_spill] sm:$0xff] %v7330_v45  ;;  %3171 = vmatprep.mubr.bf16.mxu1 %v6182_v26  ;;  %3491 = vmatprep.mubr.bf16.mxu0 %v6185_v27  ;;  %v6191_v16 = vld [vmem:[%s8462_s0 + $0x5b4] ss:$36 sps:$4 sm:$0xff]   ;;  %v6285_v26 = vld [vmem:[%s8461_s1 + $0x1c0] sm:$0xff]  }
 0x16b   :  { %v2791_v54 = vpop.f32.mrf.mxu0  ;;  %v2943_v61 = vpop.f32.mrf.mxu1  ;;  %3666 = vmatpush2.bf16.msra.mxu1 %v6285_v26  ;;  %v6189_v26 = vld [vmem:[%s8462_s0 + $0x5b0] ss:$36 sps:$4 sm:$0xff]  }
 0x16d   :  { %v7332_v62 = vpop.f32.mrf.mxu0  ;;  %v7334_v24 = vpop.f32.mrf.mxu1 }
 0x16e   :  { %8484 = vst [vmem:[#allocation19_spill] sm:$0xff] %v7334_v24 }
 0x16f   :  { %v2794_v27 = vpop.f32.mrf.mxu0  ;;  %v2946_v35 = vpop.f32.mrf.mxu1 }
 0x170   :  { %v6186_v27 = vld [vmem:[%s8462_s0 + $0x5f0] ss:$36 sps:$4 sm:$0xff]  }
 0x171   :  { %v7351_v54 = vpop.f32.mrf.mxu0  ;;  %v7353_v61 = vpop.f32.mrf.mxu1  ;;  %3172 = vmatmul.mubr.bf16.gmra.mxu1 %v6180_v13  ;;  %3492 = vmatmul.mubr.bf16.gmra.mxu0 %v6183_v30  ;;  %v6195_v13 = vld [vmem:[%s8462_s0 + $0x63c] ss:$36 sps:$4 sm:$0xff]  }
 0x172   :  { %8485 = vst [vmem:[#allocation20_spill] sm:$0xff] %v7353_v61  ;;  %3179 = vmatprep.mubr.bf16.mxu1 %v6188_v0  ;;  %3499 = vmatprep.mubr.bf16.mxu0 %v6191_v16 }
 0x173   :  { %v2799_v24 = vpop.f32.mrf.mxu0  ;;  %v2951_v45 = vpop.f32.mrf.mxu1 }
 0x174   :  { %v6198_v24 = vld [vmem:[%s8462_s0 + $0x5fc] ss:$36 sps:$4 sm:$0xff]  }
 0x175   :  { %v7355_v58 = vpop.f32.mrf.mxu0  ;;  %v7357_v20 = vpop.f32.mrf.mxu1 }
 0x176   :  { %8486 = vst [vmem:[#allocation21_spill] sm:$0xff] %v7357_v20 }
 0x177   :  { %v2802_v45 = vpop.f32.mrf.mxu0  ;;  %v2954_v30 = vpop.f32.mrf.mxu1 }
 0x178   :  { %v6196_v45 = vld [vmem:[%s8462_s0 + $0x5f8] ss:$36 sps:$4 sm:$0xff]  }
 0x179   :  { %v7371_v0 = vpop.f32.mrf.mxu0  ;;  %v7373_v16 = vpop.f32.mrf.mxu1  ;;  %3180 = vmatmul.mubr.bf16.gmra.mxu1 %v6186_v27  ;;  %3500 = vmatmul.mubr.bf16.gmra.mxu0 %v6189_v26  ;;  %v6201_v27 = vld [vmem:[%s8462_s0 + $0x684] ss:$36 sps:$4 sm:$0xff]  }
 0x17a   :  { %8487 = vst [vmem:[#allocation22_spill] sm:$0xff] %v7373_v16  ;;  %3187 = vmatprep.mubr.bf16.mxu1 %v6195_v13  ;;  %3507 = vmatprep.mubr.bf16.mxu0 %v6198_v24 }
 0x17b   :  { %v2807_v35 = vpop.f32.mrf.mxu0  ;;  %v2959_v20 = vpop.f32.mrf.mxu1 }
 0x17c   :  { %v6204_v20 = vld [vmem:[%s8462_s0 + $0x644] ss:$36 sps:$4 sm:$0xff]  }
 0x17d   :  { %v7375_v61 = vpop.f32.mrf.mxu0  ;;  %v7377_v9 = vpop.f32.mrf.mxu1 }
 0x17e   :  { %8488 = vst [vmem:[#allocation23_spill] sm:$0xff] %v7377_v9 }
 0x17f   :  { %v2810_v26 = vpop.f32.mrf.mxu0  ;;  %v2962_v13 = vpop.f32.mrf.mxu1 }
 0x180   :  { %v6202_v26 = vld [vmem:[%s8462_s0 + $0x640] ss:$36 sps:$4 sm:$0xff]  }
 0x181   :  { %v7391_v24 = vpop.f32.mrf.mxu0  ;;  %v7393_v30 = vpop.f32.mrf.mxu1  ;;  %3188 = vmatmul.mubr.bf16.gmra.mxu1 %v6193_v42  ;;  %3508 = vmatmul.mubr.bf16.gmra.mxu0 %v6196_v45  ;;  %v6207_v42 = vld [vmem:[%s8462_s0 + $0x6cc] ss:$36 sps:$4 sm:$0xff]  }
 0x182   :  { %8489 = vst [vmem:[#allocation24_spill] sm:$0xff] %v7393_v30  ;;  %3195 = vmatprep.mubr.bf16.mxu1 %v6201_v27  ;;  %3515 = vmatprep.mubr.bf16.mxu0 %v6204_v20  ;;  %v7418_v30 = vld [vmem:[%s8463_s2] ss:$0 sm:$0xff] }
 0x183   :  { %v2815_v35 = vpop.f32.mrf.mxu0  ;;  %v2967_v9 = vpop.f32.mrf.mxu1  ;;  %v2689_v25 = vadd.f32 %v7418_v30, %v7041_v47  ;;  %v6224_v47 = vld [vmem:[%s8462_s0 + $0x71c] ss:$36 sps:$4 sm:$0xff]   ;;  %v2697_v53 = vadd.f32 %v7418_v30, %v7061_v59  ;;  %v6231_v59 = vld [vmem:[%s8462_s0 + $0x764] ss:$36 sps:$4 sm:$0xff]  }
 0x184   :  { %v6210_v9 = vld [vmem:[%s8462_s0 + $0x68c] ss:$36 sps:$4 sm:$0xff]  }
 0x185   :  { %v7395_v16 = vpop.f32.mrf.mxu0  ;;  %v7397_v34 = vpop.f32.mrf.mxu1 }
 0x186   :  { %8490 = vst [vmem:[#allocation25_spill] sm:$0xff] %v7397_v34 }
 0x187   :  { %v2818_v45 = vpop.f32.mrf.mxu0  ;;  %v2970_v27 = vpop.f32.mrf.mxu1 }
 0x188   :  { %v6205_v45 = vld [vmem:[%s8462_s0 + $0x6c8] ss:$36 sps:$4 sm:$0xff]  }
 0x189   :  { %v7411_v20 = vpop.f32.mrf.mxu0  ;;  %v7413_v13 = vpop.f32.mrf.mxu1  ;;  %3196 = vmatmul.mubr.bf16.gmra.mxu1 %v6199_v15  ;;  %3516 = vmatmul.mubr.bf16.gmra.mxu0 %v6202_v26  ;;  %v6208_v15 = vld [vmem:[%s8462_s0 + $0x688] ss:$36 sps:$4 sm:$0xff]   ;;  %v6218_v26 = vld [vmem:[%s8462_s0 + $0x6d4] ss:$36 sps:$4 sm:$0xff]  }
 0x18a   :  { %8491 = vst [vmem:[#allocation26_spill] sm:$0xff] %v7413_v13  ;;  %3203 = vmatprep.mubr.bf16.mxu1 %v6207_v42  ;;  %3523 = vmatprep.mubr.bf16.mxu0 %v6210_v9 }
 0x18b   :  { %v2823_v35 = vpop.f32.mrf.mxu0  ;;  %v2975_v34 = vpop.f32.mrf.mxu1 }
 0x18c   :  { %v6215_v34 = vld [vmem:[%s8462_s0 + $0x714] ss:$36 sps:$4 sm:$0xff]  }
 0x18d   :  { %v7420_v6 = vpop.f32.mrf.mxu0  ;;  %v2976_v51 = vpop.f32.mrf.mxu1 }
 0x18e   :  { %v2686_v51 = vadd.f32 %v7418_v30, %v7036_v43  ;;  %v6213_v43 = vld [vmem:[%s8462_s0 + $0x710] ss:$36 sps:$4 sm:$0xff]  }
 0x18f   :  { %v2826_v42 = vpop.f32.mrf.mxu0  ;;  %v2977_v9 = vpop.f32.mrf.mxu1 }
 0x191   :  { %v7436_v27 = vpop.f32.mrf.mxu0  ;;  %v3013_v35 = vpop.f32.mrf.mxu1  ;;  %3204 = vmatmul.mubr.bf16.gmra.mxu1 %v6205_v45  ;;  %3524 = vmatmul.mubr.bf16.gmra.mxu0 %v6208_v15  ;;  %v6216_v45 = vld [vmem:[%s8462_s0 + $0x6d0] ss:$36 sps:$4 sm:$0xff]  }
 0x192   :  { %v3014_v13 = vadd.f32 %v3013_v35, %v2686_v51  ;;  %3211 = vmatprep.mubr.bf16.mxu1 %v6215_v34  ;;  %3531 = vmatprep.mubr.bf16.mxu0 %v6218_v26  ;;  %v2694_v26 = vadd.f32 %v7418_v30, %v7057_v55  ;;  %v6219_v55 = vld [vmem:[%s8462_s0 + $0x758] ss:$36 sps:$4 sm:$0xff]  }
 0x193   :  { %v2831_v41 = vpop.f32.mrf.mxu0  ;;  %v3015_v29 = vpop.f32.mrf.mxu1 }
 0x194   :  { %v6221_v41 = vld [vmem:[%s8462_s0 + $0x75c] ss:$36 sps:$4 sm:$0xff]  }
 0x195   :  { %v7440_v8 = vpop.f32.mrf.mxu0  ;;  %v3016_v42 = vpop.f32.mrf.mxu1 }
 0x196   :  { %v3017_v15 = vadd.f32 %v3016_v42, %v2689_v25 }
 0x197   :  { %v2834_v29 = vpop.f32.mrf.mxu0  ;;  %v3018_v34 = vpop.f32.mrf.mxu1 }
 0x199   :  { %v3021_v9 = vpop.f32.mrf.mxu1  ;;  %3212 = vmatmul.mubr.bf16.gmra.mxu1 %v6213_v43  ;;  %v3341_v51 = vpop.f32.mrf.mxu0  ;;  %3532 = vmatmul.mubr.bf16.gmra.mxu0 %v6216_v45  ;;  %v6222_v43 = vld [vmem:[%s8462_s0 + $0x718] ss:$36 sps:$4 sm:$0xff]  }
 0x19a   :  { %v3022_v35 = vadd.f32 %v3021_v9, %v2694_v26  ;;  %v7456_v2 = vadd.f32 %v3341_v51, %v3014_v13  ;;  %3219 = vmatprep.mubr.bf16.mxu1 %v6221_v41  ;;  %3539 = vmatprep.mubr.bf16.mxu0 %v6224_v47  ;;  %v6228_v41 = vld [vmem:[%s8462_s0 + $0x7a4] ss:$36 sps:$4 sm:$0xff]   ;;  %v2702_v26 = vadd.f32 %v7418_v30, %v7077_v4 }
 0x19b   :  { %v3023_v25 = vpop.f32.mrf.mxu1  ;;  %v3343_v42 = vpop.f32.mrf.mxu0  ;;  %v6226_v4 = vld [vmem:[%s8462_s0 + $0x7a0] ss:$36 sps:$4 sm:$0xff]  }
 0x19c   :  { %v2705_v42 = vadd.f32 %v7418_v30, %v7087_v10  ;;  %v6237_v10 = vld [vmem:[%s8462_s0 + $0x7ac] ss:$36 sps:$4 sm:$0xff]  }
 0x19d   :  { %v3024_v49 = vpop.f32.mrf.mxu1  ;;  %v3344_v29 = vpop.f32.mrf.mxu0 }
 0x19e   :  { %v3025_v45 = vadd.f32 %v3024_v49, %v2697_v53  ;;  %v7466_v13 = vadd.f32 %v3344_v29, %v3017_v15 }
 0x19f   :  { %v3026_v47 = vpop.f32.mrf.mxu1  ;;  %v3346_v34 = vpop.f32.mrf.mxu0 }
 0x1a1   :  { %v3029_v9 = vpop.f32.mrf.mxu1  ;;  %3220 = vmatmul.mubr.bf16.gmra.mxu1 %v6219_v55  ;;  %v3349_v51 = vpop.f32.mrf.mxu0  ;;  %3540 = vmatmul.mubr.bf16.gmra.mxu0 %v6222_v43  ;;  %v6229_v55 = vld [vmem:[%s8462_s0 + $0x760] ss:$36 sps:$4 sm:$0xff]  }
 0x1a2   :  { %v3030_v49 = vadd.f32 %v3029_v9, %v2702_v26  ;;  %v7476_v53 = vadd.f32 %v3349_v51, %v3022_v35  ;;  %3227 = vmatprep.mubr.bf16.mxu1 %v6228_v41  ;;  %3547 = vmatprep.mubr.bf16.mxu0 %v6231_v59  ;;  %v6234_v41 = vld [vmem:[%s8462_s0 + $0x7ec] ss:$36 sps:$4 sm:$0xff]   ;;  %v2710_v26 = vadd.f32 %v7418_v30, %v7105_v18 }
 0x1a3   :  { %v3031_v15 = vpop.f32.mrf.mxu1  ;;  %v3351_v25 = vpop.f32.mrf.mxu0  ;;  %v6232_v18 = vld [vmem:[%s8462_s0 + $0x7e8] ss:$36 sps:$4 sm:$0xff]  }
 0x1a5   :  { %v3032_v29 = vpop.f32.mrf.mxu1  ;;  %v3352_v47 = vpop.f32.mrf.mxu0 }
 0x1a6   :  { %v3033_v43 = vadd.f32 %v3032_v29, %v2705_v42  ;;  %v7486_v35 = vadd.f32 %v3352_v47, %v3025_v45  ;;  %v2713_v29 = vadd.f32 %v7418_v30, %v7109_v22  ;;  %v6244_v22 = vld [vmem:[%s8462_s0 + $0x7f4] ss:$36 sps:$4 sm:$0xff]  }
 0x1a7   :  { %v3034_v59 = vpop.f32.mrf.mxu1  ;;  %v3354_v34 = vpop.f32.mrf.mxu0 }
 0x1a9   :  { %v3037_v9 = vpop.f32.mrf.mxu1  ;;  %3228 = vmatmul.mubr.bf16.gmra.mxu1 %v6226_v4  ;;  %v3357_v51 = vpop.f32.mrf.mxu0  ;;  %3548 = vmatmul.mubr.bf16.gmra.mxu0 %v6229_v55  ;;  %v6235_v4 = vld [vmem:[%s8462_s0 + $0x7a8] ss:$36 sps:$4 sm:$0xff]  }
 0x1aa   :  { %v3038_v15 = vadd.f32 %v3037_v9, %v2710_v26  ;;  %v7496_v45 = vadd.f32 %v3357_v51, %v3030_v49  ;;  %3235 = vmatprep.mubr.bf16.mxu1 %v6234_v41  ;;  %3555 = vmatprep.mubr.bf16.mxu0 %v6237_v10  ;;  %v6241_v41 = vld [vmem:[%s8462_s0 + $0x834] ss:$36 sps:$4 sm:$0xff]   ;;  %v2718_v26 = vadd.f32 %v7418_v30, %v7125_v31 }
 0x1ab   :  { %v3039_v25 = vpop.f32.mrf.mxu1  ;;  %v3359_v42 = vpop.f32.mrf.mxu0  ;;  %v6239_v31 = vld [vmem:[%s8462_s0 + $0x830] ss:$36 sps:$4 sm:$0xff]  }
 0x1ad   :  { %v3040_v47 = vpop.f32.mrf.mxu1  ;;  %v3360_v59 = vpop.f32.mrf.mxu0 }
 0x1ae   :  { %v3041_v55 = vadd.f32 %v3040_v47, %v2713_v29  ;;  %v7506_v49 = vadd.f32 %v3360_v59, %v3033_v43  ;;  %v2721_v47 = vadd.f32 %v7418_v30, %v7132_v36  ;;  %v6251_v36 = vld [vmem:[%s8462_s0 + $0x83c] ss:$36 sps:$4 sm:$0xff]  }
 0x1af   :  { %v3042_v10 = vpop.f32.mrf.mxu1  ;;  %v3362_v34 = vpop.f32.mrf.mxu0 }
 0x1b1   :  { %v3045_v9 = vpop.f32.mrf.mxu1  ;;  %3236 = vmatmul.mubr.bf16.gmra.mxu1 %v6232_v18  ;;  %v3365_v51 = vpop.f32.mrf.mxu0  ;;  %3556 = vmatmul.mubr.bf16.gmra.mxu0 %v6235_v4  ;;  %v6242_v18 = vld [vmem:[%s8462_s0 + $0x7f0] ss:$36 sps:$4 sm:$0xff]  }
 0x1b2   :  { %v3046_v25 = vadd.f32 %v3045_v9, %v2718_v26  ;;  %v7516_v43 = vadd.f32 %v3365_v51, %v3038_v15  ;;  %3243 = vmatprep.mubr.bf16.mxu1 %v6241_v41  ;;  %3563 = vmatprep.mubr.bf16.mxu0 %v6244_v22  ;;  %v6248_v41 = vld [vmem:[%s8462_s0 + $0x87c] ss:$36 sps:$4 sm:$0xff]   ;;  %v2726_v26 = vadd.f32 %v7418_v30, %v7149_v46 }
 0x1b3   :  { %v3047_v42 = vpop.f32.mrf.mxu1  ;;  %v3367_v29 = vpop.f32.mrf.mxu0  ;;  %v6246_v46 = vld [vmem:[%s8462_s0 + $0x878] ss:$36 sps:$4 sm:$0xff]  }
 0x1b5   :  { %v3048_v59 = vpop.f32.mrf.mxu1  ;;  %v3368_v10 = vpop.f32.mrf.mxu0 }
 0x1b6   :  { %v3049_v4 = vadd.f32 %v3048_v59, %v2721_v47  ;;  %v7526_v15 = vadd.f32 %v3368_v10, %v3041_v55  ;;  %v2729_v59 = vadd.f32 %v7418_v30, %v7153_v52  ;;  %v6257_v52 = vld [vmem:[%s8462_s0 + $0x884] ss:$36 sps:$4 sm:$0xff]  }
 0x1b7   :  { %v3050_v22 = vpop.f32.mrf.mxu1  ;;  %v3370_v34 = vpop.f32.mrf.mxu0 }
 0x1b9   :  { %v3053_v9 = vpop.f32.mrf.mxu1  ;;  %3244 = vmatmul.mubr.bf16.gmra.mxu1 %v6239_v31  ;;  %v3373_v51 = vpop.f32.mrf.mxu0  ;;  %3564 = vmatmul.mubr.bf16.gmra.mxu0 %v6242_v18  ;;  %v6249_v31 = vld [vmem:[%s8462_s0 + $0x838] ss:$36 sps:$4 sm:$0xff]  }
 0x1ba   :  { %v3054_v42 = vadd.f32 %v3053_v9, %v2726_v26  ;;  %v7536_v55 = vadd.f32 %v3373_v51, %v3046_v25  ;;  %3251 = vmatprep.mubr.bf16.mxu1 %v6248_v41  ;;  %3571 = vmatprep.mubr.bf16.mxu0 %v6251_v36  ;;  %v6254_v41 = vld [vmem:[%s8462_s0 + $0x8c4] ss:$36 sps:$4 sm:$0xff]   ;;  %v2734_v26 = vadd.f32 %v7418_v30, %v7169_v1 }
 0x1bb   :  { %v3055_v29 = vpop.f32.mrf.mxu1  ;;  %v3375_v47 = vpop.f32.mrf.mxu0  ;;  %v6252_v1 = vld [vmem:[%s8462_s0 + $0x8c0] ss:$36 sps:$4 sm:$0xff]  }
 0x1bd   :  { %v3056_v10 = vpop.f32.mrf.mxu1  ;;  %v3376_v22 = vpop.f32.mrf.mxu0 }
 0x1be   :  { %v3057_v18 = vadd.f32 %v3056_v10, %v2729_v59  ;;  %v7546_v25 = vadd.f32 %v3376_v22, %v3049_v4  ;;  %v2737_v10 = vadd.f32 %v7418_v30, %v7173_v7  ;;  %v6264_v7 = vld [vmem:[%s8462_s0 + $0x8cc] ss:$36 sps:$4 sm:$0xff]  }
 0x1bf   :  { %v3058_v36 = vpop.f32.mrf.mxu1  ;;  %v3378_v34 = vpop.f32.mrf.mxu0 }
 0x1c1   :  { %v3061_v9 = vpop.f32.mrf.mxu1  ;;  %3252 = vmatmul.mubr.bf16.gmra.mxu1 %v6246_v46  ;;  %v3381_v51 = vpop.f32.mrf.mxu0  ;;  %3572 = vmatmul.mubr.bf16.gmra.mxu0 %v6249_v31  ;;  %v6255_v46 = vld [vmem:[%s8462_s0 + $0x880] ss:$36 sps:$4 sm:$0xff]  }
 0x1c2   :  { %v3062_v29 = vadd.f32 %v3061_v9, %v2734_v26  ;;  %v7556_v4 = vadd.f32 %v3381_v51, %v3054_v42  ;;  %3259 = vmatprep.mubr.bf16.mxu1 %v6254_v41  ;;  %3579 = vmatprep.mubr.bf16.mxu0 %v6257_v52  ;;  %v6261_v41 = vld [vmem:[%s8462_s0 + $0x90c] ss:$36 sps:$4 sm:$0xff]   ;;  %v2742_v26 = vadd.f32 %v7418_v30, %v7195_v21 }
 0x1c3   :  { %v3063_v47 = vpop.f32.mrf.mxu1  ;;  %v3383_v59 = vpop.f32.mrf.mxu0  ;;  %v6259_v21 = vld [vmem:[%s8462_s0 + $0x908] ss:$36 sps:$4 sm:$0xff]  }
 0x1c5   :  { %v3064_v22 = vpop.f32.mrf.mxu1  ;;  %v3384_v36 = vpop.f32.mrf.mxu0 }
 0x1c6   :  { %v3065_v31 = vadd.f32 %v3064_v22, %v2737_v10  ;;  %v7566_v42 = vadd.f32 %v3384_v36, %v3057_v18  ;;  %v2745_v22 = vadd.f32 %v7418_v30, %v7201_v28  ;;  %v6270_v28 = vld [vmem:[%s8462_s0 + $0x914] ss:$36 sps:$4 sm:$0xff]  }
 0x1c7   :  { %v3066_v52 = vpop.f32.mrf.mxu1  ;;  %v3386_v34 = vpop.f32.mrf.mxu0 }
 0x1c9   :  { %v3069_v9 = vpop.f32.mrf.mxu1  ;;  %3260 = vmatmul.mubr.bf16.gmra.mxu1 %v6252_v1  ;;  %v3389_v51 = vpop.f32.mrf.mxu0  ;;  %3580 = vmatmul.mubr.bf16.gmra.mxu0 %v6255_v46  ;;  %v6262_v1 = vld [vmem:[%s8462_s0 + $0x8c8] ss:$36 sps:$4 sm:$0xff]  }
 0x1ca   :  { %v3070_v47 = vadd.f32 %v3069_v9, %v2742_v26  ;;  %v7576_v18 = vadd.f32 %v3389_v51, %v3062_v29  ;;  %3267 = vmatprep.mubr.bf16.mxu1 %v6261_v41  ;;  %3587 = vmatprep.mubr.bf16.mxu0 %v6264_v7  ;;  %v6267_v41 = vld [vmem:[%s8462_s0 + $0x954] ss:$36 sps:$4 sm:$0xff]   ;;  %v2750_v26 = vadd.f32 %v7418_v30, %v7217_v40 }
 0x1cb   :  { %v3071_v59 = vpop.f32.mrf.mxu1  ;;  %v3391_v10 = vpop.f32.mrf.mxu0  ;;  %v6265_v40 = vld [vmem:[%s8462_s0 + $0x950] ss:$36 sps:$4 sm:$0xff]  }
 0x1cd   :  { %v3072_v36 = vpop.f32.mrf.mxu1  ;;  %v3392_v52 = vpop.f32.mrf.mxu0 }
 0x1ce   :  { %v3073_v46 = vadd.f32 %v3072_v36, %v2745_v22  ;;  %v7586_v29 = vadd.f32 %v3392_v52, %v3065_v31  ;;  %v2753_v36 = vadd.f32 %v7418_v30, %v7221_v50  ;;  %v6278_v50 = vld [vmem:[%s8462_s0 + $0x95c] ss:$36 sps:$4 sm:$0xff]  }
 0x1cf   :  { %v3074_v7 = vpop.f32.mrf.mxu1  ;;  %v3394_v34 = vpop.f32.mrf.mxu0 }
 0x1d1   :  { %v3077_v9 = vpop.f32.mrf.mxu1  ;;  %3268 = vmatmul.mubr.bf16.gmra.mxu1 %v6259_v21  ;;  %v3397_v51 = vpop.f32.mrf.mxu0  ;;  %3588 = vmatmul.mubr.bf16.gmra.mxu0 %v6262_v1  ;;  %v6268_v21 = vld [vmem:[%s8462_s0 + $0x910] ss:$36 sps:$4 sm:$0xff]  }
 0x1d2   :  { %v3078_v59 = vadd.f32 %v3077_v9, %v2750_v26  ;;  %v7596_v31 = vadd.f32 %v3397_v51, %v3070_v47  ;;  %3275 = vmatprep.mubr.bf16.mxu1 %v6267_v41  ;;  %3595 = vmatprep.mubr.bf16.mxu0 %v6270_v28  ;;  %v6275_v41 = vld [vmem:[%s8462_s0 + $0x99c] ss:$36 sps:$4 sm:$0xff]   ;;  %v2758_v26 = vadd.f32 %v7418_v30, %v7237_v3 }
 0x1d3   :  { %v3079_v10 = vpop.f32.mrf.mxu1  ;;  %v3399_v22 = vpop.f32.mrf.mxu0  ;;  %v6273_v3 = vld [vmem:[%s8462_s0 + $0x998] ss:$36 sps:$4 sm:$0xff]  }
 0x1d5   :  { %v3080_v52 = vpop.f32.mrf.mxu1  ;;  %v3400_v7 = vpop.f32.mrf.mxu0 }
 0x1d6   :  { %v3081_v1 = vadd.f32 %v3080_v52, %v2753_v36  ;;  %v7606_v47 = vadd.f32 %v3400_v7, %v3073_v46  ;;  %v2761_v52 = vadd.f32 %v7418_v30, %v7244_v14  ;;  %v6284_v14 = vld [vmem:[%s8462_s0 + $0x9a4] ss:$36 sps:$4 sm:$0xff]  }
 0x1d7   :  { %v3082_v28 = vpop.f32.mrf.mxu1  ;;  %v3402_v34 = vpop.f32.mrf.mxu0 }
 0x1d9   :  { %v3085_v9 = vpop.f32.mrf.mxu1  ;;  %3276 = vmatmul.mubr.bf16.gmra.mxu1 %v6265_v40  ;;  %v3405_v51 = vpop.f32.mrf.mxu0  ;;  %3596 = vmatmul.mubr.bf16.gmra.mxu0 %v6268_v21  ;;  %v6276_v40 = vld [vmem:[%s8462_s0 + $0x958] ss:$36 sps:$4 sm:$0xff]  }
 0x1da   :  { %v3086_v10 = vadd.f32 %v3085_v9, %v2758_v26  ;;  %v7616_v46 = vadd.f32 %v3405_v51, %v3078_v59  ;;  %3283 = vmatprep.mubr.bf16.mxu1 %v6275_v41  ;;  %3603 = vmatprep.mubr.bf16.mxu0 %v6278_v50  ;;  %v6281_v41 = vld [vmem:[%s8462_s0 + $0x9e4] ss:$36 sps:$4 sm:$0xff]   ;;  %v2766_v26 = vadd.f32 %v7418_v30, %v7261_v33 }
 0x1db   :  { %v3087_v22 = vpop.f32.mrf.mxu1  ;;  %v3407_v36 = vpop.f32.mrf.mxu0 }
 0x1dd   :  { %v3088_v7 = vpop.f32.mrf.mxu1  ;;  %v3408_v28 = vpop.f32.mrf.mxu0 }
 0x1de   :  { %v3089_v21 = vadd.f32 %v3088_v7, %v2761_v52  ;;  %v7626_v59 = vadd.f32 %v3408_v28, %v3081_v1  ;;  %v376_v7 = vld [vmem:[%s8462_s0 + $0xa28] sm:$0xff]  ;;  %v2769_v28 = vadd.f32 %v7418_v30, %v7265_v39 }
 0x1df   :  { %v3090_v50 = vpop.f32.mrf.mxu1  ;;  %v3410_v34 = vpop.f32.mrf.mxu0 }
 0x1e0   :  { %v6290_v34 = vld [vmem:[%s8462_s0 + $0x9ec] ss:$36 sps:$4 sm:$0xff]  }
 0x1e1   :  { %v3093_v9 = vpop.f32.mrf.mxu1  ;;  %3284 = vmatmul.mubr.bf16.gmra.mxu1 %v6273_v3  ;;  %v3413_v51 = vpop.f32.mrf.mxu0  ;;  %3604 = vmatmul.mubr.bf16.gmra.mxu0 %v6276_v40  ;;  %v6279_v3 = vld [vmem:[%s8462_s0 + $0x9e0] ss:$36 sps:$4 sm:$0xff]  }
 0x1e2   :  { %v3094_v22 = vadd.f32 %v3093_v9, %v2766_v26  ;;  %v7636_v1 = vadd.f32 %v3413_v51, %v3086_v10  ;;  %3291 = vmatprep.mubr.bf16.mxu1 %v6281_v41  ;;  %3611 = vmatprep.mubr.bf16.mxu0 %v6284_v14  ;;  %v6282_v10 = vld [vmem:[%s8462_s0 + $0x9a0] ss:$36 sps:$4 sm:$0xff]   ;;  %v5208_v14 = vcombine.high %v376_v7, %v376_v7 }
 0x1e3   :  { %v3095_v36 = vpop.f32.mrf.mxu1  ;;  %v3415_v52 = vpop.f32.mrf.mxu0  ;;  %v2774_v9 = vadd.f32 %v7418_v30, %v7281_v63 }
 0x1e4   :  { %8492 = vst [vmem:[#allocation27_spill] sm:$0xff] %v7636_v1 }
 0x1e5   :  { %v3096_v50 = vpop.f32.mrf.mxu1  ;;  %v3416_v33 = vpop.f32.mrf.mxu0 }
 0x1e6   :  { %v3097_v40 = vadd.f32 %v3096_v50, %v2769_v28  ;;  %v7649_v41 = vadd.f32 %v3416_v33, %v3089_v21  ;;  %v377_v50 = vld [vmem:[%s8462_s0 + $0xa30] sm:$0xff]  ;;  %v2777_v33 = vadd.f32 %v7418_v30, %v7288_v17  ;;  %v2782_v17 = vadd.f32 %v7418_v30, %v7308_v57  ;;  %v6293_v57 = vld [vmem:[%s8462_s0 + $0x18] ss:$36 sps:$4 sm:$0xff]  }
 0x1e7   :  { %v3098_v26 = vpop.f32.mrf.mxu1  ;;  %v3418_v39 = vpop.f32.mrf.mxu0 }
 0x1e8   :  { %v5207_v39 = vcombine.low %v376_v7, %v376_v7 }
 0x1e9   :  { %v3101_v51 = vpop.f32.mrf.mxu1  ;;  %3292 = vmatmul.mubr.bf16.gmra.mxu1 %v6279_v3  ;;  %v3421_v36 = vpop.f32.mrf.mxu0  ;;  %3612 = vmatmul.mubr.bf16.gmra.mxu0 %v6282_v10  ;;  %v6288_v3 = vld [vmem:[%s8462_s0 + $0x9e8] ss:$36 sps:$4 sm:$0xff]  }
 0x1ea   :  { %v3102_v52 = vadd.f32 %v3101_v51, %v2774_v9  ;;  %v7656_v1 = vadd.f32 %v3421_v36, %v3094_v22  ;;  %3299 = vmatprep.mubr.bf16.mxu1 %v5208_v14  ;;  %3619 = vmatprep.mubr.bf16.mxu0 %v6290_v34  ;;  %v5210_v14 = vcombine.high %v377_v50, %v377_v50  ;;  %v6295_v34 = vld [vmem:[%s8462_s0 + $0x1c] ss:$36 sps:$4 sm:$0xff]  }
 0x1eb   :  { %v3103_v21 = vpop.f32.mrf.mxu1  ;;  %v3423_v28 = vpop.f32.mrf.mxu0 }
 0x1ed   :  { %v3104_v26 = vpop.f32.mrf.mxu1  ;;  %v3424_v63 = vpop.f32.mrf.mxu0 }
 0x1ee   :  { %v3105_v22 = vadd.f32 %v3104_v26, %v2777_v33  ;;  %v7666_v10 = vadd.f32 %v3424_v63, %v3097_v40  ;;  %v2785_v26 = vadd.f32 %v7418_v30, %v7312_v12 }
 0x1ef   :  { %v3106_v9 = vpop.f32.mrf.mxu1  ;;  %v3426_v51 = vpop.f32.mrf.mxu0 }
 0x1f0   :  { %8493 = vst [vmem:[#allocation28_spill] sm:$0xff] %v7666_v10  ;;  %v5209_v51 = vcombine.low %v377_v50, %v377_v50 }
 0x1f1   :  { %v3109_v36 = vpop.f32.mrf.mxu1  ;;  %3300 = vmatmul.mubr.bf16.gmra.mxu1 %v5207_v39  ;;  %v3429_v7 = vpop.f32.mrf.mxu0  ;;  %3620 = vmatmul.mubr.bf16.gmra.mxu0 %v6288_v3 }
 0x1f2   :  { %v3110_v21 = vadd.f32 %v3109_v36, %v2782_v17  ;;  %v7673_v28 = vadd.f32 %v3429_v7, %v3102_v52  ;;  %3627 = vmatprep.mubr.bf16.mxu0 %v5210_v14  ;;  %3667 = vmatprep.mubr.bf16.mxu1 %v6295_v34  ;;  %v6298_v52 = vld [vmem:[%s8462_s0 + $0x64] ss:$36 sps:$4 sm:$0xff]   ;;  %v2790_v34 = vadd.f32 %v7418_v30, %v7328_v38 }
 0x1f3   :  { %v3111_v40 = vpop.f32.mrf.mxu1  ;;  %v3431_v33 = vpop.f32.mrf.mxu0  ;;  %v6296_v38 = vld [vmem:[%s8462_s0 + $0x60] ss:$36 sps:$4 sm:$0xff]  }
 0x1f4   :  { %v2793_v33 = vadd.f32 %v7418_v30, %v7332_v62  ;;  %v2798_v62 = vadd.f32 %v7418_v30, %v7351_v54  ;;  %v6300_v54 = vld [vmem:[%s8462_s0 + $0xa8] ss:$36 sps:$4 sm:$0xff]  }
 0x1f5   :  { %v3112_v63 = vpop.f32.mrf.mxu1  ;;  %v3432_v9 = vpop.f32.mrf.mxu0 }
 0x1f6   :  { %v3113_v39 = vadd.f32 %v3112_v63, %v2785_v26  ;;  %v7680_v10 = vadd.f32 %v3432_v9, %v3105_v22  ;;  %v8494_v22 = vmov 0.0  }
 0x1f7   :  { %v3114_v3 = vpop.f32.mrf.mxu1  ;;  %v3434_v14 = vpop.f32.mrf.mxu0 }
 0x1f9   :  { %v3117_v12 = vpop.f32.mrf.mxu1  ;;  %v3437_v17 = vpop.f32.mrf.mxu0  ;;  %3628 = vmatmul.mubr.bf16.gmra.mxu0 %v5209_v51  ;;  %3668 = vmatmul.mubr.bf16.vlgmr.msra.gmra.mxu1 %v6293_v57  ;;  %v6302_v57 = vld [vmem:[%s8462_s0 + $0xac] ss:$36 sps:$4 sm:$0xff]  }
 0x1fa   :  { %v3118_v50 = vadd.f32 %v3117_v12, %v2790_v34  ;;  %v7687_v36 = vadd.f32 %v3437_v17, %v3110_v21  ;;  %3675 = vmatprep.mubr.bf16.mxu1 %v6298_v52  ;;  %5708 = vmatprep.mubr.msk.bf16.mxu0 %vm6443_vm0, %v8494_v22  ;;  %v6299_v21 = vld [vmem:[%s8462_s0 + $0x20] ss:$36 sps:$4 sm:$0xff]  }
 0x1fb   :  { %v3119_v7 = vpop.f32.mrf.mxu1  ;;  %v3439_v40 = vpop.f32.mrf.mxu0 }
 0x1fc   :  { %v2801_v40 = vadd.f32 %v7418_v30, %v7355_v58  ;;  %v2806_v58 = vadd.f32 %v7418_v30, %v7371_v0  ;;  %v6304_v0 = vld [vmem:[%s8462_s0 + $0xf0] ss:$36 sps:$4 sm:$0xff]  }
 0x1fd   :  { %v3120_v26 = vpop.f32.mrf.mxu1  ;;  %v3440_v63 = vpop.f32.mrf.mxu0 }
 0x1fe   :  { %v3121_v9 = vadd.f32 %v3120_v26, %v2793_v33  ;;  %v7699_v51 = vadd.f32 %v3440_v63, %v3113_v39 }
 0x1ff   :  { %v3122_v52 = vpop.f32.mrf.mxu1  ;;  %v3442_v3 = vpop.f32.mrf.mxu0 }
 0x201   :  { %v3125_v14 = vpop.f32.mrf.mxu1  ;;  %v3445_v34 = vpop.f32.mrf.mxu0  ;;  %3676 = vmatmul.mubr.bf16.gmra.mxu1 %v6296_v38  ;;  %5709 = vmatmul.mubr.bf16.vlgmr.msra.gmra.mxu0 %v6299_v21  ;;  %v6306_v21 = vld [vmem:[%s8462_s0 + $0xf4] ss:$36 sps:$4 sm:$0xff]  }
 0x202   :  { %v3126_v12 = vadd.f32 %v3125_v14, %v2798_v62  ;;  %v7706_v17 = vadd.f32 %v3445_v34, %v3118_v50  ;;  %3683 = vmatprep.mubr.bf16.mxu1 %v6302_v57  ;;  %5712 = vmatprep.mubr.msk.bf16.mxu0 %vm6443_vm0, %v8494_v22  ;;  %v6303_v50 = vld [vmem:[%s8462_s0 + $0x68] ss:$36 sps:$4 sm:$0xff]  }
 0x203   :  { %v3127_v39 = vpop.f32.mrf.mxu1  ;;  %v3447_v7 = vpop.f32.mrf.mxu0 }
 0x204   :  { %v2809_v7 = vadd.f32 %v7418_v30, %v7375_v61  ;;  %v2814_v61 = vadd.f32 %v7418_v30, %v7391_v24  ;;  %v6308_v24 = vld [vmem:[%s8462_s0 + $0x138] ss:$36 sps:$4 sm:$0xff]  }
 0x205   :  { %v3128_v33 = vpop.f32.mrf.mxu1  ;;  %v3448_v26 = vpop.f32.mrf.mxu0 }
 0x206   :  { %v3129_v63 = vadd.f32 %v3128_v33, %v2801_v40  ;;  %v7718_v38 = vadd.f32 %v3448_v26, %v3121_v9 }
 0x207   :  { %v3130_v57 = vpop.f32.mrf.mxu1  ;;  %v3450_v52 = vpop.f32.mrf.mxu0 }
 0x209   :  { %v3133_v3 = vpop.f32.mrf.mxu1  ;;  %v3453_v62 = vpop.f32.mrf.mxu0  ;;  %3684 = vmatmul.mubr.bf16.gmra.mxu1 %v6300_v54  ;;  %5713 = vmatmul.mubr.bf16.gmra.mxu0 %v6303_v50  ;;  %v6310_v50 = vld [vmem:[%s8462_s0 + $0x13c] ss:$36 sps:$4 sm:$0xff]  }
 0x20a   :  { %v3134_v14 = vadd.f32 %v3133_v3, %v2806_v58  ;;  %v7725_v34 = vadd.f32 %v3453_v62, %v3126_v12  ;;  %3691 = vmatprep.mubr.bf16.mxu1 %v6306_v21  ;;  %5716 = vmatprep.mubr.msk.bf16.mxu0 %vm6443_vm0, %v8494_v22  ;;  %v6307_v12 = vld [vmem:[%s8462_s0 + $0xb0] ss:$36 sps:$4 sm:$0xff]  }
 0x20b   :  { %v3135_v9 = vpop.f32.mrf.mxu1  ;;  %v3455_v39 = vpop.f32.mrf.mxu0 }
 0x20c   :  { %v2817_v39 = vadd.f32 %v7418_v30, %v7395_v16  ;;  %v2822_v16 = vadd.f32 %v7418_v30, %v7411_v20  ;;  %v6312_v20 = vld [vmem:[%s8462_s0 + $0x180] ss:$36 sps:$4 sm:$0xff]  }
 0x20d   :  { %v3136_v40 = vpop.f32.mrf.mxu1  ;;  %v3456_v33 = vpop.f32.mrf.mxu0 }
 0x20e   :  { %v3137_v26 = vadd.f32 %v3136_v40, %v2809_v7  ;;  %v7737_v54 = vadd.f32 %v3456_v33, %v3129_v63 }
 0x20f   :  { %v3138_v21 = vpop.f32.mrf.mxu1  ;;  %v3458_v57 = vpop.f32.mrf.mxu0 }
 0x211   :  { %v3141_v52 = vpop.f32.mrf.mxu1  ;;  %v3461_v58 = vpop.f32.mrf.mxu0  ;;  %3692 = vmatmul.mubr.bf16.gmra.mxu1 %v6304_v0  ;;  %5717 = vmatmul.mubr.bf16.gmra.mxu0 %v6307_v12  ;;  %v6314_v12 = vld [vmem:[%s8462_s0 + $0x184] ss:$36 sps:$4 sm:$0xff]  }
 0x212   :  { %v3142_v3 = vadd.f32 %v3141_v52, %v2814_v61  ;;  %v7744_v62 = vadd.f32 %v3461_v58, %v3134_v14  ;;  %3699 = vmatprep.mubr.bf16.mxu1 %v6310_v50  ;;  %5720 = vmatprep.mubr.msk.bf16.mxu0 %vm6443_vm0, %v8494_v22  ;;  %v6311_v14 = vld [vmem:[%s8462_s0 + $0xf8] ss:$36 sps:$4 sm:$0xff]  }
 0x213   :  { %v3143_v63 = vpop.f32.mrf.mxu1  ;;  %v3463_v9 = vpop.f32.mrf.mxu0 }
 0x214   :  { %v2825_v9 = vadd.f32 %v7418_v30, %v7420_v6  ;;  %v2830_v6 = vadd.f32 %v7418_v30, %v7436_v27  ;;  %v6316_v27 = vld [vmem:[%s8462_s0 + $0x1c8] ss:$36 sps:$4 sm:$0xff]  }
 0x215   :  { %v3144_v7 = vpop.f32.mrf.mxu1  ;;  %v3464_v40 = vpop.f32.mrf.mxu0 }
 0x216   :  { %v3145_v33 = vadd.f32 %v3144_v7, %v2817_v39  ;;  %v7756_v0 = vadd.f32 %v3464_v40, %v3137_v26 }
 0x217   :  { %v3146_v50 = vpop.f32.mrf.mxu1  ;;  %v3466_v21 = vpop.f32.mrf.mxu0 }
 0x219   :  { %v3149_v57 = vpop.f32.mrf.mxu1  ;;  %v3469_v61 = vpop.f32.mrf.mxu0  ;;  %3700 = vmatmul.mubr.bf16.gmra.mxu1 %v6308_v24  ;;  %5721 = vmatmul.mubr.bf16.gmra.mxu0 %v6311_v14  ;;  %v6318_v14 = vld [vmem:[%s8462_s0 + $0x1cc] ss:$36 sps:$4 sm:$0xff]  }
 0x21a   :  { %v3150_v52 = vadd.f32 %v3149_v57, %v2822_v16  ;;  %v7763_v58 = vadd.f32 %v3469_v61, %v3142_v3  ;;  %3707 = vmatprep.mubr.bf16.mxu1 %v6314_v12  ;;  %5724 = vmatprep.mubr.msk.bf16.mxu0 %vm6443_vm0, %v8494_v22  ;;  %v6315_v3 = vld [vmem:[%s8462_s0 + $0x140] ss:$36 sps:$4 sm:$0xff]  }
 0x21b   :  { %v3151_v26 = vpop.f32.mrf.mxu1  ;;  %v3471_v63 = vpop.f32.mrf.mxu0 }
 0x21c   :  { %v2833_v63 = vadd.f32 %v7418_v30, %v7440_v8  ;;  %v2838_v8 = vadd.f32 %v7418_v30, %v7038_v44  ;;  %v6320_v44 = vld [vmem:[%s8462_s0 + $0x210] ss:$36 sps:$4 sm:$0xff]  }
 0x21d   :  { %v3152_v39 = vpop.f32.mrf.mxu1  ;;  %v3472_v7 = vpop.f32.mrf.mxu0 }
 0x21e   :  { %v3153_v40 = vadd.f32 %v3152_v39, %v2825_v9  ;;  %v7775_v24 = vadd.f32 %v3472_v7, %v3145_v33 }
 0x21f   :  { %v3154_v12 = vpop.f32.mrf.mxu1  ;;  %v3474_v50 = vpop.f32.mrf.mxu0 }
 0x221   :  { %v3157_v21 = vpop.f32.mrf.mxu1  ;;  %v3477_v16 = vpop.f32.mrf.mxu0  ;;  %3708 = vmatmul.mubr.bf16.gmra.mxu1 %v6312_v20  ;;  %5725 = vmatmul.mubr.bf16.gmra.mxu0 %v6315_v3  ;;  %v6322_v3 = vld [vmem:[%s8462_s0 + $0x214] ss:$36 sps:$4 sm:$0xff]  }
 0x222   :  { %v3158_v57 = vadd.f32 %v3157_v21, %v2830_v6  ;;  %v7782_v61 = vadd.f32 %v3477_v16, %v3150_v52  ;;  %3715 = vmatprep.mubr.bf16.mxu1 %v6318_v14  ;;  %5728 = vmatprep.mubr.msk.bf16.mxu0 %vm6443_vm0, %v8494_v22  ;;  %v6319_v52 = vld [vmem:[%s8462_s0 + $0x188] ss:$36 sps:$4 sm:$0xff]  }
 0x223   :  { %v3159_v33 = vpop.f32.mrf.mxu1  ;;  %v3479_v26 = vpop.f32.mrf.mxu0 }
 0x224   :  { %v2841_v26 = vadd.f32 %v7418_v30, %v7043_v48  ;;  %v2846_v48 = vadd.f32 %v7418_v30, %v7059_v56  ;;  %v6324_v56 = vld [vmem:[%s8462_s0 + $0x258] ss:$36 sps:$4 sm:$0xff]  }
 0x225   :  { %v3160_v9 = vpop.f32.mrf.mxu1  ;;  %v3480_v39 = vpop.f32.mrf.mxu0 }
 0x226   :  { %v3161_v7 = vadd.f32 %v3160_v9, %v2833_v63  ;;  %v7794_v20 = vadd.f32 %v3480_v39, %v3153_v40 }
 0x227   :  { %v3162_v14 = vpop.f32.mrf.mxu1  ;;  %v3482_v12 = vpop.f32.mrf.mxu0 }
 0x229   :  { %v3165_v50 = vpop.f32.mrf.mxu1  ;;  %v3485_v6 = vpop.f32.mrf.mxu0  ;;  %3716 = vmatmul.mubr.bf16.gmra.mxu1 %v6316_v27  ;;  %5729 = vmatmul.mubr.bf16.gmra.mxu0 %v6319_v52  ;;  %v6326_v52 = vld [vmem:[%s8462_s0 + $0x25c] ss:$36 sps:$4 sm:$0xff]  }
 0x22a   :  { %v3166_v21 = vadd.f32 %v3165_v50, %v2838_v8  ;;  %v7801_v16 = vadd.f32 %v3485_v6, %v3158_v57  ;;  %3723 = vmatprep.mubr.bf16.mxu1 %v6322_v3  ;;  %5732 = vmatprep.mubr.msk.bf16.mxu0 %vm6443_vm0, %v8494_v22  ;;  %v6323_v57 = vld [vmem:[%s8462_s0 + $0x1d0] ss:$36 sps:$4 sm:$0xff]  }
 0x22b   :  { %v3167_v40 = vpop.f32.mrf.mxu1  ;;  %v3487_v33 = vpop.f32.mrf.mxu0 }
 0x22c   :  { %v2849_v33 = vadd.f32 %v7418_v30, %v7063_v60  ;;  %v2854_v60 = vadd.f32 %v7418_v30, %v7079_v5  ;;  %v6328_v5 = vld [vmem:[%s8462_s0 + $0x2a0] ss:$36 sps:$4 sm:$0xff]  }
 0x22d   :  { %v3168_v63 = vpop.f32.mrf.mxu1  ;;  %v3488_v9 = vpop.f32.mrf.mxu0 }
 0x22e   :  { %v3169_v39 = vadd.f32 %v3168_v63, %v2841_v26  ;;  %v7813_v27 = vadd.f32 %v3488_v9, %v3161_v7 }
 0x22f   :  { %v3170_v3 = vpop.f32.mrf.mxu1  ;;  %v3490_v14 = vpop.f32.mrf.mxu0 }
 0x231   :  { %v3173_v12 = vpop.f32.mrf.mxu1  ;;  %v3493_v8 = vpop.f32.mrf.mxu0  ;;  %3724 = vmatmul.mubr.bf16.gmra.mxu1 %v6320_v44  ;;  %5733 = vmatmul.mubr.bf16.gmra.mxu0 %v6323_v57  ;;  %v6330_v57 = vld [vmem:[%s8462_s0 + $0x2a4] ss:$36 sps:$4 sm:$0xff]  }
 0x232   :  { %v3174_v50 = vadd.f32 %v3173_v12, %v2846_v48  ;;  %v7820_v6 = vadd.f32 %v3493_v8, %v3166_v21  ;;  %3731 = vmatprep.mubr.bf16.mxu1 %v6326_v52  ;;  %5736 = vmatprep.mubr.msk.bf16.mxu0 %vm6443_vm0, %v8494_v22  ;;  %v6327_v21 = vld [vmem:[%s8462_s0 + $0x218] ss:$36 sps:$4 sm:$0xff]  }
 0x233   :  { %v3175_v7 = vpop.f32.mrf.mxu1  ;;  %v3495_v40 = vpop.f32.mrf.mxu0 }
 0x234   :  { %v2857_v40 = vadd.f32 %v7418_v30, %v7089_v11  ;;  %v2862_v11 = vadd.f32 %v7418_v30, %v7107_v19  ;;  %v6332_v19 = vld [vmem:[%s8462_s0 + $0x2e8] ss:$36 sps:$4 sm:$0xff]  }
 0x235   :  { %v3176_v26 = vpop.f32.mrf.mxu1  ;;  %v3496_v63 = vpop.f32.mrf.mxu0 }
 0x236   :  { %v3177_v9 = vadd.f32 %v3176_v26, %v2849_v33  ;;  %v7832_v44 = vadd.f32 %v3496_v63, %v3169_v39 }
 0x237   :  { %v3178_v52 = vpop.f32.mrf.mxu1  ;;  %v3498_v3 = vpop.f32.mrf.mxu0 }
 0x239   :  { %v3181_v14 = vpop.f32.mrf.mxu1  ;;  %v3501_v48 = vpop.f32.mrf.mxu0  ;;  %3732 = vmatmul.mubr.bf16.gmra.mxu1 %v6324_v56  ;;  %5737 = vmatmul.mubr.bf16.gmra.mxu0 %v6327_v21  ;;  %v6334_v21 = vld [vmem:[%s8462_s0 + $0x2ec] ss:$36 sps:$4 sm:$0xff]  }
 0x23a   :  { %v3182_v12 = vadd.f32 %v3181_v14, %v2854_v60  ;;  %v7839_v8 = vadd.f32 %v3501_v48, %v3174_v50  ;;  %3739 = vmatprep.mubr.bf16.mxu1 %v6330_v57  ;;  %5740 = vmatprep.mubr.msk.bf16.mxu0 %vm6443_vm0, %v8494_v22  ;;  %v6331_v50 = vld [vmem:[%s8462_s0 + $0x260] ss:$36 sps:$4 sm:$0xff]  }
 0x23b   :  { %v3183_v39 = vpop.f32.mrf.mxu1  ;;  %v3503_v7 = vpop.f32.mrf.mxu0 }
 0x23c   :  { %v2865_v7 = vadd.f32 %v7418_v30, %v7111_v23  ;;  %v2870_v23 = vadd.f32 %v7418_v30, %v7127_v32 }
 0x23d   :  { %v3184_v33 = vpop.f32.mrf.mxu1  ;;  %v3504_v26 = vpop.f32.mrf.mxu0 }
 0x23e   :  { %v3185_v63 = vadd.f32 %v3184_v33, %v2857_v40  ;;  %v7851_v56 = vadd.f32 %v3504_v26, %v3177_v9 }
 0x23f   :  { %v3186_v57 = vpop.f32.mrf.mxu1  ;;  %v3506_v52 = vpop.f32.mrf.mxu0 }
 0x241   :  { %v3189_v3 = vpop.f32.mrf.mxu1  ;;  %v3509_v60 = vpop.f32.mrf.mxu0  ;;  %3740 = vmatmul.mubr.bf16.gmra.mxu1 %v6328_v5  ;;  %5741 = vmatmul.mubr.bf16.gmra.mxu0 %v6331_v50  ;;  %v6338_v50 = vld [vmem:[%s8462_s0 + $0x334] ss:$36 sps:$4 sm:$0xff]  }
 0x242   :  { %v3190_v14 = vadd.f32 %v3189_v3, %v2862_v11  ;;  %v7858_v48 = vadd.f32 %v3509_v60, %v3182_v12  ;;  %3747 = vmatprep.mubr.bf16.mxu1 %v6334_v21  ;;  %5744 = vmatprep.mubr.msk.bf16.mxu0 %vm6443_vm0, %v8494_v22  ;;  %v6335_v12 = vld [vmem:[%s8462_s0 + $0x2a8] ss:$36 sps:$4 sm:$0xff]  }
 0x243   :  { %v3191_v9 = vpop.f32.mrf.mxu1  ;;  %v3511_v39 = vpop.f32.mrf.mxu0 }
 0x244   :  { %v7884_v39 = vld [vmem:[%s8463_s2] ss:$0 sm:$0xff] }
 0x245   :  { %v3192_v40 = vpop.f32.mrf.mxu1  ;;  %v3512_v33 = vpop.f32.mrf.mxu0  ;;  %v2873_v32 = vadd.f32 %v7884_v39, %v7134_v37  ;;  %v8495_v37 = vld [vmem:[#allocation2_spill] sm:$0xff] }
 0x246   :  { %v3193_v26 = vadd.f32 %v3192_v40, %v2865_v7  ;;  %v7870_v5 = vadd.f32 %v3512_v33, %v3185_v63  ;;  %v6339_v40 = vld [vmem:[%s8462_s0 + $0x2f0] ss:$36 sps:$4 sm:$0xff]  }
 0x247   :  { %v3194_v21 = vpop.f32.mrf.mxu1  ;;  %v3514_v57 = vpop.f32.mrf.mxu0 }
 0x248   :  { %v2878_v57 = vadd.f32 %v7884_v39, %v8495_v37 }
 0x249   :  { %v3197_v52 = vpop.f32.mrf.mxu1  ;;  %v3517_v11 = vpop.f32.mrf.mxu0  ;;  %3748 = vmatmul.mubr.bf16.gmra.mxu1 %v6332_v19  ;;  %5745 = vmatmul.mubr.bf16.gmra.mxu0 %v6335_v12  ;;  %v6342_v12 = vld [vmem:[%s8462_s0 + $0x37c] ss:$36 sps:$4 sm:$0xff]  }
 0x24a   :  { %v3198_v3 = vadd.f32 %v3197_v52, %v2870_v23  ;;  %v7877_v60 = vadd.f32 %v3517_v11, %v3190_v14  ;;  %3755 = vmatprep.mubr.bf16.mxu1 %v6338_v50  ;;  %5748 = vmatprep.mubr.msk.bf16.mxu0 %vm6443_vm0, %v8494_v22  ;;  %v6336_v14 = vld [vmem:[%s8462_s0 + $0x330] ss:$36 sps:$4 sm:$0xff]  }
 0x24b   :  { %v3199_v63 = vpop.f32.mrf.mxu1  ;;  %v3519_v9 = vpop.f32.mrf.mxu0 }
 0x24d   :  { %v3200_v30 = vpop.f32.mrf.mxu1  ;;  %v3520_v7 = vpop.f32.mrf.mxu0 }
 0x24e   :  { %v3201_v33 = vadd.f32 %v3200_v30, %v2873_v32  ;;  %v7894_v19 = vadd.f32 %v3520_v7, %v3193_v26  ;;  %v8497_v32 = vld [vmem:[#allocation3_spill] sm:$0xff] }
 0x24f   :  { %v3202_v50 = vpop.f32.mrf.mxu1  ;;  %v3522_v21 = vpop.f32.mrf.mxu0  ;;  %v2881_v30 = vadd.f32 %v7884_v39, %v8497_v32 }
 0x250   :  { %v6340_v21 = vld [vmem:[%s8462_s0 + $0x378] ss:$36 sps:$4 sm:$0xff]  }
 0x251   :  { %v3205_v23 = vpop.f32.mrf.mxu1  ;;  %v3525_v52 = vpop.f32.mrf.mxu0  ;;  %3756 = vmatmul.mubr.bf16.gmra.mxu1 %v6336_v14  ;;  %5749 = vmatmul.mubr.bf16.gmra.mxu0 %v6339_v40 }
 0x252   :  { %v3206_v11 = vadd.f32 %v3205_v23, %v2878_v57  ;;  %v7901_v63 = vadd.f32 %v3525_v52, %v3198_v3  ;;  %3763 = vmatprep.mubr.bf16.mxu1 %v6342_v12  ;;  %5752 = vmatprep.mubr.msk.bf16.mxu0 %vm6443_vm0, %v8494_v22  ;;  %v6343_v3 = vld [vmem:[%s8462_s0 + $0x338] ss:$36 sps:$4 sm:$0xff]   ;;  %v6346_v12 = vld [vmem:[%s8462_s0 + $0x3c4] ss:$36 sps:$4 sm:$0xff]   ;;  %v8499_v23 = vld [vmem:[#allocation4_spill] sm:$0xff] }
 0x253   :  { %v3207_v26 = vpop.f32.mrf.mxu1  ;;  %v3527_v9 = vpop.f32.mrf.mxu0  ;;  %v2886_v52 = vadd.f32 %v7884_v39, %v8499_v23  ;;  %v6344_v23 = vld [vmem:[%s8462_s0 + $0x3c0] ss:$36 sps:$4 sm:$0xff]  }
 0x254   :  { %8496 = vst [vmem:[#allocation2_spill] sm:$0xff] %v7901_v63 }
 0x255   :  { %v3208_v7 = vpop.f32.mrf.mxu1  ;;  %v3528_v50 = vpop.f32.mrf.mxu0 }
 0x256   :  { %v3209_v14 = vadd.f32 %v3208_v7, %v2881_v30  ;;  %v7913_v40 = vadd.f32 %v3528_v50, %v3201_v33  ;;  %v8501_v7 = vld [vmem:[#allocation5_spill] sm:$0xff] }
 0x257   :  { %v3210_v37 = vpop.f32.mrf.mxu1  ;;  %v3530_v57 = vpop.f32.mrf.mxu0  ;;  %v2889_v50 = vadd.f32 %v7884_v39, %v8501_v7 }
 0x258   :  { %8498 = vst [vmem:[#allocation3_spill] sm:$0xff] %v7913_v40 }
 0x259   :  { %v3213_v26 = vpop.f32.mrf.mxu1  ;;  %v3533_v9 = vpop.f32.mrf.mxu0  ;;  %3764 = vmatmul.mubr.bf16.gmra.mxu1 %v6340_v21  ;;  %5753 = vmatmul.mubr.bf16.gmra.mxu0 %v6343_v3 }
 0x25a   :  { %v3214_v32 = vadd.f32 %v3213_v26, %v2886_v52  ;;  %v7920_v63 = vadd.f32 %v3533_v9, %v3206_v11  ;;  %3771 = vmatprep.mubr.bf16.mxu1 %v6346_v12  ;;  %5756 = vmatprep.mubr.msk.bf16.mxu0 %vm6443_vm0, %v8494_v22  ;;  %v6347_v11 = vld [vmem:[%s8462_s0 + $0x380] ss:$36 sps:$4 sm:$0xff]   ;;  %v6350_v12 = vld [vmem:[%s8462_s0 + $0x40c] ss:$36 sps:$4 sm:$0xff]  }
 0x25b   :  { %v3215_v33 = vpop.f32.mrf.mxu1  ;;  %v3535_v30 = vpop.f32.mrf.mxu0  ;;  %v8503_v9 = vld [vmem:[#allocation6_spill] sm:$0xff] }
 0x25c   :  { %8500 = vst [vmem:[#allocation4_spill] sm:$0xff] %v7920_v63  ;;  %v2894_v33 = vadd.f32 %v7884_v39, %v8503_v9  ;;  %v6348_v9 = vld [vmem:[%s8462_s0 + $0x408] ss:$36 sps:$4 sm:$0xff]  }
 0x25d   :  { %v3216_v37 = vpop.f32.mrf.mxu1  ;;  %v3536_v57 = vpop.f32.mrf.mxu0 }
 0x25e   :  { %v3217_v21 = vadd.f32 %v3216_v37, %v2889_v50  ;;  %v7932_v3 = vadd.f32 %v3536_v57, %v3209_v14  ;;  %v8505_v37 = vld [vmem:[#allocation7_spill] sm:$0xff] }
 0x25f   :  { %v3218_v52 = vpop.f32.mrf.mxu1  ;;  %v3538_v26 = vpop.f32.mrf.mxu0  ;;  %v2897_v57 = vadd.f32 %v7884_v39, %v8505_v37 }
 0x260   :  { %8502 = vst [vmem:[#allocation5_spill] sm:$0xff] %v7932_v3 }
 0x261   :  { %v3221_v30 = vpop.f32.mrf.mxu1  ;;  %v3541_v7 = vpop.f32.mrf.mxu0  ;;  %3772 = vmatmul.mubr.bf16.gmra.mxu1 %v6344_v23  ;;  %5757 = vmatmul.mubr.bf16.gmra.mxu0 %v6347_v11 }
 0x262   :  { %v3222_v63 = vadd.f32 %v3221_v30, %v2894_v33  ;;  %v7939_v40 = vadd.f32 %v3541_v7, %v3214_v32  ;;  %3779 = vmatprep.mubr.bf16.mxu1 %v6350_v12  ;;  %5760 = vmatprep.mubr.msk.bf16.mxu0 %vm6443_vm0, %v8494_v22  ;;  %v6351_v32 = vld [vmem:[%s8462_s0 + $0x3c8] ss:$36 sps:$4 sm:$0xff]   ;;  %v6354_v12 = vld [vmem:[%s8462_s0 + $0x454] ss:$36 sps:$4 sm:$0xff]  }
 0x263   :  { %v3223_v14 = vpop.f32.mrf.mxu1  ;;  %v3543_v50 = vpop.f32.mrf.mxu0  ;;  %v8507_v7 = vld [vmem:[#allocation8_spill] sm:$0xff] }
 0x264   :  { %8504 = vst [vmem:[#allocation6_spill] sm:$0xff] %v7939_v40  ;;  %v2902_v14 = vadd.f32 %v7884_v39, %v8507_v7  ;;  %v6352_v7 = vld [vmem:[%s8462_s0 + $0x450] ss:$36 sps:$4 sm:$0xff]  }
 0x265   :  { %v3224_v52 = vpop.f32.mrf.mxu1  ;;  %v3544_v26 = vpop.f32.mrf.mxu0 }
 0x266   :  { %v3225_v23 = vadd.f32 %v3224_v52, %v2897_v57  ;;  %v7951_v11 = vadd.f32 %v3544_v26, %v3217_v21  ;;  %v8509_v52 = vld [vmem:[#allocation9_spill] sm:$0xff] }
 0x267   :  { %v3226_v33 = vpop.f32.mrf.mxu1  ;;  %v3546_v30 = vpop.f32.mrf.mxu0  ;;  %v2905_v26 = vadd.f32 %v7884_v39, %v8509_v52 }
 0x268   :  { %8506 = vst [vmem:[#allocation7_spill] sm:$0xff] %v7951_v11 }
 0x269   :  { %v3229_v50 = vpop.f32.mrf.mxu1  ;;  %v3549_v37 = vpop.f32.mrf.mxu0  ;;  %3780 = vmatmul.mubr.bf16.gmra.mxu1 %v6348_v9  ;;  %5761 = vmatmul.mubr.bf16.gmra.mxu0 %v6351_v32 }
 0x26a   :  { %v3230_v40 = vadd.f32 %v3229_v50, %v2902_v14  ;;  %v7958_v3 = vadd.f32 %v3549_v37, %v3222_v63  ;;  %3787 = vmatprep.mubr.bf16.mxu1 %v6354_v12  ;;  %5764 = vmatprep.mubr.msk.bf16.mxu0 %vm6443_vm0, %v8494_v22  ;;  %v6355_v63 = vld [vmem:[%s8462_s0 + $0x410] ss:$36 sps:$4 sm:$0xff]   ;;  %v6358_v12 = vld [vmem:[%s8462_s0 + $0x49c] ss:$36 sps:$4 sm:$0xff]  }
 0x26b   :  { %v3231_v21 = vpop.f32.mrf.mxu1  ;;  %v3551_v57 = vpop.f32.mrf.mxu0  ;;  %v8511_v37 = vld [vmem:[#allocation10_spill] sm:$0xff] }
 0x26c   :  { %8508 = vst [vmem:[#allocation8_spill] sm:$0xff] %v7958_v3  ;;  %v2910_v21 = vadd.f32 %v7884_v39, %v8511_v37  ;;  %v6356_v37 = vld [vmem:[%s8462_s0 + $0x498] ss:$36 sps:$4 sm:$0xff]  }
 0x26d   :  { %v3232_v33 = vpop.f32.mrf.mxu1  ;;  %v3552_v30 = vpop.f32.mrf.mxu0 }
 0x26e   :  { %v3233_v9 = vadd.f32 %v3232_v33, %v2905_v26  ;;  %v7970_v32 = vadd.f32 %v3552_v30, %v3225_v23  ;;  %v8513_v33 = vld [vmem:[#allocation11_spill] sm:$0xff] }
 0x26f   :  { %v3234_v14 = vpop.f32.mrf.mxu1  ;;  %v3554_v50 = vpop.f32.mrf.mxu0  ;;  %v2913_v30 = vadd.f32 %v7884_v39, %v8513_v33 }
 0x270   :  { %8510 = vst [vmem:[#allocation9_spill] sm:$0xff] %v7970_v32 }
 0x271   :  { %v3237_v57 = vpop.f32.mrf.mxu1  ;;  %v3557_v52 = vpop.f32.mrf.mxu0  ;;  %3788 = vmatmul.mubr.bf16.gmra.mxu1 %v6352_v7  ;;  %5765 = vmatmul.mubr.bf16.gmra.mxu0 %v6355_v63 }
 0x272   :  { %v3238_v3 = vadd.f32 %v3237_v57, %v2910_v21  ;;  %v7977_v11 = vadd.f32 %v3557_v52, %v3230_v40  ;;  %3795 = vmatprep.mubr.bf16.mxu1 %v6358_v12  ;;  %5768 = vmatprep.mubr.msk.bf16.mxu0 %vm6443_vm0, %v8494_v22  ;;  %v6359_v40 = vld [vmem:[%s8462_s0 + $0x458] ss:$36 sps:$4 sm:$0xff]   ;;  %v6362_v12 = vld [vmem:[%s8462_s0 + $0x4e4] ss:$36 sps:$4 sm:$0xff]   ;;  %v8515_v52 = vld [vmem:[#allocation12_spill] sm:$0xff] }
 0x273   :  { %v3239_v23 = vpop.f32.mrf.mxu1  ;;  %v3559_v26 = vpop.f32.mrf.mxu0 }
 0x274   :  { %8512 = vst [vmem:[#allocation10_spill] sm:$0xff] %v7977_v11  ;;  %v2918_v23 = vadd.f32 %v7884_v39, %v8515_v52  ;;  %v6360_v52 = vld [vmem:[%s8462_s0 + $0x4e0] ss:$36 sps:$4 sm:$0xff]  }
 0x275   :  { %v3240_v14 = vpop.f32.mrf.mxu1  ;;  %v3560_v50 = vpop.f32.mrf.mxu0 }
 0x276   :  { %v3241_v7 = vadd.f32 %v3240_v14, %v2913_v30  ;;  %v7989_v63 = vadd.f32 %v3560_v50, %v3233_v9  ;;  %v8517_v14 = vld [vmem:[#allocation13_spill] sm:$0xff] }
 0x277   :  { %v3242_v21 = vpop.f32.mrf.mxu1  ;;  %v3562_v57 = vpop.f32.mrf.mxu0  ;;  %v2921_v50 = vadd.f32 %v7884_v39, %v8517_v14 }
 0x278   :  { %8514 = vst [vmem:[#allocation11_spill] sm:$0xff] %v7989_v63 }
 0x279   :  { %v3245_v26 = vpop.f32.mrf.mxu1  ;;  %v3565_v33 = vpop.f32.mrf.mxu0  ;;  %3796 = vmatmul.mubr.bf16.gmra.mxu1 %v6356_v37  ;;  %5769 = vmatmul.mubr.bf16.gmra.mxu0 %v6359_v40 }
 0x27a   :  { %v3246_v11 = vadd.f32 %v3245_v26, %v2918_v23  ;;  %v7996_v32 = vadd.f32 %v3565_v33, %v3238_v3  ;;  %3803 = vmatprep.mubr.bf16.mxu1 %v6362_v12  ;;  %5772 = vmatprep.mubr.msk.bf16.mxu0 %vm6443_vm0, %v8494_v22  ;;  %v6363_v3 = vld [vmem:[%s8462_s0 + $0x4a0] ss:$36 sps:$4 sm:$0xff]   ;;  %v6366_v12 = vld [vmem:[%s8462_s0 + $0x52c] ss:$36 sps:$4 sm:$0xff]  }
 0x27b   :  { %v3247_v9 = vpop.f32.mrf.mxu1  ;;  %v3567_v30 = vpop.f32.mrf.mxu0  ;;  %v8519_v33 = vld [vmem:[#allocation14_spill] sm:$0xff] }
 0x27c   :  { %8516 = vst [vmem:[#allocation12_spill] sm:$0xff] %v7996_v32  ;;  %v2926_v9 = vadd.f32 %v7884_v39, %v8519_v33  ;;  %v6364_v33 = vld [vmem:[%s8462_s0 + $0x528] ss:$36 sps:$4 sm:$0xff]  }
 0x27d   :  { %v3248_v21 = vpop.f32.mrf.mxu1  ;;  %v3568_v57 = vpop.f32.mrf.mxu0 }
 0x27e   :  { %v3249_v37 = vadd.f32 %v3248_v21, %v2921_v50  ;;  %v8008_v40 = vadd.f32 %v3568_v57, %v3241_v7  ;;  %v8521_v21 = vld [vmem:[#allocation15_spill] sm:$0xff] }
 0x27f   :  { %v3250_v23 = vpop.f32.mrf.mxu1  ;;  %v3570_v26 = vpop.f32.mrf.mxu0  ;;  %v2929_v57 = vadd.f32 %v7884_v39, %v8521_v21 }
 0x280   :  { %8518 = vst [vmem:[#allocation13_spill] sm:$0xff] %v8008_v40 }
 0x281   :  { %v3253_v30 = vpop.f32.mrf.mxu1  ;;  %v3573_v14 = vpop.f32.mrf.mxu0  ;;  %3804 = vmatmul.mubr.bf16.gmra.mxu1 %v6360_v52  ;;  %5773 = vmatmul.mubr.bf16.gmra.mxu0 %v6363_v3 }
 0x282   :  { %v3254_v32 = vadd.f32 %v3253_v30, %v2926_v9  ;;  %v8015_v63 = vadd.f32 %v3573_v14, %v3246_v11  ;;  %3811 = vmatprep.mubr.bf16.mxu1 %v6366_v12  ;;  %5776 = vmatprep.mubr.msk.bf16.mxu0 %vm6443_vm0, %v8494_v22  ;;  %v6367_v11 = vld [vmem:[%s8462_s0 + $0x4e8] ss:$36 sps:$4 sm:$0xff]   ;;  %v6370_v12 = vld [vmem:[%s8462_s0 + $0x574] ss:$36 sps:$4 sm:$0xff]  }
 0x283   :  { %v3255_v7 = vpop.f32.mrf.mxu1  ;;  %v3575_v50 = vpop.f32.mrf.mxu0  ;;  %v8523_v14 = vld [vmem:[#allocation16_spill] sm:$0xff] }
 0x284   :  { %8520 = vst [vmem:[#allocation14_spill] sm:$0xff] %v8015_v63  ;;  %v2934_v7 = vadd.f32 %v7884_v39, %v8523_v14  ;;  %v6368_v14 = vld [vmem:[%s8462_s0 + $0x570] ss:$36 sps:$4 sm:$0xff]  }
 0x285   :  { %v3256_v23 = vpop.f32.mrf.mxu1  ;;  %v3576_v26 = vpop.f32.mrf.mxu0 }
 0x286   :  { %v3257_v52 = vadd.f32 %v3256_v23, %v2929_v57  ;;  %v8027_v3 = vadd.f32 %v3576_v26, %v3249_v37  ;;  %v8525_v23 = vld [vmem:[#allocation17_spill] sm:$0xff] }
 0x287   :  { %v3258_v9 = vpop.f32.mrf.mxu1  ;;  %v3578_v30 = vpop.f32.mrf.mxu0  ;;  %v2937_v26 = vadd.f32 %v7884_v39, %v8525_v23 }
 0x288   :  { %8522 = vst [vmem:[#allocation15_spill] sm:$0xff] %v8027_v3 }
 0x289   :  { %v3261_v50 = vpop.f32.mrf.mxu1  ;;  %v3581_v21 = vpop.f32.mrf.mxu0  ;;  %3812 = vmatmul.mubr.bf16.gmra.mxu1 %v6364_v33  ;;  %5777 = vmatmul.mubr.bf16.gmra.mxu0 %v6367_v11 }
 0x28a   :  { %v3262_v63 = vadd.f32 %v3261_v50, %v2934_v7  ;;  %v8034_v40 = vadd.f32 %v3581_v21, %v3254_v32  ;;  %3819 = vmatprep.mubr.bf16.mxu1 %v6370_v12  ;;  %5780 = vmatprep.mubr.msk.bf16.mxu0 %vm6443_vm0, %v8494_v22  ;;  %v6371_v32 = vld [vmem:[%s8462_s0 + $0x530] ss:$36 sps:$4 sm:$0xff]   ;;  %v6374_v12 = vld [vmem:[%s8462_s0 + $0x5bc] ss:$36 sps:$4 sm:$0xff]  }
 0x28b   :  { %v3263_v37 = vpop.f32.mrf.mxu1  ;;  %v3583_v57 = vpop.f32.mrf.mxu0  ;;  %v8527_v21 = vld [vmem:[#allocation18_spill] sm:$0xff] }
 0x28c   :  { %8524 = vst [vmem:[#allocation16_spill] sm:$0xff] %v8034_v40  ;;  %v2942_v37 = vadd.f32 %v7884_v39, %v8527_v21  ;;  %v6372_v21 = vld [vmem:[%s8462_s0 + $0x5b8] ss:$36 sps:$4 sm:$0xff]  }
 0x28d   :  { %v3264_v9 = vpop.f32.mrf.mxu1  ;;  %v3584_v30 = vpop.f32.mrf.mxu0 }
 0x28e   :  { %v3265_v33 = vadd.f32 %v3264_v9, %v2937_v26  ;;  %v8046_v11 = vadd.f32 %v3584_v30, %v3257_v52  ;;  %v8529_v9 = vld [vmem:[#allocation19_spill] sm:$0xff] }
 0x28f   :  { %v3266_v7 = vpop.f32.mrf.mxu1  ;;  %v3586_v50 = vpop.f32.mrf.mxu0  ;;  %v2945_v30 = vadd.f32 %v7884_v39, %v8529_v9 }
 0x290   :  { %8526 = vst [vmem:[#allocation17_spill] sm:$0xff] %v8046_v11 }
 0x291   :  { %v3269_v57 = vpop.f32.mrf.mxu1  ;;  %v3589_v23 = vpop.f32.mrf.mxu0  ;;  %3820 = vmatmul.mubr.bf16.gmra.mxu1 %v6368_v14  ;;  %5781 = vmatmul.mubr.bf16.gmra.mxu0 %v6371_v32 }
 0x292   :  { %v3270_v40 = vadd.f32 %v3269_v57, %v2942_v37  ;;  %v8053_v3 = vadd.f32 %v3589_v23, %v3262_v63  ;;  %3827 = vmatprep.mubr.bf16.mxu1 %v6374_v12  ;;  %5784 = vmatprep.mubr.msk.bf16.mxu0 %vm6443_vm0, %v8494_v22  ;;  %v6375_v63 = vld [vmem:[%s8462_s0 + $0x578] ss:$36 sps:$4 sm:$0xff]   ;;  %v6378_v12 = vld [vmem:[%s8462_s0 + $0x604] ss:$36 sps:$4 sm:$0xff]   ;;  %v8531_v23 = vld [vmem:[#allocation20_spill] sm:$0xff] }
 0x293   :  { %v3271_v52 = vpop.f32.mrf.mxu1  ;;  %v3591_v26 = vpop.f32.mrf.mxu0 }
 0x294   :  { %8528 = vst [vmem:[#allocation18_spill] sm:$0xff] %v8053_v3  ;;  %v2950_v52 = vadd.f32 %v7884_v39, %v8531_v23  ;;  %v6376_v23 = vld [vmem:[%s8462_s0 + $0x600] ss:$36 sps:$4 sm:$0xff]  }
 0x295   :  { %v3272_v7 = vpop.f32.mrf.mxu1  ;;  %v3592_v50 = vpop.f32.mrf.mxu0 }
 0x296   :  { %v3273_v14 = vadd.f32 %v3272_v7, %v2945_v30  ;;  %v8065_v32 = vadd.f32 %v3592_v50, %v3265_v33  ;;  %v8533_v7 = vld [vmem:[#allocation21_spill] sm:$0xff] }
 0x297   :  { %v3274_v37 = vpop.f32.mrf.mxu1  ;;  %v3594_v57 = vpop.f32.mrf.mxu0  ;;  %v2953_v50 = vadd.f32 %v7884_v39, %v8533_v7 }
 0x298   :  { %8530 = vst [vmem:[#allocation19_spill] sm:$0xff] %v8065_v32 }
 0x299   :  { %v3277_v26 = vpop.f32.mrf.mxu1  ;;  %v3597_v9 = vpop.f32.mrf.mxu0  ;;  %3828 = vmatmul.mubr.bf16.gmra.mxu1 %v6372_v21  ;;  %5785 = vmatmul.mubr.bf16.gmra.mxu0 %v6375_v63 }
 0x29a   :  { %v3278_v3 = vadd.f32 %v3277_v26, %v2950_v52  ;;  %v8072_v11 = vadd.f32 %v3597_v9, %v3270_v40  ;;  %3835 = vmatprep.mubr.bf16.mxu1 %v6378_v12  ;;  %5788 = vmatprep.mubr.msk.bf16.mxu0 %vm6443_vm0, %v8494_v22  ;;  %v6379_v40 = vld [vmem:[%s8462_s0 + $0x5c0] ss:$36 sps:$4 sm:$0xff]   ;;  %v6382_v12 = vld [vmem:[%s8462_s0 + $0x64c] ss:$36 sps:$4 sm:$0xff]  }
 0x29b   :  { %v3279_v33 = vpop.f32.mrf.mxu1  ;;  %v3599_v30 = vpop.f32.mrf.mxu0  ;;  %v8535_v9 = vld [vmem:[#allocation22_spill] sm:$0xff] }
 0x29c   :  { %8532 = vst [vmem:[#allocation20_spill] sm:$0xff] %v8072_v11  ;;  %v2958_v33 = vadd.f32 %v7884_v39, %v8535_v9  ;;  %v6380_v9 = vld [vmem:[%s8462_s0 + $0x648] ss:$36 sps:$4 sm:$0xff]  }
 0x29d   :  { %v3280_v37 = vpop.f32.mrf.mxu1  ;;  %v3600_v57 = vpop.f32.mrf.mxu0 }
 0x29e   :  { %v3281_v21 = vadd.f32 %v3280_v37, %v2953_v50  ;;  %v8084_v63 = vadd.f32 %v3600_v57, %v3273_v14  ;;  %v8537_v37 = vld [vmem:[#allocation23_spill] sm:$0xff] }
 0x29f   :  { %v3282_v52 = vpop.f32.mrf.mxu1  ;;  %v3602_v26 = vpop.f32.mrf.mxu0  ;;  %v2961_v57 = vadd.f32 %v7884_v39, %v8537_v37 }
 0x2a0   :  { %8534 = vst [vmem:[#allocation21_spill] sm:$0xff] %v8084_v63 }
 0x2a1   :  { %v3285_v30 = vpop.f32.mrf.mxu1  ;;  %v3605_v7 = vpop.f32.mrf.mxu0  ;;  %3836 = vmatmul.mubr.bf16.gmra.mxu1 %v6376_v23  ;;  %5789 = vmatmul.mubr.bf16.gmra.mxu0 %v6379_v40 }
 0x2a2   :  { %v3286_v11 = vadd.f32 %v3285_v30, %v2958_v33  ;;  %v8091_v32 = vadd.f32 %v3605_v7, %v3278_v3  ;;  %3843 = vmatprep.mubr.bf16.mxu1 %v6382_v12  ;;  %5792 = vmatprep.mubr.msk.bf16.mxu0 %vm6443_vm0, %v8494_v22  ;;  %v6383_v3 = vld [vmem:[%s8462_s0 + $0x608] ss:$36 sps:$4 sm:$0xff]   ;;  %v6386_v12 = vld [vmem:[%s8462_s0 + $0x694] ss:$36 sps:$4 sm:$0xff]  }
 0x2a3   :  { %v3287_v14 = vpop.f32.mrf.mxu1  ;;  %v3607_v50 = vpop.f32.mrf.mxu0  ;;  %v8539_v7 = vld [vmem:[#allocation24_spill] sm:$0xff] }
 0x2a4   :  { %8536 = vst [vmem:[#allocation22_spill] sm:$0xff] %v8091_v32  ;;  %v2966_v14 = vadd.f32 %v7884_v39, %v8539_v7  ;;  %v6384_v7 = vld [vmem:[%s8462_s0 + $0x690] ss:$36 sps:$4 sm:$0xff]  }
 0x2a5   :  { %v3288_v52 = vpop.f32.mrf.mxu1  ;;  %v3608_v26 = vpop.f32.mrf.mxu0 }
 0x2a6   :  { %v3289_v23 = vadd.f32 %v3288_v52, %v2961_v57  ;;  %v8103_v40 = vadd.f32 %v3608_v26, %v3281_v21  ;;  %v8541_v52 = vld [vmem:[#allocation25_spill] sm:$0xff] }
 0x2a7   :  { %v3290_v33 = vpop.f32.mrf.mxu1  ;;  %v3610_v30 = vpop.f32.mrf.mxu0  ;;  %v2969_v26 = vadd.f32 %v7884_v39, %v8541_v52 }
 0x2a8   :  { %8538 = vst [vmem:[#allocation23_spill] sm:$0xff] %v8103_v40 }
 0x2a9   :  { %v3293_v50 = vpop.f32.mrf.mxu1  ;;  %v3613_v37 = vpop.f32.mrf.mxu0  ;;  %3844 = vmatmul.mubr.bf16.gmra.mxu1 %v6380_v9  ;;  %5793 = vmatmul.mubr.bf16.gmra.mxu0 %v6383_v3 }
 0x2aa   :  { %v3294_v32 = vadd.f32 %v3293_v50, %v2966_v14  ;;  %v8110_v63 = vadd.f32 %v3613_v37, %v3286_v11  ;;  %3851 = vmatprep.mubr.bf16.mxu1 %v6386_v12  ;;  %5796 = vmatprep.mubr.msk.bf16.mxu0 %vm6443_vm0, %v8494_v22  ;;  %v6387_v11 = vld [vmem:[%s8462_s0 + $0x650] ss:$36 sps:$4 sm:$0xff]   ;;  %v6390_v12 = vld [vmem:[%s8462_s0 + $0x6dc] ss:$36 sps:$4 sm:$0xff]  }
 0x2ab   :  { %v3295_v21 = vpop.f32.mrf.mxu1  ;;  %v3615_v57 = vpop.f32.mrf.mxu0  ;;  %v8542_v37 = vld [vmem:[#allocation26_spill] sm:$0xff] }
 0x2ac   :  { %8540 = vst [vmem:[#allocation24_spill] sm:$0xff] %v8110_v63  ;;  %v2974_v21 = vadd.f32 %v7884_v39, %v8542_v37  ;;  %v6391_v39 = vld [vmem:[%s8462_s0 + $0x698] ss:$36 sps:$4 sm:$0xff]  }
 0x2ad   :  { %v3296_v33 = vpop.f32.mrf.mxu1  ;;  %v3616_v30 = vpop.f32.mrf.mxu0 }
 0x2ae   :  { %v3297_v9 = vadd.f32 %v3296_v33, %v2969_v26  ;;  %v8122_v3 = vadd.f32 %v3616_v30, %v3289_v23 }
 0x2af   :  { %v3298_v14 = vpop.f32.mrf.mxu1  ;;  %v3618_v50 = vpop.f32.mrf.mxu0 }
 0x2b0   :  { %v6388_v14 = vld [vmem:[%s8462_s0 + $0x6d8] ss:$36 sps:$4 sm:$0xff]  }
 0x2b1   :  { %v3301_v57 = vpop.f32.mrf.mxu1  ;;  %v3621_v52 = vpop.f32.mrf.mxu0  ;;  %3852 = vmatmul.mubr.bf16.gmra.mxu1 %v6384_v7  ;;  %5797 = vmatmul.mubr.bf16.gmra.mxu0 %v6387_v11 }
 0x2b2   :  { %v3302_v63 = vadd.f32 %v3301_v57, %v2974_v21  ;;  %v8129_v40 = vadd.f32 %v3621_v52, %v3294_v32  ;;  %3859 = vmatprep.mubr.bf16.mxu1 %v6390_v12  ;;  %5800 = vmatprep.mubr.msk.bf16.mxu0 %vm6443_vm0, %v8494_v22  ;;  %v6394_v32 = vld [vmem:[%s8462_s0 + $0x724] ss:$36 sps:$4 sm:$0xff]  }
 0x2b3   :  { %v3303_v23 = vpop.f32.mrf.mxu1  ;;  %v3623_v26 = vpop.f32.mrf.mxu0 }
 0x2b4   :  { %8543 = vst [vmem:[#allocation25_spill] sm:$0xff] %v8129_v40  ;;  %v6392_v26 = vld [vmem:[%s8462_s0 + $0x720] ss:$36 sps:$4 sm:$0xff]  }
 0x2b5   :  { %v3304_v33 = vpop.f32.mrf.mxu1  ;;  %v3624_v30 = vpop.f32.mrf.mxu0 }
 0x2b6   :  { %v8139_v7 = vadd.f32 %v3624_v30, %v3297_v9  ;;  %v6395_v33 = vld [vmem:[%s8462_s0 + $0x6e0] ss:$36 sps:$4 sm:$0xff]  }
 0x2b7   :  { %v3305_v11 = vpop.f32.mrf.mxu1  ;;  %v3626_v12 = vpop.f32.mrf.mxu0 }
 0x2b8   :  { %8544 = vst [vmem:[#allocation26_spill] sm:$0xff] %v8139_v7 }
 0x2b9   :  { %v3629_v50 = vpop.f32.mrf.mxu0  ;;  %v3669_v37 = vpop.f32.mrf.mxu1  ;;  %3860 = vmatmul.mubr.bf16.gmra.mxu1 %v6388_v14  ;;  %5801 = vmatmul.mubr.bf16.gmra.mxu0 %v6391_v39 }
 0x2ba   :  { %v8144_v21 = vadd.f32 %v3629_v50, %v3302_v63  ;;  %3867 = vmatprep.mubr.bf16.mxu1 %v6394_v32  ;;  %5804 = vmatprep.mubr.msk.bf16.mxu0 %vm6443_vm0, %v8494_v22  ;;  %v6398_v63 = vld [vmem:[%s8462_s0 + $0x76c] ss:$36 sps:$4 sm:$0xff]   ;;  %v3670_v39 = vadd.f32 %v3669_v37, %v7456_v2 }
 0x2bb   :  { %v3631_v57 = vpop.f32.mrf.mxu0  ;;  %v3671_v52 = vpop.f32.mrf.mxu1  ;;  %v6399_v2 = vld [vmem:[%s8462_s0 + $0x728] ss:$36 sps:$4 sm:$0xff]  }
 0x2bc   :  { %8545 = vst [vmem:[#allocation29_spill] sm:$0xff] %v8144_v21 }
 0x2bd   :  { %v3632_v9 = vpop.f32.mrf.mxu0  ;;  %v3672_v23 = vpop.f32.mrf.mxu1 }
 0x2be   :  { %v3673_v52 = vadd.f32 %v3672_v23, %v7466_v13 }
 0x2bf   :  { %v3633_v30 = vpop.f32.mrf.mxu0  ;;  %v3674_v14 = vpop.f32.mrf.mxu1 }
 0x2c0   :  { %v6396_v30 = vld [vmem:[%s8462_s0 + $0x768] ss:$36 sps:$4 sm:$0xff]  }
 0x2c1   :  { %v3677_v32 = vpop.f32.mrf.mxu1  ;;  %3868 = vmatmul.mubr.bf16.gmra.mxu1 %v6392_v26  ;;  %v3997_v11 = vpop.f32.mrf.mxu0  ;;  %5805 = vmatmul.mubr.bf16.gmra.mxu0 %v6395_v33  ;;  %v6402_v33 = vld [vmem:[%s8462_s0 + $0x7b4] ss:$36 sps:$4 sm:$0xff]  }
 0x2c2   :  { %v3998_v12 = vadd.f32 %v3997_v11, %v3670_v39  ;;  %3875 = vmatprep.mubr.bf16.mxu1 %v6398_v63  ;;  %5808 = vmatprep.mubr.msk.bf16.mxu0 %vm6443_vm0, %v8494_v22  ;;  %v3678_v13 = vadd.f32 %v3677_v32, %v7476_v53 }
 0x2c3   :  { %v3679_v50 = vpop.f32.mrf.mxu1  ;;  %v5710_v57 = vpop.f32.mrf.mxu0 }
 0x2c4   :  { %v4364_v37 = vmul.f32 0.01, %v3998_v12  ;;  %vm4291_vm1 = vcmp.ge.f32.partialorder %v3998_v12, 0.0 }
 0x2c5   :  { %v3680_v9 = vpop.f32.mrf.mxu1  ;;  %v4000_v21 = vpop.f32.mrf.mxu0 }
 0x2c6   :  { %v4001_v26 = vadd.f32 %v4000_v21, %v3673_v52  ;;  %v4437_v50 = vsel %vm4291_vm1, %v3998_v12, %v4364_v37  ;;  %v6400_v12 = vld [vmem:[%s8462_s0 + $0x7b0] ss:$36 sps:$4 sm:$0xff]  }
 0x2c7   :  { %v3682_v63 = vpop.f32.mrf.mxu1  ;;  %v5711_v14 = vpop.f32.mrf.mxu0 }
 0x2c8   :  { %vm4292_vm2 = vcmp.ge.f32.partialorder %v4001_v26, 0.0  ;;  %v4365_v23 = vmul.f32 0.01, %v4001_v26  ;;  %v3681_v63 = vadd.f32 %v3680_v9, %v7486_v35  ;;  %v6406_v35 = vld [vmem:[%s8462_s0 + $0x7fc] ss:$36 sps:$4 sm:$0xff]  }
 0x2c9   :  { %v3685_v39 = vpop.f32.mrf.mxu1  ;;  %3876 = vmatmul.mubr.bf16.gmra.mxu1 %v6396_v30  ;;  %v4005_v11 = vpop.f32.mrf.mxu0  ;;  %5809 = vmatmul.mubr.bf16.gmra.mxu0 %v6399_v2  ;;  %v6403_v30 = vld [vmem:[%s8462_s0 + $0x770] ss:$36 sps:$4 sm:$0xff]  }
 0x2ca   :  { %v4438_v57 = vsel %vm4292_vm2, %v4001_v26, %v4365_v23  ;;  %v4006_v7 = vadd.f32 %v4005_v11, %v3678_v13  ;;  %3883 = vmatprep.mubr.bf16.mxu1 %v6402_v33  ;;  %5812 = vmatprep.mubr.msk.bf16.mxu0 %vm6443_vm0, %v8494_v22  ;;  %v3686_v26 = vadd.f32 %v3685_v39, %v7496_v45 }
 0x2cb   :  { %v5435_v21 = vpack.c.bf16 %v4438_v57, %v4437_v50  ;;  %v3687_v52 = vpop.f32.mrf.mxu1  ;;  %v5714_v40 = vpop.f32.mrf.mxu0 }
 0x2cc   :  { %v4366_v2 = vmul.f32 0.01, %v4006_v7  ;;  %vm4293_vm3 = vcmp.ge.f32.partialorder %v4006_v7, 0.0 }
 0x2cd   :  { %5436 = vst [vmem:[%s8464_s3] sm:$0xff] %v5435_v21   ;;  %v3688_v53 = vpop.f32.mrf.mxu1  ;;  %v4008_v32 = vpop.f32.mrf.mxu0 }
 0x2ce   :  { %v4009_v37 = vadd.f32 %v4008_v32, %v3681_v63  ;;  %v4439_v23 = vsel %vm4293_vm3, %v4006_v7, %v4366_v2  ;;  %v3689_v63 = vadd.f32 %v3688_v53, %v7506_v49  ;;  %v6404_v7 = vld [vmem:[%s8462_s0 + $0x7f8] ss:$36 sps:$4 sm:$0xff]   ;;  %v6410_v49 = vld [vmem:[%s8462_s0 + $0x844] ss:$36 sps:$4 sm:$0xff]  }
 0x2cf   :  { %v3690_v40 = vpop.f32.mrf.mxu1  ;;  %v5715_v9 = vpop.f32.mrf.mxu0  ;;  %v6407_v32 = vld [vmem:[%s8462_s0 + $0x7b8] ss:$36 sps:$4 sm:$0xff]  }
 0x2d0   :  { %vm4294_vm4 = vcmp.ge.f32.partialorder %v4009_v37, 0.0  ;;  %v4367_v33 = vmul.f32 0.01, %v4009_v37 }
 0x2d1   :  { %v3693_v14 = vpop.f32.mrf.mxu1  ;;  %3884 = vmatmul.mubr.bf16.gmra.mxu1 %v6400_v12  ;;  %v4013_v13 = vpop.f32.mrf.mxu0  ;;  %5813 = vmatmul.mubr.bf16.gmra.mxu0 %v6403_v30 }
 0x2d2   :  { %v4440_v11 = vsel %vm4294_vm4, %v4009_v37, %v4367_v33  ;;  %v4014_v50 = vadd.f32 %v4013_v13, %v3686_v26  ;;  %3891 = vmatprep.mubr.bf16.mxu1 %v6406_v35  ;;  %5816 = vmatprep.mubr.msk.bf16.mxu0 %vm6443_vm0, %v8494_v22  ;;  %v3694_v37 = vadd.f32 %v3693_v14, %v7516_v43 }
 0x2d3   :  { %v5440_v57 = vpack.c.bf16 %v4440_v11, %v4439_v23  ;;  %v3695_v21 = vpop.f32.mrf.mxu1  ;;  %v5718_v52 = vpop.f32.mrf.mxu0 }
 0x2d4   :  { %v4368_v12 = vmul.f32 0.01, %v4014_v50  ;;  %vm4295_vm5 = vcmp.ge.f32.partialorder %v4014_v50, 0.0  ;;  %v6411_v52 = vld [vmem:[%s8462_s0 + $0x800] ss:$36 sps:$4 sm:$0xff]  }
 0x2d5   :  { %5612 = vst [vmem:[%s8464_s3 + $0x8] sm:$0xff] %v5440_v57   ;;  %v3696_v45 = vpop.f32.mrf.mxu1  ;;  %v4016_v39 = vpop.f32.mrf.mxu0 }
 0x2d6   :  { %v4017_v30 = vadd.f32 %v4016_v39, %v3689_v63  ;;  %v4441_v26 = vsel %vm4295_vm5, %v4014_v50, %v4368_v12  ;;  %v3697_v21 = vadd.f32 %v3696_v45, %v7526_v15  ;;  %v6408_v50 = vld [vmem:[%s8462_s0 + $0x840] ss:$36 sps:$4 sm:$0xff]   ;;  %v6414_v15 = vld [vmem:[%s8462_s0 + $0x88c] ss:$36 sps:$4 sm:$0xff]  }
 0x2d7   :  { %v3698_v53 = vpop.f32.mrf.mxu1  ;;  %v5719_v2 = vpop.f32.mrf.mxu0 }
 0x2d8   :  { %vm4296_vm6 = vcmp.ge.f32.partialorder %v4017_v30, 0.0  ;;  %v4369_v35 = vmul.f32 0.01, %v4017_v30 }
 0x2d9   :  { %v3701_v40 = vpop.f32.mrf.mxu1  ;;  %3892 = vmatmul.mubr.bf16.gmra.mxu1 %v6404_v7  ;;  %v4021_v9 = vpop.f32.mrf.mxu0  ;;  %5817 = vmatmul.mubr.bf16.gmra.mxu0 %v6407_v32 }
 0x2da   :  { %v4442_v33 = vsel %vm4296_vm6, %v4017_v30, %v4369_v35  ;;  %v4022_v13 = vadd.f32 %v4021_v9, %v3694_v37  ;;  %3899 = vmatprep.mubr.bf16.mxu1 %v6410_v49  ;;  %5820 = vmatprep.mubr.msk.bf16.mxu0 %vm6443_vm0, %v8494_v22  ;;  %v3702_v32 = vadd.f32 %v3701_v40, %v7536_v55 }
 0x2db   :  { %v5445_v23 = vpack.c.bf16 %v4442_v33, %v4441_v26  ;;  %v3703_v11 = vpop.f32.mrf.mxu1  ;;  %v5722_v57 = vpop.f32.mrf.mxu0 }
 0x2dc   :  { %v4370_v63 = vmul.f32 0.01, %v4022_v13  ;;  %vm4297_vm7 = vcmp.ge.f32.partialorder %v4022_v13, 0.0 }
 0x2dd   :  { %5613 = vst [vmem:[%s8464_s3 + $0x10] sm:$0xff] %v5445_v23   ;;  %v3704_v43 = vpop.f32.mrf.mxu1  ;;  %v4024_v14 = vpop.f32.mrf.mxu0  ;;  %v6415_v23 = vld [vmem:[%s8462_s0 + $0x848] ss:$36 sps:$4 sm:$0xff]  }
 0x2de   :  { %v4025_v39 = vadd.f32 %v4024_v14, %v3697_v21  ;;  %v4443_v53 = vsel %vm4297_vm7, %v4022_v13, %v4370_v63  ;;  %v3705_v33 = vadd.f32 %v3704_v43, %v7546_v25  ;;  %v6412_v13 = vld [vmem:[%s8462_s0 + $0x888] ss:$36 sps:$4 sm:$0xff]   ;;  %v6418_v25 = vld [vmem:[%s8462_s0 + $0x8d4] ss:$36 sps:$4 sm:$0xff]  }
 0x2df   :  { %v3706_v45 = vpop.f32.mrf.mxu1  ;;  %v5723_v7 = vpop.f32.mrf.mxu0 }
 0x2e0   :  { %vm4298_vm8 = vcmp.ge.f32.partialorder %v4025_v39, 0.0  ;;  %v4371_v12 = vmul.f32 0.01, %v4025_v39 }
 0x2e1   :  { %v3709_v30 = vpop.f32.mrf.mxu1  ;;  %3900 = vmatmul.mubr.bf16.gmra.mxu1 %v6408_v50  ;;  %v4029_v49 = vpop.f32.mrf.mxu0  ;;  %5821 = vmatmul.mubr.bf16.gmra.mxu0 %v6411_v52 }
 0x2e2   :  { %v4444_v2 = vsel %vm4298_vm8, %v4025_v39, %v4371_v12  ;;  %v4030_v37 = vadd.f32 %v4029_v49, %v3702_v32  ;;  %3907 = vmatprep.mubr.bf16.mxu1 %v6414_v15  ;;  %5824 = vmatprep.mubr.msk.bf16.mxu0 %vm6443_vm0, %v8494_v22  ;;  %v3710_v14 = vadd.f32 %v3709_v30, %v7556_v4 }
 0x2e3   :  { %v5450_v35 = vpack.c.bf16 %v4444_v2, %v4443_v53  ;;  %v3711_v9 = vpop.f32.mrf.mxu1  ;;  %v5726_v26 = vpop.f32.mrf.mxu0  ;;  %v6416_v53 = vld [vmem:[%s8462_s0 + $0x8d0] ss:$36 sps:$4 sm:$0xff]  }
 0x2e4   :  { %v4372_v11 = vmul.f32 0.01, %v4030_v37  ;;  %vm4299_vm9 = vcmp.ge.f32.partialorder %v4030_v37, 0.0  ;;  %v6419_v2 = vld [vmem:[%s8462_s0 + $0x890] ss:$36 sps:$4 sm:$0xff]  }
 0x2e5   :  { %5614 = vst [vmem:[%s8464_s3 + $0x18] sm:$0xff] %v5450_v35   ;;  %v3712_v55 = vpop.f32.mrf.mxu1  ;;  %v4032_v40 = vpop.f32.mrf.mxu0 }
 0x2e6   :  { %v4033_v57 = vadd.f32 %v4032_v40, %v3705_v33  ;;  %v4445_v39 = vsel %vm4299_vm9, %v4030_v37, %v4372_v11  ;;  %v3713_v49 = vadd.f32 %v3712_v55, %v7566_v42  ;;  %v6422_v42 = vld [vmem:[%s8462_s0 + $0x91c] ss:$36 sps:$4 sm:$0xff]  }
 0x2e7   :  { %v3714_v21 = vpop.f32.mrf.mxu1  ;;  %v5727_v43 = vpop.f32.mrf.mxu0 }
 0x2e8   :  { %vm4300_vm10 = vcmp.ge.f32.partialorder %v4033_v57, 0.0  ;;  %v4373_v50 = vmul.f32 0.01, %v4033_v57 }
 0x2e9   :  { %v3717_v52 = vpop.f32.mrf.mxu1  ;;  %3908 = vmatmul.mubr.bf16.gmra.mxu1 %v6412_v13  ;;  %v4037_v63 = vpop.f32.mrf.mxu0  ;;  %5825 = vmatmul.mubr.bf16.gmra.mxu0 %v6415_v23 }
 0x2ea   :  { %v4446_v15 = vsel %vm4300_vm10, %v4033_v57, %v4373_v50  ;;  %v4038_v45 = vadd.f32 %v4037_v63, %v3710_v14  ;;  %3915 = vmatprep.mubr.bf16.mxu1 %v6418_v25  ;;  %5828 = vmatprep.mubr.msk.bf16.mxu0 %vm6443_vm0, %v8494_v22  ;;  %v3718_v33 = vadd.f32 %v3717_v52, %v7576_v18  ;;  %v6420_v52 = vld [vmem:[%s8462_s0 + $0x918] ss:$36 sps:$4 sm:$0xff]  }
 0x2eb   :  { %v5455_v7 = vpack.c.bf16 %v4446_v15, %v4445_v39  ;;  %v3719_v32 = vpop.f32.mrf.mxu1  ;;  %v5730_v12 = vpop.f32.mrf.mxu0  ;;  %v6423_v63 = vld [vmem:[%s8462_s0 + $0x8d8] ss:$36 sps:$4 sm:$0xff]  }
 0x2ec   :  { %v4374_v37 = vmul.f32 0.01, %v4038_v45  ;;  %vm4301_vm11 = vcmp.ge.f32.partialorder %v4038_v45, 0.0 }
 0x2ed   :  { %5615 = vst [vmem:[%s8464_s3 + $0x20] sm:$0xff] %v5455_v7   ;;  %v3720_v4 = vpop.f32.mrf.mxu1  ;;  %v4040_v30 = vpop.f32.mrf.mxu0 }
 0x2ee   :  { %v4041_v35 = vadd.f32 %v4040_v30, %v3713_v49  ;;  %v4447_v23 = vsel %vm4301_vm11, %v4038_v45, %v4374_v37  ;;  %v3721_v14 = vadd.f32 %v3720_v4, %v7586_v29  ;;  %v6426_v29 = vld [vmem:[%s8462_s0 + $0x964] ss:$36 sps:$4 sm:$0xff]  }
 0x2ef   :  { %v3722_v9 = vpop.f32.mrf.mxu1  ;;  %v5731_v26 = vpop.f32.mrf.mxu0 }
 0x2f0   :  { %vm4302_vm12 = vcmp.ge.f32.partialorder %v4041_v35, 0.0  ;;  %v4375_v55 = vmul.f32 0.01, %v4041_v35 }
 0x2f1   :  { %v3725_v40 = vpop.f32.mrf.mxu1  ;;  %3916 = vmatmul.mubr.bf16.gmra.mxu1 %v6416_v53  ;;  %v4045_v13 = vpop.f32.mrf.mxu0  ;;  %5829 = vmatmul.mubr.bf16.gmra.mxu0 %v6419_v2 }
 0x2f2   :  { %v4448_v11 = vsel %vm4302_vm12, %v4041_v35, %v4375_v55  ;;  %v4046_v57 = vadd.f32 %v4045_v13, %v3718_v33  ;;  %3923 = vmatprep.mubr.bf16.mxu1 %v6422_v42  ;;  %5832 = vmatprep.mubr.msk.bf16.mxu0 %vm6443_vm0, %v8494_v22  ;;  %v3726_v32 = vadd.f32 %v3725_v40, %v7596_v31  ;;  %v6424_v33 = vld [vmem:[%s8462_s0 + $0x960] ss:$36 sps:$4 sm:$0xff]  }
 0x2f3   :  { %v5460_v25 = vpack.c.bf16 %v4448_v11, %v4447_v23  ;;  %v3727_v21 = vpop.f32.mrf.mxu1  ;;  %v5734_v43 = vpop.f32.mrf.mxu0  ;;  %v6427_v55 = vld [vmem:[%s8462_s0 + $0x920] ss:$36 sps:$4 sm:$0xff]  }
 0x2f4   :  { %v4376_v39 = vmul.f32 0.01, %v4046_v57  ;;  %vm4303_vm13 = vcmp.ge.f32.partialorder %v4046_v57, 0.0 }
 0x2f5   :  { %5616 = vst [vmem:[%s8464_s3 + $0x28] sm:$0xff] %v5460_v25   ;;  %v3728_v18 = vpop.f32.mrf.mxu1  ;;  %v4048_v50 = vpop.f32.mrf.mxu0 }
 0x2f6   :  { %v4049_v15 = vadd.f32 %v4048_v50, %v3721_v14  ;;  %v4449_v30 = vsel %vm4303_vm13, %v4046_v57, %v4376_v39  ;;  %v3729_v9 = vadd.f32 %v3728_v18, %v7606_v47  ;;  %v6430_v47 = vld [vmem:[%s8462_s0 + $0x9ac] ss:$36 sps:$4 sm:$0xff]  }
 0x2f7   :  { %v3730_v45 = vpop.f32.mrf.mxu1  ;;  %v5735_v7 = vpop.f32.mrf.mxu0 }
 0x2f8   :  { %vm4304_vm14 = vcmp.ge.f32.partialorder %v4049_v15, 0.0  ;;  %v4377_v12 = vmul.f32 0.01, %v4049_v15  ;;  %v6428_v45 = vld [vmem:[%s8462_s0 + $0x9a8] ss:$36 sps:$4 sm:$0xff]  }
 0x2f9   :  { %v3733_v49 = vpop.f32.mrf.mxu1  ;;  %3924 = vmatmul.mubr.bf16.gmra.mxu1 %v6420_v52  ;;  %v4053_v4 = vpop.f32.mrf.mxu0  ;;  %5833 = vmatmul.mubr.bf16.gmra.mxu0 %v6423_v63  ;;  %v6431_v7 = vld [vmem:[%s8462_s0 + $0x968] ss:$36 sps:$4 sm:$0xff]  }
 0x2fa   :  { %v4450_v53 = vsel %vm4304_vm14, %v4049_v15, %v4377_v12  ;;  %v4054_v2 = vadd.f32 %v4053_v4, %v3726_v32  ;;  %3931 = vmatprep.mubr.bf16.mxu1 %v6426_v29  ;;  %5836 = vmatprep.mubr.msk.bf16.mxu0 %vm6443_vm0, %v8494_v22  ;;  %v3734_v57 = vadd.f32 %v3733_v49, %v7616_v46 }
 0x2fb   :  { %v5465_v37 = vpack.c.bf16 %v4450_v53, %v4449_v30  ;;  %v3735_v35 = vpop.f32.mrf.mxu1  ;;  %v5738_v42 = vpop.f32.mrf.mxu0  ;;  %v8546_v30 = vld [vmem:[#allocation27_spill] sm:$0xff] }
 0x2fc   :  { %v4378_v40 = vmul.f32 0.01, %v4054_v2  ;;  %vm4305_vm15 = vcmp.ge.f32.partialorder %v4054_v2, 0.0 }
 0x2fd   :  { %5617 = vst [vmem:[%s8464_s3 + $0x30] sm:$0xff] %v5465_v37   ;;  %v3736_v31 = vpop.f32.mrf.mxu1  ;;  %v4056_v26 = vpop.f32.mrf.mxu0 }
 0x2fe   :  { %v4057_v13 = vadd.f32 %v4056_v26, %v3729_v9  ;;  %v4451_v14 = vsel %vm4305_vm15, %v4054_v2, %v4378_v40  ;;  %v3737_v15 = vadd.f32 %v3736_v31, %v7626_v59  ;;  %v6434_v59 = vld [vmem:[%s8462_s0 + $0x9f4] ss:$36 sps:$4 sm:$0xff]  }
 0x2ff   :  { %v3738_v23 = vpop.f32.mrf.mxu1  ;;  %v5739_v11 = vpop.f32.mrf.mxu0  ;;  %v378_v40 = vld [vmem:[%s8462_s0 + $0xa38] sm:$0xff] }
 0x300   :  { %vm4306_vm1 = vcmp.ge.f32.partialorder %v4057_v13, 0.0  ;;  %v4379_v25 = vmul.f32 0.01, %v4057_v13  ;;  %v6432_v11 = vld [vmem:[%s8462_s0 + $0x9f0] ss:$36 sps:$4 sm:$0xff]  }
 0x301   :  { %v3741_v21 = vpop.f32.mrf.mxu1  ;;  %3932 = vmatmul.mubr.bf16.gmra.mxu1 %v6424_v33  ;;  %v4061_v43 = vpop.f32.mrf.mxu0  ;;  %5837 = vmatmul.mubr.bf16.gmra.mxu0 %v6427_v55 }
 0x302   :  { %v4452_v18 = vsel %vm4306_vm1, %v4057_v13, %v4379_v25  ;;  %v4062_v50 = vadd.f32 %v4061_v43, %v3734_v57  ;;  %3939 = vmatprep.mubr.bf16.mxu1 %v6430_v47  ;;  %5840 = vmatprep.mubr.msk.bf16.mxu0 %vm6443_vm0, %v8494_v22  ;;  %v3742_v53 = vadd.f32 %v3741_v21, %v8546_v30  ;;  %v6435_v57 = vld [vmem:[%s8462_s0 + $0x9b0] ss:$36 sps:$4 sm:$0xff]  }
 0x303   :  { %v5470_v52 = vpack.c.bf16 %v4452_v18, %v4451_v14  ;;  %v3743_v63 = vpop.f32.mrf.mxu1  ;;  %v5742_v39 = vpop.f32.mrf.mxu0  ;;  %v5212_v43 = vcombine.high %v378_v40, %v378_v40 }
 0x304   :  { %v4380_v32 = vmul.f32 0.01, %v4062_v50  ;;  %vm4307_vm2 = vcmp.ge.f32.partialorder %v4062_v50, 0.0 }
 0x305   :  { %5618 = vst [vmem:[%s8464_s3 + $0x38] sm:$0xff] %v5470_v52   ;;  %v3744_v46 = vpop.f32.mrf.mxu1  ;;  %v4064_v29 = vpop.f32.mrf.mxu0 }
 0x306   :  { %v4065_v12 = vadd.f32 %v4064_v29, %v3737_v15  ;;  %v4453_v42 = vsel %vm4307_vm2, %v4062_v50, %v4380_v32  ;;  %v3745_v13 = vadd.f32 %v3744_v46, %v7649_v41  ;;  %v8547_v32 = vld [vmem:[#allocation28_spill] sm:$0xff] }
 0x307   :  { %v3746_v49 = vpop.f32.mrf.mxu1  ;;  %v5743_v4 = vpop.f32.mrf.mxu0 }
 0x308   :  { %vm4308_vm3 = vcmp.ge.f32.partialorder %v4065_v12, 0.0  ;;  %v4381_v2 = vmul.f32 0.01, %v4065_v12  ;;  %v5211_v49 = vcombine.low %v378_v40, %v378_v40  ;;  %v6438_v4 = vld [vmem:[%s8462_s0 + $0x9f8] ss:$36 sps:$4 sm:$0xff]  }
 0x309   :  { %v3749_v37 = vpop.f32.mrf.mxu1  ;;  %3940 = vmatmul.mubr.bf16.gmra.mxu1 %v6428_v45  ;;  %v4069_v35 = vpop.f32.mrf.mxu0  ;;  %5841 = vmatmul.mubr.bf16.gmra.mxu0 %v6431_v7 }
 0x30a   :  { %v4454_v9 = vsel %vm4308_vm3, %v4065_v12, %v4381_v2  ;;  %v4070_v31 = vadd.f32 %v4069_v35, %v3742_v53  ;;  %3947 = vmatprep.mubr.bf16.mxu1 %v6434_v59  ;;  %5844 = vmatprep.mubr.msk.bf16.mxu0 %vm6443_vm0, %v8494_v22  ;;  %v3750_v18 = vadd.f32 %v3749_v37, %v7656_v1 }
 0x30b   :  { %v5475_v26 = vpack.c.bf16 %v4454_v9, %v4453_v42  ;;  %v3751_v33 = vpop.f32.mrf.mxu1  ;;  %v5746_v55 = vpop.f32.mrf.mxu0 }
 0x30c   :  { %v4382_v25 = vmul.f32 0.01, %v4070_v31  ;;  %vm4309_vm4 = vcmp.ge.f32.partialorder %v4070_v31, 0.0 }
 0x30d   :  { %5619 = vst [vmem:[%s8464_s3 + $0x40] sm:$0xff] %v5475_v26   ;;  %v3752_v47 = vpop.f32.mrf.mxu1  ;;  %v4072_v23 = vpop.f32.mrf.mxu0 }
 0x30e   :  { %v4073_v21 = vadd.f32 %v4072_v23, %v3745_v13  ;;  %v4455_v39 = vsel %vm4309_vm4, %v4070_v31, %v4382_v25  ;;  %v3753_v12 = vadd.f32 %v3752_v47, %v8547_v32 }
 0x30f   :  { %v3754_v14 = vpop.f32.mrf.mxu1  ;;  %v5747_v41 = vpop.f32.mrf.mxu0 }
 0x310   :  { %vm4310_vm5 = vcmp.ge.f32.partialorder %v4073_v21, 0.0  ;;  %v4383_v50 = vmul.f32 0.01, %v4073_v21 }
 0x311   :  { %v3757_v52 = vpop.f32.mrf.mxu1  ;;  %3948 = vmatmul.mubr.bf16.gmra.mxu1 %v6432_v11  ;;  %v4077_v63 = vpop.f32.mrf.mxu0  ;;  %5845 = vmatmul.mubr.bf16.gmra.mxu0 %v6435_v57  ;;  %v6439_v57 = vld [vmem:[%s8462_s0 + $0xa40] ss:$0 sps:$4 sm:$0xff]  }
 0x312   :  { %v4456_v15 = vsel %vm4310_vm5, %v4073_v21, %v4383_v50  ;;  %v4078_v46 = vadd.f32 %v4077_v63, %v3750_v18  ;;  %3955 = vmatprep.mubr.bf16.mxu1 %v5212_v43  ;;  %5848 = vmatprep.mubr.msk.bf16.mxu0 %vm6443_vm0, %v8494_v22  ;;  %v3758_v35 = vadd.f32 %v3757_v52, %v7673_v28 }
 0x313   :  { %v5480_v29 = vpack.c.bf16 %v4456_v15, %v4455_v39  ;;  %v3759_v45 = vpop.f32.mrf.mxu1  ;;  %v5750_v7 = vpop.f32.mrf.mxu0 }
 0x314   :  { %v4384_v30 = vmul.f32 0.01, %v4078_v46  ;;  %vm4311_vm6 = vcmp.ge.f32.partialorder %v4078_v46, 0.0 }
 0x315   :  { %5620 = vst [vmem:[%s8464_s3 + $0x48] sm:$0xff] %v5480_v29   ;;  %v3760_v1 = vpop.f32.mrf.mxu1  ;;  %v4080_v59 = vpop.f32.mrf.mxu0 }
 0x316   :  { %v4081_v53 = vadd.f32 %v4080_v59, %v3753_v12  ;;  %v4457_v26 = vsel %vm4311_vm6, %v4078_v46, %v4384_v30  ;;  %v3761_v23 = vadd.f32 %v3760_v1, %v7680_v10 }
 0x317   :  { %v3762_v2 = vpop.f32.mrf.mxu1  ;;  %v5751_v37 = vpop.f32.mrf.mxu0 }
 0x318   :  { %vm4312_vm7 = vcmp.ge.f32.partialorder %v4081_v53, 0.0  ;;  %v4385_v42 = vmul.f32 0.01, %v4081_v53 }
 0x319   :  { %v3765_v9 = vpop.f32.mrf.mxu1  ;;  %3956 = vmatmul.mubr.bf16.gmra.mxu1 %v5211_v49  ;;  %v4085_v31 = vpop.f32.mrf.mxu0  ;;  %5849 = vmatmul.mubr.bf16.gmra.mxu0 %v6438_v4 }
 0x31a   :  { %v4458_v33 = vsel %vm4312_vm7, %v4081_v53, %v4385_v42  ;;  %v4086_v55 = vadd.f32 %v4085_v31, %v3758_v35  ;;  %5852 = vmatprep.mubr.msk.bf16.mxu0 %vm6443_vm0, %v8494_v22  ;;  %v3766_v14 = vadd.f32 %v3765_v9, %v7687_v36 }
 0x31b   :  { %v5485_v40 = vpack.c.bf16 %v4458_v33, %v4457_v26  ;;  %v3767_v13 = vpop.f32.mrf.mxu1  ;;  %v5754_v47 = vpop.f32.mrf.mxu0 }
 0x31c   :  { %v4386_v25 = vmul.f32 0.01, %v4086_v55  ;;  %vm4313_vm8 = vcmp.ge.f32.partialorder %v4086_v55, 0.0 }
 0x31d   :  { %5621 = vst [vmem:[%s8464_s3 + $0x50] sm:$0xff] %v5485_v40   ;;  %v3768_v28 = vpop.f32.mrf.mxu1  ;;  %v4088_v11 = vpop.f32.mrf.mxu0 }
 0x31e   :  { %v4089_v21 = vadd.f32 %v4088_v11, %v3761_v23  ;;  %v4459_v50 = vsel %vm4313_vm8, %v4086_v55, %v4386_v25  ;;  %v3769_v29 = vadd.f32 %v3768_v28, %v7699_v51 }
 0x31f   :  { %v3770_v43 = vpop.f32.mrf.mxu1  ;;  %v5755_v22 = vpop.f32.mrf.mxu0 }
 0x320   :  { %vm4314_vm0 = vcmp.ge.f32.partialorder %v4089_v21, 0.0  ;;  %v4387_v41 = vmul.f32 0.01, %v4089_v21 }
 0x321   :  { %v3773_v10 = vpop.f32.mrf.mxu1  ;;  %v4093_v18 = vpop.f32.mrf.mxu0  ;;  %5853 = vmatmul.mubr.bf16.gmra.mxu0 %v6439_v57 }
 0x322   :  { %v4460_v52 = vsel %vm4314_vm0, %v4089_v21, %v4387_v41  ;;  %v4094_v63 = vadd.f32 %v4093_v18, %v3766_v14  ;;  %v3774_v59 = vadd.f32 %v3773_v10, %v7706_v17 }
 0x323   :  { %v5490_v39 = vpack.c.bf16 %v4460_v52, %v4459_v50  ;;  %v3775_v15 = vpop.f32.mrf.mxu1  ;;  %v5758_v46 = vpop.f32.mrf.mxu0 }
 0x324   :  { %v4388_v36 = vmul.f32 0.01, %v4094_v63  ;;  %vm4315_vm9 = vcmp.ge.f32.partialorder %v4094_v63, 0.0 }
 0x325   :  { %5622 = vst [vmem:[%s8464_s3 + $0x58] sm:$0xff] %v5490_v39   ;;  %v3776_v45 = vpop.f32.mrf.mxu1  ;;  %v4096_v7 = vpop.f32.mrf.mxu0 }
 0x326   :  { %v4097_v32 = vadd.f32 %v4096_v7, %v3769_v29  ;;  %v4461_v53 = vsel %vm4315_vm9, %v4094_v63, %v4388_v36  ;;  %v3777_v9 = vadd.f32 %v3776_v45, %v7718_v38 }
 0x327   :  { %v3778_v12 = vpop.f32.mrf.mxu1  ;;  %v5759_v1 = vpop.f32.mrf.mxu0 }
 0x328   :  { %vm4316_vm10 = vcmp.ge.f32.partialorder %v4097_v32, 0.0  ;;  %v4389_v49 = vmul.f32 0.01, %v4097_v32 }
 0x329   :  { %v3781_v4 = vpop.f32.mrf.mxu1  ;;  %v4101_v30 = vpop.f32.mrf.mxu0 }
 0x32a   :  { %v4462_v2 = vsel %vm4316_vm10, %v4097_v32, %v4389_v49  ;;  %v4102_v51 = vadd.f32 %v4101_v30, %v3774_v59  ;;  %v3782_v13 = vadd.f32 %v3781_v4, %v7725_v34 }
 0x32b   :  { %v5495_v37 = vpack.c.bf16 %v4462_v2, %v4461_v53  ;;  %v3783_v35 = vpop.f32.mrf.mxu1  ;;  %v5762_v42 = vpop.f32.mrf.mxu0 }
 0x32c   :  { %v4390_v33 = vmul.f32 0.01, %v4102_v51  ;;  %vm4317_vm11 = vcmp.ge.f32.partialorder %v4102_v51, 0.0 }
 0x32d   :  { %5623 = vst [vmem:[%s8464_s3 + $0x60] sm:$0xff] %v5495_v37   ;;  %v3784_v31 = vpop.f32.mrf.mxu1  ;;  %v4104_v26 = vpop.f32.mrf.mxu0 }
 0x32e   :  { %v4105_v17 = vadd.f32 %v4104_v26, %v3777_v9  ;;  %v4463_v11 = vsel %vm4317_vm11, %v4102_v51, %v4390_v33  ;;  %v3785_v22 = vadd.f32 %v3784_v31, %v7737_v54 }
 0x32f   :  { %v3786_v55 = vpop.f32.mrf.mxu1  ;;  %v5763_v40 = vpop.f32.mrf.mxu0 }
 0x330   :  { %vm4318_vm12 = vcmp.ge.f32.partialorder %v4105_v17, 0.0  ;;  %v4391_v47 = vmul.f32 0.01, %v4105_v17 }
 0x331   :  { %v3789_v23 = vpop.f32.mrf.mxu1  ;;  %v4109_v28 = vpop.f32.mrf.mxu0 }
 0x332   :  { %v4464_v57 = vsel %vm4318_vm12, %v4105_v17, %v4391_v47  ;;  %v4110_v38 = vadd.f32 %v4109_v28, %v3782_v13  ;;  %v3790_v52 = vadd.f32 %v3789_v23, %v7744_v62 }
 0x333   :  { %v5500_v25 = vpack.c.bf16 %v4464_v57, %v4463_v11  ;;  %v3791_v21 = vpop.f32.mrf.mxu1  ;;  %v5766_v43 = vpop.f32.mrf.mxu0 }
 0x334   :  { %v4392_v10 = vmul.f32 0.01, %v4110_v38  ;;  %vm4319_vm13 = vcmp.ge.f32.partialorder %v4110_v38, 0.0 }
 0x335   :  { %5624 = vst [vmem:[%s8464_s3 + $0x68] sm:$0xff] %v5500_v25   ;;  %v3792_v14 = vpop.f32.mrf.mxu1  ;;  %v4112_v41 = vpop.f32.mrf.mxu0 }
 0x336   :  { %v4113_v34 = vadd.f32 %v4112_v41, %v3785_v22  ;;  %v4465_v46 = vsel %vm4319_vm13, %v4110_v38, %v4392_v10  ;;  %v3793_v32 = vadd.f32 %v3792_v14, %v7756_v0 }
 0x337   :  { %v3794_v18 = vpop.f32.mrf.mxu1  ;;  %v5767_v50 = vpop.f32.mrf.mxu0 }
 0x338   :  { %vm4320_vm14 = vcmp.ge.f32.partialorder %v4113_v34, 0.0  ;;  %v4393_v63 = vmul.f32 0.01, %v4113_v34 }
 0x339   :  { %v3797_v39 = vpop.f32.mrf.mxu1  ;;  %v4117_v15 = vpop.f32.mrf.mxu0 }
 0x33a   :  { %v4466_v29 = vsel %vm4320_vm14, %v4113_v34, %v4393_v63  ;;  %v4118_v54 = vadd.f32 %v4117_v15, %v3790_v52  ;;  %v3798_v30 = vadd.f32 %v3797_v39, %v7763_v58 }
 0x33b   :  { %v5505_v45 = vpack.c.bf16 %v4466_v29, %v4465_v46  ;;  %v3799_v7 = vpop.f32.mrf.mxu1  ;;  %v5770_v36 = vpop.f32.mrf.mxu0 }
 0x33c   :  { %v4394_v59 = vmul.f32 0.01, %v4118_v54  ;;  %vm4321_vm15 = vcmp.ge.f32.partialorder %v4118_v54, 0.0 }
 0x33d   :  { %5625 = vst [vmem:[%s8464_s3 + $0x70] sm:$0xff] %v5505_v45   ;;  %v3800_v12 = vpop.f32.mrf.mxu1  ;;  %v4120_v1 = vpop.f32.mrf.mxu0 }
 0x33e   :  { %v4121_v62 = vadd.f32 %v4120_v1, %v3793_v32  ;;  %v4467_v37 = vsel %vm4321_vm15, %v4118_v54, %v4394_v59  ;;  %v3801_v26 = vadd.f32 %v3800_v12, %v7775_v24 }
 0x33f   :  { %v3802_v49 = vpop.f32.mrf.mxu1  ;;  %v5771_v4 = vpop.f32.mrf.mxu0 }
 0x340   :  { %vm4322_vm1 = vcmp.ge.f32.partialorder %v4121_v62, 0.0  ;;  %v4395_v53 = vmul.f32 0.01, %v4121_v62 }
 0x341   :  { %v3805_v2 = vpop.f32.mrf.mxu1  ;;  %v4125_v51 = vpop.f32.mrf.mxu0 }
 0x342   :  { %v4468_v35 = vsel %vm4322_vm1, %v4121_v62, %v4395_v53  ;;  %v4126_v0 = vadd.f32 %v4125_v51, %v3798_v30  ;;  %v3806_v47 = vadd.f32 %v3805_v2, %v7782_v61 }
 0x343   :  { %v5510_v42 = vpack.c.bf16 %v4468_v35, %v4467_v37  ;;  %v3807_v9 = vpop.f32.mrf.mxu1  ;;  %v5774_v31 = vpop.f32.mrf.mxu0 }
 0x344   :  { %v4396_v55 = vmul.f32 0.01, %v4126_v0  ;;  %vm4323_vm2 = vcmp.ge.f32.partialorder %v4126_v0, 0.0 }
 0x345   :  { %5626 = vst [vmem:[%s8464_s3 + $0x78] sm:$0xff] %v5510_v42   ;;  %v3808_v33 = vpop.f32.mrf.mxu1  ;;  %v4128_v17 = vpop.f32.mrf.mxu0 }
 0x346   :  { %v4129_v58 = vadd.f32 %v4128_v17, %v3801_v26  ;;  %v4469_v57 = vsel %vm4323_vm2, %v4126_v0, %v4396_v55  ;;  %v3809_v22 = vadd.f32 %v3808_v33, %v7794_v20 }
 0x347   :  { %v3810_v40 = vpop.f32.mrf.mxu1  ;;  %v5775_v13 = vpop.f32.mrf.mxu0 }
 0x348   :  { %vm4324_vm3 = vcmp.ge.f32.partialorder %v4129_v58, 0.0  ;;  %v4397_v23 = vmul.f32 0.01, %v4129_v58 }
 0x349   :  { %v3813_v28 = vpop.f32.mrf.mxu1  ;;  %v4133_v11 = vpop.f32.mrf.mxu0 }
 0x34a   :  { %v4470_v38 = vsel %vm4324_vm3, %v4129_v58, %v4397_v23  ;;  %v4134_v24 = vadd.f32 %v4133_v11, %v3806_v47  ;;  %v3814_v50 = vadd.f32 %v3813_v28, %v7801_v16 }
 0x34b   :  { %v5515_v25 = vpack.c.bf16 %v4470_v38, %v4469_v57  ;;  %v3815_v21 = vpop.f32.mrf.mxu1  ;;  %v5778_v43 = vpop.f32.mrf.mxu0 }
 0x34c   :  { %v4398_v10 = vmul.f32 0.01, %v4134_v24  ;;  %vm4325_vm4 = vcmp.ge.f32.partialorder %v4134_v24, 0.0 }
 0x34d   :  { %5627 = vst [vmem:[%s8464_s3 + $0x80] sm:$0xff] %v5515_v25   ;;  %v3816_v14 = vpop.f32.mrf.mxu1  ;;  %v4136_v41 = vpop.f32.mrf.mxu0 }
 0x34e   :  { %v4137_v61 = vadd.f32 %v4136_v41, %v3809_v22  ;;  %v4471_v15 = vsel %vm4325_vm4, %v4134_v24, %v4398_v10  ;;  %v3817_v7 = vadd.f32 %v3816_v14, %v7813_v27 }
 0x34f   :  { %v3818_v34 = vpop.f32.mrf.mxu1  ;;  %v5779_v18 = vpop.f32.mrf.mxu0 }
 0x350   :  { %vm4326_vm5 = vcmp.ge.f32.partialorder %v4137_v61, 0.0  ;;  %v4399_v52 = vmul.f32 0.01, %v4137_v61 }
 0x351   :  { %v3821_v63 = vpop.f32.mrf.mxu1  ;;  %v4141_v39 = vpop.f32.mrf.mxu0 }
 0x352   :  { %v4472_v46 = vsel %vm4326_vm5, %v4137_v61, %v4399_v52  ;;  %v4142_v20 = vadd.f32 %v4141_v39, %v3814_v50  ;;  %v3822_v62 = vadd.f32 %v3821_v63, %v7820_v6 }
 0x353   :  { %v5520_v29 = vpack.c.bf16 %v4472_v46, %v4471_v15  ;;  %v3823_v54 = vpop.f32.mrf.mxu1  ;;  %v5782_v45 = vpop.f32.mrf.mxu0 }
 0x354   :  { %v4400_v12 = vmul.f32 0.01, %v4142_v20  ;;  %vm4327_vm6 = vcmp.ge.f32.partialorder %v4142_v20, 0.0 }
 0x355   :  { %5628 = vst [vmem:[%s8464_s3 + $0x88] sm:$0xff] %v5520_v29   ;;  %v3824_v36 = vpop.f32.mrf.mxu1  ;;  %v4144_v32 = vpop.f32.mrf.mxu0 }
 0x356   :  { %v4145_v16 = vadd.f32 %v4144_v32, %v3817_v7  ;;  %v4473_v53 = vsel %vm4327_vm6, %v4142_v20, %v4400_v12  ;;  %v3825_v0 = vadd.f32 %v3824_v36, %v7832_v44 }
 0x357   :  { %v3826_v1 = vpop.f32.mrf.mxu1  ;;  %v5783_v59 = vpop.f32.mrf.mxu0 }
 0x358   :  { %vm4328_vm7 = vcmp.ge.f32.partialorder %v4145_v16, 0.0  ;;  %v4401_v49 = vmul.f32 0.01, %v4145_v16 }
 0x359   :  { %v3829_v4 = vpop.f32.mrf.mxu1  ;;  %v4149_v30 = vpop.f32.mrf.mxu0 }
 0x35a   :  { %v4474_v2 = vsel %vm4328_vm7, %v4145_v16, %v4401_v49  ;;  %v4150_v27 = vadd.f32 %v4149_v30, %v3822_v62  ;;  %v3830_v17 = vadd.f32 %v3829_v4, %v7839_v8 }
 0x35b   :  { %v5525_v51 = vpack.c.bf16 %v4474_v2, %v4473_v53  ;;  %v3831_v37 = vpop.f32.mrf.mxu1  ;;  %v5786_v35 = vpop.f32.mrf.mxu0 }
 0x35c   :  { %v4402_v31 = vmul.f32 0.01, %v4150_v27  ;;  %vm4329_vm8 = vcmp.ge.f32.partialorder %v4150_v27, 0.0 }
 0x35d   :  { %5629 = vst [vmem:[%s8464_s3 + $0x90] sm:$0xff] %v5525_v51   ;;  %v3832_v42 = vpop.f32.mrf.mxu1  ;;  %v4152_v9 = vpop.f32.mrf.mxu0 }
 0x35e   :  { %v4153_v6 = vadd.f32 %v4152_v9, %v3825_v0  ;;  %v4475_v13 = vsel %vm4329_vm8, %v4150_v27, %v4402_v31  ;;  %v3833_v57 = vadd.f32 %v3832_v42, %v7851_v56  ;;  %v8548_v27 = vld [vmem:[#allocation2_spill] sm:$0xff] }
 0x35f   :  { %v3834_v26 = vpop.f32.mrf.mxu1  ;;  %v5787_v33 = vpop.f32.mrf.mxu0 }
 0x360   :  { %vm4330_vm0 = vcmp.ge.f32.partialorder %v4153_v6, 0.0  ;;  %v4403_v55 = vmul.f32 0.01, %v4153_v6  ;;  %v8549_v33 = vld [vmem:[#allocation3_spill] sm:$0xff] }
 0x361   :  { %v3837_v58 = vpop.f32.mrf.mxu1  ;;  %v4157_v40 = vpop.f32.mrf.mxu0 }
 0x362   :  { %v4476_v47 = vsel %vm4330_vm0, %v4153_v6, %v4403_v55  ;;  %v4158_v44 = vadd.f32 %v4157_v40, %v3830_v17  ;;  %v3838_v22 = vadd.f32 %v3837_v58, %v7858_v48 }
 0x363   :  { %v5530_v23 = vpack.c.bf16 %v4476_v47, %v4475_v13  ;;  %v3839_v28 = vpop.f32.mrf.mxu1  ;;  %v5790_v11 = vpop.f32.mrf.mxu0 }
 0x364   :  { %v4404_v25 = vmul.f32 0.01, %v4158_v44  ;;  %vm4331_vm9 = vcmp.ge.f32.partialorder %v4158_v44, 0.0 }
 0x365   :  { %5630 = vst [vmem:[%s8464_s3 + $0x98] sm:$0xff] %v5530_v23   ;;  %v3840_v38 = vpop.f32.mrf.mxu1  ;;  %v4160_v24 = vpop.f32.mrf.mxu0  ;;  %v8550_v23 = vld [vmem:[#allocation4_spill] sm:$0xff] }
 0x366   :  { %v4161_v8 = vadd.f32 %v4160_v24, %v3833_v57  ;;  %v4477_v61 = vsel %vm4331_vm9, %v4158_v44, %v4404_v25  ;;  %v3841_v63 = vadd.f32 %v3840_v38, %v7870_v5 }
 0x367   :  { %v3842_v21 = vpop.f32.mrf.mxu1  ;;  %v5791_v43 = vpop.f32.mrf.mxu0 }
 0x368   :  { %vm4332_vm10 = vcmp.ge.f32.partialorder %v4161_v8, 0.0  ;;  %v4405_v14 = vmul.f32 0.01, %v4161_v8 }
 0x369   :  { %v3845_v41 = vpop.f32.mrf.mxu1  ;;  %v4165_v10 = vpop.f32.mrf.mxu0 }
 0x36a   :  { %v4478_v34 = vsel %vm4332_vm10, %v4161_v8, %v4405_v14  ;;  %v4166_v56 = vadd.f32 %v4165_v10, %v3838_v22  ;;  %v3846_v54 = vadd.f32 %v3845_v41, %v7877_v60  ;;  %v8551_v14 = vld [vmem:[#allocation5_spill] sm:$0xff] }
 0x36b   :  { %v5535_v18 = vpack.c.bf16 %v4478_v34, %v4477_v61  ;;  %v3847_v50 = vpop.f32.mrf.mxu1  ;;  %v5794_v52 = vpop.f32.mrf.mxu0 }
 0x36c   :  { %v4406_v46 = vmul.f32 0.01, %v4166_v56  ;;  %vm4333_vm11 = vcmp.ge.f32.partialorder %v4166_v56, 0.0  ;;  %v8552_v52 = vld [vmem:[#allocation6_spill] sm:$0xff] }
 0x36d   :  { %5631 = vst [vmem:[%s8464_s3 + $0xa0] sm:$0xff] %v5535_v18   ;;  %v3848_v39 = vpop.f32.mrf.mxu1  ;;  %v4168_v15 = vpop.f32.mrf.mxu0 }
 0x36e   :  { %v4169_v48 = vadd.f32 %v4168_v15, %v3841_v63  ;;  %v4479_v32 = vsel %vm4333_vm11, %v4166_v56, %v4406_v46  ;;  %v3849_v62 = vadd.f32 %v3848_v39, %v7894_v19 }
 0x36f   :  { %v3850_v20 = vpop.f32.mrf.mxu1  ;;  %v5795_v29 = vpop.f32.mrf.mxu0 }
 0x370   :  { %vm4334_vm12 = vcmp.ge.f32.partialorder %v4169_v48, 0.0  ;;  %v4407_v45 = vmul.f32 0.01, %v4169_v48 }
 0x371   :  { %v3853_v7 = vpop.f32.mrf.mxu1  ;;  %v4173_v36 = vpop.f32.mrf.mxu0 }
 0x372   :  { %v4480_v12 = vsel %vm4334_vm12, %v4169_v48, %v4407_v45  ;;  %v4174_v5 = vadd.f32 %v4173_v36, %v3846_v54  ;;  %v3854_v51 = vadd.f32 %v3853_v7, %v8548_v27  ;;  %v8553_v36 = vld [vmem:[#allocation7_spill] sm:$0xff] }
 0x373   :  { %v5540_v16 = vpack.c.bf16 %v4480_v12, %v4479_v32  ;;  %v3855_v1 = vpop.f32.mrf.mxu1  ;;  %v5798_v59 = vpop.f32.mrf.mxu0 }
 0x374   :  { %v4408_v30 = vmul.f32 0.01, %v4174_v5  ;;  %vm4335_vm13 = vcmp.ge.f32.partialorder %v4174_v5, 0.0 }
 0x375   :  { %5632 = vst [vmem:[%s8464_s3 + $0xa8] sm:$0xff] %v5540_v16   ;;  %v3856_v49 = vpop.f32.mrf.mxu1  ;;  %v4176_v4 = vpop.f32.mrf.mxu0 }
 0x376   :  { %v4177_v60 = vadd.f32 %v4176_v4, %v3849_v62  ;;  %v4481_v42 = vsel %vm4335_vm13, %v4174_v5, %v4408_v30  ;;  %v3857_v17 = vadd.f32 %v3856_v49, %v8549_v33  ;;  %v8554_v49 = vld [vmem:[#allocation8_spill] sm:$0xff] }
 0x377   :  { %v3858_v53 = vpop.f32.mrf.mxu1  ;;  %v5799_v2 = vpop.f32.mrf.mxu0 }
 0x378   :  { %vm4336_vm14 = vcmp.ge.f32.partialorder %v4177_v60, 0.0  ;;  %v4409_v37 = vmul.f32 0.01, %v4177_v60 }
 0x379   :  { %v3861_v35 = vpop.f32.mrf.mxu1  ;;  %v4181_v0 = vpop.f32.mrf.mxu0 }
 0x37a   :  { %v4482_v9 = vsel %vm4336_vm14, %v4177_v60, %v4409_v37  ;;  %v4182_v19 = vadd.f32 %v4181_v0, %v3854_v51  ;;  %v3862_v28 = vadd.f32 %v3861_v35, %v8550_v23 }
 0x37b   :  { %v5545_v31 = vpack.c.bf16 %v4482_v9, %v4481_v42  ;;  %v3863_v6 = vpop.f32.mrf.mxu1  ;;  %v5802_v26 = vpop.f32.mrf.mxu0  ;;  %v8555_v42 = vld [vmem:[#allocation9_spill] sm:$0xff] }
 0x37c   :  { %v4410_v40 = vmul.f32 0.01, %v4182_v19  ;;  %vm4337_vm15 = vcmp.ge.f32.partialorder %v4182_v19, 0.0 }
 0x37d   :  { %5633 = vst [vmem:[%s8464_s3 + $0xb0] sm:$0xff] %v5545_v31   ;;  %v3864_v55 = vpop.f32.mrf.mxu1  ;;  %v4184_v58 = vpop.f32.mrf.mxu0 }
 0x37e   :  { %v4185_v13 = vadd.f32 %v4184_v58, %v3857_v17  ;;  %v4483_v24 = vsel %vm4337_vm15, %v4182_v19, %v4410_v40  ;;  %v3865_v41 = vadd.f32 %v3864_v55, %v8551_v14  ;;  %v8556_v55 = vld [vmem:[#allocation10_spill] sm:$0xff] }
 0x37f   :  { %v3866_v47 = vpop.f32.mrf.mxu1  ;;  %v5803_v44 = vpop.f32.mrf.mxu0 }
 0x380   :  { %vm4338_vm1 = vcmp.ge.f32.partialorder %v4185_v13, 0.0  ;;  %v4411_v11 = vmul.f32 0.01, %v4185_v13 }
 0x381   :  { %v3869_v57 = vpop.f32.mrf.mxu1  ;;  %v4189_v38 = vpop.f32.mrf.mxu0 }
 0x382   :  { %v4484_v25 = vsel %vm4338_vm1, %v4185_v13, %v4411_v11  ;;  %v4190_v8 = vadd.f32 %v4189_v38, %v3862_v28  ;;  %v3870_v63 = vadd.f32 %v3869_v57, %v8552_v52 }
 0x383   :  { %v5550_v21 = vpack.c.bf16 %v4484_v25, %v4483_v24  ;;  %v3871_v43 = vpop.f32.mrf.mxu1  ;;  %v5806_v22 = vpop.f32.mrf.mxu0  ;;  %v8557_v24 = vld [vmem:[#allocation11_spill] sm:$0xff] }
 0x384   :  { %v4412_v34 = vmul.f32 0.01, %v4190_v8  ;;  %vm4339_vm2 = vcmp.ge.f32.partialorder %v4190_v8, 0.0 }
 0x385   :  { %5634 = vst [vmem:[%s8464_s3 + $0xb8] sm:$0xff] %v5550_v21   ;;  %v3872_v10 = vpop.f32.mrf.mxu1  ;;  %v4192_v61 = vpop.f32.mrf.mxu0 }
 0x386   :  { %v4193_v56 = vadd.f32 %v4192_v61, %v3865_v41  ;;  %v4485_v48 = vsel %vm4339_vm2, %v4190_v8, %v4412_v34  ;;  %v3873_v32 = vadd.f32 %v3872_v10, %v8553_v36  ;;  %v8558_v10 = vld [vmem:[#allocation12_spill] sm:$0xff] }
 0x387   :  { %v3874_v18 = vpop.f32.mrf.mxu1  ;;  %v5807_v50 = vpop.f32.mrf.mxu0 }
 0x388   :  { %vm4340_vm3 = vcmp.ge.f32.partialorder %v4193_v56, 0.0  ;;  %v4413_v39 = vmul.f32 0.01, %v4193_v56 }
 0x389   :  { %v3877_v15 = vpop.f32.mrf.mxu1  ;;  %v4197_v46 = vpop.f32.mrf.mxu0 }
 0x38a   :  { %v4486_v20 = vsel %vm4340_vm3, %v4193_v56, %v4413_v39  ;;  %v4198_v29 = vadd.f32 %v4197_v46, %v3870_v63  ;;  %v3878_v4 = vadd.f32 %v3877_v15, %v8554_v49 }
 0x38b   :  { %v5555_v54 = vpack.c.bf16 %v4486_v20, %v4485_v48  ;;  %v3879_v45 = vpop.f32.mrf.mxu1  ;;  %v5810_v7 = vpop.f32.mrf.mxu0  ;;  %v8559_v48 = vld [vmem:[#allocation13_spill] sm:$0xff] }
 0x38c   :  { %v4414_v16 = vmul.f32 0.01, %v4198_v29  ;;  %vm4341_vm4 = vcmp.ge.f32.partialorder %v4198_v29, 0.0 }
 0x38d   :  { %5635 = vst [vmem:[%s8464_s3 + $0xc0] sm:$0xff] %v5555_v54   ;;  %v3880_v12 = vpop.f32.mrf.mxu1  ;;  %v4200_v5 = vpop.f32.mrf.mxu0 }
 0x38e   :  { %v4201_v1 = vadd.f32 %v4200_v5, %v3873_v32  ;;  %v4487_v2 = vsel %vm4341_vm4, %v4198_v29, %v4414_v16  ;;  %v3881_v9 = vadd.f32 %v3880_v12, %v8555_v42  ;;  %v8560_v12 = vld [vmem:[#allocation14_spill] sm:$0xff] }
 0x38f   :  { %v3882_v59 = vpop.f32.mrf.mxu1  ;;  %v5811_v62 = vpop.f32.mrf.mxu0 }
 0x390   :  { %vm4342_vm5 = vcmp.ge.f32.partialorder %v4201_v1, 0.0  ;;  %v4415_v30 = vmul.f32 0.01, %v4201_v1 }
 0x391   :  { %v3885_v60 = vpop.f32.mrf.mxu1  ;;  %v4205_v53 = vpop.f32.mrf.mxu0 }
 0x392   :  { %v4488_v27 = vsel %vm4342_vm5, %v4201_v1, %v4415_v30  ;;  %v4206_v51 = vadd.f32 %v4205_v53, %v3878_v4  ;;  %v3886_v58 = vadd.f32 %v3885_v60, %v8556_v55 }
 0x393   :  { %v5560_v37 = vpack.c.bf16 %v4488_v27, %v4487_v2  ;;  %v3887_v35 = vpop.f32.mrf.mxu1  ;;  %v5814_v0 = vpop.f32.mrf.mxu0  ;;  %v8561_v2 = vld [vmem:[#allocation15_spill] sm:$0xff] }
 0x394   :  { %v4416_v6 = vmul.f32 0.01, %v4206_v51  ;;  %vm4343_vm6 = vcmp.ge.f32.partialorder %v4206_v51, 0.0 }
 0x395   :  { %5636 = vst [vmem:[%s8464_s3 + $0xc8] sm:$0xff] %v5560_v37   ;;  %v3888_v19 = vpop.f32.mrf.mxu1  ;;  %v4208_v31 = vpop.f32.mrf.mxu0 }
 0x396   :  { %v4209_v26 = vadd.f32 %v4208_v31, %v3881_v9  ;;  %v4489_v44 = vsel %vm4343_vm6, %v4206_v51, %v4416_v6  ;;  %v3889_v25 = vadd.f32 %v3888_v19, %v8557_v24  ;;  %v8562_v19 = vld [vmem:[#allocation16_spill] sm:$0xff] }
 0x397   :  { %v3890_v33 = vpop.f32.mrf.mxu1  ;;  %v5815_v17 = vpop.f32.mrf.mxu0 }
 0x398   :  { %vm4344_vm7 = vcmp.ge.f32.partialorder %v4209_v26, 0.0  ;;  %v4417_v40 = vmul.f32 0.01, %v4209_v26 }
 0x399   :  { %v3893_v13 = vpop.f32.mrf.mxu1  ;;  %v4213_v47 = vpop.f32.mrf.mxu0 }
 0x39a   :  { %v4490_v23 = vsel %vm4344_vm7, %v4209_v26, %v4417_v40  ;;  %v4214_v28 = vadd.f32 %v4213_v47, %v3886_v58  ;;  %v3894_v61 = vadd.f32 %v3893_v13, %v8558_v10 }
 0x39b   :  { %v5565_v11 = vpack.c.bf16 %v4490_v23, %v4489_v44  ;;  %v3895_v57 = vpop.f32.mrf.mxu1  ;;  %v5818_v38 = vpop.f32.mrf.mxu0  ;;  %v8563_v44 = vld [vmem:[#allocation17_spill] sm:$0xff] }
 0x39c   :  { %v4418_v43 = vmul.f32 0.01, %v4214_v28  ;;  %vm4345_vm8 = vcmp.ge.f32.partialorder %v4214_v28, 0.0 }
 0x39d   :  { %5637 = vst [vmem:[%s8464_s3 + $0xd0] sm:$0xff] %v5565_v11   ;;  %v3896_v8 = vpop.f32.mrf.mxu1  ;;  %v4216_v21 = vpop.f32.mrf.mxu0 }
 0x39e   :  { %v4217_v22 = vadd.f32 %v4216_v21, %v3889_v25  ;;  %v4491_v50 = vsel %vm4345_vm8, %v4214_v28, %v4418_v43  ;;  %v3897_v20 = vadd.f32 %v3896_v8, %v8559_v48  ;;  %v8564_v8 = vld [vmem:[#allocation18_spill] sm:$0xff] }
 0x39f   :  { %v3898_v14 = vpop.f32.mrf.mxu1  ;;  %v5819_v41 = vpop.f32.mrf.mxu0 }
 0x3a0   :  { %vm4346_vm0 = vcmp.ge.f32.partialorder %v4217_v22, 0.0  ;;  %v4419_v34 = vmul.f32 0.01, %v4217_v22 }
 0x3a1   :  { %v3901_v56 = vpop.f32.mrf.mxu1  ;;  %v4221_v18 = vpop.f32.mrf.mxu0 }
 0x3a2   :  { %v4492_v52 = vsel %vm4346_vm0, %v4217_v22, %v4419_v34  ;;  %v4222_v63 = vadd.f32 %v4221_v18, %v3894_v61  ;;  %v3902_v5 = vadd.f32 %v3901_v56, %v8560_v12 }
 0x3a3   :  { %v5570_v39 = vpack.c.bf16 %v4492_v52, %v4491_v50  ;;  %v3903_v15 = vpop.f32.mrf.mxu1  ;;  %v5822_v46 = vpop.f32.mrf.mxu0  ;;  %v8565_v50 = vld [vmem:[#allocation19_spill] sm:$0xff] }
 0x3a4   :  { %v4420_v45 = vmul.f32 0.01, %v4222_v63  ;;  %vm4347_vm9 = vcmp.ge.f32.partialorder %v4222_v63, 0.0 }
 0x3a5   :  { %5638 = vst [vmem:[%s8464_s3 + $0xd8] sm:$0xff] %v5570_v39   ;;  %v3904_v29 = vpop.f32.mrf.mxu1  ;;  %v4224_v54 = vpop.f32.mrf.mxu0 }
 0x3a6   :  { %v4225_v7 = vadd.f32 %v4224_v54, %v3897_v20  ;;  %v4493_v62 = vsel %vm4347_vm9, %v4222_v63, %v4420_v45  ;;  %v3905_v27 = vadd.f32 %v3904_v29, %v8561_v2  ;;  %v8566_v29 = vld [vmem:[#allocation20_spill] sm:$0xff] }
 0x3a7   :  { %v3906_v36 = vpop.f32.mrf.mxu1  ;;  %v5823_v32 = vpop.f32.mrf.mxu0 }
 0x3a8   :  { %vm4348_vm10 = vcmp.ge.f32.partialorder %v4225_v7, 0.0  ;;  %v4421_v16 = vmul.f32 0.01, %v4225_v7 }
 0x3a9   :  { %v3909_v1 = vpop.f32.mrf.mxu1  ;;  %v4229_v59 = vpop.f32.mrf.mxu0 }
 0x3aa   :  { %v4494_v49 = vsel %vm4348_vm10, %v4225_v7, %v4421_v16  ;;  %v4230_v4 = vadd.f32 %v4229_v59, %v3902_v5  ;;  %v3910_v31 = vadd.f32 %v3909_v1, %v8562_v19 }
 0x3ab   :  { %v5575_v30 = vpack.c.bf16 %v4494_v49, %v4493_v62  ;;  %v3911_v60 = vpop.f32.mrf.mxu1  ;;  %v5826_v53 = vpop.f32.mrf.mxu0  ;;  %v8567_v62 = vld [vmem:[#allocation21_spill] sm:$0xff] }
 0x3ac   :  { %v4422_v35 = vmul.f32 0.01, %v4230_v4  ;;  %vm4349_vm11 = vcmp.ge.f32.partialorder %v4230_v4, 0.0 }
 0x3ad   :  { %5639 = vst [vmem:[%s8464_s3 + $0xe0] sm:$0xff] %v5575_v30   ;;  %v3912_v51 = vpop.f32.mrf.mxu1  ;;  %v4232_v37 = vpop.f32.mrf.mxu0 }
 0x3ae   :  { %v4233_v0 = vadd.f32 %v4232_v37, %v3905_v27  ;;  %v4495_v17 = vsel %vm4349_vm11, %v4230_v4, %v4422_v35  ;;  %v3913_v23 = vadd.f32 %v3912_v51, %v8563_v44  ;;  %v8568_v51 = vld [vmem:[#allocation22_spill] sm:$0xff] }
 0x3af   :  { %v3914_v42 = vpop.f32.mrf.mxu1  ;;  %v5827_v9 = vpop.f32.mrf.mxu0 }
 0x3b0   :  { %vm4350_vm12 = vcmp.ge.f32.partialorder %v4233_v0, 0.0  ;;  %v4423_v6 = vmul.f32 0.01, %v4233_v0 }
 0x3b1   :  { %v3917_v26 = vpop.f32.mrf.mxu1  ;;  %v4237_v33 = vpop.f32.mrf.mxu0 }
 0x3b2   :  { %v4496_v55 = vsel %vm4350_vm12, %v4233_v0, %v4423_v6  ;;  %v4238_v58 = vadd.f32 %v4237_v33, %v3910_v31  ;;  %v3918_v21 = vadd.f32 %v3917_v26, %v8564_v8 }
 0x3b3   :  { %v5580_v40 = vpack.c.bf16 %v4496_v55, %v4495_v17  ;;  %v3919_v13 = vpop.f32.mrf.mxu1  ;;  %v5830_v47 = vpop.f32.mrf.mxu0  ;;  %v8569_v17 = vld [vmem:[#allocation23_spill] sm:$0xff] }
 0x3b4   :  { %v4424_v57 = vmul.f32 0.01, %v4238_v58  ;;  %vm4351_vm13 = vcmp.ge.f32.partialorder %v4238_v58, 0.0 }
 0x3b5   :  { %5640 = vst [vmem:[%s8464_s3 + $0xe8] sm:$0xff] %v5580_v40   ;;  %v3920_v28 = vpop.f32.mrf.mxu1  ;;  %v4240_v11 = vpop.f32.mrf.mxu0 }
 0x3b6   :  { %v4241_v38 = vadd.f32 %v4240_v11, %v3913_v23  ;;  %v4497_v41 = vsel %vm4351_vm13, %v4238_v58, %v4424_v57  ;;  %v3921_v52 = vadd.f32 %v3920_v28, %v8565_v50  ;;  %v8570_v28 = vld [vmem:[#allocation24_spill] sm:$0xff] }
 0x3b7   :  { %v3922_v24 = vpop.f32.mrf.mxu1  ;;  %v5831_v25 = vpop.f32.mrf.mxu0 }
 0x3b8   :  { %vm4352_vm14 = vcmp.ge.f32.partialorder %v4241_v38, 0.0  ;;  %v4425_v43 = vmul.f32 0.01, %v4241_v38 }
 0x3b9   :  { %v3925_v22 = vpop.f32.mrf.mxu1  ;;  %v4245_v14 = vpop.f32.mrf.mxu0 }
 0x3ba   :  { %v4498_v10 = vsel %vm4352_vm14, %v4241_v38, %v4425_v43  ;;  %v4246_v61 = vadd.f32 %v4245_v14, %v3918_v21  ;;  %v3926_v54 = vadd.f32 %v3925_v22, %v8566_v29 }
 0x3bb   :  { %v5585_v34 = vpack.c.bf16 %v4498_v10, %v4497_v41  ;;  %v3927_v56 = vpop.f32.mrf.mxu1  ;;  %v5834_v18 = vpop.f32.mrf.mxu0 }
 0x3bc   :  { %v4426_v15 = vmul.f32 0.01, %v4246_v61  ;;  %vm4353_vm15 = vcmp.ge.f32.partialorder %v4246_v61, 0.0 }
 0x3bd   :  { %5641 = vst [vmem:[%s8464_s3 + $0xf0] sm:$0xff] %v5585_v34   ;;  %v3928_v63 = vpop.f32.mrf.mxu1  ;;  %v4248_v39 = vpop.f32.mrf.mxu0 }
 0x3be   :  { %v4249_v46 = vadd.f32 %v4248_v39, %v3921_v52  ;;  %v4499_v32 = vsel %vm4353_vm15, %v4246_v61, %v4426_v15  ;;  %v3929_v49 = vadd.f32 %v3928_v63, %v8567_v62  ;;  %v8571_v52 = vld [vmem:[#allocation25_spill] sm:$0xff] }
 0x3bf   :  { %v3930_v48 = vpop.f32.mrf.mxu1  ;;  %v5835_v20 = vpop.f32.mrf.mxu0  ;;  %v8573_v62 = vld [vmem:[#allocation29_spill] sm:$0xff] }
 0x3c0   :  { %vm4354_vm1 = vcmp.ge.f32.partialorder %v4249_v46, 0.0  ;;  %v4427_v45 = vmul.f32 0.01, %v4249_v46 }
 0x3c1   :  { %v3933_v7 = vpop.f32.mrf.mxu1  ;;  %v4253_v36 = vpop.f32.mrf.mxu0 }
 0x3c2   :  { %v4500_v12 = vsel %vm4354_vm1, %v4249_v46, %v4427_v45  ;;  %v4254_v5 = vadd.f32 %v4253_v36, %v3926_v54  ;;  %v3934_v37 = vadd.f32 %v3933_v7, %v8568_v51  ;;  %v8572_v7 = vld [vmem:[#allocation26_spill] sm:$0xff] }
 0x3c3   :  { %v5590_v16 = vpack.c.bf16 %v4500_v12, %v4499_v32  ;;  %v3935_v1 = vpop.f32.mrf.mxu1  ;;  %v5838_v59 = vpop.f32.mrf.mxu0 }
 0x3c4   :  { %v4428_v60 = vmul.f32 0.01, %v4254_v5  ;;  %vm4355_vm2 = vcmp.ge.f32.partialorder %v4254_v5, 0.0 }
 0x3c5   :  { %5642 = vst [vmem:[%s8464_s3 + $0xf8] sm:$0xff] %v5590_v16   ;;  %v3936_v4 = vpop.f32.mrf.mxu1  ;;  %v4256_v30 = vpop.f32.mrf.mxu0 }
 0x3c6   :  { %v4257_v53 = vadd.f32 %v4256_v30, %v3929_v49  ;;  %v4501_v9 = vsel %vm4355_vm2, %v4254_v5, %v4428_v60  ;;  %v3937_v55 = vadd.f32 %v3936_v4, %v8569_v17 }
 0x3c7   :  { %v3938_v2 = vpop.f32.mrf.mxu1  ;;  %v5839_v27 = vpop.f32.mrf.mxu0 }
 0x3c8   :  { %vm4356_vm3 = vcmp.ge.f32.partialorder %v4257_v53, 0.0  ;;  %v4429_v35 = vmul.f32 0.01, %v4257_v53 }
 0x3c9   :  { %v3941_v0 = vpop.f32.mrf.mxu1  ;;  %v4261_v42 = vpop.f32.mrf.mxu0 }
 0x3ca   :  { %v4502_v19 = vsel %vm4356_vm3, %v4257_v53, %v4429_v35  ;;  %v4262_v31 = vadd.f32 %v4261_v42, %v3934_v37  ;;  %v3942_v11 = vadd.f32 %v3941_v0, %v8570_v28 }
 0x3cb   :  { %v5595_v6 = vpack.c.bf16 %v4502_v19, %v4501_v9  ;;  %v3943_v26 = vpop.f32.mrf.mxu1  ;;  %v5842_v33 = vpop.f32.mrf.mxu0 }
 0x3cc   :  { %v4430_v13 = vmul.f32 0.01, %v4262_v31  ;;  %vm4357_vm4 = vcmp.ge.f32.partialorder %v4262_v31, 0.0 }
 0x3cd   :  { %5643 = vst [vmem:[%s8464_s3 + $0x100] sm:$0xff] %v5595_v6   ;;  %v3944_v58 = vpop.f32.mrf.mxu1  ;;  %v4264_v40 = vpop.f32.mrf.mxu0 }
 0x3ce   :  { %v4265_v47 = vadd.f32 %v4264_v40, %v3937_v55  ;;  %v4503_v25 = vsel %vm4357_vm4, %v4262_v31, %v4430_v13  ;;  %v3945_v41 = vadd.f32 %v3944_v58, %v8122_v3 }
 0x3cf   :  { %v3946_v44 = vpop.f32.mrf.mxu1  ;;  %v5843_v23 = vpop.f32.mrf.mxu0 }
 0x3d0   :  { %vm4358_vm5 = vcmp.ge.f32.partialorder %v4265_v47, 0.0  ;;  %v4431_v57 = vmul.f32 0.01, %v4265_v47 }
 0x3d1   :  { %v3949_v38 = vpop.f32.mrf.mxu1  ;;  %v4269_v24 = vpop.f32.mrf.mxu0 }
 0x3d2   :  { %v4504_v8 = vsel %vm4358_vm5, %v4265_v47, %v4431_v57  ;;  %v4270_v21 = vadd.f32 %v4269_v24, %v3942_v11  ;;  %v3950_v63 = vadd.f32 %v3949_v38, %v8571_v52 }
 0x3d3   :  { %v5600_v43 = vpack.c.bf16 %v4504_v8, %v4503_v25  ;;  %v3951_v22 = vpop.f32.mrf.mxu1  ;;  %v5846_v14 = vpop.f32.mrf.mxu0 }
 0x3d4   :  { %v4432_v34 = vmul.f32 0.01, %v4270_v21  ;;  %vm4359_vm6 = vcmp.ge.f32.partialorder %v4270_v21, 0.0 }
 0x3d5   :  { %5644 = vst [vmem:[%s8464_s3 + $0x108] sm:$0xff] %v5600_v43   ;;  %v3952_v10 = vpop.f32.mrf.mxu1  ;;  %v4272_v61 = vpop.f32.mrf.mxu0 }
 0x3d6   :  { %v4273_v56 = vadd.f32 %v4272_v61, %v3945_v41  ;;  %v4505_v48 = vsel %vm4359_vm6, %v4270_v21, %v4432_v34  ;;  %v3953_v36 = vadd.f32 %v3952_v10, %v8572_v7 }
 0x3d7   :  { %v3954_v18 = vpop.f32.mrf.mxu1  ;;  %v5847_v50 = vpop.f32.mrf.mxu0 }
 0x3d8   :  { %vm4360_vm7 = vcmp.ge.f32.partialorder %v4273_v56, 0.0  ;;  %v4433_v39 = vmul.f32 0.01, %v4273_v56 }
 0x3d9   :  { %v3957_v15 = vpop.f32.mrf.mxu1  ;;  %v4277_v46 = vpop.f32.mrf.mxu0 }
 0x3da   :  { %v4506_v20 = vsel %vm4360_vm7, %v4273_v56, %v4433_v39  ;;  %v4278_v3 = vadd.f32 %v4277_v46, %v3950_v63  ;;  %v3958_v49 = vadd.f32 %v3957_v15, %v8573_v62 }
 0x3db   :  { %v5605_v29 = vpack.c.bf16 %v4506_v20, %v4505_v48  ;;  %v5850_v54 = vpop.f32.mrf.mxu0  ;;  %v3959_v45 = vpop.f32.mrf.mxu1 }
 0x3dc   :  { %v4434_v5 = vmul.f32 0.01, %v4278_v3  ;;  %vm4361_vm8 = vcmp.ge.f32.partialorder %v4278_v3, 0.0 }
 0x3dd   :  { %5645 = vst [vmem:[%s8464_s3 + $0x110] sm:$0xff] %v5605_v29   ;;  %v4280_v32 = vpop.f32.mrf.mxu0  ;;  %v3960_v12 = vpop.f32.mrf.mxu1 }
 0x3de   :  { %v4281_v16 = vadd.f32 %v4280_v32, %v3953_v36  ;;  %v4507_v60 = vsel %vm4361_vm8, %v4278_v3, %v4434_v5 }
 0x3df   :  { %v5851_v1 = vpop.f32.mrf.mxu0  ;;  %v3961_v59 = vpop.f32.mrf.mxu1 }
 0x3e0   :  { %vm4362_vm0 = vcmp.ge.f32.partialorder %v4281_v16, 0.0  ;;  %v4435_v4 = vmul.f32 0.01, %v4281_v16 }
 0x3e1   :  { %v4285_v30 = vpop.f32.mrf.mxu0 }
 0x3e2   :  { %v4508_v53 = vsel %vm4362_vm0, %v4281_v16, %v4435_v4  ;;  %v4286_v2 = vadd.f32 %v4285_v30, %v3958_v49 }
 0x3e3   :  { %v5610_v27 = vpack.c.bf16 %v4508_v53, %v4507_v60  ;;  %v5854_v51 = vpop.f32.mrf.mxu0 }
 0x3e4   :  { %vm4363_vm9 = vcmp.ge.f32.partialorder %v4286_v2, 0.0  ;;  %v4436_v37 = vmul.f32 0.01, %v4286_v2 }
 0x3e5   :  { %5646 = vst [vmem:[%s8464_s3 + $0x118] sm:$0xff] %v5610_v27   ;;  %v4288_v35 = vpop.f32.mrf.mxu0 }
 0x3e6   :  { %v4509_v0 = vsel %vm4363_vm9, %v4286_v2, %v4436_v37 }
 0x3e7   :  { %v5431_v42 = vpack.c.bf16 %v4509_v0, %v4509_v0  ;;  %v5855_v9 = vpop.f32.mrf.mxu0 }
 0x3e9   :  { %4875 = vst [vmem:[%s8464_s3 + $0x120] sm:$0xf] %v5431_v42 }

// kernel: generator_forward.8
= control target key start
LH: loop header
LB: loop body
LE: loop exit
PB: predicated region body
PF: predicated region fallthrough
CT: control target
= control target key end

     0   :  { %s3996_s12 = smov 0   ;;  %s4841_s0 = inlined_call_operand.vmem [shape: bf16[2048,576], index: 0, kind: input, shape index: {}]   ;;  %s4842_s1 = inlined_call_operand.vmem [shape: bf16[576,128], index: 1, kind: input, shape index: {}]   ;;  %s4843_s2 = inlined_call_operand.vmem [shape: f32[1,128], index: 2, kind: input, shape index: {}]   ;;  %s4844_s3 = inlined_call_operand.vmem [shape: bf16[2048,128], index: 3, kind: output, shape index: {}]  }
   0x1 LB: > { %s2997_s13 = sadd.s32 4294967295, %s3973_s12   ;;  %p3001_p0 = scmp.ge.s32.totalorder %s3973_s12, 1  ;;  %s3973_s12 = sphi %s3996_s12, %s13_s12  }
   0x2   : > { %p139_p1 = scmp.lt.s32.totalorder %s3973_s12, 5 }
   0x4   : > { %p140_p2 = pnand %p3001_p0, %p139_p1 }
   0x6   : > { %143 = sbr.rel (%p140_p2) target bundleno = 595 (0x253), region = 32 }
   0xb   : > { %v3706_v0 = vld [vmem:[%s4842_s1 + $0x38] sm:$0xff]   ;;  %v3975_v1 = vmov 0   ;;  %s3002_s16 = sshll.u32 %s2997_s13, 6  ;;  %v3707_v2 = vld [vmem:[%s4842_s1 + $0x30] sm:$0xff]   ;;  %v3708_v3 = vld [vmem:[%s4842_s1 + $0x28] sm:$0xff]   ;;  %vm1465_vm0 = vcmask 523264  }
   0xc   : > { %1562 = vmatprep.subr.bf16.mxu0 %v3975_v1  ;;  %3664 = vmatprep.subr.bf16.mxu1 %v3975_v1  ;;  %p165_p3 = scmp.lt.s32.totalorder %s3002_s16, 255  ;;  %v3709_v4 = vld [vmem:[%s4842_s1 + $0x20] sm:$0xff]   ;;  %v3710_v5 = vld [vmem:[%s4842_s1 + $0x18] sm:$0xff]   ;;  %v3711_v7 = vld [vmem:[%s4842_s1 + $0x10] sm:$0xff]  }
   0xd   : > { %1563 = vmatpush1.bf16.msra.mxu0 %v3706_v0  ;;  %3680 = vmatpush1.bf16.msra.mxu1 %v3706_v0  ;;  %v3712_v9 = vld [vmem:[%s4842_s1 + $0x8] sm:$0xff]   ;;  %v3713_v10 = vld [vmem:[%s4842_s1] sm:$0xff]   ;;  %v3714_v11 = vld [vmem:[%s4842_s1 + $0x78] sm:$0xff]  }
   0xe   : > { %1564 = vmatprep.subr.bf16.mxu0 %v3975_v1  ;;  %3665 = vmatprep.subr.bf16.mxu1 %v3975_v1  ;;  %s4886_s16 = smov (!%p165_p3, %s3002_s16), 255  ;;  %v3715_v12 = vld [vmem:[%s4842_s1 + $0x70] sm:$0xff]   ;;  %v3716_v13 = vld [vmem:[%s4842_s1 + $0x68] sm:$0xff]   ;;  %v3717_v14 = vld [vmem:[%s4842_s1 + $0x60] sm:$0xff]  }
   0xf   : > { %s3696_s23 = smul.u32 20, %s4886_s16  ;;  %v3718_v15 = vld [vmem:[%s4842_s1 + $0x58] sm:$0xff]   ;;  %v3719_v16 = vld [vmem:[%s4842_s1 + $0x50] sm:$0xff]   ;;  %v3720_v17 = vld [vmem:[%s4842_s1 + $0x48] sm:$0xff]  }
  0x10   : > { %v3721_v18 = vld [vmem:[%s4842_s1 + $0x40] sm:$0xff]   ;;  %v3728_v19 = vld [vmem:[%s4842_s1 + $0x118] sm:$0xff]   ;;  %v3777_v25 = vld [vmem:[%s4842_s1 + $0x110] sm:$0xff]  }
  0x11   : > { %1565 = vmatpush1.bf16.msra.mxu0 %v3707_v2  ;;  %3681 = vmatpush1.bf16.msra.mxu1 %v3707_v2  ;;  %s4033_s28 = scalar_lea.vmem %s4841_s0, %s3696_s23  ;;  %v3729_v22 = vld [vmem:[%s4842_s1 + $0xb8] sm:$0xff]   ;;  %v3730_v26 = vld [vmem:[%s4842_s1 + $0xb0] sm:$0xff]   ;;  %v3737_v29 = vld [vmem:[%s4842_s1 + $0xa8] sm:$0xff]  }
  0x12   : > { %1566 = vmatprep.subr.bf16.mxu0 %v3975_v1  ;;  %3666 = vmatprep.subr.bf16.mxu1 %v3975_v1  ;;  %v3724_v6 = vld [vmem:[%s4033_s28 + $0x4] ss:$20 sps:$4 sm:$0xff]   ;;  %v3722_v20 = vld [vmem:[%s4033_s28] ss:$20 sps:$4 sm:$0xff]   ;;  %v3735_v27 = vld [vmem:[%s4033_s28 + $0x28] ss:$20 sps:$4 sm:$0xff]  }
  0x13   : > { %v3727_v8 = vld [vmem:[%s4033_s28 + $0x3c4] ss:$20 sps:$4 sm:$0xff]   ;;  %1594 = vmatprep.mubr.bf16.mxu0 %v3724_v6  ;;  %v3725_v21 = vld [vmem:[%s4033_s28 + $0x3c0] ss:$20 sps:$4 sm:$0xff]   ;;  %v3736_v28 = vld [vmem:[%s4033_s28 + $0x3e8] ss:$20 sps:$4 sm:$0xff]  }
  0x14   : > { %1786 = vmatprep.mubr.bf16.mxu1 %v3727_v8  ;;  %v3731_v23 = vld [vmem:[%s4033_s28 + $0x2c] ss:$20 sps:$4 sm:$0xff]   ;;  %v3739_v31 = vld [vmem:[%s4033_s28 + $0x54] ss:$20 sps:$4 sm:$0xff]   ;;  %v3743_v34 = vld [vmem:[%s4033_s28 + $0x50] ss:$20 sps:$4 sm:$0xff]  }
  0x15   : > { %1567 = vmatpush1.bf16.msra.mxu0 %v3708_v3  ;;  %3682 = vmatpush1.bf16.msra.mxu1 %v3708_v3  ;;  %v3733_v24 = vld [vmem:[%s4033_s28 + $0x3ec] ss:$20 sps:$4 sm:$0xff]   ;;  %v3741_v32 = vld [vmem:[%s4033_s28 + $0x414] ss:$20 sps:$4 sm:$0xff]   ;;  %v3744_v35 = vld [vmem:[%s4033_s28 + $0x410] ss:$20 sps:$4 sm:$0xff]  }
  0x16   : > { %1568 = vmatprep.subr.bf16.mxu0 %v3975_v1  ;;  %3667 = vmatprep.subr.bf16.mxu1 %v3975_v1  ;;  %v3818_v30 = vld [vmem:[%s4842_s1 + $0x108] sm:$0xff]   ;;  %v3738_v33 = vld [vmem:[%s4842_s1 + $0xa0] sm:$0xff]   ;;  %v3745_v36 = vld [vmem:[%s4842_s1 + $0x98] sm:$0xff]  }
  0x17   : > { %v3747_v37 = vld [vmem:[%s4033_s28 + $0x7c] ss:$20 sps:$4 sm:$0xff]   ;;  %v3751_v40 = vld [vmem:[%s4033_s28 + $0x78] ss:$20 sps:$4 sm:$0xff]   ;;  %v3855_v44 = vld [vmem:[%s4842_s1 + $0x100] sm:$0xff]  }
  0x18   : > { %v3749_v38 = vld [vmem:[%s4033_s28 + $0x43c] ss:$20 sps:$4 sm:$0xff]   ;;  %v3752_v41 = vld [vmem:[%s4033_s28 + $0x438] ss:$20 sps:$4 sm:$0xff]   ;;  %v3754_v46 = vld [vmem:[%s4842_s1 + $0x80] sm:$0xff]  }
  0x19   : > { %1569 = vmatpush1.bf16.msra.mxu0 %v3709_v4  ;;  %3683 = vmatpush1.bf16.msra.mxu1 %v3709_v4  ;;  %v3746_v39 = vld [vmem:[%s4842_s1 + $0x90] sm:$0xff]   ;;  %v3753_v42 = vld [vmem:[%s4842_s1 + $0x88] sm:$0xff]   ;;  %v3755_v43 = vld [vmem:[%s4033_s28 + $0xa4] ss:$20 sps:$4 sm:$0xff]  }
  0x1a   : > { %1570 = vmatprep.subr.bf16.mxu0 %v3975_v1  ;;  %3668 = vmatprep.subr.bf16.mxu1 %v3975_v1  ;;  %v3757_v45 = vld [vmem:[%s4033_s28 + $0x464] ss:$20 sps:$4 sm:$0xff]   ;;  %v3759_v47 = vld [vmem:[%s4033_s28 + $0xa0] ss:$20 sps:$4 sm:$0xff]   ;;  %v3767_v53 = vld [vmem:[%s4033_s28 + $0xc8] ss:$20 sps:$4 sm:$0xff]  }
  0x1b   : > { %v3760_v48 = vld [vmem:[%s4033_s28 + $0x460] ss:$20 sps:$4 sm:$0xff]   ;;  %v3761_v49 = vld [vmem:[%s4842_s1 + $0xf8] sm:$0xff]   ;;  %v3769_v55 = vld [vmem:[%s4842_s1 + $0xe8] sm:$0xff]  }
  0x1c   : > { %v3763_v50 = vld [vmem:[%s4033_s28 + $0xcc] ss:$20 sps:$4 sm:$0xff]   ;;  %v3762_v52 = vld [vmem:[%s4842_s1 + $0xf0] sm:$0xff]   ;;  %v3768_v54 = vld [vmem:[%s4033_s28 + $0x488] ss:$20 sps:$4 sm:$0xff]  }
  0x1d   : > { %1571 = vmatpush1.bf16.msra.mxu0 %v3710_v5  ;;  %3684 = vmatpush1.bf16.msra.mxu1 %v3710_v5  ;;  %v3765_v51 = vld [vmem:[%s4033_s28 + $0x48c] ss:$20 sps:$4 sm:$0xff]   ;;  %v3771_v56 = vld [vmem:[%s4033_s28 + $0xf4] ss:$20 sps:$4 sm:$0xff]   ;;  %v3775_v59 = vld [vmem:[%s4033_s28 + $0xf0] ss:$20 sps:$4 sm:$0xff]  }
  0x1e   : > { %1572 = vmatprep.subr.bf16.mxu0 %v3975_v1  ;;  %3669 = vmatprep.subr.bf16.mxu1 %v3975_v1  ;;  %v3773_v57 = vld [vmem:[%s4033_s28 + $0x4b4] ss:$20 sps:$4 sm:$0xff]   ;;  %v3770_v58 = vld [vmem:[%s4842_s1 + $0xe0] sm:$0xff]   ;;  %v3778_v61 = vld [vmem:[%s4842_s1 + $0xd8] sm:$0xff]  }
  0x1f   : > { %v3776_v60 = vld [vmem:[%s4033_s28 + $0x4b0] ss:$20 sps:$4 sm:$0xff]   ;;  %v3784_v2 = vld [vmem:[%s4033_s28 + $0x118] ss:$20 sps:$4 sm:$0xff]   ;;  %v3790_v8 = vld [vmem:[%s4033_s28 + $0x8] ss:$20 sps:$4 sm:$0xff]  }
  0x20   : > { %v3780_v62 = vld [vmem:[%s4033_s28 + $0x11c] ss:$20 sps:$4 sm:$0xff]   ;;  %v3785_v3 = vld [vmem:[%s4033_s28 + $0x4d8] ss:$20 sps:$4 sm:$0xff]  }
  0x21   : > { %1573 = vmatpush1.bf16.msra.mxu0 %v3711_v7  ;;  %3685 = vmatpush1.bf16.msra.mxu1 %v3711_v7  ;;  %v3782_v63 = vld [vmem:[%s4033_s28 + $0x4dc] ss:$20 sps:$4 sm:$0xff]   ;;  %v3786_v4 = vld [vmem:[%s4842_s1 + $0xc8] sm:$0xff]   ;;  %v3788_v5 = vld [vmem:[%s4033_s28 + $0x144] ss:$20 sps:$4 sm:$0xff]  }
  0x22   : > { %1574 = vmatprep.subr.bf16.mxu0 %v3975_v1  ;;  %3670 = vmatprep.subr.bf16.mxu1 %v3975_v1  ;;  %v3779_v0 = vld [vmem:[%s4842_s1 + $0xd0] sm:$0xff]   ;;  %v3792_v6 = vld [vmem:[%s4033_s28 + $0xc] ss:$20 sps:$4 sm:$0xff]  }
  0x23   : > { %v3787_v7 = vld [vmem:[%s4842_s1 + $0xc0] sm:$0xff]  }
  0x25   : > { %1575 = vmatpush1.bf16.msra.mxu0 %v3712_v9  ;;  %3686 = vmatpush1.bf16.msra.mxu1 %v3712_v9  ;;  %v3793_v9 = vld [vmem:[%s4033_s28 + $0x140] ss:$20 sps:$4 sm:$0xff]  }
  0x26   : > { %1576 = vmatprep.subr.bf16.mxu0 %v3975_v1  ;;  %3671 = vmatprep.subr.bf16.mxu1 %v3975_v1 }
  0x29   : > { %1577 = vmatpush1.bf16.msra.mxu0 %v3713_v10  ;;  %3687 = vmatpush1.bf16.msra.mxu1 %v3713_v10  ;;  %v3794_v10 = vld [vmem:[%s4033_s28 + $0x16c] ss:$20 sps:$4 sm:$0xff]  }
  0x2a   : > { %1578 = vmatprep.subr.bf16.mxu0 %v3975_v1  ;;  %3672 = vmatprep.subr.bf16.mxu1 %v3975_v1 }
  0x2d   : > { %1579 = vmatpush2.bf16.msra.mxu0 %v3714_v11  ;;  %3688 = vmatpush2.bf16.msra.mxu1 %v3714_v11  ;;  %v3796_v11 = vld [vmem:[%s4033_s28 + $0x34] ss:$20 sps:$4 sm:$0xff]  }
  0x2e   : > { %1580 = vmatprep.subr.bf16.mxu0 %v3975_v1  ;;  %3673 = vmatprep.subr.bf16.mxu1 %v3975_v1 }
  0x31   : > { %1581 = vmatpush2.bf16.msra.mxu0 %v3715_v12  ;;  %3689 = vmatpush2.bf16.msra.mxu1 %v3715_v12  ;;  %v3798_v12 = vld [vmem:[%s4033_s28 + $0x168] ss:$20 sps:$4 sm:$0xff]  }
  0x32   : > { %1582 = vmatprep.subr.bf16.mxu0 %v3975_v1  ;;  %3674 = vmatprep.subr.bf16.mxu1 %v3975_v1 }
  0x35   : > { %1583 = vmatpush2.bf16.msra.mxu0 %v3716_v13  ;;  %3690 = vmatpush2.bf16.msra.mxu1 %v3716_v13  ;;  %v3799_v13 = vld [vmem:[%s4033_s28 + $0x30] ss:$20 sps:$4 sm:$0xff]  }
  0x36   : > { %1584 = vmatprep.subr.bf16.mxu0 %v3975_v1  ;;  %3675 = vmatprep.subr.bf16.mxu1 %v3975_v1 }
  0x39   : > { %1585 = vmatpush2.bf16.msra.mxu0 %v3717_v14  ;;  %3691 = vmatpush2.bf16.msra.mxu1 %v3717_v14  ;;  %v3800_v14 = vld [vmem:[%s4033_s28 + $0x194] ss:$20 sps:$4 sm:$0xff]  }
  0x3a   : > { %1586 = vmatprep.subr.bf16.mxu0 %v3975_v1  ;;  %3676 = vmatprep.subr.bf16.mxu1 %v3975_v1 }
  0x3d   : > { %1587 = vmatpush2.bf16.msra.mxu0 %v3718_v15  ;;  %3692 = vmatpush2.bf16.msra.mxu1 %v3718_v15  ;;  %v3804_v15 = vld [vmem:[%s4033_s28 + $0x190] ss:$20 sps:$4 sm:$0xff]  }
  0x3e   : > { %1588 = vmatprep.subr.bf16.mxu0 %v3975_v1  ;;  %3677 = vmatprep.subr.bf16.mxu1 %v3975_v1 }
  0x41   : > { %1589 = vmatpush2.bf16.msra.mxu0 %v3719_v16  ;;  %3693 = vmatpush2.bf16.msra.mxu1 %v3719_v16  ;;  %v3805_v16 = vld [vmem:[%s4033_s28 + $0x58] ss:$20 sps:$4 sm:$0xff]  }
  0x42   : > { %1590 = vmatprep.subr.bf16.mxu0 %v3975_v1  ;;  %3678 = vmatprep.subr.bf16.mxu1 %v3975_v1 }
  0x45   : > { %1591 = vmatpush2.bf16.msra.mxu0 %v3720_v17  ;;  %3694 = vmatpush2.bf16.msra.mxu1 %v3720_v17  ;;  %v3806_v17 = vld [vmem:[%s4033_s28 + $0x1bc] ss:$20 sps:$4 sm:$0xff]  }
  0x46   : > { %1592 = vmatprep.subr.bf16.mxu0 %v3975_v1  ;;  %3679 = vmatprep.subr.bf16.mxu1 %v3975_v1 }
  0x49   : > { %1593 = vmatpush2.bf16.msra.mxu0 %v3721_v18  ;;  %3695 = vmatpush2.bf16.msra.mxu1 %v3721_v18  ;;  %v3808_v18 = vld [vmem:[%s4033_s28 + $0x84] ss:$20 sps:$4 sm:$0xff]  }
  0x4a   : > { %1851 = vmatprep.subr.bf16.mxu1 %v3975_v1  ;;  %3592 = vmatprep.subr.bf16.mxu0 %v3728_v19 }
  0x4c   : > { %1595 = vmatmul.mubr.bf16.vlgmr.msra.gmra.mxu0 %v3722_v20  ;;  %1787 = vmatmul.mubr.bf16.vlgmr.msra.gmra.mxu1 %v3725_v21  ;;  %v3811_v20 = vld [vmem:[%s4033_s28 + $0x80] ss:$20 sps:$4 sm:$0xff]   ;;  %v3812_v21 = vld [vmem:[%s4033_s28 + $0x1e4] ss:$20 sps:$4 sm:$0xff]  }
  0x4d   : > { %1852 = vmatpush1.bf16.msra.mxu1 %v3729_v22  ;;  %3593 = vmatpush3.bf16.msra.mxu0 %v3728_v19  ;;  %v3810_v19 = vld [vmem:[%s4033_s28 + $0x1b8] ss:$20 sps:$4 sm:$0xff]  }
  0x4e   : > { %1853 = vmatprep.subr.bf16.mxu1 %v3975_v1  ;;  %1602 = vmatprep.mubr.bf16.mxu0 %v3731_v23  ;;  %v3814_v22 = vld [vmem:[%s4033_s28 + $0xac] ss:$20 sps:$4 sm:$0xff]  }
  0x4f   : > { %1794 = vmatprep.mubr.bf16.mxu1 %v3733_v24  ;;  %3594 = vmatprep.subr.bf16.mxu0 %v3777_v25  ;;  %v3816_v23 = vld [vmem:[%s4033_s28 + $0x1e0] ss:$20 sps:$4 sm:$0xff]   ;;  %v3817_v24 = vld [vmem:[%s4033_s28 + $0xa8] ss:$20 sps:$4 sm:$0xff]  }
  0x51   : > { %1854 = vmatpush1.bf16.msra.mxu1 %v3730_v26  ;;  %3595 = vmatpush3.bf16.msra.mxu0 %v3777_v25  ;;  %v3819_v25 = vld [vmem:[%s4033_s28 + $0x20c] ss:$20 sps:$4 sm:$0xff]   ;;  %v3821_v26 = vld [vmem:[%s4033_s28 + $0xd4] ss:$20 sps:$4 sm:$0xff]  }
  0x52   : > { %1855 = vmatprep.subr.bf16.mxu1 %v3975_v1  ;;  %3596 = vmatprep.subr.bf16.mxu0 %v3818_v30 }
  0x54   : > { %1603 = vmatmul.mubr.bf16.gmra.mxu0 %v3735_v27  ;;  %1795 = vmatmul.mubr.bf16.gmra.mxu1 %v3736_v28  ;;  %v3823_v27 = vld [vmem:[%s4033_s28 + $0x208] ss:$20 sps:$4 sm:$0xff]   ;;  %v3824_v28 = vld [vmem:[%s4033_s28 + $0xd0] ss:$20 sps:$4 sm:$0xff]  }
  0x55   : > { %1856 = vmatpush1.bf16.msra.mxu1 %v3737_v29  ;;  %1610 = vmatprep.mubr.bf16.mxu0 %v3739_v31  ;;  %v3825_v29 = vld [vmem:[%s4033_s28 + $0x234] ss:$20 sps:$4 sm:$0xff]   ;;  %v3829_v31 = vld [vmem:[%s4033_s28 + $0x230] ss:$20 sps:$4 sm:$0xff]  }
  0x56   : > { %1857 = vmatprep.subr.bf16.mxu1 %v3975_v1  ;;  %1802 = vmatprep.mubr.bf16.mxu1 %v3741_v32  ;;  %v3830_v32 = vld [vmem:[%s4033_s28 + $0xf8] ss:$20 sps:$4 sm:$0xff]  }
  0x57   : > { %3597 = vmatpush3.bf16.msra.mxu0 %v3818_v30  ;;  %v3827_v30 = vld [vmem:[%s4033_s28 + $0xfc] ss:$20 sps:$4 sm:$0xff]  }
  0x58   : > { %3598 = vmatprep.subr.bf16.mxu0 %v3855_v44 }
  0x59   : > { %1858 = vmatpush1.bf16.msra.mxu1 %v3738_v33  ;;  %v3831_v33 = vld [vmem:[%s4033_s28 + $0x25c] ss:$20 sps:$4 sm:$0xff]  }
  0x5a   : > { %1859 = vmatprep.subr.bf16.mxu1 %v3975_v1 }
  0x5b   : > { %3599 = vmatpush3.bf16.msra.mxu0 %v3855_v44  ;;  %v3848_v44 = vld [vmem:[%s4033_s28 + $0x170] ss:$20 sps:$4 sm:$0xff]  }
  0x5c   : > { %1611 = vmatmul.mubr.bf16.gmra.mxu0 %v3743_v34  ;;  %1803 = vmatmul.mubr.bf16.gmra.mxu1 %v3744_v35  ;;  %v3833_v34 = vld [vmem:[%s4033_s28 + $0x124] ss:$20 sps:$4 sm:$0xff]  }
  0x5d   : > { %1860 = vmatpush1.bf16.msra.mxu1 %v3745_v36  ;;  %1618 = vmatprep.mubr.bf16.mxu0 %v3747_v37  ;;  %v3835_v35 = vld [vmem:[%s4033_s28 + $0x258] ss:$20 sps:$4 sm:$0xff]   ;;  %v3836_v36 = vld [vmem:[%s4033_s28 + $0x120] ss:$20 sps:$4 sm:$0xff]  }
  0x5e   : > { %1861 = vmatprep.subr.bf16.mxu1 %v3975_v1  ;;  %1810 = vmatprep.mubr.bf16.mxu1 %v3749_v38  ;;  %v3837_v37 = vld [vmem:[%s4033_s28 + $0x284] ss:$20 sps:$4 sm:$0xff]   ;;  %v3839_v38 = vld [vmem:[%s4033_s28 + $0x14c] ss:$20 sps:$4 sm:$0xff]  }
  0x61   : > { %1862 = vmatpush1.bf16.msra.mxu1 %v3746_v39  ;;  %v3841_v39 = vld [vmem:[%s4033_s28 + $0x280] ss:$20 sps:$4 sm:$0xff]  }
  0x62   : > { %1863 = vmatprep.subr.bf16.mxu1 %v3975_v1 }
  0x64   : > { %1619 = vmatmul.mubr.bf16.gmra.mxu0 %v3751_v40  ;;  %1811 = vmatmul.mubr.bf16.gmra.mxu1 %v3752_v41  ;;  %v3842_v40 = vld [vmem:[%s4033_s28 + $0x148] ss:$20 sps:$4 sm:$0xff]   ;;  %v3843_v41 = vld [vmem:[%s4033_s28 + $0x2ac] ss:$20 sps:$4 sm:$0xff]  }
  0x65   : > { %1864 = vmatpush1.bf16.msra.mxu1 %v3753_v42  ;;  %1626 = vmatprep.mubr.bf16.mxu0 %v3755_v43  ;;  %v3845_v42 = vld [vmem:[%s4033_s28 + $0x174] ss:$20 sps:$4 sm:$0xff]  }
  0x66   : > { %1865 = vmatprep.subr.bf16.mxu1 %v3975_v1  ;;  %1818 = vmatprep.mubr.bf16.mxu1 %v3757_v45  ;;  %v3847_v43 = vld [vmem:[%s4033_s28 + $0x2a8] ss:$20 sps:$4 sm:$0xff]  }
  0x67   : > { %v3849_v45 = vld [vmem:[%s4033_s28 + $0x2d4] ss:$20 sps:$4 sm:$0xff]  }
  0x69   : > { %1866 = vmatpush1.bf16.msra.mxu1 %v3754_v46  ;;  %v3851_v46 = vld [vmem:[%s4033_s28 + $0x19c] ss:$20 sps:$4 sm:$0xff]  }
  0x6a   : > { %1867 = vmatprep.subr.bf16.mxu1 %v3975_v1 }
  0x6c   : > { %1627 = vmatmul.mubr.bf16.gmra.mxu0 %v3759_v47  ;;  %1819 = vmatmul.mubr.bf16.gmra.mxu1 %v3760_v48  ;;  %v3853_v47 = vld [vmem:[%s4033_s28 + $0x2d0] ss:$20 sps:$4 sm:$0xff]   ;;  %v3854_v48 = vld [vmem:[%s4033_s28 + $0x198] ss:$20 sps:$4 sm:$0xff]  }
  0x6d   : > { %1868 = vmatpush2.bf16.msra.mxu1 %v3761_v49  ;;  %1634 = vmatprep.mubr.bf16.mxu0 %v3763_v50  ;;  %v3856_v49 = vld [vmem:[%s4033_s28 + $0x2fc] ss:$20 sps:$4 sm:$0xff]   ;;  %v3858_v50 = vld [vmem:[%s4033_s28 + $0x1c4] ss:$20 sps:$4 sm:$0xff]  }
  0x6e   : > { %1869 = vmatprep.subr.bf16.mxu1 %v3975_v1  ;;  %1826 = vmatprep.mubr.bf16.mxu1 %v3765_v51  ;;  %v3860_v51 = vld [vmem:[%s4033_s28 + $0x2f8] ss:$20 sps:$4 sm:$0xff]  }
  0x71   : > { %1870 = vmatpush2.bf16.msra.mxu1 %v3762_v52  ;;  %v3861_v52 = vld [vmem:[%s4033_s28 + $0x1c0] ss:$20 sps:$4 sm:$0xff]  }
  0x72   : > { %1871 = vmatprep.subr.bf16.mxu1 %v3975_v1 }
  0x74   : > { %1635 = vmatmul.mubr.bf16.gmra.mxu0 %v3767_v53  ;;  %1827 = vmatmul.mubr.bf16.gmra.mxu1 %v3768_v54  ;;  %v3862_v53 = vld [vmem:[%s4033_s28 + $0x324] ss:$20 sps:$4 sm:$0xff]   ;;  %v3864_v54 = vld [vmem:[%s4033_s28 + $0x1ec] ss:$20 sps:$4 sm:$0xff]  }
  0x75   : > { %1872 = vmatpush2.bf16.msra.mxu1 %v3769_v55  ;;  %1642 = vmatprep.mubr.bf16.mxu0 %v3771_v56  ;;  %v3866_v55 = vld [vmem:[%s4033_s28 + $0x320] ss:$20 sps:$4 sm:$0xff]   ;;  %v3867_v56 = vld [vmem:[%s4033_s28 + $0x1e8] ss:$20 sps:$4 sm:$0xff]  }
  0x76   : > { %1873 = vmatprep.subr.bf16.mxu1 %v3975_v1  ;;  %1834 = vmatprep.mubr.bf16.mxu1 %v3773_v57  ;;  %v3868_v57 = vld [vmem:[%s4033_s28 + $0x34c] ss:$20 sps:$4 sm:$0xff]  }
  0x79   : > { %1874 = vmatpush2.bf16.msra.mxu1 %v3770_v58  ;;  %v3870_v58 = vld [vmem:[%s4033_s28 + $0x214] ss:$20 sps:$4 sm:$0xff]  }
  0x7a   : > { %1875 = vmatprep.subr.bf16.mxu1 %v3975_v1 }
  0x7c   : > { %1643 = vmatmul.mubr.bf16.gmra.mxu0 %v3775_v59  ;;  %1835 = vmatmul.mubr.bf16.gmra.mxu1 %v3776_v60  ;;  %v3872_v59 = vld [vmem:[%s4033_s28 + $0x348] ss:$20 sps:$4 sm:$0xff]   ;;  %v3873_v60 = vld [vmem:[%s4033_s28 + $0x210] ss:$20 sps:$4 sm:$0xff]  }
  0x7d   : > { %1876 = vmatpush2.bf16.msra.mxu1 %v3778_v61  ;;  %1650 = vmatprep.mubr.bf16.mxu0 %v3780_v62  ;;  %v3874_v61 = vld [vmem:[%s4033_s28 + $0x374] ss:$20 sps:$4 sm:$0xff]   ;;  %v3876_v62 = vld [vmem:[%s4033_s28 + $0x23c] ss:$20 sps:$4 sm:$0xff]  }
  0x7e   : > { %1877 = vmatprep.subr.bf16.mxu1 %v3975_v1  ;;  %1842 = vmatprep.mubr.bf16.mxu1 %v3782_v63  ;;  %v3878_v63 = vld [vmem:[%s4033_s28 + $0x370] ss:$20 sps:$4 sm:$0xff]  }
  0x81   : > { %1878 = vmatpush2.bf16.msra.mxu1 %v3779_v0  ;;  %v3879_v0 = vld [vmem:[%s4033_s28 + $0x238] ss:$20 sps:$4 sm:$0xff]  }
  0x82   : > { %1879 = vmatprep.subr.bf16.mxu1 %v3975_v1 }
  0x84   : > { %1651 = vmatmul.mubr.bf16.gmra.mxu0 %v3784_v2  ;;  %1843 = vmatmul.mubr.bf16.gmra.mxu1 %v3785_v3  ;;  %v3880_v2 = vld [vmem:[%s4033_s28 + $0x39c] ss:$20 sps:$4 sm:$0xff]   ;;  %v3882_v3 = vld [vmem:[%s4033_s28 + $0x264] ss:$20 sps:$4 sm:$0xff]  }
  0x85   : > { %1880 = vmatpush2.bf16.msra.mxu1 %v3786_v4  ;;  %1658 = vmatprep.mubr.bf16.mxu0 %v3788_v5  ;;  %v3884_v4 = vld [vmem:[%s4033_s28 + $0x398] ss:$20 sps:$4 sm:$0xff]   ;;  %v3885_v5 = vld [vmem:[%s4033_s28 + $0x260] ss:$20 sps:$4 sm:$0xff]  }
  0x86   : > { %1881 = vmatprep.subr.bf16.mxu1 %v3975_v1  ;;  %1883 = vmatprep.mubr.bf16.mxu1 %v3792_v6  ;;  %v3802_v1 = vld [vmem:[%s4033_s28 + $0x5c] ss:$20 sps:$4 sm:$0xff]   ;;  %v3886_v6 = vld [vmem:[%s4033_s28 + $0x28c] ss:$20 sps:$4 sm:$0xff]  }
  0x89   : > { %1882 = vmatpush2.bf16.msra.mxu1 %v3787_v7  ;;  %v3888_v7 = vld [vmem:[%s4033_s28 + $0x10] ss:$20 sps:$4 sm:$0xff]  }
  0x8c   : > { %1659 = vmatmul.mubr.bf16.gmra.mxu0 %v3793_v9  ;;  %1884 = vmatmul.mubr.bf16.vlgmr.msra.gmra.mxu1 %v3790_v8  ;;  %v3889_v8 = vld [vmem:[%s4033_s28 + $0x288] ss:$20 sps:$4 sm:$0xff]   ;;  %v3890_v9 = vld [vmem:[%s4033_s28 + $0x38] ss:$20 sps:$4 sm:$0xff]  }
  0x8d   : > { %1666 = vmatprep.mubr.bf16.mxu0 %v3794_v10  ;;  %1891 = vmatprep.mubr.bf16.mxu1 %v3796_v11  ;;  %v3891_v10 = vld [vmem:[%s4033_s28 + $0x2b4] ss:$20 sps:$4 sm:$0xff]  }
  0x8e   : > { %v3893_v11 = vld [vmem:[%s4033_s28 + $0x60] ss:$20 sps:$4 sm:$0xff]  }
  0x94   : > { %1667 = vmatmul.mubr.bf16.gmra.mxu0 %v3798_v12  ;;  %1892 = vmatmul.mubr.bf16.gmra.mxu1 %v3799_v13 }
  0x95   : > { %1674 = vmatprep.mubr.bf16.mxu0 %v3800_v14  ;;  %1899 = vmatprep.mubr.bf16.mxu1 %v3802_v1 }
  0x9c   : > { %1675 = vmatmul.mubr.bf16.gmra.mxu0 %v3804_v15  ;;  %1900 = vmatmul.mubr.bf16.gmra.mxu1 %v3805_v16 }
  0x9d   : > { %1682 = vmatprep.mubr.bf16.mxu0 %v3806_v17  ;;  %1907 = vmatprep.mubr.bf16.mxu1 %v3808_v18  ;;  %v3894_v17 = vld [vmem:[%s4033_s28 + $0x2b0] ss:$20 sps:$4 sm:$0xff]   ;;  %v3895_v18 = vld [vmem:[%s4033_s28 + $0x88] ss:$20 sps:$4 sm:$0xff]  }
  0xa4   : > { %1683 = vmatmul.mubr.bf16.gmra.mxu0 %v3810_v19  ;;  %1908 = vmatmul.mubr.bf16.gmra.mxu1 %v3811_v20  ;;  %v3896_v19 = vld [vmem:[%s4033_s28 + $0x2dc] ss:$20 sps:$4 sm:$0xff]  }
  0xa5   : > { %1690 = vmatprep.mubr.bf16.mxu0 %v3812_v21  ;;  %1915 = vmatprep.mubr.bf16.mxu1 %v3814_v22  ;;  %v3898_v20 = vld [vmem:[%s4033_s28 + $0xb0] ss:$20 sps:$4 sm:$0xff]  }
  0xac   : > { %1691 = vmatmul.mubr.bf16.gmra.mxu0 %v3816_v23  ;;  %1916 = vmatmul.mubr.bf16.gmra.mxu1 %v3817_v24 }
  0xad   : > { %1698 = vmatprep.mubr.bf16.mxu0 %v3819_v25  ;;  %1923 = vmatprep.mubr.bf16.mxu1 %v3821_v26 }
  0xb4   : > { %1699 = vmatmul.mubr.bf16.gmra.mxu0 %v3823_v27  ;;  %1924 = vmatmul.mubr.bf16.gmra.mxu1 %v3824_v28 }
  0xb5   : > { %1706 = vmatprep.mubr.bf16.mxu0 %v3825_v29  ;;  %1931 = vmatprep.mubr.bf16.mxu1 %v3827_v30  ;;  %v3899_v29 = vld [vmem:[%s4033_s28 + $0x2d8] ss:$20 sps:$4 sm:$0xff]  }
  0xb6   : > { %v3900_v30 = vld [vmem:[%s4033_s28 + $0xd8] ss:$20 sps:$4 sm:$0xff]  }
  0xbc   : > { %1707 = vmatmul.mubr.bf16.gmra.mxu0 %v3829_v31  ;;  %1932 = vmatmul.mubr.bf16.gmra.mxu1 %v3830_v32  ;;  %v3901_v31 = vld [vmem:[%s4033_s28 + $0x304] ss:$20 sps:$4 sm:$0xff]   ;;  %v3903_v32 = vld [vmem:[%s4033_s28 + $0x100] ss:$20 sps:$4 sm:$0xff]  }
  0xbd   : > { %1714 = vmatprep.mubr.bf16.mxu0 %v3831_v33  ;;  %1939 = vmatprep.mubr.bf16.mxu1 %v3833_v34 }
  0xc4   : > { %1715 = vmatmul.mubr.bf16.gmra.mxu0 %v3835_v35  ;;  %1940 = vmatmul.mubr.bf16.gmra.mxu1 %v3836_v36 }
  0xc5   : > { %1722 = vmatprep.mubr.bf16.mxu0 %v3837_v37  ;;  %1947 = vmatprep.mubr.bf16.mxu1 %v3839_v38 }
  0xcc   : > { %1723 = vmatmul.mubr.bf16.gmra.mxu0 %v3841_v39  ;;  %1948 = vmatmul.mubr.bf16.gmra.mxu1 %v3842_v40 }
  0xcd   : > { %1730 = vmatprep.mubr.bf16.mxu0 %v3843_v41  ;;  %1955 = vmatprep.mubr.bf16.mxu1 %v3845_v42  ;;  %v3904_v41 = vld [vmem:[%s4033_s28 + $0x300] ss:$20 sps:$4 sm:$0xff]   ;;  %v3905_v42 = vld [vmem:[%s4033_s28 + $0x128] ss:$20 sps:$4 sm:$0xff]  }
  0xd4   : > { %1731 = vmatmul.mubr.bf16.gmra.mxu0 %v3847_v43  ;;  %1956 = vmatmul.mubr.bf16.gmra.mxu1 %v3848_v44  ;;  %v3908_v43 = vld [vmem:[%s4033_s28 + $0x32c] ss:$20 sps:$4 sm:$0xff]   ;;  %v3909_v44 = vld [vmem:[%s4033_s28 + $0x150] ss:$20 sps:$4 sm:$0xff]  }
  0xd5   : > { %1738 = vmatprep.mubr.bf16.mxu0 %v3849_v45  ;;  %1963 = vmatprep.mubr.bf16.mxu1 %v3851_v46 }
  0xdc   : > { %1739 = vmatmul.mubr.bf16.gmra.mxu0 %v3853_v47  ;;  %1964 = vmatmul.mubr.bf16.gmra.mxu1 %v3854_v48 }
  0xdd   : > { %1746 = vmatprep.mubr.bf16.mxu0 %v3856_v49  ;;  %1971 = vmatprep.mubr.bf16.mxu1 %v3858_v50 }
  0xe4   : > { %1747 = vmatmul.mubr.bf16.gmra.mxu0 %v3860_v51  ;;  %1972 = vmatmul.mubr.bf16.gmra.mxu1 %v3861_v52 }
  0xe5   : > { %1754 = vmatprep.mubr.bf16.mxu0 %v3862_v53  ;;  %1979 = vmatprep.mubr.bf16.mxu1 %v3864_v54  ;;  %v3906_v53 = vld [vmem:[%s4033_s28 + $0x328] ss:$20 sps:$4 sm:$0xff]   ;;  %v3910_v54 = vld [vmem:[%s4033_s28 + $0x178] ss:$20 sps:$4 sm:$0xff]  }
  0xec   : > { %1755 = vmatmul.mubr.bf16.gmra.mxu0 %v3866_v55  ;;  %1980 = vmatmul.mubr.bf16.gmra.mxu1 %v3867_v56  ;;  %v3913_v55 = vld [vmem:[%s4033_s28 + $0x354] ss:$20 sps:$4 sm:$0xff]  }
  0xed   : > { %1762 = vmatprep.mubr.bf16.mxu0 %v3868_v57  ;;  %1987 = vmatprep.mubr.bf16.mxu1 %v3870_v58  ;;  %v3914_v56 = vld [vmem:[%s4033_s28 + $0x1a0] ss:$20 sps:$4 sm:$0xff]  }
  0xf4   : > { %1763 = vmatmul.mubr.bf16.gmra.mxu0 %v3872_v59  ;;  %1988 = vmatmul.mubr.bf16.gmra.mxu1 %v3873_v60 }
  0xf5   : > { %1770 = vmatprep.mubr.bf16.mxu0 %v3874_v61  ;;  %1995 = vmatprep.mubr.bf16.mxu1 %v3876_v62 }
  0xfc   : > { %1771 = vmatmul.mubr.bf16.gmra.mxu0 %v3878_v63  ;;  %1996 = vmatmul.mubr.bf16.gmra.mxu1 %v3879_v0 }
  0xfd   : > { %1778 = vmatprep.mubr.bf16.mxu0 %v3880_v2  ;;  %2003 = vmatprep.mubr.bf16.mxu1 %v3882_v3  ;;  %v3911_v2 = vld [vmem:[%s4033_s28 + $0x350] ss:$20 sps:$4 sm:$0xff]   ;;  %v3915_v3 = vld [vmem:[%s4033_s28 + $0x1c8] ss:$20 sps:$4 sm:$0xff]  }
 0x104   : > { %1779 = vmatmul.mubr.bf16.gmra.mxu0 %v3884_v4  ;;  %2004 = vmatmul.mubr.bf16.gmra.mxu1 %v3885_v5  ;;  %v3918_v4 = vld [vmem:[%s4033_s28 + $0x37c] ss:$20 sps:$4 sm:$0xff]  }
 0x105   : > { %2011 = vmatprep.mubr.bf16.mxu1 %v3886_v6  ;;  %3600 = vmatprep.mubr.msk.bf16.mxu0 %vm1465_vm0, %v3888_v7  ;;  %v3919_v5 = vld [vmem:[%s4033_s28 + $0x1f0] ss:$20 sps:$4 sm:$0xff]  }
 0x10c   : > { %v4271_v12 = vpop.f32.mrf.mxu0  ;;  %v4273_v13 = vpop.f32.mrf.mxu1  ;;  %2012 = vmatmul.mubr.bf16.gmra.mxu1 %v3889_v8  ;;  %3601 = vmatmul.mubr.msk.bf16.vlgmr.msra.gmra.mxu0 %vm1465_vm0, %v3890_v9 }
 0x10d   : > { %4845 = vst [vmem:[#allocation2_spill] sm:$0xff] %v4273_v13  ;;  %2019 = vmatprep.mubr.bf16.mxu1 %v3891_v10  ;;  %3604 = vmatprep.mubr.msk.bf16.mxu0 %vm1465_vm0, %v3893_v11 }
 0x10e   : > { %v1598_v14 = vpop.f32.mrf.mxu0  ;;  %v1790_v1 = vpop.f32.mrf.mxu1 }
 0x110   : > { %v4277_v15 = vpop.f32.mrf.mxu0  ;;  %v4279_v16 = vpop.f32.mrf.mxu1 }
 0x111   : > { %4846 = vst [vmem:[#allocation3_spill] sm:$0xff] %v4279_v16 }
 0x112   : > { %v1601_v21 = vpop.f32.mrf.mxu0  ;;  %v1793_v22 = vpop.f32.mrf.mxu1 }
 0x114   : > { %v4285_v23 = vpop.f32.mrf.mxu0  ;;  %v4287_v24 = vpop.f32.mrf.mxu1  ;;  %2020 = vmatmul.mubr.bf16.gmra.mxu1 %v3894_v17  ;;  %3605 = vmatmul.mubr.msk.bf16.gmra.mxu0 %vm1465_vm0, %v3895_v18  ;;  %v3916_v17 = vld [vmem:[%s4033_s28 + $0x378] ss:$20 sps:$4 sm:$0xff]  }
 0x115   : > { %4847 = vst [vmem:[#allocation4_spill] sm:$0xff] %v4287_v24  ;;  %2027 = vmatprep.mubr.bf16.mxu1 %v3896_v19  ;;  %3608 = vmatprep.mubr.msk.bf16.mxu0 %vm1465_vm0, %v3898_v20  ;;  %v3920_v18 = vld [vmem:[%s4033_s28 + $0x218] ss:$20 sps:$4 sm:$0xff]   ;;  %v3924_v20 = vld [vmem:[%s4033_s28 + $0x240] ss:$20 sps:$4 sm:$0xff]  }
 0x116   : > { %v1606_v25 = vpop.f32.mrf.mxu0  ;;  %v1798_v26 = vpop.f32.mrf.mxu1  ;;  %v3923_v19 = vld [vmem:[%s4033_s28 + $0x3a4] ss:$20 sps:$4 sm:$0xff]  }
 0x118   : > { %v4291_v27 = vpop.f32.mrf.mxu0  ;;  %v4293_v28 = vpop.f32.mrf.mxu1 }
 0x119   : > { %4848 = vst [vmem:[#allocation5_spill] sm:$0xff] %v4293_v28 }
 0x11a   : > { %v1609_v33 = vpop.f32.mrf.mxu0  ;;  %v1801_v34 = vpop.f32.mrf.mxu1 }
 0x11b   : > { %v3921_v33 = vld [vmem:[%s4033_s28 + $0x3a0] ss:$20 sps:$4 sm:$0xff]   ;;  %v3925_v34 = vld [vmem:[%s4033_s28 + $0x268] ss:$20 sps:$4 sm:$0xff]  }
 0x11c   : > { %v4299_v35 = vpop.f32.mrf.mxu0  ;;  %v4301_v36 = vpop.f32.mrf.mxu1  ;;  %2028 = vmatmul.mubr.bf16.gmra.mxu1 %v3899_v29  ;;  %3609 = vmatmul.mubr.msk.bf16.gmra.mxu0 %vm1465_vm0, %v3900_v30 }
 0x11d   : > { %4849 = vst [vmem:[#allocation6_spill] sm:$0xff] %v4301_v36  ;;  %2035 = vmatprep.mubr.bf16.mxu1 %v3901_v31  ;;  %3612 = vmatprep.mubr.msk.bf16.mxu0 %vm1465_vm0, %v3903_v32 }
 0x11e   : > { %v1614_v37 = vpop.f32.mrf.mxu0  ;;  %v1806_v38 = vpop.f32.mrf.mxu1 }
 0x11f   : > { %v3928_v37 = vld [vmem:[%s4033_s28 + $0x3cc] ss:$20 sps:$4 sm:$0xff]   ;;  %v3929_v38 = vld [vmem:[%s4033_s28 + $0x290] ss:$20 sps:$4 sm:$0xff]  }
 0x120   : > { %v4305_v39 = vpop.f32.mrf.mxu0  ;;  %v4307_v40 = vpop.f32.mrf.mxu1 }
 0x121   : > { %4850 = vst [vmem:[#allocation7_spill] sm:$0xff] %v4307_v40 }
 0x122   : > { %v1617_v45 = vpop.f32.mrf.mxu0  ;;  %v1809_v46 = vpop.f32.mrf.mxu1 }
 0x124   : > { %v4313_v47 = vpop.f32.mrf.mxu0  ;;  %v4315_v48 = vpop.f32.mrf.mxu1  ;;  %2036 = vmatmul.mubr.bf16.gmra.mxu1 %v3904_v41  ;;  %3613 = vmatmul.mubr.msk.bf16.gmra.mxu0 %vm1465_vm0, %v3905_v42 }
 0x125   : > { %4851 = vst [vmem:[#allocation8_spill] sm:$0xff] %v4315_v48  ;;  %2043 = vmatprep.mubr.bf16.mxu1 %v3908_v43  ;;  %3616 = vmatprep.mubr.msk.bf16.mxu0 %vm1465_vm0, %v3909_v44 }
 0x126   : > { %v1622_v49 = vpop.f32.mrf.mxu0  ;;  %v1814_v50 = vpop.f32.mrf.mxu1 }
 0x127   : > { %v4378_v49 = vld [vmem:[%s4843_s2] ss:$0 sm:$0xff] }
 0x128   : > { %v4319_v51 = vpop.f32.mrf.mxu0  ;;  %v4321_v52 = vpop.f32.mrf.mxu1 }
 0x129   : > { %4852 = vst [vmem:[#allocation9_spill] sm:$0xff] %v4321_v52 }
 0x12a   : > { %v1625_v57 = vpop.f32.mrf.mxu0  ;;  %v1817_v58 = vpop.f32.mrf.mxu1 }
 0x12b   : > { %v3934_v57 = vld [vmem:[%s4033_s28 + $0x2e0] ss:$20 sps:$4 sm:$0xff]  }
 0x12c   : > { %v4327_v59 = vpop.f32.mrf.mxu0  ;;  %v4329_v60 = vpop.f32.mrf.mxu1  ;;  %2044 = vmatmul.mubr.bf16.gmra.mxu1 %v3906_v53  ;;  %3617 = vmatmul.mubr.msk.bf16.gmra.mxu0 %vm1465_vm0, %v3910_v54  ;;  %v3926_v54 = vld [vmem:[%s4033_s28 + $0x3c8] ss:$20 sps:$4 sm:$0xff]  }
 0x12d   : > { %4853 = vst [vmem:[#allocation10_spill] sm:$0xff] %v4329_v60  ;;  %2051 = vmatprep.mubr.bf16.mxu1 %v3913_v55  ;;  %3620 = vmatprep.mubr.msk.bf16.mxu0 %vm1465_vm0, %v3914_v56  ;;  %v3930_v55 = vld [vmem:[%s4033_s28 + $0x2b8] ss:$20 sps:$4 sm:$0xff]   ;;  %v3933_v56 = vld [vmem:[%s4033_s28 + $0x3f4] ss:$20 sps:$4 sm:$0xff]  }
 0x12e   : > { %v1630_v61 = vpop.f32.mrf.mxu0  ;;  %v1822_v62 = vpop.f32.mrf.mxu1 }
 0x12f   : > { %v1597_v62 = vadd.f32 %v4378_v49, %v4271_v12 }
 0x130   : > { %v4333_v63 = vpop.f32.mrf.mxu0  ;;  %v4335_v0 = vpop.f32.mrf.mxu1 }
 0x131   : > { %4854 = vst [vmem:[#allocation11_spill] sm:$0xff] %v4335_v0 }
 0x132   : > { %v1633_v6 = vpop.f32.mrf.mxu0  ;;  %v1825_v7 = vpop.f32.mrf.mxu1 }
 0x133   : > { %v1600_v7 = vadd.f32 %v4378_v49, %v4277_v15 }
 0x134   : > { %v4341_v8 = vpop.f32.mrf.mxu0  ;;  %v4343_v9 = vpop.f32.mrf.mxu1  ;;  %2052 = vmatmul.mubr.bf16.gmra.mxu1 %v3911_v2  ;;  %3621 = vmatmul.mubr.msk.bf16.gmra.mxu0 %vm1465_vm0, %v3915_v3 }
 0x135   : > { %4855 = vst [vmem:[#allocation12_spill] sm:$0xff] %v4343_v9  ;;  %2059 = vmatprep.mubr.bf16.mxu1 %v3918_v4  ;;  %3624 = vmatprep.mubr.msk.bf16.mxu0 %vm1465_vm0, %v3919_v5 }
 0x136   : > { %v1638_v10 = vpop.f32.mrf.mxu0  ;;  %v1830_v11 = vpop.f32.mrf.mxu1 }
 0x137   : > { %v3931_v11 = vld [vmem:[%s4033_s28 + $0x3f0] ss:$20 sps:$4 sm:$0xff]  }
 0x138   : > { %v4347_v14 = vpop.f32.mrf.mxu0  ;;  %v4349_v1 = vpop.f32.mrf.mxu1 }
 0x139   : > { %4856 = vst [vmem:[#allocation13_spill] sm:$0xff] %v4349_v1 }
 0x13a   : > { %v1641_v21 = vpop.f32.mrf.mxu0  ;;  %v1833_v22 = vpop.f32.mrf.mxu1 }
 0x13c   : > { %v4355_v25 = vpop.f32.mrf.mxu0  ;;  %v4357_v26 = vpop.f32.mrf.mxu1  ;;  %2060 = vmatmul.mubr.bf16.gmra.mxu1 %v3916_v17  ;;  %3625 = vmatmul.mubr.msk.bf16.gmra.mxu0 %vm1465_vm0, %v3920_v18  ;;  %v3935_v17 = vld [vmem:[%s4033_s28 + $0x308] ss:$20 sps:$4 sm:$0xff]  }
 0x13d   : > { %4857 = vst [vmem:[#allocation14_spill] sm:$0xff] %v4357_v26  ;;  %2067 = vmatprep.mubr.bf16.mxu1 %v3923_v19  ;;  %3628 = vmatprep.mubr.msk.bf16.mxu0 %vm1465_vm0, %v3924_v20  ;;  %v3938_v19 = vld [vmem:[%s4033_s28 + $0x41c] ss:$20 sps:$4 sm:$0xff]  }
 0x13e   : > { %v1646_v29 = vpop.f32.mrf.mxu0  ;;  %v1838_v30 = vpop.f32.mrf.mxu1  ;;  %v3939_v20 = vld [vmem:[%s4033_s28 + $0x330] ss:$20 sps:$4 sm:$0xff]  }
 0x13f   : > { %v1605_v29 = vadd.f32 %v4378_v49, %v4285_v23 }
 0x140   : > { %v4361_v31 = vpop.f32.mrf.mxu0  ;;  %v4363_v32 = vpop.f32.mrf.mxu1 }
 0x141   : > { %4858 = vst [vmem:[#allocation15_spill] sm:$0xff] %v4363_v32 }
 0x142   : > { %v1649_v41 = vpop.f32.mrf.mxu0  ;;  %v1841_v42 = vpop.f32.mrf.mxu1 }
 0x143   : > { %v3936_v42 = vld [vmem:[%s4033_s28 + $0x418] ss:$20 sps:$4 sm:$0xff]  }
 0x144   : > { %v4369_v43 = vpop.f32.mrf.mxu0  ;;  %v4371_v44 = vpop.f32.mrf.mxu1  ;;  %2068 = vmatmul.mubr.bf16.gmra.mxu1 %v3921_v33  ;;  %3629 = vmatmul.mubr.msk.bf16.gmra.mxu0 %vm1465_vm0, %v3925_v34 }
 0x145   : > { %4859 = vst [vmem:[#allocation16_spill] sm:$0xff] %v4371_v44  ;;  %2075 = vmatprep.mubr.bf16.mxu1 %v3928_v37  ;;  %3632 = vmatprep.mubr.msk.bf16.mxu0 %vm1465_vm0, %v3929_v38  ;;  %v1608_v38 = vadd.f32 %v4378_v49, %v4291_v27 }
 0x146   : > { %v1654_v45 = vpop.f32.mrf.mxu0  ;;  %v1846_v46 = vpop.f32.mrf.mxu1 }
 0x147   : > { %v3940_v45 = vld [vmem:[%s4033_s28 + $0x358] ss:$20 sps:$4 sm:$0xff]  }
 0x148   : > { %v4380_v50 = vpop.f32.mrf.mxu0  ;;  %v4382_v53 = vpop.f32.mrf.mxu1 }
 0x149   : > { %4860 = vst [vmem:[#allocation17_spill] sm:$0xff] %v4382_v53 }
 0x14a   : > { %v1657_v58 = vpop.f32.mrf.mxu0  ;;  %v1849_v61 = vpop.f32.mrf.mxu1 }
 0x14b   : > { %v1613_v58 = vadd.f32 %v4378_v49, %v4299_v35 }
 0x14c   : > { %v4390_v2 = vpop.f32.mrf.mxu0  ;;  %v1885_v3 = vpop.f32.mrf.mxu1  ;;  %2076 = vmatmul.mubr.bf16.gmra.mxu1 %v3926_v54  ;;  %3633 = vmatmul.mubr.msk.bf16.gmra.mxu0 %vm1465_vm0, %v3930_v55  ;;  %v3943_v54 = vld [vmem:[%s4033_s28 + $0x444] ss:$20 sps:$4 sm:$0xff]   ;;  %v3944_v55 = vld [vmem:[%s4033_s28 + $0x380] ss:$20 sps:$4 sm:$0xff]  }
 0x14d   : > { %v4393_v4 = vadd.f32 %v1885_v3, %v1597_v62  ;;  %2083 = vmatprep.mubr.bf16.mxu1 %v3933_v56  ;;  %3636 = vmatprep.mubr.msk.bf16.mxu0 %vm1465_vm0, %v3934_v57 }
 0x14e   : > { %v1662_v5 = vpop.f32.mrf.mxu0  ;;  %v1887_v6 = vpop.f32.mrf.mxu1 }
 0x14f   : > { %v1616_v6 = vadd.f32 %v4378_v49, %v4305_v39 }
 0x150   : > { %v4398_v10 = vpop.f32.mrf.mxu0  ;;  %v1888_v12 = vpop.f32.mrf.mxu1 }
 0x151   : > { %v4402_v18 = vadd.f32 %v1888_v12, %v1600_v7  ;;  %v3941_v12 = vld [vmem:[%s4033_s28 + $0x440] ss:$20 sps:$4 sm:$0xff]  }
 0x152   : > { %v1665_v21 = vpop.f32.mrf.mxu0  ;;  %v1890_v22 = vpop.f32.mrf.mxu1 }
 0x154   : > { %v4408_v30 = vpop.f32.mrf.mxu0  ;;  %v1893_v15 = vpop.f32.mrf.mxu1  ;;  %2084 = vmatmul.mubr.bf16.gmra.mxu1 %v3931_v11  ;;  %3637 = vmatmul.mubr.msk.bf16.gmra.mxu0 %vm1465_vm0, %v3935_v17  ;;  %v3945_v11 = vld [vmem:[%s4033_s28 + $0x3a8] ss:$20 sps:$4 sm:$0xff]  }
 0x155   : > { %v4411_v33 = vadd.f32 %v1893_v15, %v1605_v29  ;;  %2091 = vmatprep.mubr.bf16.mxu1 %v3938_v19  ;;  %3640 = vmatprep.mubr.msk.bf16.mxu0 %vm1465_vm0, %v3939_v20  ;;  %v3948_v19 = vld [vmem:[%s4033_s28 + $0x46c] ss:$20 sps:$4 sm:$0xff]   ;;  %v3949_v20 = vld [vmem:[%s4033_s28 + $0x3d0] ss:$20 sps:$4 sm:$0xff]   ;;  %v1621_v29 = vadd.f32 %v4378_v49, %v4313_v47 }
 0x156   : > { %v1670_v34 = vpop.f32.mrf.mxu0  ;;  %v1895_v37 = vpop.f32.mrf.mxu1 }
 0x158   : > { %v4416_v41 = vpop.f32.mrf.mxu0  ;;  %v1896_v23 = vpop.f32.mrf.mxu1 }
 0x159   : > { %v4420_v46 = vadd.f32 %v1896_v23, %v1608_v38  ;;  %v1624_v23 = vadd.f32 %v4378_v49, %v4319_v51 }
 0x15a   : > { %v1673_v56 = vpop.f32.mrf.mxu0  ;;  %v1898_v57 = vpop.f32.mrf.mxu1 }
 0x15b   : > { %v3953_v56 = vld [vmem:[%s4033_s28 + $0x494] ss:$20 sps:$4 sm:$0xff]  }
 0x15c   : > { %v4426_v61 = vpop.f32.mrf.mxu0  ;;  %v1901_v27 = vpop.f32.mrf.mxu1  ;;  %2092 = vmatmul.mubr.bf16.gmra.mxu1 %v3936_v42  ;;  %3641 = vmatmul.mubr.msk.bf16.gmra.mxu0 %vm1465_vm0, %v3940_v45  ;;  %v3946_v45 = vld [vmem:[%s4033_s28 + $0x468] ss:$20 sps:$4 sm:$0xff]   ;;  %v3954_v57 = vld [vmem:[%s4033_s28 + $0x420] ss:$20 sps:$4 sm:$0xff]  }
 0x15d   : > { %v4429_v62 = vadd.f32 %v1901_v27, %v1613_v58  ;;  %2099 = vmatprep.mubr.bf16.mxu1 %v3943_v54  ;;  %3644 = vmatprep.mubr.msk.bf16.mxu0 %vm1465_vm0, %v3944_v55  ;;  %v3950_v54 = vld [vmem:[%s4033_s28 + $0x3f8] ss:$20 sps:$4 sm:$0xff]  }
 0x15e   : > { %v1678_v3 = vpop.f32.mrf.mxu0  ;;  %v1903_v5 = vpop.f32.mrf.mxu1 }
 0x15f   : > { %v1629_v3 = vadd.f32 %v4378_v49, %v4327_v59 }
 0x160   : > { %v4434_v7 = vpop.f32.mrf.mxu0  ;;  %v1904_v35 = vpop.f32.mrf.mxu1 }
 0x161   : > { %v4438_v17 = vadd.f32 %v1904_v35, %v1616_v6 }
 0x162   : > { %v1681_v21 = vpop.f32.mrf.mxu0  ;;  %v1906_v22 = vpop.f32.mrf.mxu1 }
 0x163   : > { %v3955_v21 = vld [vmem:[%s4033_s28 + $0x448] ss:$20 sps:$4 sm:$0xff]  }
 0x164   : > { %v4444_v15 = vpop.f32.mrf.mxu0  ;;  %v1909_v39 = vpop.f32.mrf.mxu1  ;;  %2100 = vmatmul.mubr.bf16.gmra.mxu1 %v3941_v12  ;;  %3645 = vmatmul.mubr.msk.bf16.gmra.mxu0 %vm1465_vm0, %v3945_v11  ;;  %v1632_v11 = vadd.f32 %v4378_v49, %v4333_v63 }
 0x165   : > { %v4447_v34 = vadd.f32 %v1909_v39, %v1621_v29  ;;  %2107 = vmatprep.mubr.bf16.mxu1 %v3948_v19  ;;  %3648 = vmatprep.mubr.msk.bf16.mxu0 %vm1465_vm0, %v3949_v20  ;;  %v3951_v20 = vld [vmem:[%s4033_s28 + $0x490] ss:$20 sps:$4 sm:$0xff]  }
 0x166   : > { %v1686_v37 = vpop.f32.mrf.mxu0  ;;  %v1911_v38 = vpop.f32.mrf.mxu1  ;;  %v3958_v29 = vld [vmem:[%s4033_s28 + $0x4bc] ss:$20 sps:$4 sm:$0xff]  }
 0x167   : > { %v3959_v39 = vld [vmem:[%s4033_s28 + $0x470] ss:$20 sps:$4 sm:$0xff]  }
 0x168   : > { %v4452_v42 = vpop.f32.mrf.mxu0  ;;  %v1912_v47 = vpop.f32.mrf.mxu1 }
 0x169   : > { %v4456_v55 = vadd.f32 %v1912_v47, %v1624_v23  ;;  %v1637_v23 = vadd.f32 %v4378_v49, %v4341_v8 }
 0x16a   : > { %v1689_v58 = vpop.f32.mrf.mxu0  ;;  %v1914_v27 = vpop.f32.mrf.mxu1 }
 0x16b   : > { %v3956_v27 = vld [vmem:[%s4033_s28 + $0x4b8] ss:$20 sps:$4 sm:$0xff]  }
 0x16c   : > { %v4462_v5 = vpop.f32.mrf.mxu0  ;;  %v1917_v51 = vpop.f32.mrf.mxu1  ;;  %2108 = vmatmul.mubr.bf16.gmra.mxu1 %v3946_v45  ;;  %3649 = vmatmul.mubr.msk.bf16.gmra.mxu0 %vm1465_vm0, %v3950_v54 }
 0x16d   : > { %v4465_v6 = vadd.f32 %v1917_v51, %v1629_v3  ;;  %2115 = vmatprep.mubr.bf16.mxu1 %v3953_v56  ;;  %3652 = vmatprep.mubr.msk.bf16.mxu0 %vm1465_vm0, %v3954_v57  ;;  %v1640_v57 = vadd.f32 %v4378_v49, %v4347_v14  ;;  %v3960_v3 = vld [vmem:[%s4033_s28 + $0x498] ss:$20 sps:$4 sm:$0xff]  }
 0x16e   : > { %v1694_v35 = vpop.f32.mrf.mxu0  ;;  %v1919_v12 = vpop.f32.mrf.mxu1 }
 0x16f   : > { %v3963_v35 = vld [vmem:[%s4033_s28 + $0x4e4] ss:$20 sps:$4 sm:$0xff]   ;;  %v3964_v12 = vld [vmem:[%s4033_s28 + $0x4c0] ss:$20 sps:$4 sm:$0xff]  }
 0x170   : > { %v4470_v19 = vpop.f32.mrf.mxu0  ;;  %v1920_v59 = vpop.f32.mrf.mxu1 }
 0x171   : > { %v4474_v22 = vadd.f32 %v1920_v59, %v1632_v11 }
 0x172   : > { %v1697_v37 = vpop.f32.mrf.mxu0  ;;  %v1922_v38 = vpop.f32.mrf.mxu1 }
 0x173   : > { %v1648_v38 = vadd.f32 %v4378_v49, %v4361_v31 }
 0x174   : > { %v4480_v47 = vpop.f32.mrf.mxu0  ;;  %v1925_v63 = vpop.f32.mrf.mxu1  ;;  %2116 = vmatmul.mubr.bf16.gmra.mxu1 %v3951_v20  ;;  %3653 = vmatmul.mubr.msk.bf16.gmra.mxu0 %vm1465_vm0, %v3955_v21  ;;  %v1645_v20 = vadd.f32 %v4378_v49, %v4355_v25  ;;  %v3961_v25 = vld [vmem:[%s4033_s28 + $0x4e0] ss:$20 sps:$4 sm:$0xff]  }
 0x175   : > { %v4483_v45 = vadd.f32 %v1925_v63, %v1637_v23  ;;  %2123 = vmatprep.mubr.bf16.mxu1 %v3958_v29  ;;  %3656 = vmatprep.mubr.msk.bf16.mxu0 %vm1465_vm0, %v3959_v39 }
 0x176   : > { %v1702_v54 = vpop.f32.mrf.mxu0  ;;  %v1927_v56 = vpop.f32.mrf.mxu1 }
 0x177   : > { %v3965_v54 = vld [vmem:[%s4033_s28 + $0x4e8] ss:$20 sps:$4 sm:$0xff]   ;;  %s3005_s28 = sshll.u32 %s4886_s16, 2 }
 0x178   : > { %v4488_v58 = vpop.f32.mrf.mxu0  ;;  %v1928_v8 = vpop.f32.mrf.mxu1  ;;  %s4638_s22 = scalar_lea.vmem %s4844_s3, %s3005_s28 }
 0x179   : > { %v4492_v51 = vadd.f32 %v1928_v8, %v1640_v57 }
 0x17a   : > { %v1705_v11 = vpop.f32.mrf.mxu0  ;;  %v1930_v59 = vpop.f32.mrf.mxu1 }
 0x17b   : > { %v1656_v59 = vadd.f32 %v4378_v49, %v4380_v50  ;;  %v1664_v50 = vadd.f32 %v4378_v49, %v4398_v10  ;;  %v1672_v10 = vadd.f32 %v4378_v49, %v4416_v41  ;;  %v1680_v41 = vadd.f32 %v4378_v49, %v4434_v7 }
 0x17c   : > { %v4498_v21 = vpop.f32.mrf.mxu0  ;;  %v1933_v29 = vpop.f32.mrf.mxu1  ;;  %2124 = vmatmul.mubr.bf16.gmra.mxu1 %v3956_v27  ;;  %3657 = vmatmul.mubr.msk.bf16.gmra.mxu0 %vm1465_vm0, %v3960_v3  ;;  %v1653_v27 = vadd.f32 %v4378_v49, %v4369_v43  ;;  %v1688_v7 = vadd.f32 %v4378_v49, %v4452_v42  ;;  %v1696_v42 = vadd.f32 %v4378_v49, %v4470_v19 }
 0x17d   : > { %v4501_v14 = vadd.f32 %v1933_v29, %v1645_v20  ;;  %2131 = vmatprep.mubr.bf16.mxu1 %v3963_v35  ;;  %3660 = vmatprep.mubr.msk.bf16.mxu0 %vm1465_vm0, %v3964_v12  ;;  %v1704_v19 = vadd.f32 %v4378_v49, %v4488_v58 }
 0x17e   : > { %v1710_v39 = vpop.f32.mrf.mxu0  ;;  %v1935_v37 = vpop.f32.mrf.mxu1 }
 0x180   : > { %v4506_v23 = vpop.f32.mrf.mxu0  ;;  %v1936_v63 = vpop.f32.mrf.mxu1 }
 0x181   : > { %v4510_v56 = vadd.f32 %v1936_v63, %v1648_v38  ;;  %v1661_v38 = vadd.f32 %v4378_v49, %v4390_v2  ;;  %v1669_v2 = vadd.f32 %v4378_v49, %v4408_v30  ;;  %v1677_v30 = vadd.f32 %v4378_v49, %v4426_v61 }
 0x182   : > { %v1713_v57 = vpop.f32.mrf.mxu0  ;;  %v1938_v8 = vpop.f32.mrf.mxu1  ;;  %v1685_v61 = vadd.f32 %v4378_v49, %v4444_v15  ;;  %v1693_v15 = vadd.f32 %v4378_v49, %v4462_v5  ;;  %v1701_v5 = vadd.f32 %v4378_v49, %v4480_v47  ;;  %v1709_v47 = vadd.f32 %v4378_v49, %v4498_v21 }
 0x183   : > { %v1712_v58 = vadd.f32 %v4378_v49, %v4506_v23 }
 0x184   : > { %v4514_v3 = vpop.f32.mrf.mxu0  ;;  %v1941_v35 = vpop.f32.mrf.mxu1  ;;  %2132 = vmatmul.mubr.bf16.gmra.mxu1 %v3961_v25  ;;  %3661 = vmatmul.mubr.msk.bf16.gmra.mxu0 %vm1465_vm0, %v3965_v54 }
 0x185   : > { %v4517_v12 = vadd.f32 %v1941_v35, %v1653_v27  ;;  %v1717_v21 = vadd.f32 %v4378_v49, %v4514_v3 }
 0x186   : > { %v1718_v31 = vpop.f32.mrf.mxu0  ;;  %v1943_v11 = vpop.f32.mrf.mxu1 }
 0x188   : > { %v4521_v20 = vpop.f32.mrf.mxu0  ;;  %v1944_v29 = vpop.f32.mrf.mxu1 }
 0x189   : > { %v4523_v39 = vadd.f32 %v1944_v29, %v1656_v59 }
 0x18a   : > { %v1721_v37 = vpop.f32.mrf.mxu0  ;;  %v1946_v43 = vpop.f32.mrf.mxu1 }
 0x18c   : > { %v4527_v63 = vpop.f32.mrf.mxu0  ;;  %v1949_v25 = vpop.f32.mrf.mxu1 }
 0x18d   : > { %v4529_v54 = vadd.f32 %v1949_v25, %v1661_v38 }
 0x18e   : > { %v1726_v57 = vpop.f32.mrf.mxu0  ;;  %v1951_v8 = vpop.f32.mrf.mxu1 }
 0x190   : > { %v4533_v27 = vpop.f32.mrf.mxu0  ;;  %v1952_v35 = vpop.f32.mrf.mxu1 }
 0x191   : > { %v4535_v31 = vadd.f32 %v1952_v35, %v1664_v50 }
 0x192   : > { %v1729_v11 = vpop.f32.mrf.mxu0  ;;  %v1954_v59 = vpop.f32.mrf.mxu1 }
 0x194   : > { %v4539_v29 = vpop.f32.mrf.mxu0  ;;  %v1957_v37 = vpop.f32.mrf.mxu1 }
 0x195   : > { %v4541_v43 = vadd.f32 %v1957_v37, %v1669_v2 }
 0x196   : > { %v1734_v38 = vpop.f32.mrf.mxu0  ;;  %v1959_v25 = vpop.f32.mrf.mxu1 }
 0x198   : > { %v4545_v57 = vpop.f32.mrf.mxu0  ;;  %v1960_v8 = vpop.f32.mrf.mxu1 }
 0x199   : > { %v4547_v50 = vadd.f32 %v1960_v8, %v1672_v10 }
 0x19a   : > { %v1737_v35 = vpop.f32.mrf.mxu0  ;;  %v1962_v11 = vpop.f32.mrf.mxu1 }
 0x19c   : > { %v4551_v59 = vpop.f32.mrf.mxu0  ;;  %v1965_v53 = vpop.f32.mrf.mxu1 }
 0x19d   : > { %v4553_v2 = vadd.f32 %v1965_v53, %v1677_v30 }
 0x19e   : > { %v1742_v37 = vpop.f32.mrf.mxu0  ;;  %v1967_v38 = vpop.f32.mrf.mxu1 }
 0x1a0   : > { %v4557_v25 = vpop.f32.mrf.mxu0  ;;  %v1968_v32 = vpop.f32.mrf.mxu1 }
 0x1a1   : > { %v4559_v10 = vadd.f32 %v1968_v32, %v1680_v41 }
 0x1a2   : > { %v1745_v8 = vpop.f32.mrf.mxu0  ;;  %v1970_v35 = vpop.f32.mrf.mxu1 }
 0x1a4   : > { %v4563_v11 = vpop.f32.mrf.mxu0  ;;  %v1973_v44 = vpop.f32.mrf.mxu1 }
 0x1a5   : > { %v4565_v53 = vadd.f32 %v1973_v44, %v1685_v61 }
 0x1a6   : > { %v1750_v30 = vpop.f32.mrf.mxu0  ;;  %v1975_v37 = vpop.f32.mrf.mxu1 }
 0x1a8   : > { %v4569_v38 = vpop.f32.mrf.mxu0  ;;  %v1976_v26 = vpop.f32.mrf.mxu1 }
 0x1a9   : > { %v4571_v32 = vadd.f32 %v1976_v26, %v1688_v7 }
 0x1aa   : > { %v1753_v41 = vpop.f32.mrf.mxu0  ;;  %v1978_v8 = vpop.f32.mrf.mxu1 }
 0x1ac   : > { %v4575_v35 = vpop.f32.mrf.mxu0  ;;  %v1981_v0 = vpop.f32.mrf.mxu1 }
 0x1ad   : > { %v4577_v44 = vadd.f32 %v1981_v0, %v1693_v15 }
 0x1ae   : > { %v1758_v61 = vpop.f32.mrf.mxu0  ;;  %v1983_v30 = vpop.f32.mrf.mxu1 }
 0x1b0   : > { %v4581_v37 = vpop.f32.mrf.mxu0  ;;  %v1984_v1 = vpop.f32.mrf.mxu1 }
 0x1b1   : > { %v4583_v26 = vadd.f32 %v1984_v1, %v1696_v42 }
 0x1b2   : > { %v1761_v7 = vpop.f32.mrf.mxu0  ;;  %v1986_v41 = vpop.f32.mrf.mxu1 }
 0x1b4   : > { %v4587_v8 = vpop.f32.mrf.mxu0  ;;  %v1989_v9 = vpop.f32.mrf.mxu1 }
 0x1b5   : > { %v4589_v0 = vadd.f32 %v1989_v9, %v1701_v5 }
 0x1b6   : > { %v1766_v15 = vpop.f32.mrf.mxu0  ;;  %v1991_v61 = vpop.f32.mrf.mxu1 }
 0x1b8   : > { %v4593_v30 = vpop.f32.mrf.mxu0  ;;  %v1992_v60 = vpop.f32.mrf.mxu1 }
 0x1b9   : > { %v4595_v1 = vadd.f32 %v1992_v60, %v1704_v19 }
 0x1ba   : > { %v1769_v42 = vpop.f32.mrf.mxu0  ;;  %v1994_v7 = vpop.f32.mrf.mxu1 }
 0x1bc   : > { %v4599_v41 = vpop.f32.mrf.mxu0  ;;  %v1997_v40 = vpop.f32.mrf.mxu1 }
 0x1bd   : > { %4861 = vst [vmem:[#allocation18_spill] sm:$0xff] %v4599_v41  ;;  %v4601_v9 = vadd.f32 %v1997_v40, %v1709_v47 }
 0x1be   : > { %v1774_v5 = vpop.f32.mrf.mxu0  ;;  %v1999_v15 = vpop.f32.mrf.mxu1 }
 0x1c0   : > { %v4605_v61 = vpop.f32.mrf.mxu0  ;;  %v2000_v52 = vpop.f32.mrf.mxu1 }
 0x1c1   : > { %4862 = vst [vmem:[#allocation19_spill] sm:$0xff] %v4605_v61  ;;  %v4607_v60 = vadd.f32 %v2000_v52, %v1712_v58  ;;  %v1725_v52 = vadd.f32 %v4378_v49, %v4527_v63 }
 0x1c2   : > { %v1777_v19 = vpop.f32.mrf.mxu0  ;;  %v2002_v42 = vpop.f32.mrf.mxu1 }
 0x1c4   : > { %v4611_v7 = vpop.f32.mrf.mxu0  ;;  %v2005_v48 = vpop.f32.mrf.mxu1 }
 0x1c5   : > { %4863 = vst [vmem:[#allocation20_spill] sm:$0xff] %v4611_v7  ;;  %v4613_v40 = vadd.f32 %v2005_v48, %v1717_v21 }
 0x1c6   : > { %v1782_v47 = vpop.f32.mrf.mxu0  ;;  %v2007_v5 = vpop.f32.mrf.mxu1 }
 0x1c7   : > { %v1728_v47 = vadd.f32 %v4378_v49, %v4533_v27 }
 0x1c8   : > { %v4615_v15 = vpop.f32.mrf.mxu0  ;;  %v4617_v23 = vpop.f32.mrf.mxu1 }
 0x1c9   : > { %4864 = vst [vmem:[#allocation21_spill] sm:$0xff] %v4615_v15 }
 0x1ca   : > { %v1785_v36 = vpop.f32.mrf.mxu0  ;;  %v2010_v16 = vpop.f32.mrf.mxu1 }
 0x1cc   : > { %v2013_v58 = vpop.f32.mrf.mxu1  ;;  %v3602_v19 = vpop.f32.mrf.mxu0 }
 0x1cd   : > { %v4621_v3 = vadd.f32 %v2013_v58, %v1725_v52  ;;  %v2183_v42 = vadd.f32 %v3602_v19, %v4411_v33 }
 0x1ce   : > { %v2015_v48 = vpop.f32.mrf.mxu1  ;;  %v2174_v21 = vpop.f32.mrf.mxu0 }
 0x1cf   : > { %v2175_v5 = vadd.f32 %v2174_v21, %v4393_v4  ;;  %v2495_v24 = vmul.f32 0.01, %v2183_v42  ;;  %vm2431_vm1 = vcmp.ge.f32.partialorder %v2183_v42, 0.0 }
 0x1d0   : > { %v2016_v28 = vpop.f32.mrf.mxu1  ;;  %v3603_v36 = vpop.f32.mrf.mxu0 }
 0x1d1   : > { %v4627_v16 = vadd.f32 %v2016_v28, %v1728_v47  ;;  %v2186_v63 = vadd.f32 %v3603_v36, %v4420_v46  ;;  %v2493_v52 = vmul.f32 0.01, %v2175_v5  ;;  %vm2429_vm2 = vcmp.ge.f32.partialorder %v2175_v5, 0.0 }
 0x1d2   : > { %v2018_v13 = vpop.f32.mrf.mxu1  ;;  %v2177_v61 = vpop.f32.mrf.mxu0  ;;  %v2559_v48 = vsel %vm2431_vm1, %v2183_v42, %v2495_v24 }
 0x1d3   : > { %v2178_v33 = vadd.f32 %v2177_v61, %v4402_v18  ;;  %vm2432_vm3 = vcmp.ge.f32.partialorder %v2186_v63, 0.0  ;;  %v2496_v58 = vmul.f32 0.01, %v2186_v63  ;;  %v2557_v61 = vsel %vm2429_vm2, %v2175_v5, %v2493_v52 }
 0x1d4   : > { %v4632_v27 = vpop.f32.mrf.mxu1  ;;  %v3606_v4 = vpop.f32.mrf.mxu0 }
 0x1d5   : > { %vm2430_vm4 = vcmp.ge.f32.partialorder %v2178_v33, 0.0  ;;  %v2494_v19 = vmul.f32 0.01, %v2178_v33  ;;  %v2199_v28 = vadd.f32 %v3606_v4, %v4447_v34  ;;  %v2560_v13 = vsel %vm2432_vm3, %v2186_v63, %v2496_v58 }
 0x1d6   : > { %v2023_v18 = vpop.f32.mrf.mxu1  ;;  %v2190_v46 = vpop.f32.mrf.mxu0  ;;  %v3373_v21 = vpack.c.bf16 %v2560_v13, %v2559_v48 }
 0x1d7   : > { %v2558_v47 = vsel %vm2430_vm4, %v2178_v33, %v2494_v19  ;;  %v2191_v15 = vadd.f32 %v2190_v46, %v4429_v62  ;;  %v2499_v24 = vmul.f32 0.01, %v2199_v28  ;;  %vm2435_vm5 = vcmp.ge.f32.partialorder %v2199_v28, 0.0 }
 0x1d8   : > { %v3368_v36 = vpack.c.bf16 %v2558_v47, %v2557_v61  ;;  %v4641_v7 = vpop.f32.mrf.mxu1  ;;  %v3607_v34 = vpop.f32.mrf.mxu0  ;;  %3525 = vst [vmem:[%s4638_s22 + $0x8] sm:$0xff] %v3373_v21  }
 0x1d9   : > { %v2202_v42 = vadd.f32 %v3607_v34, %v4456_v55  ;;  %v2497_v63 = vmul.f32 0.01, %v2191_v15  ;;  %vm2433_vm7 = vcmp.ge.f32.partialorder %v2191_v15, 0.0  ;;  %v2563_v33 = vsel %vm2435_vm5, %v2199_v28, %v2499_v24 }
 0x1da   : > { %3369 = vst [vmem:[%s4638_s22] sm:$0xff] %v3368_v36   ;;  %v2026_v4 = vpop.f32.mrf.mxu1  ;;  %v2193_v41 = vpop.f32.mrf.mxu0 }
 0x1db   : > { %vm2436_vm6 = vcmp.ge.f32.partialorder %v2202_v42, 0.0  ;;  %v2500_v58 = vmul.f32 0.01, %v2202_v42  ;;  %v2194_v5 = vadd.f32 %v2193_v41, %v4438_v17  ;;  %v2561_v61 = vsel %vm2433_vm7, %v2191_v15, %v2497_v63 }
 0x1dc   : > { %v4647_v52 = vpop.f32.mrf.mxu1  ;;  %v3610_v62 = vpop.f32.mrf.mxu0 }
 0x1dd   : > { %v2564_v19 = vsel %vm2436_vm6, %v2202_v42, %v2500_v58  ;;  %vm2434_vm8 = vcmp.ge.f32.partialorder %v2194_v5, 0.0  ;;  %v2498_v48 = vmul.f32 0.01, %v2194_v5  ;;  %v2215_v13 = vadd.f32 %v3610_v62, %v4483_v45 }
 0x1de   : > { %v3383_v55 = vpack.c.bf16 %v2564_v19, %v2563_v33  ;;  %v2031_v18 = vpop.f32.mrf.mxu1  ;;  %v2206_v46 = vpop.f32.mrf.mxu0 }
 0x1df   : > { %v2562_v21 = vsel %vm2434_vm8, %v2194_v5, %v2498_v48  ;;  %v2207_v47 = vadd.f32 %v2206_v46, %v4465_v6  ;;  %v2503_v34 = vmul.f32 0.01, %v2215_v13  ;;  %vm2439_vm9 = vcmp.ge.f32.partialorder %v2215_v13, 0.0 }
 0x1e0   : > { %3527 = vst [vmem:[%s4638_s22 + $0x18] sm:$0xff] %v3383_v55   ;;  %v3378_v17 = vpack.c.bf16 %v2562_v21, %v2561_v61  ;;  %v4652_v41 = vpop.f32.mrf.mxu1  ;;  %v3611_v36 = vpop.f32.mrf.mxu0 }
 0x1e1   : > { %v2218_v28 = vadd.f32 %v3611_v36, %v4492_v51  ;;  %v2501_v4 = vmul.f32 0.01, %v2207_v47  ;;  %vm2437_vm11 = vcmp.ge.f32.partialorder %v2207_v47, 0.0  ;;  %v2567_v58 = vsel %vm2439_vm9, %v2215_v13, %v2503_v34 }
 0x1e2   : > { %3526 = vst [vmem:[%s4638_s22 + $0x10] sm:$0xff] %v3378_v17   ;;  %v2034_v24 = vpop.f32.mrf.mxu1  ;;  %v2209_v42 = vpop.f32.mrf.mxu0 }
 0x1e3   : > { %vm2440_vm10 = vcmp.ge.f32.partialorder %v2218_v28, 0.0  ;;  %v2504_v45 = vmul.f32 0.01, %v2218_v28  ;;  %v2210_v15 = vadd.f32 %v2209_v42, %v4474_v22  ;;  %v2565_v55 = vsel %vm2437_vm11, %v2207_v47, %v2501_v4 }
 0x1e4   : > { %v4657_v6 = vpop.f32.mrf.mxu1  ;;  %v3614_v63 = vpop.f32.mrf.mxu0 }
 0x1e5   : > { %v2568_v5 = vsel %vm2440_vm10, %v2218_v28, %v2504_v45  ;;  %vm2438_vm12 = vcmp.ge.f32.partialorder %v2210_v15, 0.0  ;;  %v2502_v62 = vmul.f32 0.01, %v2210_v15  ;;  %v2231_v33 = vadd.f32 %v3614_v63, %v4517_v12 }
 0x1e6   : > { %v3393_v51 = vpack.c.bf16 %v2568_v5, %v2567_v58  ;;  %v2039_v19 = vpop.f32.mrf.mxu1  ;;  %v2222_v48 = vpop.f32.mrf.mxu0 }
 0x1e7   : > { %v2566_v18 = vsel %vm2438_vm12, %v2210_v15, %v2502_v62  ;;  %v2223_v46 = vadd.f32 %v2222_v48, %v4501_v14  ;;  %v2507_v17 = vmul.f32 0.01, %v2231_v33  ;;  %vm2443_vm13 = vcmp.ge.f32.partialorder %v2231_v33, 0.0 }
 0x1e8   : > { %3529 = vst [vmem:[%s4638_s22 + $0x28] sm:$0xff] %v3393_v51   ;;  %v3388_v22 = vpack.c.bf16 %v2566_v18, %v2565_v55  ;;  %v4662_v61 = vpop.f32.mrf.mxu1  ;;  %v3615_v21 = vpop.f32.mrf.mxu0 }
 0x1e9   : > { %v2234_v13 = vadd.f32 %v3615_v21, %v4523_v39  ;;  %v2505_v28 = vmul.f32 0.01, %v2223_v46  ;;  %vm2441_vm15 = vcmp.ge.f32.partialorder %v2223_v46, 0.0  ;;  %v2571_v42 = vsel %vm2443_vm13, %v2231_v33, %v2507_v17 }
 0x1ea   : > { %3528 = vst [vmem:[%s4638_s22 + $0x20] sm:$0xff] %v3388_v22   ;;  %v2042_v36 = vpop.f32.mrf.mxu1  ;;  %v2225_v34 = vpop.f32.mrf.mxu0 }
 0x1eb   : > { %vm2444_vm14 = vcmp.ge.f32.partialorder %v2234_v13, 0.0  ;;  %v2508_v12 = vmul.f32 0.01, %v2234_v13  ;;  %v2226_v47 = vadd.f32 %v2225_v34, %v4510_v56  ;;  %v2569_v5 = vsel %vm2441_vm15, %v2223_v46, %v2505_v28 }
 0x1ec   : > { %v4667_v14 = vpop.f32.mrf.mxu1  ;;  %v3618_v24 = vpop.f32.mrf.mxu0 }
 0x1ed   : > { %v2572_v4 = vsel %vm2444_vm14, %v2234_v13, %v2508_v12  ;;  %vm2442_vm0 = vcmp.ge.f32.partialorder %v2226_v47, 0.0  ;;  %v2506_v45 = vmul.f32 0.01, %v2226_v47  ;;  %v2247_v15 = vadd.f32 %v3618_v24, %v4541_v43 }
 0x1ee   : > { %v3403_v39 = vpack.c.bf16 %v2572_v4, %v2571_v42  ;;  %v2047_v63 = vpop.f32.mrf.mxu1  ;;  %v2238_v58 = vpop.f32.mrf.mxu0 }
 0x1ef   : > { %v2570_v62 = vsel %vm2442_vm0, %v2226_v47, %v2506_v45  ;;  %v2239_v51 = vadd.f32 %v2238_v58, %v4529_v54  ;;  %v2511_v55 = vmul.f32 0.01, %v2247_v15  ;;  %vm2447_vm1 = vcmp.ge.f32.partialorder %v2247_v15, 0.0 }
 0x1f0   : > { %3531 = vst [vmem:[%s4638_s22 + $0x38] sm:$0xff] %v3403_v39   ;;  %v3398_v56 = vpack.c.bf16 %v2570_v62, %v2569_v5  ;;  %v4672_v19 = vpop.f32.mrf.mxu1  ;;  %v3619_v48 = vpop.f32.mrf.mxu0 }
 0x1f1   : > { %v2250_v33 = vadd.f32 %v3619_v48, %v4547_v50  ;;  %v2509_v21 = vmul.f32 0.01, %v2239_v51  ;;  %vm2445_vm3 = vcmp.ge.f32.partialorder %v2239_v51, 0.0  ;;  %v2575_v13 = vsel %vm2447_vm1, %v2247_v15, %v2511_v55 }
 0x1f2   : > { %3530 = vst [vmem:[%s4638_s22 + $0x30] sm:$0xff] %v3398_v56   ;;  %v2050_v18 = vpop.f32.mrf.mxu1  ;;  %v2241_v22 = vpop.f32.mrf.mxu0 }
 0x1f3   : > { %vm2448_vm2 = vcmp.ge.f32.partialorder %v2250_v33, 0.0  ;;  %v2512_v43 = vmul.f32 0.01, %v2250_v33  ;;  %v2242_v46 = vadd.f32 %v2241_v22, %v4535_v31  ;;  %v2573_v24 = vsel %vm2445_vm3, %v2239_v51, %v2509_v21 }
 0x1f4   : > { %v4677_v54 = vpop.f32.mrf.mxu1  ;;  %v3622_v17 = vpop.f32.mrf.mxu0 }
 0x1f5   : > { %v2576_v36 = vsel %vm2448_vm2, %v2250_v33, %v2512_v43  ;;  %vm2446_vm4 = vcmp.ge.f32.partialorder %v2242_v46, 0.0  ;;  %v2510_v34 = vmul.f32 0.01, %v2242_v46  ;;  %v2263_v28 = vadd.f32 %v3622_v17, %v4565_v53 }
 0x1f6   : > { %v3413_v50 = vpack.c.bf16 %v2576_v36, %v2575_v13  ;;  %v2055_v12 = vpop.f32.mrf.mxu1  ;;  %v2254_v47 = vpop.f32.mrf.mxu0 }
 0x1f7   : > { %v2574_v42 = vsel %vm2446_vm4, %v2242_v46, %v2510_v34  ;;  %v2255_v4 = vadd.f32 %v2254_v47, %v4553_v2  ;;  %v2515_v63 = vmul.f32 0.01, %v2263_v28  ;;  %vm2451_vm5 = vcmp.ge.f32.partialorder %v2263_v28, 0.0 }
 0x1f8   : > { %3533 = vst [vmem:[%s4638_s22 + $0x48] sm:$0xff] %v3413_v50   ;;  %v3408_v31 = vpack.c.bf16 %v2574_v42, %v2573_v24  ;;  %v4682_v45 = vpop.f32.mrf.mxu1  ;;  %v3623_v39 = vpop.f32.mrf.mxu0 }
 0x1f9   : > { %v2266_v15 = vadd.f32 %v3623_v39, %v4571_v32  ;;  %v2513_v62 = vmul.f32 0.01, %v2255_v4  ;;  %vm2449_vm7 = vcmp.ge.f32.partialorder %v2255_v4, 0.0  ;;  %v2579_v48 = vsel %vm2451_vm5, %v2263_v28, %v2515_v63 }
 0x1fa   : > { %3532 = vst [vmem:[%s4638_s22 + $0x40] sm:$0xff] %v3408_v31   ;;  %v2058_v58 = vpop.f32.mrf.mxu1  ;;  %v2257_v5 = vpop.f32.mrf.mxu0 }
 0x1fb   : > { %vm2452_vm6 = vcmp.ge.f32.partialorder %v2266_v15, 0.0  ;;  %v2516_v53 = vmul.f32 0.01, %v2266_v15  ;;  %v2258_v51 = vadd.f32 %v2257_v5, %v4559_v10  ;;  %v2577_v43 = vsel %vm2449_vm7, %v2255_v4, %v2513_v62 }
 0x1fc   : > { %v4687_v2 = vpop.f32.mrf.mxu1  ;;  %v3626_v56 = vpop.f32.mrf.mxu0 }
 0x1fd   : > { %v2580_v55 = vsel %vm2452_vm6, %v2266_v15, %v2516_v53  ;;  %vm2450_vm8 = vcmp.ge.f32.partialorder %v2258_v51, 0.0  ;;  %v2514_v33 = vmul.f32 0.01, %v2258_v51  ;;  %v2279_v18 = vadd.f32 %v3626_v56, %v4589_v0 }
 0x1fe   : > { %v3423_v32 = vpack.c.bf16 %v2580_v55, %v2579_v48  ;;  %v2063_v22 = vpop.f32.mrf.mxu1  ;;  %v2270_v21 = vpop.f32.mrf.mxu0 }
 0x1ff   : > { %v2578_v46 = vsel %vm2450_vm8, %v2258_v51, %v2514_v33  ;;  %v2271_v17 = vadd.f32 %v2270_v21, %v4577_v44  ;;  %v2519_v34 = vmul.f32 0.01, %v2279_v18  ;;  %vm2455_vm9 = vcmp.ge.f32.partialorder %v2279_v18, 0.0 }
 0x200   : > { %3535 = vst [vmem:[%s4638_s22 + $0x58] sm:$0xff] %v3423_v32   ;;  %v3418_v10 = vpack.c.bf16 %v2578_v46, %v2577_v43  ;;  %v4692_v13 = vpop.f32.mrf.mxu1  ;;  %v3627_v36 = vpop.f32.mrf.mxu0  ;;  %v1720_v44 = vadd.f32 %v4378_v49, %v4521_v20  ;;  %v1733_v32 = vadd.f32 %v4378_v49, %v4539_v29 }
 0x201   : > { %v2282_v50 = vadd.f32 %v3627_v36, %v4595_v1  ;;  %v2517_v47 = vmul.f32 0.01, %v2271_v17  ;;  %vm2453_vm11 = vcmp.ge.f32.partialorder %v2271_v17, 0.0  ;;  %v2583_v31 = vsel %vm2455_vm9, %v2279_v18, %v2519_v34 }
 0x202   : > { %3534 = vst [vmem:[%s4638_s22 + $0x50] sm:$0xff] %v3418_v10   ;;  %v2066_v28 = vpop.f32.mrf.mxu1  ;;  %v2273_v12 = vpop.f32.mrf.mxu0  ;;  %v2022_v43 = vadd.f32 %v4632_v27, %v1733_v32 }
 0x203   : > { %vm2456_vm10 = vcmp.ge.f32.partialorder %v2282_v50, 0.0  ;;  %v2520_v0 = vmul.f32 0.01, %v2282_v50  ;;  %v2274_v24 = vadd.f32 %v2273_v12, %v4583_v26  ;;  %v2009_v26 = vadd.f32 %v4617_v23, %v1720_v44 }
 0x204   : > { %v4699_v42 = vpop.f32.mrf.mxu1  ;;  %v3630_v4 = vpop.f32.mrf.mxu0  ;;  %v2581_v62 = vsel %vm2453_vm11, %v2271_v17, %v2517_v47 }
 0x205   : > { %v2584_v39 = vsel %vm2456_vm10, %v2282_v50, %v2520_v0  ;;  %vm2454_vm12 = vcmp.ge.f32.partialorder %v2274_v24, 0.0  ;;  %v2518_v1 = vmul.f32 0.01, %v2274_v24  ;;  %v2295_v15 = vadd.f32 %v3630_v4, %v4613_v40 }
 0x206   : > { %v3433_v63 = vpack.c.bf16 %v2584_v39, %v2583_v31  ;;  %v2071_v58 = vpop.f32.mrf.mxu1  ;;  %v2286_v5 = vpop.f32.mrf.mxu0  ;;  %v1741_v39 = vadd.f32 %v4378_v49, %v4551_v59 }
 0x207   : > { %v2582_v53 = vsel %vm2454_vm12, %v2274_v24, %v2518_v1  ;;  %v2287_v20 = vadd.f32 %v2286_v5, %v4601_v9  ;;  %v2523_v55 = vmul.f32 0.01, %v2295_v15  ;;  %vm2459_vm13 = vcmp.ge.f32.partialorder %v2295_v15, 0.0 }
 0x208   : > { %3537 = vst [vmem:[%s4638_s22 + $0x68] sm:$0xff] %v3433_v63   ;;  %v3428_v51 = vpack.c.bf16 %v2582_v53, %v2581_v62  ;;  %v4705_v56 = vpop.f32.mrf.mxu1  ;;  %v3631_v48 = vpop.f32.mrf.mxu0  ;;  %v1736_v9 = vadd.f32 %v4378_v49, %v4545_v57  ;;  %v1749_v1 = vadd.f32 %v4378_v49, %v4563_v11  ;;  %v1752_v5 = vadd.f32 %v4378_v49, %v4569_v38 }
 0x209   : > { %v2298_v33 = vadd.f32 %v3631_v48, %v2009_v26  ;;  %v2521_v22 = vmul.f32 0.01, %v2287_v20  ;;  %vm2457_vm15 = vcmp.ge.f32.partialorder %v2287_v20, 0.0  ;;  %v2587_v29 = vsel %vm2459_vm13, %v2295_v15, %v2523_v55 }
 0x20a   : > { %3536 = vst [vmem:[%s4638_s22 + $0x60] sm:$0xff] %v3428_v51   ;;  %v2074_v40 = vpop.f32.mrf.mxu1  ;;  %v2289_v18 = vpop.f32.mrf.mxu0  ;;  %v2030_v26 = vadd.f32 %v4647_v52, %v1741_v39  ;;  %v2038_v62 = vadd.f32 %v4657_v6, %v1749_v1  ;;  %v2041_v55 = vadd.f32 %v4662_v61, %v1752_v5  ;;  %v4866_v5 = vld [vmem:[#allocation20_spill] sm:$0xff] }
 0x20b   : > { %vm2460_vm14 = vcmp.ge.f32.partialorder %v2298_v33, 0.0  ;;  %v2524_v23 = vmul.f32 0.01, %v2298_v33  ;;  %v2290_v21 = vadd.f32 %v2289_v18, %v4607_v60  ;;  %v2025_v60 = vadd.f32 %v4641_v7, %v1736_v9 }
 0x20c   : > { %v4714_v46 = vpop.f32.mrf.mxu1  ;;  %v3634_v17 = vpop.f32.mrf.mxu0  ;;  %v2585_v47 = vsel %vm2457_vm15, %v2287_v20, %v2521_v22 }
 0x20d   : > { %v2588_v10 = vsel %vm2460_vm14, %v2298_v33, %v2524_v23  ;;  %vm2458_vm0 = vcmp.ge.f32.partialorder %v2290_v21, 0.0  ;;  %v2522_v36 = vmul.f32 0.01, %v2290_v21  ;;  %v2311_v50 = vadd.f32 %v3634_v17, %v2022_v43 }
 0x20e   : > { %v3443_v34 = vpack.c.bf16 %v2588_v10, %v2587_v29  ;;  %v2079_v28 = vpop.f32.mrf.mxu1  ;;  %v2302_v12 = vpop.f32.mrf.mxu0 }
 0x20f   : > { %v2586_v57 = vsel %vm2458_vm0, %v2290_v21, %v2522_v36  ;;  %v2303_v27 = vadd.f32 %v2302_v12, %v4621_v3  ;;  %v2527_v4 = vmul.f32 0.01, %v2311_v50  ;;  %vm2463_vm1 = vcmp.ge.f32.partialorder %v2311_v50, 0.0 }
 0x210   : > { %3539 = vst [vmem:[%s4638_s22 + $0x78] sm:$0xff] %v3443_v34   ;;  %v3438_v0 = vpack.c.bf16 %v2586_v57, %v2585_v47  ;;  %v4719_v24 = vpop.f32.mrf.mxu1  ;;  %v3635_v44 = vpop.f32.mrf.mxu0 }
 0x211   : > { %v2314_v31 = vadd.f32 %v3635_v44, %v2025_v60  ;;  %v2525_v15 = vmul.f32 0.01, %v2303_v27  ;;  %vm2461_vm3 = vcmp.ge.f32.partialorder %v2303_v27, 0.0  ;;  %v2591_v53 = vsel %vm2463_vm1, %v2311_v50, %v2527_v4 }
 0x212   : > { %3538 = vst [vmem:[%s4638_s22 + $0x70] sm:$0xff] %v3438_v0   ;;  %v2082_v7 = vpop.f32.mrf.mxu1  ;;  %v2305_v63 = vpop.f32.mrf.mxu0 }
 0x213   : > { %vm2464_vm2 = vcmp.ge.f32.partialorder %v2314_v31, 0.0  ;;  %v2528_v3 = vmul.f32 0.01, %v2314_v31  ;;  %v2306_v58 = vadd.f32 %v2305_v63, %v4627_v16  ;;  %v4736_v16 = vld [vmem:[%s4843_s2] ss:$0 sm:$0xff]  ;;  %v2589_v33 = vsel %vm2461_vm3, %v2303_v27, %v2525_v15 }
 0x214   : > { %v4731_v59 = vpop.f32.mrf.mxu1  ;;  %v3638_v11 = vpop.f32.mrf.mxu0  ;;  %v1744_v49 = vadd.f32 %v4736_v16, %v4557_v25  ;;  %v1757_v25 = vadd.f32 %v4736_v16, %v4575_v35  ;;  %v1765_v17 = vadd.f32 %v4736_v16, %v4587_v8  ;;  %v1768_v50 = vadd.f32 %v4736_v16, %v4593_v30 }
 0x215   : > { %v2592_v20 = vsel %vm2464_vm2, %v2314_v31, %v2528_v3  ;;  %vm2462_vm4 = vcmp.ge.f32.partialorder %v2306_v58, 0.0  ;;  %v2526_v51 = vmul.f32 0.01, %v2306_v58  ;;  %v2327_v52 = vadd.f32 %v3638_v11, %v2038_v62 }
 0x216   : > { %v3453_v38 = vpack.c.bf16 %v2592_v20, %v2591_v53  ;;  %v2087_v6 = vpop.f32.mrf.mxu1  ;;  %v2318_v48 = vpop.f32.mrf.mxu0  ;;  %v2033_v21 = vadd.f32 %v4652_v41, %v1744_v49  ;;  %v2046_v41 = vadd.f32 %v4667_v14, %v1757_v25  ;;  %v2054_v28 = vadd.f32 %v4677_v54, %v1765_v17 }
 0x217   : > { %v2590_v32 = vsel %vm2462_vm4, %v2306_v58, %v2526_v51  ;;  %v2319_v40 = vadd.f32 %v2318_v48, %v2030_v26  ;;  %v2531_v9 = vmul.f32 0.01, %v2327_v52  ;;  %vm2467_vm5 = vcmp.ge.f32.partialorder %v2327_v52, 0.0  ;;  %v4867_v51 = vld [vmem:[#allocation21_spill] sm:$0xff] }
 0x218   : > { %3541 = vst [vmem:[%s4638_s22 + $0x88] sm:$0xff] %v3453_v38   ;;  %v3448_v18 = vpack.c.bf16 %v2590_v32, %v2589_v33  ;;  %v4742_v22 = vpop.f32.mrf.mxu1  ;;  %v3639_v23 = vpop.f32.mrf.mxu0  ;;  %v1760_v57 = vadd.f32 %v4736_v16, %v4581_v37  ;;  %v2057_v14 = vadd.f32 %v4682_v45, %v1768_v50  ;;  %v4865_v37 = vld [vmem:[#allocation18_spill] sm:$0xff]  ;;  %v1781_v26 = vadd.f32 %v4736_v16, %v4866_v5  ;;  %v4868_v32 = vld [vmem:[#allocation19_spill] sm:$0xff] }
 0x219   : > { %v2330_v43 = vadd.f32 %v3639_v23, %v2041_v55  ;;  %v2529_v10 = vmul.f32 0.01, %v2319_v40  ;;  %vm2465_vm7 = vcmp.ge.f32.partialorder %v2319_v40, 0.0  ;;  %v2595_v12 = vsel %vm2467_vm5, %v2327_v52, %v2531_v9  ;;  %v4869_v50 = vld [vmem:[#allocation2_spill] sm:$0xff] }
 0x21a   : > { %3540 = vst [vmem:[%s4638_s22 + $0x80] sm:$0xff] %v3448_v18   ;;  %v2090_v61 = vpop.f32.mrf.mxu1  ;;  %v2321_v29 = vpop.f32.mrf.mxu0  ;;  %v2049_v63 = vadd.f32 %v4672_v19, %v1760_v57  ;;  %v1773_v58 = vadd.f32 %v4736_v16, %v4865_v37  ;;  %v1784_v49 = vadd.f32 %v4736_v16, %v4867_v51  ;;  %v2070_v38 = vadd.f32 %v4699_v42, %v1781_v26  ;;  %v4873_v51 = vld [vmem:[#allocation6_spill] sm:$0xff] }
 0x21b   : > { %vm2468_vm6 = vcmp.ge.f32.partialorder %v2330_v43, 0.0  ;;  %v2532_v36 = vmul.f32 0.01, %v2330_v43  ;;  %v2322_v34 = vadd.f32 %v2321_v29, %v2033_v21  ;;  %v2593_v54 = vsel %vm2465_vm7, %v2319_v40, %v2529_v10 }
 0x21c   : > { %v4754_v35 = vpop.f32.mrf.mxu1  ;;  %v3642_v8 = vpop.f32.mrf.mxu0  ;;  %v2062_v19 = vadd.f32 %v4687_v2, %v1773_v58  ;;  %v1776_v40 = vadd.f32 %v4736_v16, %v4868_v32  ;;  %v2073_v2 = vadd.f32 %v4705_v56, %v1784_v49  ;;  %v1805_v49 = vadd.f32 %v4736_v16, %v4873_v51  ;;  %v4875_v32 = vld [vmem:[#allocation9_spill] sm:$0xff] }
 0x21d   : > { %v2596_v60 = vsel %vm2468_vm6, %v2330_v43, %v2532_v36  ;;  %vm2466_vm8 = vcmp.ge.f32.partialorder %v2322_v34, 0.0  ;;  %v2530_v47 = vmul.f32 0.01, %v2322_v34  ;;  %v2343_v0 = vadd.f32 %v3642_v8, %v2054_v28  ;;  %v4870_v28 = vld [vmem:[#allocation4_spill] sm:$0xff] }
 0x21e   : > { %v3463_v27 = vpack.c.bf16 %v2596_v60, %v2595_v12  ;;  %v2095_v30 = vpop.f32.mrf.mxu1  ;;  %v2334_v44 = vpop.f32.mrf.mxu0  ;;  %v2065_v10 = vadd.f32 %v4692_v13, %v1776_v40  ;;  %v1797_v8 = vadd.f32 %v4736_v16, %v4870_v28  ;;  %v1816_v40 = vadd.f32 %v4736_v16, %v4875_v32 }
 0x21f   : > { %v2594_v4 = vsel %vm2466_vm8, %v2322_v34, %v2530_v47  ;;  %v2335_v31 = vadd.f32 %v2334_v44, %v2046_v41  ;;  %v2535_v15 = vmul.f32 0.01, %v2343_v0  ;;  %vm2471_vm9 = vcmp.ge.f32.partialorder %v2343_v0, 0.0 }
 0x220   : > { %3543 = vst [vmem:[%s4638_s22 + $0x98] sm:$0xff] %v3463_v27   ;;  %v3458_v39 = vpack.c.bf16 %v2594_v4, %v2593_v54  ;;  %v4760_v1 = vpop.f32.mrf.mxu1  ;;  %v3643_v7 = vpop.f32.mrf.mxu0  ;;  %v1789_v41 = vadd.f32 %v4736_v16, %v4869_v50  ;;  %v4871_v27 = vld [vmem:[#allocation5_spill] sm:$0xff]  ;;  %v2086_v30 = vadd.f32 %v4731_v59, %v1797_v8 }
 0x221   : > { %v2346_v3 = vadd.f32 %v3643_v7, %v2057_v14  ;;  %v2533_v11 = vmul.f32 0.01, %v2335_v31  ;;  %vm2469_vm11 = vcmp.ge.f32.partialorder %v2335_v31, 0.0  ;;  %v2599_v48 = vsel %vm2471_vm9, %v2343_v0, %v2535_v15 }
 0x222   : > { %3542 = vst [vmem:[%s4638_s22 + $0x90] sm:$0xff] %v3458_v39   ;;  %v2098_v45 = vpop.f32.mrf.mxu1  ;;  %v2337_v62 = vpop.f32.mrf.mxu0  ;;  %v1800_v0 = vadd.f32 %v4736_v16, %v4871_v27  ;;  %v2078_v13 = vadd.f32 %v4714_v46, %v1789_v41  ;;  %v4872_v39 = vld [vmem:[#allocation3_spill] sm:$0xff]  ;;  %v4878_v27 = vld [vmem:[#allocation12_spill] sm:$0xff] }
 0x223   : > { %vm2472_vm10 = vcmp.ge.f32.partialorder %v2346_v3, 0.0  ;;  %v2536_v53 = vmul.f32 0.01, %v2346_v3  ;;  %v2338_v20 = vadd.f32 %v2337_v62, %v2049_v63  ;;  %v2597_v42 = vsel %vm2469_vm11, %v2335_v31, %v2533_v11 }
 0x224   : > { %v4772_v52 = vpop.f32.mrf.mxu1  ;;  %v3646_v6 = vpop.f32.mrf.mxu0  ;;  %v1792_v7 = vadd.f32 %v4736_v16, %v4872_v39  ;;  %v2089_v46 = vadd.f32 %v4742_v22, %v1800_v0  ;;  %v1829_v0 = vadd.f32 %v4736_v16, %v4878_v27 }
 0x225   : > { %v2600_v55 = vsel %vm2472_vm10, %v2346_v3, %v2536_v53  ;;  %vm2470_vm12 = vcmp.ge.f32.partialorder %v2338_v20, 0.0  ;;  %v2534_v33 = vmul.f32 0.01, %v2338_v20  ;;  %v2359_v23 = vadd.f32 %v3646_v6, %v2070_v38 }
 0x226   : > { %v3473_v18 = vpack.c.bf16 %v2600_v55, %v2599_v48  ;;  %v2103_v21 = vpop.f32.mrf.mxu1  ;;  %v2350_v9 = vpop.f32.mrf.mxu0  ;;  %v2081_v11 = vadd.f32 %v4719_v24, %v1792_v7  ;;  %v2094_v24 = vadd.f32 %v4754_v35, %v1805_v49 }
 0x227   : > { %v2598_v43 = vsel %vm2470_vm12, %v2338_v20, %v2534_v33  ;;  %v2351_v25 = vadd.f32 %v2350_v9, %v2062_v19  ;;  %v2539_v36 = vmul.f32 0.01, %v2359_v23  ;;  %vm2475_vm13 = vcmp.ge.f32.partialorder %v2359_v23, 0.0  ;;  %v4874_v19 = vld [vmem:[#allocation8_spill] sm:$0xff] }
 0x228   : > { %3545 = vst [vmem:[%s4638_s22 + $0xa8] sm:$0xff] %v3473_v18   ;;  %v3468_v17 = vpack.c.bf16 %v2598_v43, %v2597_v42  ;;  %v4778_v61 = vpop.f32.mrf.mxu1  ;;  %v3647_v29 = vpop.f32.mrf.mxu0  ;;  %v1813_v38 = vadd.f32 %v4736_v16, %v4874_v19  ;;  %v4876_v43 = vld [vmem:[#allocation7_spill] sm:$0xff] }
 0x229   : > { %v2362_v34 = vadd.f32 %v3647_v29, %v2073_v2  ;;  %v2537_v60 = vmul.f32 0.01, %v2351_v25  ;;  %vm2473_vm15 = vcmp.ge.f32.partialorder %v2351_v25, 0.0  ;;  %v2603_v54 = vsel %vm2475_vm13, %v2359_v23, %v2539_v36 }
 0x22a   : > { %3544 = vst [vmem:[%s4638_s22 + $0xa0] sm:$0xff] %v3468_v17   ;;  %v2106_v56 = vpop.f32.mrf.mxu1  ;;  %v2353_v12 = vpop.f32.mrf.mxu0  ;;  %v2102_v18 = vadd.f32 %v4772_v52, %v1813_v38  ;;  %v2105_v35 = vadd.f32 %v4778_v61, %v1816_v40 }
 0x22b   : > { %vm2476_vm14 = vcmp.ge.f32.partialorder %v2362_v34, 0.0  ;;  %v2540_v47 = vmul.f32 0.01, %v2362_v34  ;;  %v2354_v57 = vadd.f32 %v2353_v12, %v2065_v10  ;;  %v2601_v59 = vsel %vm2473_vm15, %v2351_v25, %v2537_v60 }
 0x22c   : > { %v4790_v44 = vpop.f32.mrf.mxu1  ;;  %v3650_v14 = vpop.f32.mrf.mxu0  ;;  %v1808_v25 = vadd.f32 %v4736_v16, %v4876_v43 }
 0x22d   : > { %v2604_v4 = vsel %vm2476_vm14, %v2362_v34, %v2540_v47  ;;  %vm2474_vm0 = vcmp.ge.f32.partialorder %v2354_v57, 0.0  ;;  %v2538_v31 = vmul.f32 0.01, %v2354_v57  ;;  %v2375_v15 = vadd.f32 %v3650_v14, %v2086_v30  ;;  %v4877_v47 = vld [vmem:[#allocation10_spill] sm:$0xff] }
 0x22e   : > { %v3483_v63 = vpack.c.bf16 %v2604_v4, %v2603_v54  ;;  %v2111_v3 = vpop.f32.mrf.mxu1  ;;  %v2366_v37 = vpop.f32.mrf.mxu0  ;;  %v2097_v56 = vadd.f32 %v4760_v1, %v1808_v25  ;;  %v4879_v4 = vld [vmem:[#allocation13_spill] sm:$0xff] }
 0x22f   : > { %v2602_v58 = vsel %vm2474_vm0, %v2354_v57, %v2538_v31  ;;  %v2367_v5 = vadd.f32 %v2366_v37, %v2078_v13  ;;  %v2543_v53 = vmul.f32 0.01, %v2375_v15  ;;  %vm2479_vm1 = vcmp.ge.f32.partialorder %v2375_v15, 0.0 }
 0x230   : > { %3547 = vst [vmem:[%s4638_s22 + $0xb8] sm:$0xff] %v3483_v63   ;;  %v3478_v26 = vpack.c.bf16 %v2602_v58, %v2601_v59  ;;  %v4796_v45 = vpop.f32.mrf.mxu1  ;;  %v3651_v62 = vpop.f32.mrf.mxu0  ;;  %v1821_v57 = vadd.f32 %v4736_v16, %v4877_v47  ;;  %v1832_v31 = vadd.f32 %v4736_v16, %v4879_v4 }
 0x231   : > { %v2378_v20 = vadd.f32 %v3651_v62, %v2089_v46  ;;  %v2541_v48 = vmul.f32 0.01, %v2367_v5  ;;  %vm2477_vm3 = vcmp.ge.f32.partialorder %v2367_v5, 0.0  ;;  %v2607_v9 = vsel %vm2479_vm1, %v2375_v15, %v2543_v53  ;;  %v4880_v46 = vld [vmem:[#allocation11_spill] sm:$0xff] }
 0x232   : > { %3546 = vst [vmem:[%s4638_s22 + $0xb0] sm:$0xff] %v3478_v26   ;;  %v2114_v22 = vpop.f32.mrf.mxu1  ;;  %v2369_v6 = vpop.f32.mrf.mxu0  ;;  %v2110_v1 = vadd.f32 %v4790_v44, %v1821_v57  ;;  %v1824_v59 = vadd.f32 %v4736_v16, %v4880_v46 }
 0x233   : > { %vm2480_vm2 = vcmp.ge.f32.partialorder %v2378_v20, 0.0  ;;  %v2544_v55 = vmul.f32 0.01, %v2378_v20  ;;  %v2370_v33 = vadd.f32 %v2369_v6, %v2081_v11  ;;  %v2605_v34 = vsel %vm2477_vm3, %v2367_v5, %v2541_v48  ;;  %v4881_v48 = vld [vmem:[#allocation14_spill] sm:$0xff] }
 0x234   : > { %v2117_v23 = vpop.f32.mrf.mxu1  ;;  %v3654_v21 = vpop.f32.mrf.mxu0  ;;  %v2113_v22 = vadd.f32 %v4796_v45, %v1824_v59 }
 0x235   : > { %v2608_v2 = vsel %vm2480_vm2, %v2378_v20, %v2544_v55  ;;  %vm2478_vm4 = vcmp.ge.f32.partialorder %v2370_v33, 0.0  ;;  %v2542_v42 = vmul.f32 0.01, %v2370_v33  ;;  %v2391_v29 = vadd.f32 %v3654_v21, %v2102_v18 }
 0x236   : > { %v3493_v17 = vpack.c.bf16 %v2608_v2, %v2607_v9  ;;  %v2119_v10 = vpop.f32.mrf.mxu1  ;;  %v2382_v36 = vpop.f32.mrf.mxu0  ;;  %v2118_v39 = vadd.f32 %v2117_v23, %v1829_v0  ;;  %v1837_v55 = vadd.f32 %v4736_v16, %v4881_v48 }
 0x237   : > { %v2606_v52 = vsel %vm2478_vm4, %v2370_v33, %v2542_v42  ;;  %v2383_v50 = vadd.f32 %v2382_v36, %v2094_v24  ;;  %v2547_v12 = vmul.f32 0.01, %v2391_v29  ;;  %vm2483_vm5 = vcmp.ge.f32.partialorder %v2391_v29, 0.0  ;;  %v4882_v33 = vld [vmem:[#allocation16_spill] sm:$0xff] }
 0x238   : > { %3549 = vst [vmem:[%s4638_s22 + $0xc8] sm:$0xff] %v3493_v17   ;;  %v3488_v41 = vpack.c.bf16 %v2606_v52, %v2605_v34  ;;  %v2120_v28 = vpop.f32.mrf.mxu1  ;;  %v3655_v8 = vpop.f32.mrf.mxu0  ;;  %v1845_v32 = vadd.f32 %v4736_v16, %v4882_v33 }
 0x239   : > { %v2394_v60 = vadd.f32 %v3655_v8, %v2105_v35  ;;  %v2545_v30 = vmul.f32 0.01, %v2383_v50  ;;  %vm2481_vm7 = vcmp.ge.f32.partialorder %v2383_v50, 0.0  ;;  %v2611_v15 = vsel %vm2483_vm5, %v2391_v29, %v2547_v12  ;;  %v4883_v35 = vld [vmem:[#allocation15_spill] sm:$0xff] }
 0x23a   : > { %3548 = vst [vmem:[%s4638_s22 + $0xc0] sm:$0xff] %v3488_v41   ;;  %v2122_v61 = vpop.f32.mrf.mxu1  ;;  %v2385_v13 = vpop.f32.mrf.mxu0  ;;  %v2121_v53 = vadd.f32 %v2120_v28, %v1832_v31  ;;  %v1840_v34 = vadd.f32 %v4736_v16, %v4883_v35  ;;  %v4884_v28 = vld [vmem:[#allocation17_spill] sm:$0xff] }
 0x23b   : > { %vm2484_vm6 = vcmp.ge.f32.partialorder %v2394_v60, 0.0  ;;  %v2548_v14 = vmul.f32 0.01, %v2394_v60  ;;  %v2386_v54 = vadd.f32 %v2385_v13, %v2097_v56  ;;  %v2609_v11 = vsel %vm2481_vm7, %v2383_v50, %v2545_v30 }
 0x23c   : > { %v2125_v7 = vpop.f32.mrf.mxu1  ;;  %v3658_v63 = vpop.f32.mrf.mxu0  ;;  %v1848_v8 = vadd.f32 %v4736_v16, %v4884_v28 }
 0x23d   : > { %v2612_v3 = vsel %vm2484_vm6, %v2394_v60, %v2548_v14  ;;  %vm2482_vm8 = vcmp.ge.f32.partialorder %v2386_v54, 0.0  ;;  %v2546_v37 = vmul.f32 0.01, %v2386_v54  ;;  %v2407_v5 = vadd.f32 %v3658_v63, %v2118_v39 }
 0x23e   : > { %v3503_v58 = vpack.c.bf16 %v2612_v3, %v2611_v15  ;;  %v2127_v26 = vpop.f32.mrf.mxu1  ;;  %v2398_v62 = vpop.f32.mrf.mxu0  ;;  %v2126_v9 = vadd.f32 %v2125_v7, %v1837_v55 }
 0x23f   : > { %v2610_v44 = vsel %vm2482_vm8, %v2386_v54, %v2546_v37  ;;  %v2399_v20 = vadd.f32 %v2398_v62, %v2110_v1  ;;  %v2551_v49 = vmul.f32 0.01, %v2407_v5  ;;  %vm2487_vm9 = vcmp.ge.f32.partialorder %v2407_v5, 0.0 }
 0x240   : > { %3551 = vst [vmem:[%s4638_s22 + $0xd8] sm:$0xff] %v3503_v58   ;;  %v3498_v51 = vpack.c.bf16 %v2610_v44, %v2609_v11  ;;  %v2128_v19 = vpop.f32.mrf.mxu1  ;;  %v3659_v38 = vpop.f32.mrf.mxu0 }
 0x241   : > { %v2410_v6 = vadd.f32 %v3659_v38, %v2121_v53  ;;  %v2549_v18 = vmul.f32 0.01, %v2399_v20  ;;  %v2615_v2 = vsel %vm2487_vm9, %v2407_v5, %v2551_v49  ;;  %vm2485_vm11 = vcmp.ge.f32.partialorder %v2399_v20, 0.0 }
 0x242   : > { %3550 = vst [vmem:[%s4638_s22 + $0xd0] sm:$0xff] %v3498_v51   ;;  %v2130_v40 = vpop.f32.mrf.mxu1  ;;  %v2401_v24 = vpop.f32.mrf.mxu0  ;;  %v2129_v57 = vadd.f32 %v2128_v19, %v1840_v34 }
 0x243   : > { %vm2488_vm10 = vcmp.ge.f32.partialorder %v2410_v6, 0.0  ;;  %v2552_v23 = vmul.f32 0.01, %v2410_v6  ;;  %v2402_v21 = vadd.f32 %v2401_v24, %v2113_v22  ;;  %v2613_v52 = vsel %vm2485_vm11, %v2399_v20, %v2549_v18 }
 0x244   : > { %v2133_v45 = vpop.f32.mrf.mxu1  ;;  %v3662_v42 = vpop.f32.mrf.mxu0 }
 0x245   : > { %v2616_v43 = vsel %vm2488_vm10, %v2410_v6, %v2552_v23  ;;  %vm2486_vm12 = vcmp.ge.f32.partialorder %v2402_v21, 0.0  ;;  %v2550_v25 = vmul.f32 0.01, %v2402_v21  ;;  %v2134_v17 = vadd.f32 %v2133_v45, %v1845_v32 }
 0x246   : > { %v3513_v29 = vpack.c.bf16 %v2616_v43, %v2615_v2  ;;  %v2135_v10 = vpop.f32.mrf.mxu1  ;;  %v2414_v36 = vpop.f32.mrf.mxu0 }
 0x247   : > { %v2614_v50 = vsel %vm2486_vm12, %v2402_v21, %v2550_v25  ;;  %v2415_v41 = vadd.f32 %v2414_v36, %v2126_v9  ;;  %v2423_v12 = vadd.f32 %v3662_v42, %v2134_v17 }
 0x248   : > { %3553 = vst [vmem:[%s4638_s22 + $0xe8] sm:$0xff] %v3513_v29   ;;  %v3508_v56 = vpack.c.bf16 %v2614_v50, %v2613_v52  ;;  %v2136_v60 = vpop.f32.mrf.mxu1  ;;  %v3663_v47 = vpop.f32.mrf.mxu0 }
 0x249   : > { %v2137_v27 = vadd.f32 %v2136_v60, %v1848_v8  ;;  %v2553_v13 = vmul.f32 0.01, %v2415_v41  ;;  %v2555_v14 = vmul.f32 0.01, %v2423_v12  ;;  %vm2489_vm13 = vcmp.ge.f32.partialorder %v2415_v41, 0.0 }
 0x24a   : > { %3552 = vst [vmem:[%s4638_s22 + $0xe0] sm:$0xff] %v3508_v56   ;;  %v2138_v0 = vpop.f32.mrf.mxu1  ;;  %v2417_v61 = vpop.f32.mrf.mxu0  ;;  %vm2491_vm14 = vcmp.ge.f32.partialorder %v2423_v12, 0.0 }
 0x24b   : > { %v2418_v30 = vadd.f32 %v2417_v61, %v2129_v57  ;;  %v2426_v54 = vadd.f32 %v3663_v47, %v2137_v27  ;;  %v2617_v31 = vsel %vm2489_vm13, %v2415_v41, %v2553_v13  ;;  %v2619_v39 = vsel %vm2491_vm14, %v2423_v12, %v2555_v14 }
 0x24d   : > { %vm2490_vm15 = vcmp.ge.f32.partialorder %v2418_v30, 0.0  ;;  %v2554_v16 = vmul.f32 0.01, %v2418_v30  ;;  %vm2492_vm0 = vcmp.ge.f32.partialorder %v2426_v54, 0.0  ;;  %v2556_v4 = vmul.f32 0.01, %v2426_v54 }
 0x24f   : > { %v2618_v1 = vsel %vm2490_vm15, %v2418_v30, %v2554_v16  ;;  %v2620_v7 = vsel %vm2492_vm0, %v2426_v54, %v2556_v4 }
 0x250   : > { %v3518_v63 = vpack.c.bf16 %v2618_v1, %v2617_v31  ;;  %v3523_v15 = vpack.c.bf16 %v2620_v7, %v2619_v39 }
 0x252   : > { %3554 = vst [vmem:[%s4638_s22 + $0xf0] sm:$0xff] %v3518_v63   ;;  %3555 = vst [vmem:[%s4638_s22 + $0xf8] sm:$0xff] %v3523_v15  }
 0x253 PF: > { %s13_s12 = sadd.s32 1, %s3973_s12  }
 0x254   : > { %p10_p4 = scmp.ge.s32.totalorder %s13_s12, 6  }
 0x256   :  { %12 = sbr.rel (!%p10_p4) target bundleno = 1 (0x1), region = 62 }

// kernel: generator_forward.9
= control target key start
LH: loop header
LB: loop body
LE: loop exit
PB: predicated region body
PF: predicated region fallthrough
CT: control target
= control target key end

     0   :  { %s3421_s12 = smov 0   ;;  %s4292_s0 = inlined_call_operand.vmem [shape: bf16[2048,576], index: 0, kind: input, shape index: {}]   ;;  %s4293_s1 = inlined_call_operand.vmem [shape: bf16[576,128], index: 1, kind: input, shape index: {}]   ;;  %s4294_s2 = inlined_call_operand.vmem [shape: f32[1,128], index: 2, kind: input, shape index: {}]   ;;  %s4295_s3 = inlined_call_operand.vmem [shape: f32[2048,128], index: 3, kind: output, shape index: {}]  }
   0x1 LB: > { %s2613_s13 = sadd.s32 4294967295, %s3398_s12   ;;  %p2617_p0 = scmp.ge.s32.totalorder %s3398_s12, 1  ;;  %s3398_s12 = sphi %s3421_s12, %s13_s12  }
   0x2   : > { %p139_p1 = scmp.lt.s32.totalorder %s3398_s12, 5 }
   0x4   : > { %p140_p2 = pnand %p2617_p0, %p139_p1 }
   0x6   : > { %143 = sbr.rel (%p140_p2) target bundleno = 605 (0x25d), region = 32 }
   0xb   : > { %v3003_v0 = vld [vmem:[%s4293_s1 + $0x38] sm:$0xff]   ;;  %v3400_v1 = vmov 0   ;;  %s2618_s16 = sshll.u32 %s2613_s13, 6  ;;  %v3004_v2 = vld [vmem:[%s4293_s1 + $0x30] sm:$0xff]   ;;  %v3005_v3 = vld [vmem:[%s4293_s1 + $0x28] sm:$0xff]   ;;  %vm1465_vm0 = vcmask 523264  }
   0xc   : > { %1562 = vmatprep.subr.bf16.mxu0 %v3400_v1  ;;  %2961 = vmatprep.subr.bf16.mxu1 %v3400_v1  ;;  %p165_p3 = scmp.lt.s32.totalorder %s2618_s16, 255  ;;  %v3006_v4 = vld [vmem:[%s4293_s1 + $0x20] sm:$0xff]   ;;  %v3007_v5 = vld [vmem:[%s4293_s1 + $0x18] sm:$0xff]   ;;  %v3008_v7 = vld [vmem:[%s4293_s1 + $0x10] sm:$0xff]  }
   0xd   : > { %1563 = vmatpush1.bf16.msra.mxu0 %v3003_v0  ;;  %2977 = vmatpush1.bf16.msra.mxu1 %v3003_v0  ;;  %v3009_v9 = vld [vmem:[%s4293_s1 + $0x8] sm:$0xff]   ;;  %v3010_v10 = vld [vmem:[%s4293_s1] sm:$0xff]   ;;  %v3011_v11 = vld [vmem:[%s4293_s1 + $0x78] sm:$0xff]  }
   0xe   : > { %1564 = vmatprep.subr.bf16.mxu0 %v3400_v1  ;;  %2962 = vmatprep.subr.bf16.mxu1 %v3400_v1  ;;  %s4327_s16 = smov (!%p165_p3, %s2618_s16), 255  ;;  %v3012_v12 = vld [vmem:[%s4293_s1 + $0x70] sm:$0xff]   ;;  %v3013_v13 = vld [vmem:[%s4293_s1 + $0x68] sm:$0xff]   ;;  %v3014_v14 = vld [vmem:[%s4293_s1 + $0x60] sm:$0xff]  }
   0xf   : > { %s2993_s23 = smul.u32 20, %s4327_s16  ;;  %v3015_v15 = vld [vmem:[%s4293_s1 + $0x58] sm:$0xff]   ;;  %v3016_v16 = vld [vmem:[%s4293_s1 + $0x50] sm:$0xff]   ;;  %v3017_v17 = vld [vmem:[%s4293_s1 + $0x48] sm:$0xff]  }
  0x10   : > { %v3018_v18 = vld [vmem:[%s4293_s1 + $0x40] sm:$0xff]   ;;  %v3025_v19 = vld [vmem:[%s4293_s1 + $0x118] sm:$0xff]   ;;  %v3074_v25 = vld [vmem:[%s4293_s1 + $0x110] sm:$0xff]  }
  0x11   : > { %1565 = vmatpush1.bf16.msra.mxu0 %v3004_v2  ;;  %2978 = vmatpush1.bf16.msra.mxu1 %v3004_v2  ;;  %s3458_s28 = scalar_lea.vmem %s4292_s0, %s2993_s23  ;;  %v3026_v22 = vld [vmem:[%s4293_s1 + $0xb8] sm:$0xff]   ;;  %v3027_v26 = vld [vmem:[%s4293_s1 + $0xb0] sm:$0xff]   ;;  %v3034_v29 = vld [vmem:[%s4293_s1 + $0xa8] sm:$0xff]  }
  0x12   : > { %1566 = vmatprep.subr.bf16.mxu0 %v3400_v1  ;;  %2963 = vmatprep.subr.bf16.mxu1 %v3400_v1  ;;  %v3021_v6 = vld [vmem:[%s3458_s28 + $0x4] ss:$20 sps:$4 sm:$0xff]   ;;  %v3019_v20 = vld [vmem:[%s3458_s28] ss:$20 sps:$4 sm:$0xff]   ;;  %v3032_v27 = vld [vmem:[%s3458_s28 + $0x28] ss:$20 sps:$4 sm:$0xff]  }
  0x13   : > { %v3024_v8 = vld [vmem:[%s3458_s28 + $0x3c4] ss:$20 sps:$4 sm:$0xff]   ;;  %1594 = vmatprep.mubr.bf16.mxu0 %v3021_v6  ;;  %v3022_v21 = vld [vmem:[%s3458_s28 + $0x3c0] ss:$20 sps:$4 sm:$0xff]   ;;  %v3033_v28 = vld [vmem:[%s3458_s28 + $0x3e8] ss:$20 sps:$4 sm:$0xff]  }
  0x14   : > { %1786 = vmatprep.mubr.bf16.mxu1 %v3024_v8  ;;  %v3028_v23 = vld [vmem:[%s3458_s28 + $0x2c] ss:$20 sps:$4 sm:$0xff]   ;;  %v3036_v31 = vld [vmem:[%s3458_s28 + $0x54] ss:$20 sps:$4 sm:$0xff]   ;;  %v3040_v34 = vld [vmem:[%s3458_s28 + $0x50] ss:$20 sps:$4 sm:$0xff]  }
  0x15   : > { %1567 = vmatpush1.bf16.msra.mxu0 %v3005_v3  ;;  %2979 = vmatpush1.bf16.msra.mxu1 %v3005_v3  ;;  %v3030_v24 = vld [vmem:[%s3458_s28 + $0x3ec] ss:$20 sps:$4 sm:$0xff]   ;;  %v3038_v32 = vld [vmem:[%s3458_s28 + $0x414] ss:$20 sps:$4 sm:$0xff]   ;;  %v3041_v35 = vld [vmem:[%s3458_s28 + $0x410] ss:$20 sps:$4 sm:$0xff]  }
  0x16   : > { %1568 = vmatprep.subr.bf16.mxu0 %v3400_v1  ;;  %2964 = vmatprep.subr.bf16.mxu1 %v3400_v1  ;;  %v3115_v30 = vld [vmem:[%s4293_s1 + $0x108] sm:$0xff]   ;;  %v3035_v33 = vld [vmem:[%s4293_s1 + $0xa0] sm:$0xff]   ;;  %v3042_v36 = vld [vmem:[%s4293_s1 + $0x98] sm:$0xff]  }
  0x17   : > { %v3044_v37 = vld [vmem:[%s3458_s28 + $0x7c] ss:$20 sps:$4 sm:$0xff]   ;;  %v3048_v40 = vld [vmem:[%s3458_s28 + $0x78] ss:$20 sps:$4 sm:$0xff]   ;;  %v3152_v44 = vld [vmem:[%s4293_s1 + $0x100] sm:$0xff]  }
  0x18   : > { %v3046_v38 = vld [vmem:[%s3458_s28 + $0x43c] ss:$20 sps:$4 sm:$0xff]   ;;  %v3049_v41 = vld [vmem:[%s3458_s28 + $0x438] ss:$20 sps:$4 sm:$0xff]   ;;  %v3051_v46 = vld [vmem:[%s4293_s1 + $0x80] sm:$0xff]  }
  0x19   : > { %1569 = vmatpush1.bf16.msra.mxu0 %v3006_v4  ;;  %2980 = vmatpush1.bf16.msra.mxu1 %v3006_v4  ;;  %v3043_v39 = vld [vmem:[%s4293_s1 + $0x90] sm:$0xff]   ;;  %v3050_v42 = vld [vmem:[%s4293_s1 + $0x88] sm:$0xff]   ;;  %v3052_v43 = vld [vmem:[%s3458_s28 + $0xa4] ss:$20 sps:$4 sm:$0xff]  }
  0x1a   : > { %1570 = vmatprep.subr.bf16.mxu0 %v3400_v1  ;;  %2965 = vmatprep.subr.bf16.mxu1 %v3400_v1  ;;  %v3054_v45 = vld [vmem:[%s3458_s28 + $0x464] ss:$20 sps:$4 sm:$0xff]   ;;  %v3056_v47 = vld [vmem:[%s3458_s28 + $0xa0] ss:$20 sps:$4 sm:$0xff]   ;;  %v3064_v53 = vld [vmem:[%s3458_s28 + $0xc8] ss:$20 sps:$4 sm:$0xff]  }
  0x1b   : > { %v3057_v48 = vld [vmem:[%s3458_s28 + $0x460] ss:$20 sps:$4 sm:$0xff]   ;;  %v3058_v49 = vld [vmem:[%s4293_s1 + $0xf8] sm:$0xff]   ;;  %v3066_v55 = vld [vmem:[%s4293_s1 + $0xe8] sm:$0xff]  }
  0x1c   : > { %v3060_v50 = vld [vmem:[%s3458_s28 + $0xcc] ss:$20 sps:$4 sm:$0xff]   ;;  %v3059_v52 = vld [vmem:[%s4293_s1 + $0xf0] sm:$0xff]   ;;  %v3065_v54 = vld [vmem:[%s3458_s28 + $0x488] ss:$20 sps:$4 sm:$0xff]  }
  0x1d   : > { %1571 = vmatpush1.bf16.msra.mxu0 %v3007_v5  ;;  %2981 = vmatpush1.bf16.msra.mxu1 %v3007_v5  ;;  %v3062_v51 = vld [vmem:[%s3458_s28 + $0x48c] ss:$20 sps:$4 sm:$0xff]   ;;  %v3068_v56 = vld [vmem:[%s3458_s28 + $0xf4] ss:$20 sps:$4 sm:$0xff]   ;;  %v3072_v59 = vld [vmem:[%s3458_s28 + $0xf0] ss:$20 sps:$4 sm:$0xff]  }
  0x1e   : > { %1572 = vmatprep.subr.bf16.mxu0 %v3400_v1  ;;  %2966 = vmatprep.subr.bf16.mxu1 %v3400_v1  ;;  %v3070_v57 = vld [vmem:[%s3458_s28 + $0x4b4] ss:$20 sps:$4 sm:$0xff]   ;;  %v3067_v58 = vld [vmem:[%s4293_s1 + $0xe0] sm:$0xff]   ;;  %v3075_v61 = vld [vmem:[%s4293_s1 + $0xd8] sm:$0xff]  }
  0x1f   : > { %v3073_v60 = vld [vmem:[%s3458_s28 + $0x4b0] ss:$20 sps:$4 sm:$0xff]   ;;  %v3081_v2 = vld [vmem:[%s3458_s28 + $0x118] ss:$20 sps:$4 sm:$0xff]   ;;  %v3087_v8 = vld [vmem:[%s3458_s28 + $0x8] ss:$20 sps:$4 sm:$0xff]  }
  0x20   : > { %v3077_v62 = vld [vmem:[%s3458_s28 + $0x11c] ss:$20 sps:$4 sm:$0xff]   ;;  %v3082_v3 = vld [vmem:[%s3458_s28 + $0x4d8] ss:$20 sps:$4 sm:$0xff]  }
  0x21   : > { %1573 = vmatpush1.bf16.msra.mxu0 %v3008_v7  ;;  %2982 = vmatpush1.bf16.msra.mxu1 %v3008_v7  ;;  %v3079_v63 = vld [vmem:[%s3458_s28 + $0x4dc] ss:$20 sps:$4 sm:$0xff]   ;;  %v3083_v4 = vld [vmem:[%s4293_s1 + $0xc8] sm:$0xff]   ;;  %v3085_v5 = vld [vmem:[%s3458_s28 + $0x144] ss:$20 sps:$4 sm:$0xff]  }
  0x22   : > { %1574 = vmatprep.subr.bf16.mxu0 %v3400_v1  ;;  %2967 = vmatprep.subr.bf16.mxu1 %v3400_v1  ;;  %v3076_v0 = vld [vmem:[%s4293_s1 + $0xd0] sm:$0xff]   ;;  %v3089_v6 = vld [vmem:[%s3458_s28 + $0xc] ss:$20 sps:$4 sm:$0xff]  }
  0x23   : > { %v3084_v7 = vld [vmem:[%s4293_s1 + $0xc0] sm:$0xff]  }
  0x25   : > { %1575 = vmatpush1.bf16.msra.mxu0 %v3009_v9  ;;  %2983 = vmatpush1.bf16.msra.mxu1 %v3009_v9  ;;  %v3090_v9 = vld [vmem:[%s3458_s28 + $0x140] ss:$20 sps:$4 sm:$0xff]  }
  0x26   : > { %1576 = vmatprep.subr.bf16.mxu0 %v3400_v1  ;;  %2968 = vmatprep.subr.bf16.mxu1 %v3400_v1 }
  0x29   : > { %1577 = vmatpush1.bf16.msra.mxu0 %v3010_v10  ;;  %2984 = vmatpush1.bf16.msra.mxu1 %v3010_v10  ;;  %v3091_v10 = vld [vmem:[%s3458_s28 + $0x16c] ss:$20 sps:$4 sm:$0xff]  }
  0x2a   : > { %1578 = vmatprep.subr.bf16.mxu0 %v3400_v1  ;;  %2969 = vmatprep.subr.bf16.mxu1 %v3400_v1 }
  0x2d   : > { %1579 = vmatpush2.bf16.msra.mxu0 %v3011_v11  ;;  %2985 = vmatpush2.bf16.msra.mxu1 %v3011_v11  ;;  %v3093_v11 = vld [vmem:[%s3458_s28 + $0x34] ss:$20 sps:$4 sm:$0xff]  }
  0x2e   : > { %1580 = vmatprep.subr.bf16.mxu0 %v3400_v1  ;;  %2970 = vmatprep.subr.bf16.mxu1 %v3400_v1 }
  0x31   : > { %1581 = vmatpush2.bf16.msra.mxu0 %v3012_v12  ;;  %2986 = vmatpush2.bf16.msra.mxu1 %v3012_v12  ;;  %v3095_v12 = vld [vmem:[%s3458_s28 + $0x168] ss:$20 sps:$4 sm:$0xff]  }
  0x32   : > { %1582 = vmatprep.subr.bf16.mxu0 %v3400_v1  ;;  %2971 = vmatprep.subr.bf16.mxu1 %v3400_v1 }
  0x35   : > { %1583 = vmatpush2.bf16.msra.mxu0 %v3013_v13  ;;  %2987 = vmatpush2.bf16.msra.mxu1 %v3013_v13  ;;  %v3096_v13 = vld [vmem:[%s3458_s28 + $0x30] ss:$20 sps:$4 sm:$0xff]  }
  0x36   : > { %1584 = vmatprep.subr.bf16.mxu0 %v3400_v1  ;;  %2972 = vmatprep.subr.bf16.mxu1 %v3400_v1 }
  0x39   : > { %1585 = vmatpush2.bf16.msra.mxu0 %v3014_v14  ;;  %2988 = vmatpush2.bf16.msra.mxu1 %v3014_v14  ;;  %v3097_v14 = vld [vmem:[%s3458_s28 + $0x194] ss:$20 sps:$4 sm:$0xff]  }
  0x3a   : > { %1586 = vmatprep.subr.bf16.mxu0 %v3400_v1  ;;  %2973 = vmatprep.subr.bf16.mxu1 %v3400_v1 }
  0x3d   : > { %1587 = vmatpush2.bf16.msra.mxu0 %v3015_v15  ;;  %2989 = vmatpush2.bf16.msra.mxu1 %v3015_v15  ;;  %v3101_v15 = vld [vmem:[%s3458_s28 + $0x190] ss:$20 sps:$4 sm:$0xff]  }
  0x3e   : > { %1588 = vmatprep.subr.bf16.mxu0 %v3400_v1  ;;  %2974 = vmatprep.subr.bf16.mxu1 %v3400_v1 }
  0x41   : > { %1589 = vmatpush2.bf16.msra.mxu0 %v3016_v16  ;;  %2990 = vmatpush2.bf16.msra.mxu1 %v3016_v16  ;;  %v3102_v16 = vld [vmem:[%s3458_s28 + $0x58] ss:$20 sps:$4 sm:$0xff]  }
  0x42   : > { %1590 = vmatprep.subr.bf16.mxu0 %v3400_v1  ;;  %2975 = vmatprep.subr.bf16.mxu1 %v3400_v1 }
  0x45   : > { %1591 = vmatpush2.bf16.msra.mxu0 %v3017_v17  ;;  %2991 = vmatpush2.bf16.msra.mxu1 %v3017_v17  ;;  %v3103_v17 = vld [vmem:[%s3458_s28 + $0x1bc] ss:$20 sps:$4 sm:$0xff]  }
  0x46   : > { %1592 = vmatprep.subr.bf16.mxu0 %v3400_v1  ;;  %2976 = vmatprep.subr.bf16.mxu1 %v3400_v1 }
  0x49   : > { %1593 = vmatpush2.bf16.msra.mxu0 %v3018_v18  ;;  %2992 = vmatpush2.bf16.msra.mxu1 %v3018_v18  ;;  %v3105_v18 = vld [vmem:[%s3458_s28 + $0x84] ss:$20 sps:$4 sm:$0xff]  }
  0x4a   : > { %1851 = vmatprep.subr.bf16.mxu1 %v3400_v1  ;;  %2889 = vmatprep.subr.bf16.mxu0 %v3025_v19 }
  0x4c   : > { %1595 = vmatmul.mubr.bf16.vlgmr.msra.gmra.mxu0 %v3019_v20  ;;  %1787 = vmatmul.mubr.bf16.vlgmr.msra.gmra.mxu1 %v3022_v21  ;;  %v3108_v20 = vld [vmem:[%s3458_s28 + $0x80] ss:$20 sps:$4 sm:$0xff]   ;;  %v3109_v21 = vld [vmem:[%s3458_s28 + $0x1e4] ss:$20 sps:$4 sm:$0xff]  }
  0x4d   : > { %1852 = vmatpush1.bf16.msra.mxu1 %v3026_v22  ;;  %2890 = vmatpush3.bf16.msra.mxu0 %v3025_v19  ;;  %v3107_v19 = vld [vmem:[%s3458_s28 + $0x1b8] ss:$20 sps:$4 sm:$0xff]  }
  0x4e   : > { %1853 = vmatprep.subr.bf16.mxu1 %v3400_v1  ;;  %1602 = vmatprep.mubr.bf16.mxu0 %v3028_v23  ;;  %v3111_v22 = vld [vmem:[%s3458_s28 + $0xac] ss:$20 sps:$4 sm:$0xff]  }
  0x4f   : > { %1794 = vmatprep.mubr.bf16.mxu1 %v3030_v24  ;;  %2891 = vmatprep.subr.bf16.mxu0 %v3074_v25  ;;  %v3113_v23 = vld [vmem:[%s3458_s28 + $0x1e0] ss:$20 sps:$4 sm:$0xff]   ;;  %v3114_v24 = vld [vmem:[%s3458_s28 + $0xa8] ss:$20 sps:$4 sm:$0xff]  }
  0x51   : > { %1854 = vmatpush1.bf16.msra.mxu1 %v3027_v26  ;;  %2892 = vmatpush3.bf16.msra.mxu0 %v3074_v25  ;;  %v3116_v25 = vld [vmem:[%s3458_s28 + $0x20c] ss:$20 sps:$4 sm:$0xff]   ;;  %v3118_v26 = vld [vmem:[%s3458_s28 + $0xd4] ss:$20 sps:$4 sm:$0xff]  }
  0x52   : > { %1855 = vmatprep.subr.bf16.mxu1 %v3400_v1  ;;  %2893 = vmatprep.subr.bf16.mxu0 %v3115_v30 }
  0x54   : > { %1603 = vmatmul.mubr.bf16.gmra.mxu0 %v3032_v27  ;;  %1795 = vmatmul.mubr.bf16.gmra.mxu1 %v3033_v28  ;;  %v3120_v27 = vld [vmem:[%s3458_s28 + $0x208] ss:$20 sps:$4 sm:$0xff]   ;;  %v3121_v28 = vld [vmem:[%s3458_s28 + $0xd0] ss:$20 sps:$4 sm:$0xff]  }
  0x55   : > { %1856 = vmatpush1.bf16.msra.mxu1 %v3034_v29  ;;  %1610 = vmatprep.mubr.bf16.mxu0 %v3036_v31  ;;  %v3122_v29 = vld [vmem:[%s3458_s28 + $0x234] ss:$20 sps:$4 sm:$0xff]   ;;  %v3126_v31 = vld [vmem:[%s3458_s28 + $0x230] ss:$20 sps:$4 sm:$0xff]  }
  0x56   : > { %1857 = vmatprep.subr.bf16.mxu1 %v3400_v1  ;;  %1802 = vmatprep.mubr.bf16.mxu1 %v3038_v32  ;;  %v3127_v32 = vld [vmem:[%s3458_s28 + $0xf8] ss:$20 sps:$4 sm:$0xff]  }
  0x57   : > { %2894 = vmatpush3.bf16.msra.mxu0 %v3115_v30  ;;  %v3124_v30 = vld [vmem:[%s3458_s28 + $0xfc] ss:$20 sps:$4 sm:$0xff]  }
  0x58   : > { %2895 = vmatprep.subr.bf16.mxu0 %v3152_v44 }
  0x59   : > { %1858 = vmatpush1.bf16.msra.mxu1 %v3035_v33  ;;  %v3128_v33 = vld [vmem:[%s3458_s28 + $0x25c] ss:$20 sps:$4 sm:$0xff]  }
  0x5a   : > { %1859 = vmatprep.subr.bf16.mxu1 %v3400_v1 }
  0x5b   : > { %2896 = vmatpush3.bf16.msra.mxu0 %v3152_v44  ;;  %v3145_v44 = vld [vmem:[%s3458_s28 + $0x170] ss:$20 sps:$4 sm:$0xff]  }
  0x5c   : > { %1611 = vmatmul.mubr.bf16.gmra.mxu0 %v3040_v34  ;;  %1803 = vmatmul.mubr.bf16.gmra.mxu1 %v3041_v35  ;;  %v3130_v34 = vld [vmem:[%s3458_s28 + $0x124] ss:$20 sps:$4 sm:$0xff]  }
  0x5d   : > { %1860 = vmatpush1.bf16.msra.mxu1 %v3042_v36  ;;  %1618 = vmatprep.mubr.bf16.mxu0 %v3044_v37  ;;  %v3132_v35 = vld [vmem:[%s3458_s28 + $0x258] ss:$20 sps:$4 sm:$0xff]   ;;  %v3133_v36 = vld [vmem:[%s3458_s28 + $0x120] ss:$20 sps:$4 sm:$0xff]  }
  0x5e   : > { %1861 = vmatprep.subr.bf16.mxu1 %v3400_v1  ;;  %1810 = vmatprep.mubr.bf16.mxu1 %v3046_v38  ;;  %v3134_v37 = vld [vmem:[%s3458_s28 + $0x284] ss:$20 sps:$4 sm:$0xff]   ;;  %v3136_v38 = vld [vmem:[%s3458_s28 + $0x14c] ss:$20 sps:$4 sm:$0xff]  }
  0x61   : > { %1862 = vmatpush1.bf16.msra.mxu1 %v3043_v39  ;;  %v3138_v39 = vld [vmem:[%s3458_s28 + $0x280] ss:$20 sps:$4 sm:$0xff]  }
  0x62   : > { %1863 = vmatprep.subr.bf16.mxu1 %v3400_v1 }
  0x64   : > { %1619 = vmatmul.mubr.bf16.gmra.mxu0 %v3048_v40  ;;  %1811 = vmatmul.mubr.bf16.gmra.mxu1 %v3049_v41  ;;  %v3139_v40 = vld [vmem:[%s3458_s28 + $0x148] ss:$20 sps:$4 sm:$0xff]   ;;  %v3140_v41 = vld [vmem:[%s3458_s28 + $0x2ac] ss:$20 sps:$4 sm:$0xff]  }
  0x65   : > { %1864 = vmatpush1.bf16.msra.mxu1 %v3050_v42  ;;  %1626 = vmatprep.mubr.bf16.mxu0 %v3052_v43  ;;  %v3142_v42 = vld [vmem:[%s3458_s28 + $0x174] ss:$20 sps:$4 sm:$0xff]  }
  0x66   : > { %1865 = vmatprep.subr.bf16.mxu1 %v3400_v1  ;;  %1818 = vmatprep.mubr.bf16.mxu1 %v3054_v45  ;;  %v3144_v43 = vld [vmem:[%s3458_s28 + $0x2a8] ss:$20 sps:$4 sm:$0xff]  }
  0x67   : > { %v3146_v45 = vld [vmem:[%s3458_s28 + $0x2d4] ss:$20 sps:$4 sm:$0xff]  }
  0x69   : > { %1866 = vmatpush1.bf16.msra.mxu1 %v3051_v46  ;;  %v3148_v46 = vld [vmem:[%s3458_s28 + $0x19c] ss:$20 sps:$4 sm:$0xff]  }
  0x6a   : > { %1867 = vmatprep.subr.bf16.mxu1 %v3400_v1 }
  0x6c   : > { %1627 = vmatmul.mubr.bf16.gmra.mxu0 %v3056_v47  ;;  %1819 = vmatmul.mubr.bf16.gmra.mxu1 %v3057_v48  ;;  %v3150_v47 = vld [vmem:[%s3458_s28 + $0x2d0] ss:$20 sps:$4 sm:$0xff]   ;;  %v3151_v48 = vld [vmem:[%s3458_s28 + $0x198] ss:$20 sps:$4 sm:$0xff]  }
  0x6d   : > { %1868 = vmatpush2.bf16.msra.mxu1 %v3058_v49  ;;  %1634 = vmatprep.mubr.bf16.mxu0 %v3060_v50  ;;  %v3153_v49 = vld [vmem:[%s3458_s28 + $0x2fc] ss:$20 sps:$4 sm:$0xff]   ;;  %v3155_v50 = vld [vmem:[%s3458_s28 + $0x1c4] ss:$20 sps:$4 sm:$0xff]  }
  0x6e   : > { %1869 = vmatprep.subr.bf16.mxu1 %v3400_v1  ;;  %1826 = vmatprep.mubr.bf16.mxu1 %v3062_v51  ;;  %v3157_v51 = vld [vmem:[%s3458_s28 + $0x2f8] ss:$20 sps:$4 sm:$0xff]  }
  0x71   : > { %1870 = vmatpush2.bf16.msra.mxu1 %v3059_v52  ;;  %v3158_v52 = vld [vmem:[%s3458_s28 + $0x1c0] ss:$20 sps:$4 sm:$0xff]  }
  0x72   : > { %1871 = vmatprep.subr.bf16.mxu1 %v3400_v1 }
  0x74   : > { %1635 = vmatmul.mubr.bf16.gmra.mxu0 %v3064_v53  ;;  %1827 = vmatmul.mubr.bf16.gmra.mxu1 %v3065_v54  ;;  %v3159_v53 = vld [vmem:[%s3458_s28 + $0x324] ss:$20 sps:$4 sm:$0xff]   ;;  %v3161_v54 = vld [vmem:[%s3458_s28 + $0x1ec] ss:$20 sps:$4 sm:$0xff]  }
  0x75   : > { %1872 = vmatpush2.bf16.msra.mxu1 %v3066_v55  ;;  %1642 = vmatprep.mubr.bf16.mxu0 %v3068_v56  ;;  %v3163_v55 = vld [vmem:[%s3458_s28 + $0x320] ss:$20 sps:$4 sm:$0xff]   ;;  %v3164_v56 = vld [vmem:[%s3458_s28 + $0x1e8] ss:$20 sps:$4 sm:$0xff]  }
  0x76   : > { %1873 = vmatprep.subr.bf16.mxu1 %v3400_v1  ;;  %1834 = vmatprep.mubr.bf16.mxu1 %v3070_v57  ;;  %v3165_v57 = vld [vmem:[%s3458_s28 + $0x34c] ss:$20 sps:$4 sm:$0xff]  }
  0x79   : > { %1874 = vmatpush2.bf16.msra.mxu1 %v3067_v58  ;;  %v3167_v58 = vld [vmem:[%s3458_s28 + $0x214] ss:$20 sps:$4 sm:$0xff]  }
  0x7a   : > { %1875 = vmatprep.subr.bf16.mxu1 %v3400_v1 }
  0x7c   : > { %1643 = vmatmul.mubr.bf16.gmra.mxu0 %v3072_v59  ;;  %1835 = vmatmul.mubr.bf16.gmra.mxu1 %v3073_v60  ;;  %v3169_v59 = vld [vmem:[%s3458_s28 + $0x348] ss:$20 sps:$4 sm:$0xff]   ;;  %v3170_v60 = vld [vmem:[%s3458_s28 + $0x210] ss:$20 sps:$4 sm:$0xff]  }
  0x7d   : > { %1876 = vmatpush2.bf16.msra.mxu1 %v3075_v61  ;;  %1650 = vmatprep.mubr.bf16.mxu0 %v3077_v62  ;;  %v3171_v61 = vld [vmem:[%s3458_s28 + $0x374] ss:$20 sps:$4 sm:$0xff]   ;;  %v3173_v62 = vld [vmem:[%s3458_s28 + $0x23c] ss:$20 sps:$4 sm:$0xff]  }
  0x7e   : > { %1877 = vmatprep.subr.bf16.mxu1 %v3400_v1  ;;  %1842 = vmatprep.mubr.bf16.mxu1 %v3079_v63  ;;  %v3175_v63 = vld [vmem:[%s3458_s28 + $0x370] ss:$20 sps:$4 sm:$0xff]  }
  0x81   : > { %1878 = vmatpush2.bf16.msra.mxu1 %v3076_v0  ;;  %v3176_v0 = vld [vmem:[%s3458_s28 + $0x238] ss:$20 sps:$4 sm:$0xff]  }
  0x82   : > { %1879 = vmatprep.subr.bf16.mxu1 %v3400_v1 }
  0x84   : > { %1651 = vmatmul.mubr.bf16.gmra.mxu0 %v3081_v2  ;;  %1843 = vmatmul.mubr.bf16.gmra.mxu1 %v3082_v3  ;;  %v3177_v2 = vld [vmem:[%s3458_s28 + $0x39c] ss:$20 sps:$4 sm:$0xff]   ;;  %v3179_v3 = vld [vmem:[%s3458_s28 + $0x264] ss:$20 sps:$4 sm:$0xff]  }
  0x85   : > { %1880 = vmatpush2.bf16.msra.mxu1 %v3083_v4  ;;  %1658 = vmatprep.mubr.bf16.mxu0 %v3085_v5  ;;  %v3181_v4 = vld [vmem:[%s3458_s28 + $0x398] ss:$20 sps:$4 sm:$0xff]   ;;  %v3182_v5 = vld [vmem:[%s3458_s28 + $0x260] ss:$20 sps:$4 sm:$0xff]  }
  0x86   : > { %1881 = vmatprep.subr.bf16.mxu1 %v3400_v1  ;;  %1883 = vmatprep.mubr.bf16.mxu1 %v3089_v6  ;;  %v3099_v1 = vld [vmem:[%s3458_s28 + $0x5c] ss:$20 sps:$4 sm:$0xff]   ;;  %v3183_v6 = vld [vmem:[%s3458_s28 + $0x28c] ss:$20 sps:$4 sm:$0xff]  }
  0x89   : > { %1882 = vmatpush2.bf16.msra.mxu1 %v3084_v7  ;;  %v3185_v7 = vld [vmem:[%s3458_s28 + $0x10] ss:$20 sps:$4 sm:$0xff]  }
  0x8c   : > { %1659 = vmatmul.mubr.bf16.gmra.mxu0 %v3090_v9  ;;  %1884 = vmatmul.mubr.bf16.vlgmr.msra.gmra.mxu1 %v3087_v8  ;;  %v3186_v8 = vld [vmem:[%s3458_s28 + $0x288] ss:$20 sps:$4 sm:$0xff]   ;;  %v3187_v9 = vld [vmem:[%s3458_s28 + $0x38] ss:$20 sps:$4 sm:$0xff]  }
  0x8d   : > { %1666 = vmatprep.mubr.bf16.mxu0 %v3091_v10  ;;  %1891 = vmatprep.mubr.bf16.mxu1 %v3093_v11  ;;  %v3188_v10 = vld [vmem:[%s3458_s28 + $0x2b4] ss:$20 sps:$4 sm:$0xff]  }
  0x8e   : > { %v3190_v11 = vld [vmem:[%s3458_s28 + $0x60] ss:$20 sps:$4 sm:$0xff]  }
  0x94   : > { %1667 = vmatmul.mubr.bf16.gmra.mxu0 %v3095_v12  ;;  %1892 = vmatmul.mubr.bf16.gmra.mxu1 %v3096_v13 }
  0x95   : > { %1674 = vmatprep.mubr.bf16.mxu0 %v3097_v14  ;;  %1899 = vmatprep.mubr.bf16.mxu1 %v3099_v1 }
  0x9c   : > { %1675 = vmatmul.mubr.bf16.gmra.mxu0 %v3101_v15  ;;  %1900 = vmatmul.mubr.bf16.gmra.mxu1 %v3102_v16 }
  0x9d   : > { %1682 = vmatprep.mubr.bf16.mxu0 %v3103_v17  ;;  %1907 = vmatprep.mubr.bf16.mxu1 %v3105_v18  ;;  %v3191_v17 = vld [vmem:[%s3458_s28 + $0x2b0] ss:$20 sps:$4 sm:$0xff]   ;;  %v3192_v18 = vld [vmem:[%s3458_s28 + $0x88] ss:$20 sps:$4 sm:$0xff]  }
  0xa4   : > { %1683 = vmatmul.mubr.bf16.gmra.mxu0 %v3107_v19  ;;  %1908 = vmatmul.mubr.bf16.gmra.mxu1 %v3108_v20  ;;  %v3193_v19 = vld [vmem:[%s3458_s28 + $0x2dc] ss:$20 sps:$4 sm:$0xff]  }
  0xa5   : > { %1690 = vmatprep.mubr.bf16.mxu0 %v3109_v21  ;;  %1915 = vmatprep.mubr.bf16.mxu1 %v3111_v22  ;;  %v3195_v20 = vld [vmem:[%s3458_s28 + $0xb0] ss:$20 sps:$4 sm:$0xff]  }
  0xac   : > { %1691 = vmatmul.mubr.bf16.gmra.mxu0 %v3113_v23  ;;  %1916 = vmatmul.mubr.bf16.gmra.mxu1 %v3114_v24 }
  0xad   : > { %1698 = vmatprep.mubr.bf16.mxu0 %v3116_v25  ;;  %1923 = vmatprep.mubr.bf16.mxu1 %v3118_v26 }
  0xb4   : > { %1699 = vmatmul.mubr.bf16.gmra.mxu0 %v3120_v27  ;;  %1924 = vmatmul.mubr.bf16.gmra.mxu1 %v3121_v28 }
  0xb5   : > { %1706 = vmatprep.mubr.bf16.mxu0 %v3122_v29  ;;  %1931 = vmatprep.mubr.bf16.mxu1 %v3124_v30  ;;  %v3196_v29 = vld [vmem:[%s3458_s28 + $0x2d8] ss:$20 sps:$4 sm:$0xff]  }
  0xb6   : > { %v3197_v30 = vld [vmem:[%s3458_s28 + $0xd8] ss:$20 sps:$4 sm:$0xff]  }
  0xbc   : > { %1707 = vmatmul.mubr.bf16.gmra.mxu0 %v3126_v31  ;;  %1932 = vmatmul.mubr.bf16.gmra.mxu1 %v3127_v32  ;;  %v3198_v31 = vld [vmem:[%s3458_s28 + $0x304] ss:$20 sps:$4 sm:$0xff]   ;;  %v3200_v32 = vld [vmem:[%s3458_s28 + $0x100] ss:$20 sps:$4 sm:$0xff]  }
  0xbd   : > { %1714 = vmatprep.mubr.bf16.mxu0 %v3128_v33  ;;  %1939 = vmatprep.mubr.bf16.mxu1 %v3130_v34 }
  0xc4   : > { %1715 = vmatmul.mubr.bf16.gmra.mxu0 %v3132_v35  ;;  %1940 = vmatmul.mubr.bf16.gmra.mxu1 %v3133_v36 }
  0xc5   : > { %1722 = vmatprep.mubr.bf16.mxu0 %v3134_v37  ;;  %1947 = vmatprep.mubr.bf16.mxu1 %v3136_v38 }
  0xcc   : > { %1723 = vmatmul.mubr.bf16.gmra.mxu0 %v3138_v39  ;;  %1948 = vmatmul.mubr.bf16.gmra.mxu1 %v3139_v40 }
  0xcd   : > { %1730 = vmatprep.mubr.bf16.mxu0 %v3140_v41  ;;  %1955 = vmatprep.mubr.bf16.mxu1 %v3142_v42  ;;  %v3201_v41 = vld [vmem:[%s3458_s28 + $0x300] ss:$20 sps:$4 sm:$0xff]   ;;  %v3202_v42 = vld [vmem:[%s3458_s28 + $0x128] ss:$20 sps:$4 sm:$0xff]  }
  0xd4   : > { %1731 = vmatmul.mubr.bf16.gmra.mxu0 %v3144_v43  ;;  %1956 = vmatmul.mubr.bf16.gmra.mxu1 %v3145_v44  ;;  %v3205_v43 = vld [vmem:[%s3458_s28 + $0x32c] ss:$20 sps:$4 sm:$0xff]   ;;  %v3206_v44 = vld [vmem:[%s3458_s28 + $0x150] ss:$20 sps:$4 sm:$0xff]  }
  0xd5   : > { %1738 = vmatprep.mubr.bf16.mxu0 %v3146_v45  ;;  %1963 = vmatprep.mubr.bf16.mxu1 %v3148_v46 }
  0xdc   : > { %1739 = vmatmul.mubr.bf16.gmra.mxu0 %v3150_v47  ;;  %1964 = vmatmul.mubr.bf16.gmra.mxu1 %v3151_v48 }
  0xdd   : > { %1746 = vmatprep.mubr.bf16.mxu0 %v3153_v49  ;;  %1971 = vmatprep.mubr.bf16.mxu1 %v3155_v50 }
  0xe4   : > { %1747 = vmatmul.mubr.bf16.gmra.mxu0 %v3157_v51  ;;  %1972 = vmatmul.mubr.bf16.gmra.mxu1 %v3158_v52 }
  0xe5   : > { %1754 = vmatprep.mubr.bf16.mxu0 %v3159_v53  ;;  %1979 = vmatprep.mubr.bf16.mxu1 %v3161_v54  ;;  %v3203_v53 = vld [vmem:[%s3458_s28 + $0x328] ss:$20 sps:$4 sm:$0xff]   ;;  %v3207_v54 = vld [vmem:[%s3458_s28 + $0x178] ss:$20 sps:$4 sm:$0xff]  }
  0xec   : > { %1755 = vmatmul.mubr.bf16.gmra.mxu0 %v3163_v55  ;;  %1980 = vmatmul.mubr.bf16.gmra.mxu1 %v3164_v56  ;;  %v3210_v55 = vld [vmem:[%s3458_s28 + $0x354] ss:$20 sps:$4 sm:$0xff]  }
  0xed   : > { %1762 = vmatprep.mubr.bf16.mxu0 %v3165_v57  ;;  %1987 = vmatprep.mubr.bf16.mxu1 %v3167_v58  ;;  %v3211_v56 = vld [vmem:[%s3458_s28 + $0x1a0] ss:$20 sps:$4 sm:$0xff]  }
  0xf4   : > { %1763 = vmatmul.mubr.bf16.gmra.mxu0 %v3169_v59  ;;  %1988 = vmatmul.mubr.bf16.gmra.mxu1 %v3170_v60 }
  0xf5   : > { %1770 = vmatprep.mubr.bf16.mxu0 %v3171_v61  ;;  %1995 = vmatprep.mubr.bf16.mxu1 %v3173_v62 }
  0xfc   : > { %1771 = vmatmul.mubr.bf16.gmra.mxu0 %v3175_v63  ;;  %1996 = vmatmul.mubr.bf16.gmra.mxu1 %v3176_v0 }
  0xfd   : > { %1778 = vmatprep.mubr.bf16.mxu0 %v3177_v2  ;;  %2003 = vmatprep.mubr.bf16.mxu1 %v3179_v3  ;;  %v3208_v2 = vld [vmem:[%s3458_s28 + $0x350] ss:$20 sps:$4 sm:$0xff]   ;;  %v3212_v3 = vld [vmem:[%s3458_s28 + $0x1c8] ss:$20 sps:$4 sm:$0xff]  }
 0x104   : > { %1779 = vmatmul.mubr.bf16.gmra.mxu0 %v3181_v4  ;;  %2004 = vmatmul.mubr.bf16.gmra.mxu1 %v3182_v5  ;;  %v3215_v4 = vld [vmem:[%s3458_s28 + $0x37c] ss:$20 sps:$4 sm:$0xff]  }
 0x105   : > { %2011 = vmatprep.mubr.bf16.mxu1 %v3183_v6  ;;  %2897 = vmatprep.mubr.msk.bf16.mxu0 %vm1465_vm0, %v3185_v7  ;;  %v3216_v5 = vld [vmem:[%s3458_s28 + $0x1f0] ss:$20 sps:$4 sm:$0xff]  }
 0x10c   : > { %v3696_v12 = vpop.f32.mrf.mxu0  ;;  %v3698_v13 = vpop.f32.mrf.mxu1  ;;  %2012 = vmatmul.mubr.bf16.gmra.mxu1 %v3186_v8  ;;  %2898 = vmatmul.mubr.msk.bf16.vlgmr.msra.gmra.mxu0 %vm1465_vm0, %v3187_v9 }
 0x10d   : > { %4296 = vst [vmem:[#allocation2_spill] sm:$0xff] %v3698_v13  ;;  %2019 = vmatprep.mubr.bf16.mxu1 %v3188_v10  ;;  %2901 = vmatprep.mubr.msk.bf16.mxu0 %vm1465_vm0, %v3190_v11 }
 0x10e   : > { %v1598_v14 = vpop.f32.mrf.mxu0  ;;  %v1790_v1 = vpop.f32.mrf.mxu1 }
 0x110   : > { %v3702_v15 = vpop.f32.mrf.mxu0  ;;  %v3704_v16 = vpop.f32.mrf.mxu1 }
 0x111   : > { %4297 = vst [vmem:[#allocation3_spill] sm:$0xff] %v3704_v16 }
 0x112   : > { %v1601_v21 = vpop.f32.mrf.mxu0  ;;  %v1793_v22 = vpop.f32.mrf.mxu1 }
 0x114   : > { %v3710_v23 = vpop.f32.mrf.mxu0  ;;  %v3712_v24 = vpop.f32.mrf.mxu1  ;;  %2020 = vmatmul.mubr.bf16.gmra.mxu1 %v3191_v17  ;;  %2902 = vmatmul.mubr.msk.bf16.gmra.mxu0 %vm1465_vm0, %v3192_v18  ;;  %v3213_v17 = vld [vmem:[%s3458_s28 + $0x378] ss:$20 sps:$4 sm:$0xff]  }
 0x115   : > { %2027 = vmatprep.mubr.bf16.mxu1 %v3193_v19  ;;  %2905 = vmatprep.mubr.msk.bf16.mxu0 %vm1465_vm0, %v3195_v20  ;;  %v3217_v18 = vld [vmem:[%s3458_s28 + $0x218] ss:$20 sps:$4 sm:$0xff]   ;;  %v3221_v20 = vld [vmem:[%s3458_s28 + $0x240] ss:$20 sps:$4 sm:$0xff]  }
 0x116   : > { %v1606_v25 = vpop.f32.mrf.mxu0  ;;  %v1798_v26 = vpop.f32.mrf.mxu1  ;;  %v3220_v19 = vld [vmem:[%s3458_s28 + $0x3a4] ss:$20 sps:$4 sm:$0xff]  }
 0x118   : > { %v3716_v27 = vpop.f32.mrf.mxu0  ;;  %v3718_v28 = vpop.f32.mrf.mxu1 }
 0x119   : > { %4298 = vst [vmem:[#allocation4_spill] sm:$0xff] %v3718_v28 }
 0x11a   : > { %v1609_v33 = vpop.f32.mrf.mxu0  ;;  %v1801_v34 = vpop.f32.mrf.mxu1 }
 0x11b   : > { %v3218_v33 = vld [vmem:[%s3458_s28 + $0x3a0] ss:$20 sps:$4 sm:$0xff]   ;;  %v3222_v34 = vld [vmem:[%s3458_s28 + $0x268] ss:$20 sps:$4 sm:$0xff]  }
 0x11c   : > { %v3724_v35 = vpop.f32.mrf.mxu0  ;;  %v3726_v36 = vpop.f32.mrf.mxu1  ;;  %2028 = vmatmul.mubr.bf16.gmra.mxu1 %v3196_v29  ;;  %2906 = vmatmul.mubr.msk.bf16.gmra.mxu0 %vm1465_vm0, %v3197_v30 }
 0x11d   : > { %4299 = vst [vmem:[#allocation5_spill] sm:$0xff] %v3726_v36  ;;  %2035 = vmatprep.mubr.bf16.mxu1 %v3198_v31  ;;  %2909 = vmatprep.mubr.msk.bf16.mxu0 %vm1465_vm0, %v3200_v32 }
 0x11e   : > { %v1614_v37 = vpop.f32.mrf.mxu0  ;;  %v1806_v38 = vpop.f32.mrf.mxu1 }
 0x11f   : > { %v3225_v37 = vld [vmem:[%s3458_s28 + $0x3cc] ss:$20 sps:$4 sm:$0xff]   ;;  %v3226_v38 = vld [vmem:[%s3458_s28 + $0x290] ss:$20 sps:$4 sm:$0xff]  }
 0x120   : > { %v3730_v39 = vpop.f32.mrf.mxu0  ;;  %v3732_v40 = vpop.f32.mrf.mxu1 }
 0x121   : > { %4300 = vst [vmem:[#allocation6_spill] sm:$0xff] %v3732_v40 }
 0x122   : > { %v1617_v45 = vpop.f32.mrf.mxu0  ;;  %v1809_v46 = vpop.f32.mrf.mxu1 }
 0x124   : > { %v3738_v47 = vpop.f32.mrf.mxu0  ;;  %v3740_v48 = vpop.f32.mrf.mxu1  ;;  %2036 = vmatmul.mubr.bf16.gmra.mxu1 %v3201_v41  ;;  %2910 = vmatmul.mubr.msk.bf16.gmra.mxu0 %vm1465_vm0, %v3202_v42 }
 0x125   : > { %4301 = vst [vmem:[#allocation7_spill] sm:$0xff] %v3740_v48  ;;  %2043 = vmatprep.mubr.bf16.mxu1 %v3205_v43  ;;  %2913 = vmatprep.mubr.msk.bf16.mxu0 %vm1465_vm0, %v3206_v44 }
 0x126   : > { %v1622_v49 = vpop.f32.mrf.mxu0  ;;  %v1814_v50 = vpop.f32.mrf.mxu1 }
 0x127   : > { %v3803_v49 = vld [vmem:[%s4294_s2] ss:$0 sm:$0xff] }
 0x128   : > { %v3744_v51 = vpop.f32.mrf.mxu0  ;;  %v3746_v52 = vpop.f32.mrf.mxu1 }
 0x129   : > { %4302 = vst [vmem:[#allocation8_spill] sm:$0xff] %v3746_v52 }
 0x12a   : > { %v1625_v57 = vpop.f32.mrf.mxu0  ;;  %v1817_v58 = vpop.f32.mrf.mxu1 }
 0x12b   : > { %v3231_v57 = vld [vmem:[%s3458_s28 + $0x2e0] ss:$20 sps:$4 sm:$0xff]  }
 0x12c   : > { %v3752_v59 = vpop.f32.mrf.mxu0  ;;  %v3754_v60 = vpop.f32.mrf.mxu1  ;;  %2044 = vmatmul.mubr.bf16.gmra.mxu1 %v3203_v53  ;;  %2914 = vmatmul.mubr.msk.bf16.gmra.mxu0 %vm1465_vm0, %v3207_v54  ;;  %v3223_v54 = vld [vmem:[%s3458_s28 + $0x3c8] ss:$20 sps:$4 sm:$0xff]  }
 0x12d   : > { %4303 = vst [vmem:[#allocation9_spill] sm:$0xff] %v3754_v60  ;;  %2051 = vmatprep.mubr.bf16.mxu1 %v3210_v55  ;;  %2917 = vmatprep.mubr.msk.bf16.mxu0 %vm1465_vm0, %v3211_v56  ;;  %v3227_v55 = vld [vmem:[%s3458_s28 + $0x2b8] ss:$20 sps:$4 sm:$0xff]   ;;  %v3230_v56 = vld [vmem:[%s3458_s28 + $0x3f4] ss:$20 sps:$4 sm:$0xff]  }
 0x12e   : > { %v1630_v61 = vpop.f32.mrf.mxu0  ;;  %v1822_v62 = vpop.f32.mrf.mxu1 }
 0x12f   : > { %v1597_v62 = vadd.f32 %v3803_v49, %v3696_v12 }
 0x130   : > { %v3758_v63 = vpop.f32.mrf.mxu0  ;;  %v3760_v0 = vpop.f32.mrf.mxu1 }
 0x131   : > { %4304 = vst [vmem:[#allocation10_spill] sm:$0xff] %v3760_v0 }
 0x132   : > { %v1633_v6 = vpop.f32.mrf.mxu0  ;;  %v1825_v7 = vpop.f32.mrf.mxu1 }
 0x133   : > { %v1600_v7 = vadd.f32 %v3803_v49, %v3702_v15 }
 0x134   : > { %v3766_v8 = vpop.f32.mrf.mxu0  ;;  %v3768_v9 = vpop.f32.mrf.mxu1  ;;  %2052 = vmatmul.mubr.bf16.gmra.mxu1 %v3208_v2  ;;  %2918 = vmatmul.mubr.msk.bf16.gmra.mxu0 %vm1465_vm0, %v3212_v3 }
 0x135   : > { %4305 = vst [vmem:[#allocation11_spill] sm:$0xff] %v3768_v9  ;;  %2059 = vmatprep.mubr.bf16.mxu1 %v3215_v4  ;;  %2921 = vmatprep.mubr.msk.bf16.mxu0 %vm1465_vm0, %v3216_v5 }
 0x136   : > { %v1638_v10 = vpop.f32.mrf.mxu0  ;;  %v1830_v11 = vpop.f32.mrf.mxu1 }
 0x137   : > { %v3228_v11 = vld [vmem:[%s3458_s28 + $0x3f0] ss:$20 sps:$4 sm:$0xff]  }
 0x138   : > { %v3772_v14 = vpop.f32.mrf.mxu0  ;;  %v3774_v1 = vpop.f32.mrf.mxu1 }
 0x139   : > { %4306 = vst [vmem:[#allocation12_spill] sm:$0xff] %v3774_v1 }
 0x13a   : > { %v1641_v21 = vpop.f32.mrf.mxu0  ;;  %v1833_v22 = vpop.f32.mrf.mxu1 }
 0x13c   : > { %v3780_v25 = vpop.f32.mrf.mxu0  ;;  %v3782_v26 = vpop.f32.mrf.mxu1  ;;  %2060 = vmatmul.mubr.bf16.gmra.mxu1 %v3213_v17  ;;  %2922 = vmatmul.mubr.msk.bf16.gmra.mxu0 %vm1465_vm0, %v3217_v18  ;;  %v3232_v17 = vld [vmem:[%s3458_s28 + $0x308] ss:$20 sps:$4 sm:$0xff]  }
 0x13d   : > { %4307 = vst [vmem:[#allocation13_spill] sm:$0xff] %v3782_v26  ;;  %2067 = vmatprep.mubr.bf16.mxu1 %v3220_v19  ;;  %2925 = vmatprep.mubr.msk.bf16.mxu0 %vm1465_vm0, %v3221_v20  ;;  %v3235_v19 = vld [vmem:[%s3458_s28 + $0x41c] ss:$20 sps:$4 sm:$0xff]  }
 0x13e   : > { %v1646_v29 = vpop.f32.mrf.mxu0  ;;  %v1838_v30 = vpop.f32.mrf.mxu1  ;;  %v3236_v20 = vld [vmem:[%s3458_s28 + $0x330] ss:$20 sps:$4 sm:$0xff]  }
 0x13f   : > { %v1605_v29 = vadd.f32 %v3803_v49, %v3710_v23 }
 0x140   : > { %v3786_v31 = vpop.f32.mrf.mxu0  ;;  %v3788_v32 = vpop.f32.mrf.mxu1 }
 0x141   : > { %4308 = vst [vmem:[#allocation14_spill] sm:$0xff] %v3788_v32 }
 0x142   : > { %v1649_v41 = vpop.f32.mrf.mxu0  ;;  %v1841_v42 = vpop.f32.mrf.mxu1 }
 0x143   : > { %v3233_v42 = vld [vmem:[%s3458_s28 + $0x418] ss:$20 sps:$4 sm:$0xff]  }
 0x144   : > { %v3794_v43 = vpop.f32.mrf.mxu0  ;;  %v3796_v44 = vpop.f32.mrf.mxu1  ;;  %2068 = vmatmul.mubr.bf16.gmra.mxu1 %v3218_v33  ;;  %2926 = vmatmul.mubr.msk.bf16.gmra.mxu0 %vm1465_vm0, %v3222_v34 }
 0x145   : > { %4309 = vst [vmem:[#allocation15_spill] sm:$0xff] %v3796_v44  ;;  %2075 = vmatprep.mubr.bf16.mxu1 %v3225_v37  ;;  %2929 = vmatprep.mubr.msk.bf16.mxu0 %vm1465_vm0, %v3226_v38  ;;  %v1608_v38 = vadd.f32 %v3803_v49, %v3716_v27 }
 0x146   : > { %v1654_v45 = vpop.f32.mrf.mxu0  ;;  %v1846_v46 = vpop.f32.mrf.mxu1 }
 0x147   : > { %v3237_v45 = vld [vmem:[%s3458_s28 + $0x358] ss:$20 sps:$4 sm:$0xff]  }
 0x148   : > { %v3805_v50 = vpop.f32.mrf.mxu0  ;;  %v3807_v53 = vpop.f32.mrf.mxu1 }
 0x149   : > { %4310 = vst [vmem:[#allocation16_spill] sm:$0xff] %v3807_v53 }
 0x14a   : > { %v1657_v58 = vpop.f32.mrf.mxu0  ;;  %v1849_v61 = vpop.f32.mrf.mxu1 }
 0x14b   : > { %v1613_v58 = vadd.f32 %v3803_v49, %v3724_v35 }
 0x14c   : > { %v3815_v2 = vpop.f32.mrf.mxu0  ;;  %v1885_v3 = vpop.f32.mrf.mxu1  ;;  %2076 = vmatmul.mubr.bf16.gmra.mxu1 %v3223_v54  ;;  %2930 = vmatmul.mubr.msk.bf16.gmra.mxu0 %vm1465_vm0, %v3227_v55  ;;  %v3240_v54 = vld [vmem:[%s3458_s28 + $0x444] ss:$20 sps:$4 sm:$0xff]   ;;  %v3241_v55 = vld [vmem:[%s3458_s28 + $0x380] ss:$20 sps:$4 sm:$0xff]  }
 0x14d   : > { %v3818_v4 = vadd.f32 %v1885_v3, %v1597_v62  ;;  %2083 = vmatprep.mubr.bf16.mxu1 %v3230_v56  ;;  %2933 = vmatprep.mubr.msk.bf16.mxu0 %vm1465_vm0, %v3231_v57 }
 0x14e   : > { %v1662_v5 = vpop.f32.mrf.mxu0  ;;  %v1887_v6 = vpop.f32.mrf.mxu1 }
 0x14f   : > { %v1616_v6 = vadd.f32 %v3803_v49, %v3730_v39 }
 0x150   : > { %v3823_v10 = vpop.f32.mrf.mxu0  ;;  %v1888_v12 = vpop.f32.mrf.mxu1 }
 0x151   : > { %v3827_v18 = vadd.f32 %v1888_v12, %v1600_v7  ;;  %v3238_v12 = vld [vmem:[%s3458_s28 + $0x440] ss:$20 sps:$4 sm:$0xff]  }
 0x152   : > { %v1665_v21 = vpop.f32.mrf.mxu0  ;;  %v1890_v22 = vpop.f32.mrf.mxu1 }
 0x154   : > { %v3833_v30 = vpop.f32.mrf.mxu0  ;;  %v1893_v15 = vpop.f32.mrf.mxu1  ;;  %2084 = vmatmul.mubr.bf16.gmra.mxu1 %v3228_v11  ;;  %2934 = vmatmul.mubr.msk.bf16.gmra.mxu0 %vm1465_vm0, %v3232_v17  ;;  %v3242_v11 = vld [vmem:[%s3458_s28 + $0x3a8] ss:$20 sps:$4 sm:$0xff]  }
 0x155   : > { %v3836_v33 = vadd.f32 %v1893_v15, %v1605_v29  ;;  %2091 = vmatprep.mubr.bf16.mxu1 %v3235_v19  ;;  %2937 = vmatprep.mubr.msk.bf16.mxu0 %vm1465_vm0, %v3236_v20  ;;  %v3245_v19 = vld [vmem:[%s3458_s28 + $0x46c] ss:$20 sps:$4 sm:$0xff]   ;;  %v3246_v20 = vld [vmem:[%s3458_s28 + $0x3d0] ss:$20 sps:$4 sm:$0xff]   ;;  %v1621_v29 = vadd.f32 %v3803_v49, %v3738_v47 }
 0x156   : > { %v1670_v34 = vpop.f32.mrf.mxu0  ;;  %v1895_v37 = vpop.f32.mrf.mxu1 }
 0x158   : > { %v3841_v41 = vpop.f32.mrf.mxu0  ;;  %v1896_v23 = vpop.f32.mrf.mxu1 }
 0x159   : > { %v3845_v46 = vadd.f32 %v1896_v23, %v1608_v38  ;;  %v1624_v23 = vadd.f32 %v3803_v49, %v3744_v51 }
 0x15a   : > { %v1673_v56 = vpop.f32.mrf.mxu0  ;;  %v1898_v57 = vpop.f32.mrf.mxu1 }
 0x15b   : > { %v3250_v56 = vld [vmem:[%s3458_s28 + $0x494] ss:$20 sps:$4 sm:$0xff]  }
 0x15c   : > { %v3851_v61 = vpop.f32.mrf.mxu0  ;;  %v1901_v27 = vpop.f32.mrf.mxu1  ;;  %2092 = vmatmul.mubr.bf16.gmra.mxu1 %v3233_v42  ;;  %2938 = vmatmul.mubr.msk.bf16.gmra.mxu0 %vm1465_vm0, %v3237_v45  ;;  %v3243_v45 = vld [vmem:[%s3458_s28 + $0x468] ss:$20 sps:$4 sm:$0xff]   ;;  %v3251_v57 = vld [vmem:[%s3458_s28 + $0x420] ss:$20 sps:$4 sm:$0xff]  }
 0x15d   : > { %v3854_v62 = vadd.f32 %v1901_v27, %v1613_v58  ;;  %2099 = vmatprep.mubr.bf16.mxu1 %v3240_v54  ;;  %2941 = vmatprep.mubr.msk.bf16.mxu0 %vm1465_vm0, %v3241_v55  ;;  %v3247_v54 = vld [vmem:[%s3458_s28 + $0x3f8] ss:$20 sps:$4 sm:$0xff]  }
 0x15e   : > { %v1678_v3 = vpop.f32.mrf.mxu0  ;;  %v1903_v5 = vpop.f32.mrf.mxu1 }
 0x15f   : > { %v1629_v3 = vadd.f32 %v3803_v49, %v3752_v59 }
 0x160   : > { %v3859_v7 = vpop.f32.mrf.mxu0  ;;  %v1904_v35 = vpop.f32.mrf.mxu1 }
 0x161   : > { %v3863_v17 = vadd.f32 %v1904_v35, %v1616_v6 }
 0x162   : > { %v1681_v21 = vpop.f32.mrf.mxu0  ;;  %v1906_v22 = vpop.f32.mrf.mxu1 }
 0x163   : > { %v3252_v21 = vld [vmem:[%s3458_s28 + $0x448] ss:$20 sps:$4 sm:$0xff]  }
 0x164   : > { %v3869_v15 = vpop.f32.mrf.mxu0  ;;  %v1909_v39 = vpop.f32.mrf.mxu1  ;;  %2100 = vmatmul.mubr.bf16.gmra.mxu1 %v3238_v12  ;;  %2942 = vmatmul.mubr.msk.bf16.gmra.mxu0 %vm1465_vm0, %v3242_v11  ;;  %v1632_v11 = vadd.f32 %v3803_v49, %v3758_v63 }
 0x165   : > { %v3872_v34 = vadd.f32 %v1909_v39, %v1621_v29  ;;  %2107 = vmatprep.mubr.bf16.mxu1 %v3245_v19  ;;  %2945 = vmatprep.mubr.msk.bf16.mxu0 %vm1465_vm0, %v3246_v20  ;;  %v3248_v20 = vld [vmem:[%s3458_s28 + $0x490] ss:$20 sps:$4 sm:$0xff]  }
 0x166   : > { %v1686_v37 = vpop.f32.mrf.mxu0  ;;  %v1911_v38 = vpop.f32.mrf.mxu1  ;;  %v3255_v29 = vld [vmem:[%s3458_s28 + $0x4bc] ss:$20 sps:$4 sm:$0xff]  }
 0x167   : > { %v3256_v39 = vld [vmem:[%s3458_s28 + $0x470] ss:$20 sps:$4 sm:$0xff]  }
 0x168   : > { %v3877_v42 = vpop.f32.mrf.mxu0  ;;  %v1912_v47 = vpop.f32.mrf.mxu1 }
 0x169   : > { %v3881_v55 = vadd.f32 %v1912_v47, %v1624_v23  ;;  %v1637_v23 = vadd.f32 %v3803_v49, %v3766_v8 }
 0x16a   : > { %v1689_v58 = vpop.f32.mrf.mxu0  ;;  %v1914_v27 = vpop.f32.mrf.mxu1 }
 0x16b   : > { %v3253_v27 = vld [vmem:[%s3458_s28 + $0x4b8] ss:$20 sps:$4 sm:$0xff]  }
 0x16c   : > { %v3887_v5 = vpop.f32.mrf.mxu0  ;;  %v1917_v51 = vpop.f32.mrf.mxu1  ;;  %2108 = vmatmul.mubr.bf16.gmra.mxu1 %v3243_v45  ;;  %2946 = vmatmul.mubr.msk.bf16.gmra.mxu0 %vm1465_vm0, %v3247_v54 }
 0x16d   : > { %v3890_v6 = vadd.f32 %v1917_v51, %v1629_v3  ;;  %2115 = vmatprep.mubr.bf16.mxu1 %v3250_v56  ;;  %2949 = vmatprep.mubr.msk.bf16.mxu0 %vm1465_vm0, %v3251_v57  ;;  %v1640_v57 = vadd.f32 %v3803_v49, %v3772_v14  ;;  %v3257_v3 = vld [vmem:[%s3458_s28 + $0x498] ss:$20 sps:$4 sm:$0xff]  }
 0x16e   : > { %v1694_v35 = vpop.f32.mrf.mxu0  ;;  %v1919_v12 = vpop.f32.mrf.mxu1 }
 0x16f   : > { %v3260_v35 = vld [vmem:[%s3458_s28 + $0x4e4] ss:$20 sps:$4 sm:$0xff]   ;;  %v3261_v12 = vld [vmem:[%s3458_s28 + $0x4c0] ss:$20 sps:$4 sm:$0xff]  }
 0x170   : > { %v3895_v19 = vpop.f32.mrf.mxu0  ;;  %v1920_v59 = vpop.f32.mrf.mxu1 }
 0x171   : > { %v3899_v22 = vadd.f32 %v1920_v59, %v1632_v11 }
 0x172   : > { %v1697_v37 = vpop.f32.mrf.mxu0  ;;  %v1922_v38 = vpop.f32.mrf.mxu1 }
 0x173   : > { %v1648_v38 = vadd.f32 %v3803_v49, %v3786_v31 }
 0x174   : > { %v3905_v47 = vpop.f32.mrf.mxu0  ;;  %v1925_v63 = vpop.f32.mrf.mxu1  ;;  %2116 = vmatmul.mubr.bf16.gmra.mxu1 %v3248_v20  ;;  %2950 = vmatmul.mubr.msk.bf16.gmra.mxu0 %vm1465_vm0, %v3252_v21  ;;  %v1645_v20 = vadd.f32 %v3803_v49, %v3780_v25  ;;  %v3258_v25 = vld [vmem:[%s3458_s28 + $0x4e0] ss:$20 sps:$4 sm:$0xff]  }
 0x175   : > { %v3908_v45 = vadd.f32 %v1925_v63, %v1637_v23  ;;  %2123 = vmatprep.mubr.bf16.mxu1 %v3255_v29  ;;  %2953 = vmatprep.mubr.msk.bf16.mxu0 %vm1465_vm0, %v3256_v39 }
 0x176   : > { %v1702_v54 = vpop.f32.mrf.mxu0  ;;  %v1927_v56 = vpop.f32.mrf.mxu1 }
 0x177   : > { %v3262_v54 = vld [vmem:[%s3458_s28 + $0x4e8] ss:$20 sps:$4 sm:$0xff]   ;;  %s2621_s28 = sshll.u32 %s4327_s16, 3 }
 0x178   : > { %v3913_v58 = vpop.f32.mrf.mxu0  ;;  %v1928_v8 = vpop.f32.mrf.mxu1  ;;  %s4065_s22 = scalar_lea.vmem %s4295_s3, %s2621_s28 }
 0x179   : > { %v3917_v51 = vadd.f32 %v1928_v8, %v1640_v57 }
 0x17a   : > { %v1705_v11 = vpop.f32.mrf.mxu0  ;;  %v1930_v59 = vpop.f32.mrf.mxu1 }
 0x17b   : > { %v1656_v59 = vadd.f32 %v3803_v49, %v3805_v50  ;;  %v1664_v50 = vadd.f32 %v3803_v49, %v3823_v10  ;;  %v1672_v10 = vadd.f32 %v3803_v49, %v3841_v41  ;;  %v1680_v41 = vadd.f32 %v3803_v49, %v3859_v7 }
 0x17c   : > { %v3923_v21 = vpop.f32.mrf.mxu0  ;;  %v1933_v29 = vpop.f32.mrf.mxu1  ;;  %2124 = vmatmul.mubr.bf16.gmra.mxu1 %v3253_v27  ;;  %2954 = vmatmul.mubr.msk.bf16.gmra.mxu0 %vm1465_vm0, %v3257_v3  ;;  %v1653_v27 = vadd.f32 %v3803_v49, %v3794_v43  ;;  %v1688_v7 = vadd.f32 %v3803_v49, %v3877_v42  ;;  %v1696_v42 = vadd.f32 %v3803_v49, %v3895_v19 }
 0x17d   : > { %v3926_v14 = vadd.f32 %v1933_v29, %v1645_v20  ;;  %2131 = vmatprep.mubr.bf16.mxu1 %v3260_v35  ;;  %2957 = vmatprep.mubr.msk.bf16.mxu0 %vm1465_vm0, %v3261_v12  ;;  %v1704_v19 = vadd.f32 %v3803_v49, %v3913_v58 }
 0x17e   : > { %v1710_v39 = vpop.f32.mrf.mxu0  ;;  %v1935_v37 = vpop.f32.mrf.mxu1 }
 0x180   : > { %v3931_v23 = vpop.f32.mrf.mxu0  ;;  %v1936_v63 = vpop.f32.mrf.mxu1 }
 0x181   : > { %v3935_v56 = vadd.f32 %v1936_v63, %v1648_v38  ;;  %v1661_v38 = vadd.f32 %v3803_v49, %v3815_v2  ;;  %v1669_v2 = vadd.f32 %v3803_v49, %v3833_v30  ;;  %v1677_v30 = vadd.f32 %v3803_v49, %v3851_v61 }
 0x182   : > { %v1713_v57 = vpop.f32.mrf.mxu0  ;;  %v1938_v8 = vpop.f32.mrf.mxu1  ;;  %v1685_v61 = vadd.f32 %v3803_v49, %v3869_v15  ;;  %v1693_v15 = vadd.f32 %v3803_v49, %v3887_v5  ;;  %v1701_v5 = vadd.f32 %v3803_v49, %v3905_v47  ;;  %v1709_v47 = vadd.f32 %v3803_v49, %v3923_v21 }
 0x183   : > { %v1712_v58 = vadd.f32 %v3803_v49, %v3931_v23 }
 0x184   : > { %v3939_v3 = vpop.f32.mrf.mxu0  ;;  %v1941_v35 = vpop.f32.mrf.mxu1  ;;  %2132 = vmatmul.mubr.bf16.gmra.mxu1 %v3258_v25  ;;  %2958 = vmatmul.mubr.msk.bf16.gmra.mxu0 %vm1465_vm0, %v3262_v54 }
 0x185   : > { %v3942_v12 = vadd.f32 %v1941_v35, %v1653_v27 }
 0x186   : > { %v1718_v31 = vpop.f32.mrf.mxu0  ;;  %v1943_v11 = vpop.f32.mrf.mxu1 }
 0x188   : > { %v3946_v20 = vpop.f32.mrf.mxu0  ;;  %v1944_v29 = vpop.f32.mrf.mxu1 }
 0x189   : > { %v3948_v39 = vadd.f32 %v1944_v29, %v1656_v59 }
 0x18a   : > { %v1721_v37 = vpop.f32.mrf.mxu0  ;;  %v1946_v43 = vpop.f32.mrf.mxu1 }
 0x18c   : > { %v3952_v63 = vpop.f32.mrf.mxu0  ;;  %v1949_v25 = vpop.f32.mrf.mxu1 }
 0x18d   : > { %v3954_v54 = vadd.f32 %v1949_v25, %v1661_v38  ;;  %v1725_v23 = vadd.f32 %v3803_v49, %v3952_v63 }
 0x18e   : > { %v1726_v57 = vpop.f32.mrf.mxu0  ;;  %v1951_v8 = vpop.f32.mrf.mxu1 }
 0x190   : > { %v3958_v27 = vpop.f32.mrf.mxu0  ;;  %v1952_v35 = vpop.f32.mrf.mxu1 }
 0x191   : > { %v3960_v31 = vadd.f32 %v1952_v35, %v1664_v50 }
 0x192   : > { %v1729_v11 = vpop.f32.mrf.mxu0  ;;  %v1954_v59 = vpop.f32.mrf.mxu1 }
 0x194   : > { %v3964_v29 = vpop.f32.mrf.mxu0  ;;  %v1957_v37 = vpop.f32.mrf.mxu1 }
 0x195   : > { %v3966_v43 = vadd.f32 %v1957_v37, %v1669_v2 }
 0x196   : > { %v1734_v38 = vpop.f32.mrf.mxu0  ;;  %v1959_v25 = vpop.f32.mrf.mxu1 }
 0x198   : > { %v3970_v57 = vpop.f32.mrf.mxu0  ;;  %v1960_v8 = vpop.f32.mrf.mxu1 }
 0x199   : > { %v3972_v50 = vadd.f32 %v1960_v8, %v1672_v10 }
 0x19a   : > { %v1737_v35 = vpop.f32.mrf.mxu0  ;;  %v1962_v11 = vpop.f32.mrf.mxu1 }
 0x19c   : > { %v3976_v59 = vpop.f32.mrf.mxu0  ;;  %v1965_v53 = vpop.f32.mrf.mxu1 }
 0x19d   : > { %v3978_v2 = vadd.f32 %v1965_v53, %v1677_v30 }
 0x19e   : > { %v1742_v37 = vpop.f32.mrf.mxu0  ;;  %v1967_v38 = vpop.f32.mrf.mxu1 }
 0x1a0   : > { %v3982_v25 = vpop.f32.mrf.mxu0  ;;  %v1968_v32 = vpop.f32.mrf.mxu1 }
 0x1a1   : > { %v3984_v10 = vadd.f32 %v1968_v32, %v1680_v41 }
 0x1a2   : > { %v1745_v8 = vpop.f32.mrf.mxu0  ;;  %v1970_v35 = vpop.f32.mrf.mxu1 }
 0x1a4   : > { %v3988_v11 = vpop.f32.mrf.mxu0  ;;  %v1973_v44 = vpop.f32.mrf.mxu1 }
 0x1a5   : > { %v3990_v53 = vadd.f32 %v1973_v44, %v1685_v61 }
 0x1a6   : > { %v1750_v30 = vpop.f32.mrf.mxu0  ;;  %v1975_v37 = vpop.f32.mrf.mxu1 }
 0x1a8   : > { %v3994_v38 = vpop.f32.mrf.mxu0  ;;  %v1976_v26 = vpop.f32.mrf.mxu1 }
 0x1a9   : > { %v3996_v32 = vadd.f32 %v1976_v26, %v1688_v7 }
 0x1aa   : > { %v1753_v41 = vpop.f32.mrf.mxu0  ;;  %v1978_v8 = vpop.f32.mrf.mxu1 }
 0x1ac   : > { %v4000_v35 = vpop.f32.mrf.mxu0  ;;  %v1981_v0 = vpop.f32.mrf.mxu1 }
 0x1ad   : > { %v4002_v44 = vadd.f32 %v1981_v0, %v1693_v15 }
 0x1ae   : > { %v1758_v61 = vpop.f32.mrf.mxu0  ;;  %v1983_v30 = vpop.f32.mrf.mxu1 }
 0x1b0   : > { %v4006_v37 = vpop.f32.mrf.mxu0  ;;  %v1984_v1 = vpop.f32.mrf.mxu1 }
 0x1b1   : > { %v4008_v26 = vadd.f32 %v1984_v1, %v1696_v42 }
 0x1b2   : > { %v1761_v7 = vpop.f32.mrf.mxu0  ;;  %v1986_v41 = vpop.f32.mrf.mxu1 }
 0x1b4   : > { %v4012_v8 = vpop.f32.mrf.mxu0  ;;  %v1989_v60 = vpop.f32.mrf.mxu1 }
 0x1b5   : > { %v4014_v0 = vadd.f32 %v1989_v60, %v1701_v5 }
 0x1b6   : > { %v1766_v15 = vpop.f32.mrf.mxu0  ;;  %v1991_v61 = vpop.f32.mrf.mxu1 }
 0x1b8   : > { %v4018_v30 = vpop.f32.mrf.mxu0  ;;  %v1992_v9 = vpop.f32.mrf.mxu1 }
 0x1b9   : > { %v4020_v1 = vadd.f32 %v1992_v9, %v1704_v19 }
 0x1ba   : > { %v1769_v42 = vpop.f32.mrf.mxu0  ;;  %v1994_v7 = vpop.f32.mrf.mxu1 }
 0x1bc   : > { %v4024_v41 = vpop.f32.mrf.mxu0  ;;  %v1997_v40 = vpop.f32.mrf.mxu1 }
 0x1bd   : > { %v4026_v60 = vadd.f32 %v1997_v40, %v1709_v47 }
 0x1be   : > { %v1774_v5 = vpop.f32.mrf.mxu0  ;;  %v1999_v15 = vpop.f32.mrf.mxu1 }
 0x1c0   : > { %v4030_v61 = vpop.f32.mrf.mxu0  ;;  %v2000_v52 = vpop.f32.mrf.mxu1 }
 0x1c1   : > { %v4032_v9 = vadd.f32 %v2000_v52, %v1712_v58 }
 0x1c2   : > { %v1777_v19 = vpop.f32.mrf.mxu0  ;;  %v2002_v42 = vpop.f32.mrf.mxu1 }
 0x1c4   : > { %v4034_v7 = vpop.f32.mrf.mxu0  ;;  %v4036_v21 = vpop.f32.mrf.mxu1 }
 0x1c6   : > { %v1782_v36 = vpop.f32.mrf.mxu0  ;;  %v2007_v48 = vpop.f32.mrf.mxu1 }
 0x1c7   : > { %v1728_v36 = vadd.f32 %v3803_v49, %v3958_v27 }
 0x1c8   : > { %v4038_v40 = vpop.f32.mrf.mxu0  ;;  %v4040_v47 = vpop.f32.mrf.mxu1 }
 0x1ca   : > { %v1785_v5 = vpop.f32.mrf.mxu0  ;;  %v2010_v15 = vpop.f32.mrf.mxu1 }
 0x1cc   : > { %v2013_v16 = vpop.f32.mrf.mxu1  ;;  %v2899_v52 = vpop.f32.mrf.mxu0 }
 0x1cd   : > { %v4044_v58 = vadd.f32 %v2013_v16, %v1725_v23  ;;  %v2183_v19 = vadd.f32 %v2899_v52, %v3836_v33 }
 0x1ce   : > { %v2015_v42 = vpop.f32.mrf.mxu1  ;;  %v2174_v28 = vpop.f32.mrf.mxu0 }
 0x1cf   : > { %3263 = vtanh.f32 %v2183_v19  ;;  %v2175_v48 = vadd.f32 %v2174_v28, %v3818_v4 }
 0x1d0   : > { %v2016_v5 = vpop.f32.mrf.mxu1  ;;  %v2900_v15 = vpop.f32.mrf.mxu0 }
 0x1d1   : > { %3265 = vtanh.f32 %v2175_v48  ;;  %v4050_v13 = vadd.f32 %v2016_v5, %v1728_v36  ;;  %v2186_v63 = vadd.f32 %v2900_v15, %v3845_v46 }
 0x1d2   : > { %v2018_v16 = vpop.f32.mrf.mxu1  ;;  %v2177_v23 = vpop.f32.mrf.mxu0 }
 0x1d3   : > { %3267 = vtanh.f32 %v2186_v63  ;;  %v2178_v33 = vadd.f32 %v2177_v23, %v3827_v18 }
 0x1d4   : > { %v4054_v52 = vpop.f32.mrf.mxu1  ;;  %v2903_v42 = vpop.f32.mrf.mxu0 }
 0x1d5   : > { %3269 = vtanh.f32 %v2178_v33  ;;  %v2199_v27 = vadd.f32 %v2903_v42, %v3872_v34 }
 0x1d6   : > { %v2023_v28 = vpop.f32.mrf.mxu1  ;;  %v2190_v4 = vpop.f32.mrf.mxu0 }
 0x1d7   : > { %3271 = vtanh.f32 %v2199_v27  ;;  %v2191_v19 = vadd.f32 %v2190_v4, %v3854_v62 }
 0x1d8   : > { %v4059_v36 = vpop.f32.mrf.mxu1  ;;  %v2904_v46 = vpop.f32.mrf.mxu0 }
 0x1d9   : > { %3273 = vtanh.f32 %v2191_v19  ;;  %v2202_v48 = vadd.f32 %v2904_v46, %v3881_v55 }
 0x1da   : > { %v2026_v18 = vpop.f32.mrf.mxu1  ;;  %v2193_v34 = vpop.f32.mrf.mxu0 }
 0x1db   : > { %3275 = vtanh.f32 %v2202_v48  ;;  %v2194_v5 = vadd.f32 %v2193_v34, %v3863_v17 }
 0x1dc   : > { %v3264_v62 = vpop.eup %3263  ;;  %v4068_v15 = vpop.f32.mrf.mxu1 }
 0x1dd   : > { %v2907_v63 = vpop.f32.mrf.mxu0  ;;  %2495 = vst [vmem:[%s4065_s22 + $0x10] sm:$0xff] %v3264_v62  ;;  %3277 = vtanh.f32 %v2194_v5 }
 0x1de   : > { %v2215_v55 = vadd.f32 %v2907_v63, %v3908_v45  ;;  %v3266_v16 = vpop.eup %3265  ;;  %v2031_v23 = vpop.f32.mrf.mxu1 }
 0x1df   : > { %v2206_v33 = vpop.f32.mrf.mxu0  ;;  %2493 = vst [vmem:[%s4065_s22] sm:$0xff] %v3266_v16 }
 0x1e0   : > { %3279 = vtanh.f32 %v2215_v55  ;;  %v2207_v42 = vadd.f32 %v2206_v33, %v3890_v6  ;;  %v3268_v27 = vpop.eup %3267  ;;  %v4074_v17 = vpop.f32.mrf.mxu1 }
 0x1e1   : > { %v2908_v28 = vpop.f32.mrf.mxu0  ;;  %2496 = vst [vmem:[%s4065_s22 + $0x18] sm:$0xff] %v3268_v27 }
 0x1e2   : > { %3281 = vtanh.f32 %v2207_v42  ;;  %v2218_v4 = vadd.f32 %v2908_v28, %v3917_v51  ;;  %v3270_v19 = vpop.eup %3269  ;;  %v2034_v45 = vpop.f32.mrf.mxu1 }
 0x1e3   : > { %v2209_v46 = vpop.f32.mrf.mxu0  ;;  %2494 = vst [vmem:[%s4065_s22 + $0x8] sm:$0xff] %v3270_v19 }
 0x1e4   : > { %3283 = vtanh.f32 %v2218_v4  ;;  %v2210_v48 = vadd.f32 %v2209_v46, %v3899_v22  ;;  %v3272_v18 = vpop.eup %3271  ;;  %v4080_v6 = vpop.f32.mrf.mxu1 }
 0x1e5   : > { %v2911_v34 = vpop.f32.mrf.mxu0  ;;  %2499 = vst [vmem:[%s4065_s22 + $0x30] sm:$0xff] %v3272_v18 }
 0x1e6   : > { %3285 = vtanh.f32 %v2210_v48  ;;  %v2231_v5 = vadd.f32 %v2911_v34, %v3942_v12  ;;  %v3274_v62 = vpop.eup %3273  ;;  %v2039_v51 = vpop.f32.mrf.mxu1 }
 0x1e7   : > { %v2222_v63 = vpop.f32.mrf.mxu0  ;;  %2497 = vst [vmem:[%s4065_s22 + $0x20] sm:$0xff] %v3274_v62 }
 0x1e8   : > { %3287 = vtanh.f32 %v2231_v5  ;;  %v2223_v55 = vadd.f32 %v2222_v63, %v3926_v14  ;;  %v3276_v16 = vpop.eup %3275  ;;  %v4086_v22 = vpop.f32.mrf.mxu1 }
 0x1e9   : > { %v2912_v23 = vpop.f32.mrf.mxu0  ;;  %2500 = vst [vmem:[%s4065_s22 + $0x38] sm:$0xff] %v3276_v16 }
 0x1ea   : > { %3289 = vtanh.f32 %v2223_v55  ;;  %v2234_v33 = vadd.f32 %v2912_v23, %v3948_v39  ;;  %v3278_v42 = vpop.eup %3277  ;;  %v2042_v12 = vpop.f32.mrf.mxu1 }
 0x1eb   : > { %v2225_v27 = vpop.f32.mrf.mxu0  ;;  %2498 = vst [vmem:[%s4065_s22 + $0x28] sm:$0xff] %v3278_v42 }
 0x1ec   : > { %3291 = vtanh.f32 %v2234_v33  ;;  %v2226_v28 = vadd.f32 %v2225_v27, %v3935_v56  ;;  %v4092_v14 = vpop.f32.mrf.mxu1 }
 0x1ed   : > { %v3280_v4 = vpop.eup %3279  ;;  %v2915_v19 = vpop.f32.mrf.mxu0 }
 0x1ee   : > { %2503 = vst [vmem:[%s4065_s22 + $0x50] sm:$0xff] %v3280_v4  ;;  %3293 = vtanh.f32 %v2226_v28  ;;  %v2247_v45 = vadd.f32 %v2915_v19, %v3966_v43  ;;  %v2047_v39 = vpop.f32.mrf.mxu1 }
 0x1ef   : > { %v3282_v46 = vpop.eup %3281  ;;  %v2238_v48 = vpop.f32.mrf.mxu0 }
 0x1f0   : > { %2501 = vst [vmem:[%s4065_s22 + $0x40] sm:$0xff] %v3282_v46  ;;  %3295 = vtanh.f32 %v2247_v45  ;;  %v2239_v18 = vadd.f32 %v2238_v48, %v3954_v54  ;;  %v4098_v56 = vpop.f32.mrf.mxu1 }
 0x1f1   : > { %v3284_v34 = vpop.eup %3283  ;;  %v2916_v5 = vpop.f32.mrf.mxu0 }
 0x1f2   : > { %2504 = vst [vmem:[%s4065_s22 + $0x58] sm:$0xff] %v3284_v34  ;;  %3297 = vtanh.f32 %v2239_v18  ;;  %v2250_v62 = vadd.f32 %v2916_v5, %v3972_v50  ;;  %v2050_v43 = vpop.f32.mrf.mxu1 }
 0x1f3   : > { %v3286_v51 = vpop.eup %3285  ;;  %v2241_v63 = vpop.f32.mrf.mxu0 }
 0x1f4   : > { %2502 = vst [vmem:[%s4065_s22 + $0x48] sm:$0xff] %v3286_v51  ;;  %3299 = vtanh.f32 %v2250_v62  ;;  %v2242_v55 = vadd.f32 %v2241_v63, %v3960_v31  ;;  %v4104_v54 = vpop.f32.mrf.mxu1 }
 0x1f5   : > { %v3288_v16 = vpop.eup %3287  ;;  %v2919_v23 = vpop.f32.mrf.mxu0 }
 0x1f6   : > { %2507 = vst [vmem:[%s4065_s22 + $0x70] sm:$0xff] %v3288_v16  ;;  %3301 = vtanh.f32 %v2242_v55  ;;  %v2263_v33 = vadd.f32 %v2919_v23, %v3990_v53  ;;  %v2055_v50 = vpop.f32.mrf.mxu1  ;;  %v1717_v55 = vadd.f32 %v3803_v49, %v3939_v3  ;;  %v1720_v3 = vadd.f32 %v3803_v49, %v3946_v20 }
 0x1f7   : > { %v3290_v42 = vpop.eup %3289  ;;  %v2254_v12 = vpop.f32.mrf.mxu0  ;;  %v1733_v20 = vadd.f32 %v3803_v49, %v3964_v29  ;;  %v1736_v29 = vadd.f32 %v3803_v49, %v3970_v57  ;;  %v1749_v57 = vadd.f32 %v3803_v49, %v3988_v11 }
 0x1f8   : > { %2505 = vst [vmem:[%s4065_s22 + $0x60] sm:$0xff] %v3290_v42  ;;  %3303 = vtanh.f32 %v2263_v33  ;;  %v2255_v27 = vadd.f32 %v2254_v12, %v3978_v2  ;;  %v4110_v31 = vpop.f32.mrf.mxu1  ;;  %v2006_v42 = vadd.f32 %v4036_v21, %v1717_v55  ;;  %v2009_v21 = vadd.f32 %v4040_v47, %v1720_v3 }
 0x1f9   : > { %v3292_v28 = vpop.eup %3291  ;;  %v2920_v4 = vpop.f32.mrf.mxu0  ;;  %v2022_v47 = vadd.f32 %v4054_v52, %v1733_v20  ;;  %v2025_v52 = vadd.f32 %v4059_v36, %v1736_v29  ;;  %v1741_v36 = vadd.f32 %v3803_v49, %v3976_v59  ;;  %v1765_v20 = vadd.f32 %v3803_v49, %v4012_v8 }
 0x1fa   : > { %2508 = vst [vmem:[%s4065_s22 + $0x78] sm:$0xff] %v3292_v28  ;;  %3305 = vtanh.f32 %v2255_v27  ;;  %v2266_v19 = vadd.f32 %v2920_v4, %v3996_v32  ;;  %v2058_v53 = vpop.f32.mrf.mxu1 }
 0x1fb   : > { %v3294_v45 = vpop.eup %3293  ;;  %v2257_v46 = vpop.f32.mrf.mxu0 }
 0x1fc   : > { %2506 = vst [vmem:[%s4065_s22 + $0x68] sm:$0xff] %v3294_v45  ;;  %3307 = vtanh.f32 %v2266_v19  ;;  %v2258_v39 = vadd.f32 %v2257_v46, %v3984_v10  ;;  %v4116_v2 = vpop.f32.mrf.mxu1 }
 0x1fd   : > { %v3296_v48 = vpop.eup %3295  ;;  %v2923_v18 = vpop.f32.mrf.mxu0 }
 0x1fe   : > { %2511 = vst [vmem:[%s4065_s22 + $0x90] sm:$0xff] %v3296_v48  ;;  %3309 = vtanh.f32 %v2258_v39  ;;  %v2279_v34 = vadd.f32 %v2923_v18, %v4014_v0  ;;  %v2063_v62 = vpop.f32.mrf.mxu1 }
 0x1ff   : > { %v3298_v5 = vpop.eup %3297  ;;  %v2270_v32 = vpop.f32.mrf.mxu0 }
 0x200   : > { %2509 = vst [vmem:[%s4065_s22 + $0x80] sm:$0xff] %v3298_v5  ;;  %3311 = vtanh.f32 %v2279_v34  ;;  %v2271_v51 = vadd.f32 %v2270_v32, %v4002_v44  ;;  %v4122_v63 = vpop.f32.mrf.mxu1 }
 0x201   : > { %v3300_v43 = vpop.eup %3299  ;;  %v2924_v10 = vpop.f32.mrf.mxu0 }
 0x202   : > { %2512 = vst [vmem:[%s4065_s22 + $0x98] sm:$0xff] %v3300_v43  ;;  %3313 = vtanh.f32 %v2271_v51  ;;  %v2282_v0 = vadd.f32 %v2924_v10, %v4020_v1  ;;  %v2066_v23 = vpop.f32.mrf.mxu1 }
 0x203   : > { %v3302_v16 = vpop.eup %3301  ;;  %v2273_v33 = vpop.f32.mrf.mxu0 }
 0x204   : > { %2510 = vst [vmem:[%s4065_s22 + $0x88] sm:$0xff] %v3302_v16  ;;  %3315 = vtanh.f32 %v2282_v0  ;;  %v2274_v44 = vadd.f32 %v2273_v33, %v4008_v26  ;;  %v4131_v12 = vpop.f32.mrf.mxu1 }
 0x205   : > { %v3304_v50 = vpop.eup %3303  ;;  %v2927_v27 = vpop.f32.mrf.mxu0 }
 0x206   : > { %2515 = vst [vmem:[%s4065_s22 + $0xb0] sm:$0xff] %v3304_v50  ;;  %3317 = vtanh.f32 %v2274_v44  ;;  %v2295_v1 = vadd.f32 %v2927_v27, %v2006_v42  ;;  %v2071_v4 = vpop.f32.mrf.mxu1  ;;  %v2038_v27 = vadd.f32 %v4080_v6, %v1749_v57 }
 0x207   : > { %v3306_v28 = vpop.eup %3305  ;;  %v2286_v19 = vpop.f32.mrf.mxu0  ;;  %v2030_v4 = vadd.f32 %v4068_v15, %v1741_v36 }
 0x208   : > { %2513 = vst [vmem:[%s4065_s22 + $0xa0] sm:$0xff] %v3306_v28  ;;  %3319 = vtanh.f32 %v2295_v1  ;;  %v2287_v26 = vadd.f32 %v2286_v19, %v4026_v60  ;;  %v4139_v53 = vpop.f32.mrf.mxu1  ;;  %v1752_v28 = vadd.f32 %v3803_v49, %v3994_v38 }
 0x209   : > { %v3308_v45 = vpop.eup %3307  ;;  %v2928_v46 = vpop.f32.mrf.mxu0 }
 0x20a   : > { %2516 = vst [vmem:[%s4065_s22 + $0xb8] sm:$0xff] %v3308_v45  ;;  %3321 = vtanh.f32 %v2287_v26  ;;  %v2298_v39 = vadd.f32 %v2928_v46, %v2009_v21  ;;  %v2074_v18 = vpop.f32.mrf.mxu1  ;;  %v1744_v26 = vadd.f32 %v3803_v49, %v3982_v25 }
 0x20b   : > { %v3310_v48 = vpop.eup %3309  ;;  %v2289_v34 = vpop.f32.mrf.mxu0 }
 0x20c   : > { %2514 = vst [vmem:[%s4065_s22 + $0xa8] sm:$0xff] %v3310_v48  ;;  %3323 = vtanh.f32 %v2298_v39  ;;  %v2290_v60 = vadd.f32 %v2289_v34, %v4032_v9  ;;  %v4147_v62 = vpop.f32.mrf.mxu1  ;;  %v2033_v39 = vadd.f32 %v4074_v17, %v1744_v26  ;;  %v1757_v34 = vadd.f32 %v3803_v49, %v4000_v35 }
 0x20d   : > { %v3312_v5 = vpop.eup %3311  ;;  %v2931_v32 = vpop.f32.mrf.mxu0 }
 0x20e   : > { %2519 = vst [vmem:[%s4065_s22 + $0xd0] sm:$0xff] %v3312_v5  ;;  %3325 = vtanh.f32 %v2290_v60  ;;  %v2311_v51 = vadd.f32 %v2931_v32, %v2022_v47  ;;  %v2079_v10 = vpop.f32.mrf.mxu1  ;;  %v2054_v47 = vadd.f32 %v4104_v54, %v1765_v20  ;;  %v1768_v32 = vadd.f32 %v3803_v49, %v4018_v30 }
 0x20f   : > { %v3314_v43 = vpop.eup %3313  ;;  %v2302_v55 = vpop.f32.mrf.mxu0  ;;  %v2046_v29 = vadd.f32 %v4092_v14, %v1757_v34  ;;  %v4194_v10 = vld [vmem:[%s4294_s2] ss:$0 sm:$0xff] }
 0x210   : > { %2517 = vst [vmem:[%s4065_s22 + $0xc0] sm:$0xff] %v3314_v43  ;;  %3327 = vtanh.f32 %v2311_v51  ;;  %v2303_v9 = vadd.f32 %v2302_v55, %v4044_v58  ;;  %v4155_v16 = vpop.f32.mrf.mxu1  ;;  %v1760_v55 = vadd.f32 %v4194_v10, %v4006_v37 }
 0x211   : > { %v3316_v0 = vpop.eup %3315  ;;  %v2932_v23 = vpop.f32.mrf.mxu0 }
 0x212   : > { %2520 = vst [vmem:[%s4065_s22 + $0xd8] sm:$0xff] %v3316_v0  ;;  %3329 = vtanh.f32 %v2303_v9  ;;  %v2314_v33 = vadd.f32 %v2932_v23, %v2025_v52  ;;  %v2082_v44 = vpop.f32.mrf.mxu1  ;;  %v2057_v52 = vadd.f32 %v4110_v31, %v1768_v32  ;;  %v1781_v0 = vadd.f32 %v4194_v10, %v4034_v7 }
 0x213   : > { %v3318_v42 = vpop.eup %3317  ;;  %v2305_v50 = vpop.f32.mrf.mxu0  ;;  %v2049_v23 = vadd.f32 %v4098_v56, %v1760_v55  ;;  %v1784_v56 = vadd.f32 %v4194_v10, %v4038_v40 }
 0x214   : > { %2518 = vst [vmem:[%s4065_s22 + $0xc8] sm:$0xff] %v3318_v42  ;;  %3331 = vtanh.f32 %v2314_v33  ;;  %v2306_v58 = vadd.f32 %v2305_v50, %v4050_v13  ;;  %v4165_v1 = vpop.f32.mrf.mxu1  ;;  %v2041_v13 = vadd.f32 %v4086_v22, %v1752_v28  ;;  %v1773_v42 = vadd.f32 %v4194_v10, %v4024_v41 }
 0x215   : > { %v3320_v3 = vpop.eup %3319  ;;  %v2935_v11 = vpop.f32.mrf.mxu0  ;;  %v2070_v44 = vadd.f32 %v4131_v12, %v1781_v0  ;;  %v1776_v12 = vadd.f32 %v4194_v10, %v4030_v61 }
 0x216   : > { %2523 = vst [vmem:[%s4065_s22 + $0xf0] sm:$0xff] %v3320_v3  ;;  %3333 = vtanh.f32 %v2306_v58  ;;  %v2327_v59 = vadd.f32 %v2935_v11, %v2038_v27  ;;  %v2087_v6 = vpop.f32.mrf.mxu1  ;;  %v2062_v58 = vadd.f32 %v4116_v2, %v1773_v42  ;;  %v1797_v2 = vadd.f32 %v4194_v10, %v3712_v24 }
 0x217   : > { %v3322_v19 = vpop.eup %3321  ;;  %v2318_v21 = vpop.f32.mrf.mxu0 }
 0x218   : > { %2521 = vst [vmem:[%s4065_s22 + $0xe0] sm:$0xff] %v3322_v19  ;;  %3335 = vtanh.f32 %v2327_v59  ;;  %v2319_v45 = vadd.f32 %v2318_v21, %v2030_v4  ;;  %v4175_v38 = vpop.f32.mrf.mxu1  ;;  %v2073_v4 = vadd.f32 %v4139_v53, %v1784_v56  ;;  %v2065_v21 = vadd.f32 %v4122_v63, %v1776_v12  ;;  %v4311_v53 = vld [vmem:[#allocation2_spill] sm:$0xff]  ;;  %v4318_v12 = vld [vmem:[#allocation11_spill] sm:$0xff] }
 0x219   : > { %v3324_v46 = vpop.eup %3323  ;;  %v2936_v15 = vpop.f32.mrf.mxu0  ;;  %v4317_v56 = vld [vmem:[#allocation6_spill] sm:$0xff] }
 0x21a   : > { %2524 = vst [vmem:[%s4065_s22 + $0xf8] sm:$0xff] %v3324_v46  ;;  %3337 = vtanh.f32 %v2319_v45  ;;  %v2330_v48 = vadd.f32 %v2936_v15, %v2041_v13  ;;  %v2090_v18 = vpop.f32.mrf.mxu1  ;;  %v1789_v46 = vadd.f32 %v4194_v10, %v4311_v53  ;;  %v2086_v15 = vadd.f32 %v4165_v1, %v1797_v2 }
 0x21b   : > { %v3326_v25 = vpop.eup %3325  ;;  %v2321_v22 = vpop.f32.mrf.mxu0 }
 0x21c   : > { %2522 = vst [vmem:[%s4065_s22 + $0xe8] sm:$0xff] %v3326_v25  ;;  %3339 = vtanh.f32 %v2330_v48  ;;  %v2322_v60 = vadd.f32 %v2321_v22, %v2033_v39  ;;  %v4185_v8 = vpop.f32.mrf.mxu1  ;;  %v4312_v48 = vld [vmem:[#allocation4_spill] sm:$0xff]  ;;  %v2078_v18 = vadd.f32 %v4147_v62, %v1789_v46 }
 0x21d   : > { %v3328_v5 = vpop.eup %3327  ;;  %v2939_v17 = vpop.f32.mrf.mxu0  ;;  %v1800_v25 = vadd.f32 %v4194_v10, %v4312_v48  ;;  %v4320_v46 = vld [vmem:[#allocation12_spill] sm:$0xff] }
 0x21e   : > { %2527 = vst [vmem:[%s4065_s22 + $0x110] sm:$0xff] %v3328_v5  ;;  %3341 = vtanh.f32 %v2322_v60  ;;  %v2343_v51 = vadd.f32 %v2939_v17, %v2054_v47  ;;  %v2095_v43 = vpop.f32.mrf.mxu1  ;;  %v4313_v60 = vld [vmem:[#allocation3_spill] sm:$0xff] }
 0x21f   : > { %v3330_v35 = vpop.eup %3329  ;;  %v2334_v54 = vpop.f32.mrf.mxu0  ;;  %v1792_v5 = vadd.f32 %v4194_v10, %v4313_v60  ;;  %v2089_v17 = vadd.f32 %v4175_v38, %v1800_v25  ;;  %v4321_v25 = vld [vmem:[#allocation10_spill] sm:$0xff] }
 0x220   : > { %2525 = vst [vmem:[%s4065_s22 + $0x100] sm:$0xff] %v3330_v35  ;;  %3343 = vtanh.f32 %v2343_v51  ;;  %v2335_v49 = vadd.f32 %v2334_v54, %v2046_v29  ;;  %v4200_v14 = vpop.f32.mrf.mxu1  ;;  %v4314_v35 = vld [vmem:[#allocation7_spill] sm:$0xff] }
 0x221   : > { %v3332_v30 = vpop.eup %3331  ;;  %v2940_v9 = vpop.f32.mrf.mxu0  ;;  %v1813_v43 = vadd.f32 %v4194_v10, %v4314_v35  ;;  %v2081_v54 = vadd.f32 %v4155_v16, %v1792_v5 }
 0x222   : > { %2528 = vst [vmem:[%s4065_s22 + $0x118] sm:$0xff] %v3332_v30  ;;  %3345 = vtanh.f32 %v2335_v49  ;;  %v2346_v57 = vadd.f32 %v2940_v9, %v2057_v52  ;;  %v2098_v33 = vpop.f32.mrf.mxu1  ;;  %v4315_v30 = vld [vmem:[#allocation5_spill] sm:$0xff] }
 0x223   : > { %v3334_v37 = vpop.eup %3333  ;;  %v2337_v31 = vpop.f32.mrf.mxu0  ;;  %v1805_v9 = vadd.f32 %v4194_v10, %v4315_v30 }
 0x224   : > { %2526 = vst [vmem:[%s4065_s22 + $0x108] sm:$0xff] %v3334_v37  ;;  %3347 = vtanh.f32 %v2346_v57  ;;  %v2338_v50 = vadd.f32 %v2337_v31, %v2049_v23  ;;  %v2101_v7 = vpop.f32.mrf.mxu1  ;;  %v4316_v31 = vld [vmem:[#allocation8_spill] sm:$0xff] }
 0x225   : > { %v3336_v36 = vpop.eup %3335  ;;  %v2943_v27 = vpop.f32.mrf.mxu0  ;;  %v2102_v0 = vadd.f32 %v2101_v7, %v1813_v43  ;;  %v1816_v16 = vadd.f32 %v4194_v10, %v4316_v31  ;;  %v2094_v42 = vadd.f32 %v4185_v8, %v1805_v9  ;;  %v1808_v7 = vadd.f32 %v4194_v10, %v4317_v56  ;;  %v4323_v43 = vld [vmem:[#allocation15_spill] sm:$0xff] }
 0x226   : > { %2531 = vst [vmem:[%s4065_s22 + $0x130] sm:$0xff] %v3336_v36  ;;  %3349 = vtanh.f32 %v2338_v50  ;;  %v2359_v3 = vadd.f32 %v2943_v27, %v2070_v44  ;;  %v2103_v41 = vpop.f32.mrf.mxu1  ;;  %v1829_v8 = vadd.f32 %v4194_v10, %v4318_v12 }
 0x227   : > { %v3338_v11 = vpop.eup %3337  ;;  %v2350_v28 = vpop.f32.mrf.mxu0 }
 0x228   : > { %2529 = vst [vmem:[%s4065_s22 + $0x120] sm:$0xff] %v3338_v11  ;;  %3351 = vtanh.f32 %v2359_v3  ;;  %v2351_v59 = vadd.f32 %v2350_v28, %v2062_v58  ;;  %v2104_v40 = vpop.f32.mrf.mxu1 }
 0x229   : > { %v3340_v19 = vpop.eup %3339  ;;  %v2944_v6 = vpop.f32.mrf.mxu0  ;;  %v2105_v58 = vadd.f32 %v2104_v40, %v1816_v16 }
 0x22a   : > { %2532 = vst [vmem:[%s4065_s22 + $0x138] sm:$0xff] %v3340_v19  ;;  %3353 = vtanh.f32 %v2351_v59  ;;  %v2362_v26 = vadd.f32 %v2944_v6, %v2073_v4  ;;  %v2106_v61 = vpop.f32.mrf.mxu1  ;;  %v2097_v4 = vadd.f32 %v4200_v14, %v1808_v7  ;;  %v1832_v14 = vadd.f32 %v4194_v10, %v4320_v46 }
 0x22b   : > { %v3342_v13 = vpop.eup %3341  ;;  %v2353_v45 = vpop.f32.mrf.mxu0 }
 0x22c   : > { %2530 = vst [vmem:[%s4065_s22 + $0x128] sm:$0xff] %v3342_v13  ;;  %3355 = vtanh.f32 %v2362_v26  ;;  %v2354_v20 = vadd.f32 %v2353_v45, %v2065_v21  ;;  %v4226_v24 = vpop.f32.mrf.mxu1  ;;  %v4319_v21 = vld [vmem:[#allocation9_spill] sm:$0xff] }
 0x22d   : > { %v3344_v39 = vpop.eup %3343  ;;  %v2947_v63 = vpop.f32.mrf.mxu0  ;;  %v1821_v40 = vadd.f32 %v4194_v10, %v4319_v21 }
 0x22e   : > { %2535 = vst [vmem:[%s4065_s22 + $0x150] sm:$0xff] %v3344_v39  ;;  %3357 = vtanh.f32 %v2354_v20  ;;  %v2375_v22 = vadd.f32 %v2947_v63, %v2086_v15  ;;  %v2111_v47 = vpop.f32.mrf.mxu1 }
 0x22f   : > { %v3346_v34 = vpop.eup %3345  ;;  %v2366_v1 = vpop.f32.mrf.mxu0  ;;  %v2110_v15 = vadd.f32 %v4226_v24, %v1821_v40 }
 0x230   : > { %2533 = vst [vmem:[%s4065_s22 + $0x140] sm:$0xff] %v3346_v34  ;;  %3359 = vtanh.f32 %v2375_v22  ;;  %v2367_v32 = vadd.f32 %v2366_v1, %v2078_v18  ;;  %v4236_v51 = vpop.f32.mrf.mxu1  ;;  %v1824_v18 = vadd.f32 %v4194_v10, %v4321_v25 }
 0x231   : > { %v3348_v29 = vpop.eup %3347  ;;  %v2948_v62 = vpop.f32.mrf.mxu0 }
 0x232   : > { %2536 = vst [vmem:[%s4065_s22 + $0x158] sm:$0xff] %v3348_v29  ;;  %3361 = vtanh.f32 %v2367_v32  ;;  %v2378_v55 = vadd.f32 %v2948_v62, %v2089_v17  ;;  %v2114_v49 = vpop.f32.mrf.mxu1  ;;  %v2113_v24 = vadd.f32 %v4236_v51, %v1824_v18  ;;  %v4322_v62 = vld [vmem:[#allocation13_spill] sm:$0xff] }
 0x233   : > { %v3350_v52 = vpop.eup %3349  ;;  %v2369_v38 = vpop.f32.mrf.mxu0  ;;  %v1837_v35 = vadd.f32 %v4194_v10, %v4322_v62 }
 0x234   : > { %2534 = vst [vmem:[%s4065_s22 + $0x148] sm:$0xff] %v3350_v52  ;;  %3363 = vtanh.f32 %v2378_v55  ;;  %v2370_v23 = vadd.f32 %v2369_v38, %v2081_v54  ;;  %v2117_v37 = vpop.f32.mrf.mxu1  ;;  %v1845_v54 = vadd.f32 %v4194_v10, %v4323_v43 }
 0x235   : > { %v3352_v57 = vpop.eup %3351  ;;  %v2951_v33 = vpop.f32.mrf.mxu0  ;;  %v2118_v26 = vadd.f32 %v2117_v37, %v1829_v8 }
 0x236   : > { %2539 = vst [vmem:[%s4065_s22 + $0x170] sm:$0xff] %v3352_v57  ;;  %3365 = vtanh.f32 %v2370_v23  ;;  %v2391_v44 = vadd.f32 %v2951_v33, %v2102_v0  ;;  %v2119_v36 = vpop.f32.mrf.mxu1  ;;  %v4324_v57 = vld [vmem:[#allocation14_spill] sm:$0xff]  ;;  %v4325_v33 = vld [vmem:[#allocation16_spill] sm:$0xff] }
 0x237   : > { %v3354_v50 = vpop.eup %3353  ;;  %v2382_v27 = vpop.f32.mrf.mxu0  ;;  %v1840_v37 = vadd.f32 %v4194_v10, %v4324_v57  ;;  %v1848_v31 = vadd.f32 %v4194_v10, %v4325_v33 }
 0x238   : > { %2537 = vst [vmem:[%s4065_s22 + $0x160] sm:$0xff] %v3354_v50  ;;  %3367 = vtanh.f32 %v2391_v44  ;;  %v2383_v3 = vadd.f32 %v2382_v27, %v2094_v42  ;;  %v2120_v41 = vpop.f32.mrf.mxu1 }
 0x239   : > { %v3356_v11 = vpop.eup %3355  ;;  %v2952_v28 = vpop.f32.mrf.mxu0  ;;  %v2121_v22 = vadd.f32 %v2120_v41, %v1832_v14 }
 0x23a   : > { %2540 = vst [vmem:[%s4065_s22 + $0x178] sm:$0xff] %v3356_v11  ;;  %3369 = vtanh.f32 %v2383_v3  ;;  %v2394_v59 = vadd.f32 %v2952_v28, %v2105_v58  ;;  %v2122_v6 = vpop.f32.mrf.mxu1 }
 0x23b   : > { %v3358_v19 = vpop.eup %3357  ;;  %v2385_v2 = vpop.f32.mrf.mxu0 }
 0x23c   : > { %2538 = vst [vmem:[%s4065_s22 + $0x168] sm:$0xff] %v3358_v19  ;;  %3371 = vtanh.f32 %v2394_v59  ;;  %v2386_v13 = vadd.f32 %v2385_v2, %v2097_v4  ;;  %v2125_v45 = vpop.f32.mrf.mxu1 }
 0x23d   : > { %v3360_v61 = vpop.eup %3359  ;;  %v2955_v53 = vpop.f32.mrf.mxu0  ;;  %v2126_v51 = vadd.f32 %v2125_v45, %v1837_v35 }
 0x23e   : > { %2543 = vst [vmem:[%s4065_s22 + $0x190] sm:$0xff] %v3360_v61  ;;  %3373 = vtanh.f32 %v2386_v13  ;;  %v2407_v20 = vadd.f32 %v2955_v53, %v2118_v26  ;;  %v2127_v63 = vpop.f32.mrf.mxu1 }
 0x23f   : > { %v3362_v39 = vpop.eup %3361  ;;  %v2398_v48 = vpop.f32.mrf.mxu0 }
 0x240   : > { %2541 = vst [vmem:[%s4065_s22 + $0x180] sm:$0xff] %v3362_v39  ;;  %3375 = vtanh.f32 %v2407_v20  ;;  %v2399_v34 = vadd.f32 %v2398_v48, %v2110_v15  ;;  %v2128_v1 = vpop.f32.mrf.mxu1 }
 0x241   : > { %v3364_v47 = vpop.eup %3363  ;;  %v2956_v60 = vpop.f32.mrf.mxu0  ;;  %v2129_v27 = vadd.f32 %v2128_v1, %v1840_v37 }
 0x242   : > { %2544 = vst [vmem:[%s4065_s22 + $0x198] sm:$0xff] %v3364_v47  ;;  %3377 = vtanh.f32 %v2399_v34  ;;  %v2410_v5 = vadd.f32 %v2956_v60, %v2121_v22  ;;  %v2130_v32 = vpop.f32.mrf.mxu1 }
 0x243   : > { %v3366_v17 = vpop.eup %3365  ;;  %v2401_v29 = vpop.f32.mrf.mxu0 }
 0x244   : > { %2542 = vst [vmem:[%s4065_s22 + $0x188] sm:$0xff] %v3366_v17  ;;  %3379 = vtanh.f32 %v2410_v5  ;;  %v2402_v55 = vadd.f32 %v2401_v29, %v2113_v24  ;;  %v2133_v49 = vpop.f32.mrf.mxu1 }
 0x245   : > { %v3368_v52 = vpop.eup %3367  ;;  %v2959_v38 = vpop.f32.mrf.mxu0  ;;  %v2134_v30 = vadd.f32 %v2133_v49, %v1845_v54 }
 0x246   : > { %2547 = vst [vmem:[%s4065_s22 + $0x1b0] sm:$0xff] %v3368_v52  ;;  %3381 = vtanh.f32 %v2402_v55  ;;  %v2135_v0 = vpop.f32.mrf.mxu1 }
 0x247   : > { %v3370_v9 = vpop.eup %3369  ;;  %v2414_v23 = vpop.f32.mrf.mxu0  ;;  %v2423_v16 = vadd.f32 %v2959_v38, %v2134_v30 }
 0x248   : > { %2545 = vst [vmem:[%s4065_s22 + $0x1a0] sm:$0xff] %v3370_v9  ;;  %v2415_v42 = vadd.f32 %v2414_v23, %v2126_v51  ;;  %v2136_v50 = vpop.f32.mrf.mxu1 }
 0x249   : > { %v3372_v44 = vpop.eup %3371  ;;  %v2960_v36 = vpop.f32.mrf.mxu0  ;;  %3383 = vtanh.f32 %v2423_v16  ;;  %v2137_v56 = vadd.f32 %v2136_v50, %v1848_v31 }
 0x24a   : > { %2548 = vst [vmem:[%s4065_s22 + $0x1b8] sm:$0xff] %v3372_v44  ;;  %3385 = vtanh.f32 %v2415_v42  ;;  %v2138_v58 = vpop.f32.mrf.mxu1 }
 0x24b   : > { %v3374_v7 = vpop.eup %3373  ;;  %v2417_v3 = vpop.f32.mrf.mxu0  ;;  %v2426_v10 = vadd.f32 %v2960_v36, %v2137_v56 }
 0x24c   : > { %2546 = vst [vmem:[%s4065_s22 + $0x1a8] sm:$0xff] %v3374_v7  ;;  %v2418_v11 = vadd.f32 %v2417_v3, %v2129_v27 }
 0x24d   : > { %v3376_v41 = vpop.eup %3375  ;;  %3387 = vtanh.f32 %v2426_v10 }
 0x24e   : > { %2551 = vst [vmem:[%s4065_s22 + $0x1d0] sm:$0xff] %v3376_v41  ;;  %3389 = vtanh.f32 %v2418_v11 }
 0x24f   : > { %v3378_v28 = vpop.eup %3377 }
 0x250   : > { %2549 = vst [vmem:[%s4065_s22 + $0x1c0] sm:$0xff] %v3378_v28 }
 0x251   : > { %v3380_v12 = vpop.eup %3379 }
 0x252   : > { %2552 = vst [vmem:[%s4065_s22 + $0x1d8] sm:$0xff] %v3380_v12 }
 0x253   : > { %v3382_v8 = vpop.eup %3381 }
 0x254   : > { %2550 = vst [vmem:[%s4065_s22 + $0x1c8] sm:$0xff] %v3382_v8 }
 0x256   : > { %v3384_v4 = vpop.eup %3383 }
 0x257   : > { %v3386_v59 = vpop.eup %3385  ;;  %2555 = vst [vmem:[%s4065_s22 + $0x1f0] sm:$0xff] %v3384_v4 }
 0x258   : > { %2553 = vst [vmem:[%s4065_s22 + $0x1e0] sm:$0xff] %v3386_v59 }
 0x25a   : > { %v3388_v19 = vpop.eup %3387 }
 0x25b   : > { %v3390_v6 = vpop.eup %3389  ;;  %2556 = vst [vmem:[%s4065_s22 + $0x1f8] sm:$0xff] %v3388_v19 }
 0x25c   : > { %2554 = vst [vmem:[%s4065_s22 + $0x1e8] sm:$0xff] %v3390_v6 }
 0x25d PF: > { %s13_s12 = sadd.s32 1, %s3398_s12  }
 0x25e   : > { %p10_p4 = scmp.ge.s32.totalorder %s13_s12, 6  }
 0x260   :  { %12 = sbr.rel (!%p10_p4) target bundleno = 1 (0x1), region = 62 }

</bundles_post_ra>
